<compile_context>
chip_gen: v6e
topology: v6e:2x2x1
jax: 0.10.0
libtpu: 0.0.40
codegen_flags: <defaults>
</compile_context>

<pallas_src>
import functools

import jax
import jax.numpy as jnp
from jax.experimental import pallas as pl
from jax.experimental.pallas import tpu as pltpu

EPS = 1e-5  # torch.nn.InstanceNorm2d default


def _weight_spec(C):
    """(9, C, C) weight block, constant across the batch grid.

    Single-buffered: the block never changes across grid steps, so default
    double-buffering would only burn an extra 9*C*C*2 B of VMEM per weight.
    Falls back to a plain BlockSpec on jax versions without pipeline_mode.
    """
    index_map = lambda n: (0, 0, 0)
    try:
        return pl.BlockSpec((9, C, C), index_map,
                            pipeline_mode=pl.Buffered(buffer_count=1))
    except TypeError:  # pipeline_mode / Buffered signature not available
        return pl.BlockSpec((9, C, C), index_map)


def _res_block_kernel(x_ref, w1_ref, w2_ref, o_ref, y1p_ref, y2_ref,
                      *, H, W, chunk):
    # x_ref  : (P, C) f32    reflect-padded input image, flattened row-major
    #                        (Hp*Wp real rows + >=4 zero tail rows).
    # w1_ref : (9, C, C) bf16 conv1 weights, tap-major [t, ci, co], t=3*dy+dx.
    # w2_ref : (9, C, C) bf16 conv2 weights.
    # o_ref  : (H, W, C)      output block (dense, junk columns stripped).
    # y1p_ref: (P, C) f32     scratch: reflect-padded y1 (same layout as x).
    # y2_ref : (HWp8, C) f32  scratch: raw conv2 output, junk-column layout.
    Wp, Hp = W + 2, H + 2
    HWp = H * Wp
    P = y1p_ref.shape[0]
    C = o_ref.shape[-1]
    inv_n = 1.0 / (H * W)
    chunk_starts = tuple(range(0, HWp, chunk))  # chunk is a multiple of Wp

    def col_of(n):
        # Per-row column index (r % Wp); rows with col >= W are the two junk
        # columns that land exactly on the reflect-pad positions.
        return jax.lax.broadcasted_iota(jnp.int32, (n, 1), 0) % Wp

    def conv3x3_chunk(src_ref, w_ref, start, n):
        # 9 taps = 9 sublane-offset slices (row stride Wp) of the padded src.
        # bf16 operands on the MXU, f32 accumulation; the chunk-sized
        # accumulator stays register-resident across all 9 taps.
        acc = jnp.zeros((n, C), jnp.float32)
        for t in range(9):
            dy, dx = divmod(t, 3)
            xs = src_ref[pl.ds(start + dy * Wp + dx, n), :].astype(jnp.bfloat16)
            acc = acc + jnp.dot(xs, w_ref[t],
                                preferred_element_type=jnp.float32)
        return acc

    # Zero the tail rows once so conv2's 2-row tap over-read stays finite.
    y1p_ref[pl.ds(Hp * Wp, P - Hp * Wp), :] = jnp.zeros(
        (P - Hp * Wp, C), jnp.float32)

    # -------- phase A: conv1 (chunked, bf16 MXU) + masked IN1 stats --------
    # Each chunk is conv'ed over n+2 rows so the reflect patch of the two junk
    # columns comes from in-register values (roll / slice of the extension)
    # and the *patched raw* chunk is stored exactly once.  Normalization has
    # to wait for the global stats (phase A2).
    s1 = jnp.zeros((1, C), jnp.float32)
    q1 = jnp.zeros((1, C), jnp.float32)
    for start in chunk_starts:
        n = min(chunk, HWp - start)
        acc = conv3x3_chunk(x_ref, w1_ref, start, n + 2)
        raw = acc[:n]
        p2 = acc[2:n + 2]                       # raw[r+2] -> left-pad reflect
        m2 = pltpu.roll(raw, shift=2, axis=0)   # raw[r-2] -> right-pad reflect
        col = col_of(n)
        valid = col < W
        raw_m = jnp.where(valid, raw, 0.0)
        s1 = s1 + jnp.sum(raw_m, axis=0, keepdims=True)
        q1 = q1 + jnp.sum(raw_m * raw_m, axis=0, keepdims=True)
        # Rows wrapped by the roll (local j < 2) are never selected because
        # col == W implies j >= W >= 2; chunk starts are multiples of Wp.
        patched = jnp.where(col == W, m2, jnp.where(col == W + 1, p2, raw))
        y1p_ref[pl.ds(Wp + 1 + start, n), :] = patched
    mean1 = s1 * inv_n
    var1 = jnp.maximum(q1 * inv_n - mean1 * mean1, 0.0)
    scale1 = jax.lax.rsqrt(var1 + EPS)

    # -------- phase A2: normalize + ReLU in place (1 load + 1 store) --------
    for start in chunk_starts:
        n = min(chunk, HWp - start)
        blk = y1p_ref[pl.ds(Wp + 1 + start, n), :]
        y1p_ref[pl.ds(Wp + 1 + start, n), :] = jnp.maximum(
            (blk - mean1) * scale1, 0.0)

    # -------- boundary rows of the reflect-padded y1 --------
    # Order is load-bearing: these run after phase A2 (they must read the
    # normalized interior) and the bottom-row copy also overwrites the junk
    # value the last output row parked at padded position (H+1)*Wp.
    y1p_ref[pl.ds(Wp, 1), :] = y1p_ref[pl.ds(Wp + 2, 1), :]       # row-1 left pad
    y1p_ref[pl.ds(0, Wp), :] = y1p_ref[pl.ds(2 * Wp, Wp), :]      # top pad row
    y1p_ref[pl.ds((H + 1) * Wp, Wp), :] = (
        y1p_ref[pl.ds((H - 1) * Wp, Wp), :])                      # bottom pad row

    # -------- phase B: conv2 (chunked, bf16 MXU) + masked IN2 stats --------
    s2 = jnp.zeros((1, C), jnp.float32)
    q2 = jnp.zeros((1, C), jnp.float32)
    for start in chunk_starts:
        n = min(chunk, HWp - start)
        acc = conv3x3_chunk(y1p_ref, w2_ref, start, n)
        valid = col_of(n) < W
        acc_m = jnp.where(valid, acc, 0.0)
        s2 = s2 + jnp.sum(acc_m, axis=0, keepdims=True)
        q2 = q2 + jnp.sum(acc_m * acc_m, axis=0, keepdims=True)
        y2_ref[pl.ds(start, n), :] = acc
    mean2 = s2 * inv_n
    var2 = jnp.maximum(q2 * inv_n - mean2 * mean2, 0.0)
    scale2 = jax.lax.rsqrt(var2 + EPS)

    # -------- phase C: normalize conv2 + residual, dense (junk-free) store --
    for h in range(H):
        y2 = y2_ref[pl.ds(h * Wp, W), :]
        xr = x_ref[pl.ds(Wp + 1 + h * Wp, W), :]
        o_ref[h] = (xr + (y2 - mean2) * scale2).astype(o_ref.dtype)


def residual_block_forward(x_nchw, params):
    """ResidualBlock forward, NCHW in / NCHW out (PyTorch layout)."""
    # Conv biases are mathematically dead under affine=False InstanceNorm.
    w1, _, w2, _ = params
    N, C, H, W = x_nchw.shape
    assert H >= 2 and W >= 2, "reflect padding needs H, W >= 2"
    Hp, Wp = H + 2, W + 2
    HWp = H * Wp
    HWp8 = (HWp + 7) // 8 * 8
    P = (Hp * Wp + 4 + 7) // 8 * 8            # +4 rows of tap over-read room

    # NCHW -> NHWC (channels on lanes), reflect pad, flatten, zero tail rows.
    xh = jnp.transpose(x_nchw, (0, 2, 3, 1))
    xp = jnp.pad(xh, ((0, 0), (1, 1), (1, 1), (0, 0)), mode="reflect")
    xf = jnp.pad(xp.reshape(N, Hp * Wp, C), ((0, 0), (0, P - Hp * Wp), (0, 0)))

    # OIHW -> (9, Cin, Cout), tap-major, bf16 (halves weight HBM/VMEM traffic
    # and keeps the MXU at full bf16 rate; accumulation stays f32 in-kernel).
    wt1 = jnp.transpose(w1, (2, 3, 1, 0)).reshape(9, C, C).astype(jnp.bfloat16)
    wt2 = jnp.transpose(w2, (2, 3, 1, 0)).reshape(9, C, C).astype(jnp.bfloat16)

    # Chunk rows (multiple of Wp) sized so the per-chunk f32 accumulator is
    # ~<=64 KiB and stays in vregs across the 9-tap accumulation.
    chunk = max(Wp, (16384 // max(C, 1)) // Wp * Wp)
    chunk = min(chunk, HWp)

    # Scoped-VMEM budget from the actual block sizes (defaults: 16/32 MiB).
    vmem_bytes = (2 * P * C * 4                 # input (double-buffered)
                  + 2 * 2 * 9 * C * C * 2       # weights (<=2 buffers, bf16)
                  + 2 * H * W * C * 4           # output (double-buffered)
                  + (P + HWp8) * C * 4)         # scratches
    vmem_limit = int(min(128 << 20, max(32 << 20, 2 * vmem_bytes)))

    kernel = functools.partial(_res_block_kernel, H=H, W=W, chunk=chunk)
    out_nhwc = pl.pallas_call(
        kernel,
        out_shape=jax.ShapeDtypeStruct((N, H, W, C), x_nchw.dtype),
        grid=(N,),
        in_specs=[
            pl.BlockSpec((None, P, C), lambda n: (n, 0, 0)),
            _weight_spec(C),
            _weight_spec(C),
        ],
        out_specs=pl.BlockSpec((None, H, W, C), lambda n: (n, 0, 0, 0)),
        scratch_shapes=[pltpu.VMEM((P, C), jnp.float32),
                        pltpu.VMEM((HWp8, C), jnp.float32)],
        compiler_params=pltpu.CompilerParams(
            dimension_semantics=("parallel",),
            vmem_limit_bytes=vmem_limit),
    )(xf, wt1, wt2)

    # NHWC -> NCHW only because the PyTorch module contract is channels-first;
    # NHWC consumers should take `out_nhwc` directly and skip this transpose.
    return jnp.transpose(out_nhwc, (0, 3, 1, 2))


def residual_block_reference(x_nchw, params, *, mxu_dtype=jnp.float32):
    """Pure-JAX/XLA reference (includes biases, faithful to PyTorch).

    mxu_dtype=bfloat16 mirrors the kernel's MXU operand precision (f32
    accumulation, f32 statistics, f32 residual path).
    """
    w1, b1, w2, b2 = params
    x = jnp.transpose(x_nchw, (0, 2, 3, 1))

    def conv_block(inp, w, b, use_act):
        xp = jnp.pad(inp.astype(mxu_dtype), ((0, 0), (1, 1), (1, 1), (0, 0)),
                     mode="reflect")
        y = jax.lax.conv_general_dilated(
            xp, w.astype(mxu_dtype), (1, 1), "VALID",
            dimension_numbers=("NHWC", "OIHW", "NHWC"),
            preferred_element_type=jnp.float32) + b
        mean = jnp.mean(y, axis=(1, 2), keepdims=True)
        var = jnp.mean((y - mean) ** 2, axis=(1, 2), keepdims=True)
        y = (y - mean) * jax.lax.rsqrt(var + EPS)
        return jnp.maximum(y, 0.0) if use_act else y

    y1 = conv_block(x, w1, b1, True)
    y2 = conv_block(y1, w2, b2, False)
    return jnp.transpose(x + y2, (0, 3, 1, 2))


if __name__ == "__main__":
    N, C, H, W = 2, 4, 16, 16
    key = jax.random.PRNGKey(0)
    kx, k1, k2, k3, k4 = jax.random.split(key, 5)

    x = jax.random.normal(kx, (N, C, H, W), jnp.float32)
    # Synthetic Conv2d(C, C, 3) parameters in PyTorch OIHW layout (+ biases,
    # which are provably dead under affine=False InstanceNorm).
    w1 = jax.random.normal(k1, (C, C, 3, 3), jnp.float32) * 0.1
    b1 = jax.random.normal(k2, (C,), jnp.float32) * 0.1
    w2 = jax.random.normal(k3, (C, C, 3, 3), jnp.float32) * 0.1
    b2 = jax.random.normal(k4, (C,), jnp.float32) * 0.1
    params = (w1, b1, w2, b2)

    out = jax.block_until_ready(jax.jit(residual_block_forward)(x, params))
    ref_bf16 = jax.block_until_ready(
        residual_block_reference(x, params, mxu_dtype=jnp.bfloat16))
    ref_f32 = jax.block_until_ready(residual_block_reference(x, params))

    assert out.shape == (N, C, H, W)
    # Primary check: against a reference using the same bf16 MXU-operand /
    # f32-accumulate precision as the kernel.  Secondary: loose sanity bound
    # against the full-f32 reference (bf16 operand rounding dominates).
    err_bf16 = float(jnp.max(jnp.abs(out - ref_bf16)))
    err_f32 = float(jnp.max(jnp.abs(out - ref_f32)))
    assert err_bf16 < 2e-2, f"mismatch vs bf16-operand reference: {err_bf16}"
    assert err_f32 < 2e-1, f"mismatch vs f32 reference: {err_f32}"
    print("KERNEL_OK")
</pallas_src>

<mosaic_0001>
module attributes {stable_mosaic.version = 11 : i64} {
  func.func @_res_block_kernel(%arg0: i32, %arg1: memref<1x328x4xf32, #tpu.memory_space<vmem>>, %arg2: memref<9x4x4xbf16, #tpu.memory_space<vmem>>, %arg3: memref<9x4x4xbf16, #tpu.memory_space<vmem>>, %arg4: memref<1x16x16x4xf32, #tpu.memory_space<vmem>>, %arg5: memref<328x4xf32, #tpu.memory_space<vmem>>, %arg6: memref<288x4xf32, #tpu.memory_space<vmem>>) attributes {dimension_semantics = [#tpu.dimension_semantics<parallel>], iteration_bounds = array<i64: 2>, scalar_prefetch = 0 : i64, scratch_operands = 2 : i64, tpu.core_type = #tpu.core_type<tc>, window_params = [{transform_indices = @transform_0, window_bounds = array<i64: 1, 328, 4>}, {pipeline_mode = #tpu.pipeline_mode<synchronous>, transform_indices = @transform_1, window_bounds = array<i64: 9, 4, 4>}, {pipeline_mode = #tpu.pipeline_mode<synchronous>, transform_indices = @transform_2, window_bounds = array<i64: 9, 4, 4>}, {transform_indices = @transform_3, window_bounds = array<i64: 1, 16, 16, 4>}]} {
    %cst = arith.constant 0.000000e+00 : f32
    %0 = vector.broadcast %cst : f32 to vector<4x4xf32>
    %c324 = arith.constant 324 : index
    %c0 = arith.constant 0 : index
    %1 = vector.load %arg5[%c324, %c0] : memref<328x4xf32, #tpu.memory_space<vmem>>, vector<4x4xf32>
    tpu.vector_store %arg5[%c324, %c0], %0 {strides = array<i32>} : memref<328x4xf32, #tpu.memory_space<vmem>>, vector<4x4xf32>,
    %cst_0 = arith.constant 0.000000e+00 : f32
    %2 = vector.broadcast %cst_0 : f32 to vector<1x4xf32>
    %cst_1 = arith.constant 0.000000e+00 : f32
    %3 = vector.broadcast %cst_1 : f32 to vector<1x4xf32>
    %cst_2 = arith.constant 0.000000e+00 : f32
    %4 = vector.broadcast %cst_2 : f32 to vector<290x4xf32>
    %c0_3 = arith.constant 0 : index
    %c0_4 = arith.constant 0 : index
    %c0_5 = arith.constant 0 : index
    %5 = vector.load %arg1[%c0_3, %c0_4, %c0_5] : memref<1x328x4xf32, #tpu.memory_space<vmem>>, vector<1x290x4xf32>
    %6 = vector.shape_cast %5 : vector<1x290x4xf32> to vector<290x4xf32>
    %7 = arith.truncf %6 : vector<290x4xf32> to vector<290x4xbf16>
    %c0_6 = arith.constant 0 : index
    %c0_7 = arith.constant 0 : index
    %c0_8 = arith.constant 0 : index
    %8 = vector.load %arg2[%c0_6, %c0_7, %c0_8] : memref<9x4x4xbf16, #tpu.memory_space<vmem>>, vector<1x4x4xbf16>
    %9 = vector.shape_cast %8 : vector<1x4x4xbf16> to vector<4x4xbf16>
    %cst_9 = arith.constant dense<0.000000e+00> : vector<290x4xf32>
    %10 = tpu.matmul %7, %9, %cst_9 {dimension_numbers = #tpu.dot_dimension_numbers<[1], [0], [0], [1], [0, 0, 1, 1], [], []>} : vector<290x4xbf16>, vector<4x4xbf16>, vector<290x4xf32> -> vector<290x4xf32>
    %11 = arith.addf %4, %10 : vector<290x4xf32>
    %c0_10 = arith.constant 0 : index
    %c1 = arith.constant 1 : index
    %c0_11 = arith.constant 0 : index
    %12 = vector.load %arg1[%c0_10, %c1, %c0_11] : memref<1x328x4xf32, #tpu.memory_space<vmem>>, vector<1x290x4xf32>
    %13 = vector.shape_cast %12 : vector<1x290x4xf32> to vector<290x4xf32>
    %14 = arith.truncf %13 : vector<290x4xf32> to vector<290x4xbf16>
    %c1_12 = arith.constant 1 : index
    %c0_13 = arith.constant 0 : index
    %c0_14 = arith.constant 0 : index
    %15 = vector.load %arg2[%c1_12, %c0_13, %c0_14] : memref<9x4x4xbf16, #tpu.memory_space<vmem>>, vector<1x4x4xbf16>
    %16 = vector.shape_cast %15 : vector<1x4x4xbf16> to vector<4x4xbf16>
    %cst_15 = arith.constant dense<0.000000e+00> : vector<290x4xf32>
    %17 = tpu.matmul %14, %16, %cst_15 {dimension_numbers = #tpu.dot_dimension_numbers<[1], [0], [0], [1], [0, 0, 1, 1], [], []>} : vector<290x4xbf16>, vector<4x4xbf16>, vector<290x4xf32> -> vector<290x4xf32>
    %18 = arith.addf %11, %17 : vector<290x4xf32>
    %c0_16 = arith.constant 0 : index
    %c2 = arith.constant 2 : index
    %c0_17 = arith.constant 0 : index
    %19 = vector.load %arg1[%c0_16, %c2, %c0_17] : memref<1x328x4xf32, #tpu.memory_space<vmem>>, vector<1x290x4xf32>
    %20 = vector.shape_cast %19 : vector<1x290x4xf32> to vector<290x4xf32>
    %21 = arith.truncf %20 : vector<290x4xf32> to vector<290x4xbf16>
    %c2_18 = arith.constant 2 : index
    %c0_19 = arith.constant 0 : index
    %c0_20 = arith.constant 0 : index
    %22 = vector.load %arg2[%c2_18, %c0_19, %c0_20] : memref<9x4x4xbf16, #tpu.memory_space<vmem>>, vector<1x4x4xbf16>
    %23 = vector.shape_cast %22 : vector<1x4x4xbf16> to vector<4x4xbf16>
    %cst_21 = arith.constant dense<0.000000e+00> : vector<290x4xf32>
    %24 = tpu.matmul %21, %23, %cst_21 {dimension_numbers = #tpu.dot_dimension_numbers<[1], [0], [0], [1], [0, 0, 1, 1], [], []>} : vector<290x4xbf16>, vector<4x4xbf16>, vector<290x4xf32> -> vector<290x4xf32>
    %25 = arith.addf %18, %24 : vector<290x4xf32>
    %c0_22 = arith.constant 0 : index
    %c18 = arith.constant 18 : index
    %c0_23 = arith.constant 0 : index
    %26 = vector.load %arg1[%c0_22, %c18, %c0_23] : memref<1x328x4xf32, #tpu.memory_space<vmem>>, vector<1x290x4xf32>
    %27 = vector.shape_cast %26 : vector<1x290x4xf32> to vector<290x4xf32>
    %28 = arith.truncf %27 : vector<290x4xf32> to vector<290x4xbf16>
    %c3 = arith.constant 3 : index
    %c0_24 = arith.constant 0 : index
    %c0_25 = arith.constant 0 : index
    %29 = vector.load %arg2[%c3, %c0_24, %c0_25] : memref<9x4x4xbf16, #tpu.memory_space<vmem>>, vector<1x4x4xbf16>
    %30 = vector.shape_cast %29 : vector<1x4x4xbf16> to vector<4x4xbf16>
    %cst_26 = arith.constant dense<0.000000e+00> : vector<290x4xf32>
    %31 = tpu.matmul %28, %30, %cst_26 {dimension_numbers = #tpu.dot_dimension_numbers<[1], [0], [0], [1], [0, 0, 1, 1], [], []>} : vector<290x4xbf16>, vector<4x4xbf16>, vector<290x4xf32> -> vector<290x4xf32>
    %32 = arith.addf %25, %31 : vector<290x4xf32>
    %c0_27 = arith.constant 0 : index
    %c19 = arith.constant 19 : index
    %c0_28 = arith.constant 0 : index
    %33 = vector.load %arg1[%c0_27, %c19, %c0_28] : memref<1x328x4xf32, #tpu.memory_space<vmem>>, vector<1x290x4xf32>
    %34 = vector.shape_cast %33 : vector<1x290x4xf32> to vector<290x4xf32>
    %35 = arith.truncf %34 : vector<290x4xf32> to vector<290x4xbf16>
    %c4 = arith.constant 4 : index
    %c0_29 = arith.constant 0 : index
    %c0_30 = arith.constant 0 : index
    %36 = vector.load %arg2[%c4, %c0_29, %c0_30] : memref<9x4x4xbf16, #tpu.memory_space<vmem>>, vector<1x4x4xbf16>
    %37 = vector.shape_cast %36 : vector<1x4x4xbf16> to vector<4x4xbf16>
    %cst_31 = arith.constant dense<0.000000e+00> : vector<290x4xf32>
    %38 = tpu.matmul %35, %37, %cst_31 {dimension_numbers = #tpu.dot_dimension_numbers<[1], [0], [0], [1], [0, 0, 1, 1], [], []>} : vector<290x4xbf16>, vector<4x4xbf16>, vector<290x4xf32> -> vector<290x4xf32>
    %39 = arith.addf %32, %38 : vector<290x4xf32>
    %c0_32 = arith.constant 0 : index
    %c20 = arith.constant 20 : index
    %c0_33 = arith.constant 0 : index
    %40 = vector.load %arg1[%c0_32, %c20, %c0_33] : memref<1x328x4xf32, #tpu.memory_space<vmem>>, vector<1x290x4xf32>
    %41 = vector.shape_cast %40 : vector<1x290x4xf32> to vector<290x4xf32>
    %42 = arith.truncf %41 : vector<290x4xf32> to vector<290x4xbf16>
    %c5 = arith.constant 5 : index
    %c0_34 = arith.constant 0 : index
    %c0_35 = arith.constant 0 : index
    %43 = vector.load %arg2[%c5, %c0_34, %c0_35] : memref<9x4x4xbf16, #tpu.memory_space<vmem>>, vector<1x4x4xbf16>
    %44 = vector.shape_cast %43 : vector<1x4x4xbf16> to vector<4x4xbf16>
    %cst_36 = arith.constant dense<0.000000e+00> : vector<290x4xf32>
    %45 = tpu.matmul %42, %44, %cst_36 {dimension_numbers = #tpu.dot_dimension_numbers<[1], [0], [0], [1], [0, 0, 1, 1], [], []>} : vector<290x4xbf16>, vector<4x4xbf16>, vector<290x4xf32> -> vector<290x4xf32>
    %46 = arith.addf %39, %45 : vector<290x4xf32>
    %c0_37 = arith.constant 0 : index
    %c36 = arith.constant 36 : index
    %c0_38 = arith.constant 0 : index
    %47 = vector.load %arg1[%c0_37, %c36, %c0_38] : memref<1x328x4xf32, #tpu.memory_space<vmem>>, vector<1x290x4xf32>
    %48 = vector.shape_cast %47 : vector<1x290x4xf32> to vector<290x4xf32>
    %49 = arith.truncf %48 : vector<290x4xf32> to vector<290x4xbf16>
    %c6 = arith.constant 6 : index
    %c0_39 = arith.constant 0 : index
    %c0_40 = arith.constant 0 : index
    %50 = vector.load %arg2[%c6, %c0_39, %c0_40] : memref<9x4x4xbf16, #tpu.memory_space<vmem>>, vector<1x4x4xbf16>
    %51 = vector.shape_cast %50 : vector<1x4x4xbf16> to vector<4x4xbf16>
    %cst_41 = arith.constant dense<0.000000e+00> : vector<290x4xf32>
    %52 = tpu.matmul %49, %51, %cst_41 {dimension_numbers = #tpu.dot_dimension_numbers<[1], [0], [0], [1], [0, 0, 1, 1], [], []>} : vector<290x4xbf16>, vector<4x4xbf16>, vector<290x4xf32> -> vector<290x4xf32>
    %53 = arith.addf %46, %52 : vector<290x4xf32>
    %c0_42 = arith.constant 0 : index
    %c37 = arith.constant 37 : index
    %c0_43 = arith.constant 0 : index
    %54 = vector.load %arg1[%c0_42, %c37, %c0_43] : memref<1x328x4xf32, #tpu.memory_space<vmem>>, vector<1x290x4xf32>
    %55 = vector.shape_cast %54 : vector<1x290x4xf32> to vector<290x4xf32>
    %56 = arith.truncf %55 : vector<290x4xf32> to vector<290x4xbf16>
    %c7 = arith.constant 7 : index
    %c0_44 = arith.constant 0 : index
    %c0_45 = arith.constant 0 : index
    %57 = vector.load %arg2[%c7, %c0_44, %c0_45] : memref<9x4x4xbf16, #tpu.memory_space<vmem>>, vector<1x4x4xbf16>
    %58 = vector.shape_cast %57 : vector<1x4x4xbf16> to vector<4x4xbf16>
    %cst_46 = arith.constant dense<0.000000e+00> : vector<290x4xf32>
    %59 = tpu.matmul %56, %58, %cst_46 {dimension_numbers = #tpu.dot_dimension_numbers<[1], [0], [0], [1], [0, 0, 1, 1], [], []>} : vector<290x4xbf16>, vector<4x4xbf16>, vector<290x4xf32> -> vector<290x4xf32>
    %60 = arith.addf %53, %59 : vector<290x4xf32>
    %c0_47 = arith.constant 0 : index
    %c38 = arith.constant 38 : index
    %c0_48 = arith.constant 0 : index
    %61 = vector.load %arg1[%c0_47, %c38, %c0_48] : memref<1x328x4xf32, #tpu.memory_space<vmem>>, vector<1x290x4xf32>
    %62 = vector.shape_cast %61 : vector<1x290x4xf32> to vector<290x4xf32>
    %63 = arith.truncf %62 : vector<290x4xf32> to vector<290x4xbf16>
    %c8 = arith.constant 8 : index
    %c0_49 = arith.constant 0 : index
    %c0_50 = arith.constant 0 : index
    %64 = vector.load %arg2[%c8, %c0_49, %c0_50] : memref<9x4x4xbf16, #tpu.memory_space<vmem>>, vector<1x4x4xbf16>
    %65 = vector.shape_cast %64 : vector<1x4x4xbf16> to vector<4x4xbf16>
    %cst_51 = arith.constant dense<0.000000e+00> : vector<290x4xf32>
    %66 = tpu.matmul %63, %65, %cst_51 {dimension_numbers = #tpu.dot_dimension_numbers<[1], [0], [0], [1], [0, 0, 1, 1], [], []>} : vector<290x4xbf16>, vector<4x4xbf16>, vector<290x4xf32> -> vector<290x4xf32>
    %67 = arith.addf %60, %66 : vector<290x4xf32>
    %68 = vector.extract_strided_slice %67 {offsets = [0, 0], sizes = [288, 4], strides = [1, 1]} : vector<290x4xf32> to vector<288x4xf32>
    %69 = vector.extract_strided_slice %67 {offsets = [2, 0], sizes = [288, 4], strides = [1, 1]} : vector<290x4xf32> to vector<288x4xf32>
    %c2_i32 = arith.constant 2 : i32
    %70 = tpu.dynamic_rotate %68 by %c2_i32 dim 0 : vector<288x4xf32>, i32 -> vector<288x4xf32>
    %71 = tpu.iota {dimensions = array<i32: 0>} : vector<288x1xi32>
    %c18_i32 = arith.constant 18 : i32
    %c0_i32 = arith.constant 0 : i32
    %72 = arith.cmpi eq, %c18_i32, %c0_i32 : i32
    %c1_i32 = arith.constant 1 : i32
    %73 = arith.select %72, %c1_i32, %c18_i32 : i32
    %74 = vector.broadcast %73 : i32 to vector<288x1xi32>
    %75 = arith.remsi %71, %74 : vector<288x1xi32>
    %c0_i32_52 = arith.constant 0 : i32
    %76 = vector.broadcast %c0_i32_52 : i32 to vector<288x1xi32>
    %77 = arith.cmpi ne, %75, %76 : vector<288x1xi32>
    %c0_i32_53 = arith.constant 0 : i32
    %78 = vector.broadcast %c0_i32_53 : i32 to vector<288x1xi32>
    %79 = arith.cmpi slt, %75, %78 : vector<288x1xi32>
    %c0_i32_54 = arith.constant 0 : i32
    %80 = arith.cmpi slt, %73, %c0_i32_54 : i32
    %81 = vector.broadcast %80 : i1 to vector<288x1xi1>
    %82 = vector.broadcast %81 : vector<288x1xi1> to vector<288x1xi1>
    %83 = arith.xori %79, %82 : vector<288x1xi1>
    %84 = arith.andi %83, %77 : vector<288x1xi1>
    %85 = vector.broadcast %73 : i32 to vector<288x1xi32>
    %86 = arith.addi %75, %85 : vector<288x1xi32>
    %87 = arith.select %84, %86, %75 : vector<288x1xi1>, vector<288x1xi32>
    %c16_i32 = arith.constant 16 : i32
    %88 = vector.broadcast %c16_i32 : i32 to vector<288x1xi32>
    %89 = arith.cmpi slt, %87, %88 : vector<288x1xi32>
    %cst_55 = arith.constant 0.000000e+00 : f32
    %90 = vector.shape_cast %89 : vector<288x1xi1> to vector<288x1xi1>
    %91 = vector.broadcast %90 : vector<288x1xi1> to vector<288x4xi1>
    %92 = vector.broadcast %cst_55 : f32 to vector<288x4xf32>
    %93 = arith.select %91, %68, %92 : vector<288x4xi1>, vector<288x4xf32>
    %cst_56 = arith.constant dense<0.000000e+00> : vector<4xf32>
    %94 = vector.multi_reduction <add>, %93, %cst_56 [0] : vector<288x4xf32> to vector<4xf32>
    %95 = vector.shape_cast %94 : vector<4xf32> to vector<1x4xf32>
    %96 = arith.addf %2, %95 : vector<1x4xf32>
    %97 = arith.mulf %93, %93 : vector<288x4xf32>
    %cst_57 = arith.constant dense<0.000000e+00> : vector<4xf32>
    %98 = vector.multi_reduction <add>, %97, %cst_57 [0] : vector<288x4xf32> to vector<4xf32>
    %99 = vector.shape_cast %98 : vector<4xf32> to vector<1x4xf32>
    %100 = arith.addf %3, %99 : vector<1x4xf32>
    %c16_i32_58 = arith.constant 16 : i32
    %101 = vector.broadcast %c16_i32_58 : i32 to vector<288x1xi32>
    %102 = arith.cmpi eq, %87, %101 : vector<288x1xi32>
    %c17_i32 = arith.constant 17 : i32
    %103 = vector.broadcast %c17_i32 : i32 to vector<288x1xi32>
    %104 = arith.cmpi eq, %87, %103 : vector<288x1xi32>
    %105 = vector.shape_cast %104 : vector<288x1xi1> to vector<288x1xi1>
    %106 = vector.broadcast %105 : vector<288x1xi1> to vector<288x4xi1>
    %107 = arith.select %106, %69, %68 : vector<288x4xi1>, vector<288x4xf32>
    %108 = vector.shape_cast %102 : vector<288x1xi1> to vector<288x1xi1>
    %109 = vector.broadcast %108 : vector<288x1xi1> to vector<288x4xi1>
    %110 = arith.select %109, %70, %107 : vector<288x4xi1>, vector<288x4xf32>
    %c19_59 = arith.constant 19 : index
    %c0_60 = arith.constant 0 : index
    %111 = vector.load %arg5[%c19_59, %c0_60] : memref<328x4xf32, #tpu.memory_space<vmem>>, vector<288x4xf32>
    tpu.vector_store %arg5[%c19_59, %c0_60], %110 {strides = array<i32>} : memref<328x4xf32, #tpu.memory_space<vmem>>, vector<288x4xf32>,
    %cst_61 = arith.constant 3.906250e-03 : f32
    %112 = vector.broadcast %cst_61 : f32 to vector<1x4xf32>
    %113 = arith.mulf %96, %112 : vector<1x4xf32>
    %cst_62 = arith.constant 3.906250e-03 : f32
    %114 = vector.broadcast %cst_62 : f32 to vector<1x4xf32>
    %115 = arith.mulf %100, %114 : vector<1x4xf32>
    %116 = arith.mulf %113, %113 : vector<1x4xf32>
    %117 = arith.subf %115, %116 : vector<1x4xf32>
    %cst_63 = arith.constant 0.000000e+00 : f32
    %118 = vector.broadcast %cst_63 : f32 to vector<1x4xf32>
    %119 = arith.maximumf %117, %118 : vector<1x4xf32>
    %cst_64 = arith.constant 9.99999974E-6 : f32
    %120 = vector.broadcast %cst_64 : f32 to vector<1x4xf32>
    %121 = arith.addf %119, %120 : vector<1x4xf32>
    %122 = math.rsqrt %121 : vector<1x4xf32>
    %c19_65 = arith.constant 19 : index
    %c0_66 = arith.constant 0 : index
    %123 = vector.load %arg5[%c19_65, %c0_66] : memref<328x4xf32, #tpu.memory_space<vmem>>, vector<288x4xf32>
    %124 = vector.broadcast %113 : vector<1x4xf32> to vector<288x4xf32>
    %125 = arith.subf %123, %124 : vector<288x4xf32>
    %126 = vector.broadcast %122 : vector<1x4xf32> to vector<288x4xf32>
    %127 = arith.mulf %125, %126 : vector<288x4xf32>
    %cst_67 = arith.constant 0.000000e+00 : f32
    %128 = vector.broadcast %cst_67 : f32 to vector<288x4xf32>
    %129 = arith.maximumf %127, %128 : vector<288x4xf32>
    %c19_68 = arith.constant 19 : index
    %c0_69 = arith.constant 0 : index
    %130 = vector.load %arg5[%c19_68, %c0_69] : memref<328x4xf32, #tpu.memory_space<vmem>>, vector<288x4xf32>
    tpu.vector_store %arg5[%c19_68, %c0_69], %129 {strides = array<i32>} : memref<328x4xf32, #tpu.memory_space<vmem>>, vector<288x4xf32>,
    %c20_70 = arith.constant 20 : index
    %c0_71 = arith.constant 0 : index
    %131 = vector.load %arg5[%c20_70, %c0_71] : memref<328x4xf32, #tpu.memory_space<vmem>>, vector<1x4xf32>
    %c18_72 = arith.constant 18 : index
    %c0_73 = arith.constant 0 : index
    %132 = vector.load %arg5[%c18_72, %c0_73] : memref<328x4xf32, #tpu.memory_space<vmem>>, vector<1x4xf32>
    tpu.vector_store %arg5[%c18_72, %c0_73], %131 {strides = array<i32>} : memref<328x4xf32, #tpu.memory_space<vmem>>, vector<1x4xf32>,
    %c36_74 = arith.constant 36 : index
    %c0_75 = arith.constant 0 : index
    %133 = vector.load %arg5[%c36_74, %c0_75] : memref<328x4xf32, #tpu.memory_space<vmem>>, vector<18x4xf32>
    %c0_76 = arith.constant 0 : index
    %c0_77 = arith.constant 0 : index
    %134 = vector.load %arg5[%c0_76, %c0_77] : memref<328x4xf32, #tpu.memory_space<vmem>>, vector<18x4xf32>
    tpu.vector_store %arg5[%c0_76, %c0_77], %133 {strides = array<i32>} : memref<328x4xf32, #tpu.memory_space<vmem>>, vector<18x4xf32>,
    %c270 = arith.constant 270 : index
    %c0_78 = arith.constant 0 : index
    %135 = vector.load %arg5[%c270, %c0_78] : memref<328x4xf32, #tpu.memory_space<vmem>>, vector<18x4xf32>
    %c306 = arith.constant 306 : index
    %c0_79 = arith.constant 0 : index
    %136 = vector.load %arg5[%c306, %c0_79] : memref<328x4xf32, #tpu.memory_space<vmem>>, vector<18x4xf32>
    tpu.vector_store %arg5[%c306, %c0_79], %135 {strides = array<i32>} : memref<328x4xf32, #tpu.memory_space<vmem>>, vector<18x4xf32>,
    %cst_80 = arith.constant 0.000000e+00 : f32
    %137 = vector.broadcast %cst_80 : f32 to vector<1x4xf32>
    %cst_81 = arith.constant 0.000000e+00 : f32
    %138 = vector.broadcast %cst_81 : f32 to vector<1x4xf32>
    %cst_82 = arith.constant 0.000000e+00 : f32
    %139 = vector.broadcast %cst_82 : f32 to vector<288x4xf32>
    %c0_83 = arith.constant 0 : index
    %c0_84 = arith.constant 0 : index
    %140 = vector.load %arg5[%c0_83, %c0_84] : memref<328x4xf32, #tpu.memory_space<vmem>>, vector<288x4xf32>
    %141 = arith.truncf %140 : vector<288x4xf32> to vector<288x4xbf16>
    %c0_85 = arith.constant 0 : index
    %c0_86 = arith.constant 0 : index
    %c0_87 = arith.constant 0 : index
    %142 = vector.load %arg3[%c0_85, %c0_86, %c0_87] : memref<9x4x4xbf16, #tpu.memory_space<vmem>>, vector<1x4x4xbf16>
    %143 = vector.shape_cast %142 : vector<1x4x4xbf16> to vector<4x4xbf16>
    %cst_88 = arith.constant dense<0.000000e+00> : vector<288x4xf32>
    %144 = tpu.matmul %141, %143, %cst_88 {dimension_numbers = #tpu.dot_dimension_numbers<[1], [0], [0], [1], [0, 0, 1, 1], [], []>} : vector<288x4xbf16>, vector<4x4xbf16>, vector<288x4xf32> -> vector<288x4xf32>
    %145 = arith.addf %139, %144 : vector<288x4xf32>
    %c1_89 = arith.constant 1 : index
    %c0_90 = arith.constant 0 : index
    %146 = vector.load %arg5[%c1_89, %c0_90] : memref<328x4xf32, #tpu.memory_space<vmem>>, vector<288x4xf32>
    %147 = arith.truncf %146 : vector<288x4xf32> to vector<288x4xbf16>
    %c1_91 = arith.constant 1 : index
    %c0_92 = arith.constant 0 : index
    %c0_93 = arith.constant 0 : index
    %148 = vector.load %arg3[%c1_91, %c0_92, %c0_93] : memref<9x4x4xbf16, #tpu.memory_space<vmem>>, vector<1x4x4xbf16>
    %149 = vector.shape_cast %148 : vector<1x4x4xbf16> to vector<4x4xbf16>
    %cst_94 = arith.constant dense<0.000000e+00> : vector<288x4xf32>
    %150 = tpu.matmul %147, %149, %cst_94 {dimension_numbers = #tpu.dot_dimension_numbers<[1], [0], [0], [1], [0, 0, 1, 1], [], []>} : vector<288x4xbf16>, vector<4x4xbf16>, vector<288x4xf32> -> vector<288x4xf32>
    %151 = arith.addf %145, %150 : vector<288x4xf32>
    %c2_95 = arith.constant 2 : index
    %c0_96 = arith.constant 0 : index
    %152 = vector.load %arg5[%c2_95, %c0_96] : memref<328x4xf32, #tpu.memory_space<vmem>>, vector<288x4xf32>
    %153 = arith.truncf %152 : vector<288x4xf32> to vector<288x4xbf16>
    %c2_97 = arith.constant 2 : index
    %c0_98 = arith.constant 0 : index
    %c0_99 = arith.constant 0 : index
    %154 = vector.load %arg3[%c2_97, %c0_98, %c0_99] : memref<9x4x4xbf16, #tpu.memory_space<vmem>>, vector<1x4x4xbf16>
    %155 = vector.shape_cast %154 : vector<1x4x4xbf16> to vector<4x4xbf16>
    %cst_100 = arith.constant dense<0.000000e+00> : vector<288x4xf32>
    %156 = tpu.matmul %153, %155, %cst_100 {dimension_numbers = #tpu.dot_dimension_numbers<[1], [0], [0], [1], [0, 0, 1, 1], [], []>} : vector<288x4xbf16>, vector<4x4xbf16>, vector<288x4xf32> -> vector<288x4xf32>
    %157 = arith.addf %151, %156 : vector<288x4xf32>
    %c18_101 = arith.constant 18 : index
    %c0_102 = arith.constant 0 : index
    %158 = vector.load %arg5[%c18_101, %c0_102] : memref<328x4xf32, #tpu.memory_space<vmem>>, vector<288x4xf32>
    %159 = arith.truncf %158 : vector<288x4xf32> to vector<288x4xbf16>
    %c3_103 = arith.constant 3 : index
    %c0_104 = arith.constant 0 : index
    %c0_105 = arith.constant 0 : index
    %160 = vector.load %arg3[%c3_103, %c0_104, %c0_105] : memref<9x4x4xbf16, #tpu.memory_space<vmem>>, vector<1x4x4xbf16>
    %161 = vector.shape_cast %160 : vector<1x4x4xbf16> to vector<4x4xbf16>
    %cst_106 = arith.constant dense<0.000000e+00> : vector<288x4xf32>
    %162 = tpu.matmul %159, %161, %cst_106 {dimension_numbers = #tpu.dot_dimension_numbers<[1], [0], [0], [1], [0, 0, 1, 1], [], []>} : vector<288x4xbf16>, vector<4x4xbf16>, vector<288x4xf32> -> vector<288x4xf32>
    %163 = arith.addf %157, %162 : vector<288x4xf32>
    %c19_107 = arith.constant 19 : index
    %c0_108 = arith.constant 0 : index
    %164 = vector.load %arg5[%c19_107, %c0_108] : memref<328x4xf32, #tpu.memory_space<vmem>>, vector<288x4xf32>
    %165 = arith.truncf %164 : vector<288x4xf32> to vector<288x4xbf16>
    %c4_109 = arith.constant 4 : index
    %c0_110 = arith.constant 0 : index
    %c0_111 = arith.constant 0 : index
    %166 = vector.load %arg3[%c4_109, %c0_110, %c0_111] : memref<9x4x4xbf16, #tpu.memory_space<vmem>>, vector<1x4x4xbf16>
    %167 = vector.shape_cast %166 : vector<1x4x4xbf16> to vector<4x4xbf16>
    %cst_112 = arith.constant dense<0.000000e+00> : vector<288x4xf32>
    %168 = tpu.matmul %165, %167, %cst_112 {dimension_numbers = #tpu.dot_dimension_numbers<[1], [0], [0], [1], [0, 0, 1, 1], [], []>} : vector<288x4xbf16>, vector<4x4xbf16>, vector<288x4xf32> -> vector<288x4xf32>
    %169 = arith.addf %163, %168 : vector<288x4xf32>
    %c20_113 = arith.constant 20 : index
    %c0_114 = arith.constant 0 : index
    %170 = vector.load %arg5[%c20_113, %c0_114] : memref<328x4xf32, #tpu.memory_space<vmem>>, vector<288x4xf32>
    %171 = arith.truncf %170 : vector<288x4xf32> to vector<288x4xbf16>
    %c5_115 = arith.constant 5 : index
    %c0_116 = arith.constant 0 : index
    %c0_117 = arith.constant 0 : index
    %172 = vector.load %arg3[%c5_115, %c0_116, %c0_117] : memref<9x4x4xbf16, #tpu.memory_space<vmem>>, vector<1x4x4xbf16>
    %173 = vector.shape_cast %172 : vector<1x4x4xbf16> to vector<4x4xbf16>
    %cst_118 = arith.constant dense<0.000000e+00> : vector<288x4xf32>
    %174 = tpu.matmul %171, %173, %cst_118 {dimension_numbers = #tpu.dot_dimension_numbers<[1], [0], [0], [1], [0, 0, 1, 1], [], []>} : vector<288x4xbf16>, vector<4x4xbf16>, vector<288x4xf32> -> vector<288x4xf32>
    %175 = arith.addf %169, %174 : vector<288x4xf32>
    %c36_119 = arith.constant 36 : index
    %c0_120 = arith.constant 0 : index
    %176 = vector.load %arg5[%c36_119, %c0_120] : memref<328x4xf32, #tpu.memory_space<vmem>>, vector<288x4xf32>
    %177 = arith.truncf %176 : vector<288x4xf32> to vector<288x4xbf16>
    %c6_121 = arith.constant 6 : index
    %c0_122 = arith.constant 0 : index
    %c0_123 = arith.constant 0 : index
    %178 = vector.load %arg3[%c6_121, %c0_122, %c0_123] : memref<9x4x4xbf16, #tpu.memory_space<vmem>>, vector<1x4x4xbf16>
    %179 = vector.shape_cast %178 : vector<1x4x4xbf16> to vector<4x4xbf16>
    %cst_124 = arith.constant dense<0.000000e+00> : vector<288x4xf32>
    %180 = tpu.matmul %177, %179, %cst_124 {dimension_numbers = #tpu.dot_dimension_numbers<[1], [0], [0], [1], [0, 0, 1, 1], [], []>} : vector<288x4xbf16>, vector<4x4xbf16>, vector<288x4xf32> -> vector<288x4xf32>
    %181 = arith.addf %175, %180 : vector<288x4xf32>
    %c37_125 = arith.constant 37 : index
    %c0_126 = arith.constant 0 : index
    %182 = vector.load %arg5[%c37_125, %c0_126] : memref<328x4xf32, #tpu.memory_space<vmem>>, vector<288x4xf32>
    %183 = arith.truncf %182 : vector<288x4xf32> to vector<288x4xbf16>
    %c7_127 = arith.constant 7 : index
    %c0_128 = arith.constant 0 : index
    %c0_129 = arith.constant 0 : index
    %184 = vector.load %arg3[%c7_127, %c0_128, %c0_129] : memref<9x4x4xbf16, #tpu.memory_space<vmem>>, vector<1x4x4xbf16>
    %185 = vector.shape_cast %184 : vector<1x4x4xbf16> to vector<4x4xbf16>
    %cst_130 = arith.constant dense<0.000000e+00> : vector<288x4xf32>
    %186 = tpu.matmul %183, %185, %cst_130 {dimension_numbers = #tpu.dot_dimension_numbers<[1], [0], [0], [1], [0, 0, 1, 1], [], []>} : vector<288x4xbf16>, vector<4x4xbf16>, vector<288x4xf32> -> vector<288x4xf32>
    %187 = arith.addf %181, %186 : vector<288x4xf32>
    %c38_131 = arith.constant 38 : index
    %c0_132 = arith.constant 0 : index
    %188 = vector.load %arg5[%c38_131, %c0_132] : memref<328x4xf32, #tpu.memory_space<vmem>>, vector<288x4xf32>
    %189 = arith.truncf %188 : vector<288x4xf32> to vector<288x4xbf16>
    %c8_133 = arith.constant 8 : index
    %c0_134 = arith.constant 0 : index
    %c0_135 = arith.constant 0 : index
    %190 = vector.load %arg3[%c8_133, %c0_134, %c0_135] : memref<9x4x4xbf16, #tpu.memory_space<vmem>>, vector<1x4x4xbf16>
    %191 = vector.shape_cast %190 : vector<1x4x4xbf16> to vector<4x4xbf16>
    %cst_136 = arith.constant dense<0.000000e+00> : vector<288x4xf32>
    %192 = tpu.matmul %189, %191, %cst_136 {dimension_numbers = #tpu.dot_dimension_numbers<[1], [0], [0], [1], [0, 0, 1, 1], [], []>} : vector<288x4xbf16>, vector<4x4xbf16>, vector<288x4xf32> -> vector<288x4xf32>
    %193 = arith.addf %187, %192 : vector<288x4xf32>
    %194 = tpu.iota {dimensions = array<i32: 0>} : vector<288x1xi32>
    %c18_i32_137 = arith.constant 18 : i32
    %c0_i32_138 = arith.constant 0 : i32
    %195 = arith.cmpi eq, %c18_i32_137, %c0_i32_138 : i32
    %c1_i32_139 = arith.constant 1 : i32
    %196 = arith.select %195, %c1_i32_139, %c18_i32_137 : i32
    %197 = vector.broadcast %196 : i32 to vector<288x1xi32>
    %198 = arith.remsi %194, %197 : vector<288x1xi32>
    %c0_i32_140 = arith.constant 0 : i32
    %199 = vector.broadcast %c0_i32_140 : i32 to vector<288x1xi32>
    %200 = arith.cmpi ne, %198, %199 : vector<288x1xi32>
    %c0_i32_141 = arith.constant 0 : i32
    %201 = vector.broadcast %c0_i32_141 : i32 to vector<288x1xi32>
    %202 = arith.cmpi slt, %198, %201 : vector<288x1xi32>
    %c0_i32_142 = arith.constant 0 : i32
    %203 = arith.cmpi slt, %196, %c0_i32_142 : i32
    %204 = vector.broadcast %203 : i1 to vector<288x1xi1>
    %205 = vector.broadcast %204 : vector<288x1xi1> to vector<288x1xi1>
    %206 = arith.xori %202, %205 : vector<288x1xi1>
    %207 = arith.andi %206, %200 : vector<288x1xi1>
    %208 = vector.broadcast %196 : i32 to vector<288x1xi32>
    %209 = arith.addi %198, %208 : vector<288x1xi32>
    %210 = arith.select %207, %209, %198 : vector<288x1xi1>, vector<288x1xi32>
    %c16_i32_143 = arith.constant 16 : i32
    %211 = vector.broadcast %c16_i32_143 : i32 to vector<288x1xi32>
    %212 = arith.cmpi slt, %210, %211 : vector<288x1xi32>
    %cst_144 = arith.constant 0.000000e+00 : f32
    %213 = vector.shape_cast %212 : vector<288x1xi1> to vector<288x1xi1>
    %214 = vector.broadcast %213 : vector<288x1xi1> to vector<288x4xi1>
    %215 = vector.broadcast %cst_144 : f32 to vector<288x4xf32>
    %216 = arith.select %214, %193, %215 : vector<288x4xi1>, vector<288x4xf32>
    %cst_145 = arith.constant dense<0.000000e+00> : vector<4xf32>
    %217 = vector.multi_reduction <add>, %216, %cst_145 [0] : vector<288x4xf32> to vector<4xf32>
    %218 = vector.shape_cast %217 : vector<4xf32> to vector<1x4xf32>
    %219 = arith.addf %137, %218 : vector<1x4xf32>
    %220 = arith.mulf %216, %216 : vector<288x4xf32>
    %cst_146 = arith.constant dense<0.000000e+00> : vector<4xf32>
    %221 = vector.multi_reduction <add>, %220, %cst_146 [0] : vector<288x4xf32> to vector<4xf32>
    %222 = vector.shape_cast %221 : vector<4xf32> to vector<1x4xf32>
    %223 = arith.addf %138, %222 : vector<1x4xf32>
    %c0_147 = arith.constant 0 : index
    %c0_148 = arith.constant 0 : index
    %224 = vector.load %arg6[%c0_147, %c0_148] : memref<288x4xf32, #tpu.memory_space<vmem>>, vector<288x4xf32>
    tpu.vector_store %arg6[%c0_147, %c0_148], %193 {strides = array<i32>} : memref<288x4xf32, #tpu.memory_space<vmem>>, vector<288x4xf32>,
    %cst_149 = arith.constant 3.906250e-03 : f32
    %225 = vector.broadcast %cst_149 : f32 to vector<1x4xf32>
    %226 = arith.mulf %219, %225 : vector<1x4xf32>
    %cst_150 = arith.constant 3.906250e-03 : f32
    %227 = vector.broadcast %cst_150 : f32 to vector<1x4xf32>
    %228 = arith.mulf %223, %227 : vector<1x4xf32>
    %229 = arith.mulf %226, %226 : vector<1x4xf32>
    %230 = arith.subf %228, %229 : vector<1x4xf32>
    %cst_151 = arith.constant 0.000000e+00 : f32
    %231 = vector.broadcast %cst_151 : f32 to vector<1x4xf32>
    %232 = arith.maximumf %230, %231 : vector<1x4xf32>
    %cst_152 = arith.constant 9.99999974E-6 : f32
    %233 = vector.broadcast %cst_152 : f32 to vector<1x4xf32>
    %234 = arith.addf %232, %233 : vector<1x4xf32>
    %235 = math.rsqrt %234 : vector<1x4xf32>
    %c0_153 = arith.constant 0 : index
    %c0_154 = arith.constant 0 : index
    %236 = vector.load %arg6[%c0_153, %c0_154] : memref<288x4xf32, #tpu.memory_space<vmem>>, vector<16x4xf32>
    %c0_155 = arith.constant 0 : index
    %c19_156 = arith.constant 19 : index
    %c0_157 = arith.constant 0 : index
    %237 = vector.load %arg1[%c0_155, %c19_156, %c0_157] : memref<1x328x4xf32, #tpu.memory_space<vmem>>, vector<1x16x4xf32>
    %238 = vector.shape_cast %237 : vector<1x16x4xf32> to vector<16x4xf32>
    %239 = vector.broadcast %226 : vector<1x4xf32> to vector<16x4xf32>
    %240 = arith.subf %236, %239 : vector<16x4xf32>
    %241 = vector.broadcast %235 : vector<1x4xf32> to vector<16x4xf32>
    %242 = arith.mulf %240, %241 : vector<16x4xf32>
    %243 = arith.addf %238, %242 : vector<16x4xf32>
    %c0_158 = arith.constant 0 : index
    %c0_159 = arith.constant 0 : index
    %c0_160 = arith.constant 0 : index
    %c0_161 = arith.constant 0 : index
    %244 = vector.load %arg4[%c0_158, %c0_159, %c0_160, %c0_161] : memref<1x16x16x4xf32, #tpu.memory_space<vmem>>, vector<1x1x16x4xf32>
    %245 = vector.shape_cast %244 : vector<1x1x16x4xf32> to vector<16x4xf32>
    %246 = vector.shape_cast %243 : vector<16x4xf32> to vector<1x1x16x4xf32>
    tpu.vector_store %arg4[%c0_158, %c0_159, %c0_160, %c0_161], %246 {strides = array<i32>} : memref<1x16x16x4xf32, #tpu.memory_space<vmem>>, vector<1x1x16x4xf32>,
    %c18_162 = arith.constant 18 : index
    %c0_163 = arith.constant 0 : index
    %247 = vector.load %arg6[%c18_162, %c0_163] : memref<288x4xf32, #tpu.memory_space<vmem>>, vector<16x4xf32>
    %c0_164 = arith.constant 0 : index
    %c37_165 = arith.constant 37 : index
    %c0_166 = arith.constant 0 : index
    %248 = vector.load %arg1[%c0_164, %c37_165, %c0_166] : memref<1x328x4xf32, #tpu.memory_space<vmem>>, vector<1x16x4xf32>
    %249 = vector.shape_cast %248 : vector<1x16x4xf32> to vector<16x4xf32>
    %250 = vector.broadcast %226 : vector<1x4xf32> to vector<16x4xf32>
    %251 = arith.subf %247, %250 : vector<16x4xf32>
    %252 = vector.broadcast %235 : vector<1x4xf32> to vector<16x4xf32>
    %253 = arith.mulf %251, %252 : vector<16x4xf32>
    %254 = arith.addf %249, %253 : vector<16x4xf32>
    %c0_167 = arith.constant 0 : index
    %c1_168 = arith.constant 1 : index
    %c0_169 = arith.constant 0 : index
    %c0_170 = arith.constant 0 : index
    %255 = vector.load %arg4[%c0_167, %c1_168, %c0_169, %c0_170] : memref<1x16x16x4xf32, #tpu.memory_space<vmem>>, vector<1x1x16x4xf32>
    %256 = vector.shape_cast %255 : vector<1x1x16x4xf32> to vector<16x4xf32>
    %257 = vector.shape_cast %254 : vector<16x4xf32> to vector<1x1x16x4xf32>
    tpu.vector_store %arg4[%c0_167, %c1_168, %c0_169, %c0_170], %257 {strides = array<i32>} : memref<1x16x16x4xf32, #tpu.memory_space<vmem>>, vector<1x1x16x4xf32>,
    %c36_171 = arith.constant 36 : index
    %c0_172 = arith.constant 0 : index
    %258 = vector.load %arg6[%c36_171, %c0_172] : memref<288x4xf32, #tpu.memory_space<vmem>>, vector<16x4xf32>
    %c0_173 = arith.constant 0 : index
    %c55 = arith.constant 55 : index
    %c0_174 = arith.constant 0 : index
    %259 = vector.load %arg1[%c0_173, %c55, %c0_174] : memref<1x328x4xf32, #tpu.memory_space<vmem>>, vector<1x16x4xf32>
    %260 = vector.shape_cast %259 : vector<1x16x4xf32> to vector<16x4xf32>
    %261 = vector.broadcast %226 : vector<1x4xf32> to vector<16x4xf32>
    %262 = arith.subf %258, %261 : vector<16x4xf32>
    %263 = vector.broadcast %235 : vector<1x4xf32> to vector<16x4xf32>
    %264 = arith.mulf %262, %263 : vector<16x4xf32>
    %265 = arith.addf %260, %264 : vector<16x4xf32>
    %c0_175 = arith.constant 0 : index
    %c2_176 = arith.constant 2 : index
    %c0_177 = arith.constant 0 : index
    %c0_178 = arith.constant 0 : index
    %266 = vector.load %arg4[%c0_175, %c2_176, %c0_177, %c0_178] : memref<1x16x16x4xf32, #tpu.memory_space<vmem>>, vector<1x1x16x4xf32>
    %267 = vector.shape_cast %266 : vector<1x1x16x4xf32> to vector<16x4xf32>
    %268 = vector.shape_cast %265 : vector<16x4xf32> to vector<1x1x16x4xf32>
    tpu.vector_store %arg4[%c0_175, %c2_176, %c0_177, %c0_178], %268 {strides = array<i32>} : memref<1x16x16x4xf32, #tpu.memory_space<vmem>>, vector<1x1x16x4xf32>,
    %c54 = arith.constant 54 : index
    %c0_179 = arith.constant 0 : index
    %269 = vector.load %arg6[%c54, %c0_179] : memref<288x4xf32, #tpu.memory_space<vmem>>, vector<16x4xf32>
    %c0_180 = arith.constant 0 : index
    %c73 = arith.constant 73 : index
    %c0_181 = arith.constant 0 : index
    %270 = vector.load %arg1[%c0_180, %c73, %c0_181] : memref<1x328x4xf32, #tpu.memory_space<vmem>>, vector<1x16x4xf32>
    %271 = vector.shape_cast %270 : vector<1x16x4xf32> to vector<16x4xf32>
    %272 = vector.broadcast %226 : vector<1x4xf32> to vector<16x4xf32>
    %273 = arith.subf %269, %272 : vector<16x4xf32>
    %274 = vector.broadcast %235 : vector<1x4xf32> to vector<16x4xf32>
    %275 = arith.mulf %273, %274 : vector<16x4xf32>
    %276 = arith.addf %271, %275 : vector<16x4xf32>
    %c0_182 = arith.constant 0 : index
    %c3_183 = arith.constant 3 : index
    %c0_184 = arith.constant 0 : index
    %c0_185 = arith.constant 0 : index
    %277 = vector.load %arg4[%c0_182, %c3_183, %c0_184, %c0_185] : memref<1x16x16x4xf32, #tpu.memory_space<vmem>>, vector<1x1x16x4xf32>
    %278 = vector.shape_cast %277 : vector<1x1x16x4xf32> to vector<16x4xf32>
    %279 = vector.shape_cast %276 : vector<16x4xf32> to vector<1x1x16x4xf32>
    tpu.vector_store %arg4[%c0_182, %c3_183, %c0_184, %c0_185], %279 {strides = array<i32>} : memref<1x16x16x4xf32, #tpu.memory_space<vmem>>, vector<1x1x16x4xf32>,
    %c72 = arith.constant 72 : index
    %c0_186 = arith.constant 0 : index
    %280 = vector.load %arg6[%c72, %c0_186] : memref<288x4xf32, #tpu.memory_space<vmem>>, vector<16x4xf32>
    %c0_187 = arith.constant 0 : index
    %c91 = arith.constant 91 : index
    %c0_188 = arith.constant 0 : index
    %281 = vector.load %arg1[%c0_187, %c91, %c0_188] : memref<1x328x4xf32, #tpu.memory_space<vmem>>, vector<1x16x4xf32>
    %282 = vector.shape_cast %281 : vector<1x16x4xf32> to vector<16x4xf32>
    %283 = vector.broadcast %226 : vector<1x4xf32> to vector<16x4xf32>
    %284 = arith.subf %280, %283 : vector<16x4xf32>
    %285 = vector.broadcast %235 : vector<1x4xf32> to vector<16x4xf32>
    %286 = arith.mulf %284, %285 : vector<16x4xf32>
    %287 = arith.addf %282, %286 : vector<16x4xf32>
    %c0_189 = arith.constant 0 : index
    %c4_190 = arith.constant 4 : index
    %c0_191 = arith.constant 0 : index
    %c0_192 = arith.constant 0 : index
    %288 = vector.load %arg4[%c0_189, %c4_190, %c0_191, %c0_192] : memref<1x16x16x4xf32, #tpu.memory_space<vmem>>, vector<1x1x16x4xf32>
    %289 = vector.shape_cast %288 : vector<1x1x16x4xf32> to vector<16x4xf32>
    %290 = vector.shape_cast %287 : vector<16x4xf32> to vector<1x1x16x4xf32>
    tpu.vector_store %arg4[%c0_189, %c4_190, %c0_191, %c0_192], %290 {strides = array<i32>} : memref<1x16x16x4xf32, #tpu.memory_space<vmem>>, vector<1x1x16x4xf32>,
    %c90 = arith.constant 90 : index
    %c0_193 = arith.constant 0 : index
    %291 = vector.load %arg6[%c90, %c0_193] : memref<288x4xf32, #tpu.memory_space<vmem>>, vector<16x4xf32>
    %c0_194 = arith.constant 0 : index
    %c109 = arith.constant 109 : index
    %c0_195 = arith.constant 0 : index
    %292 = vector.load %arg1[%c0_194, %c109, %c0_195] : memref<1x328x4xf32, #tpu.memory_space<vmem>>, vector<1x16x4xf32>
    %293 = vector.shape_cast %292 : vector<1x16x4xf32> to vector<16x4xf32>
    %294 = vector.broadcast %226 : vector<1x4xf32> to vector<16x4xf32>
    %295 = arith.subf %291, %294 : vector<16x4xf32>
    %296 = vector.broadcast %235 : vector<1x4xf32> to vector<16x4xf32>
    %297 = arith.mulf %295, %296 : vector<16x4xf32>
    %298 = arith.addf %293, %297 : vector<16x4xf32>
    %c0_196 = arith.constant 0 : index
    %c5_197 = arith.constant 5 : index
    %c0_198 = arith.constant 0 : index
    %c0_199 = arith.constant 0 : index
    %299 = vector.load %arg4[%c0_196, %c5_197, %c0_198, %c0_199] : memref<1x16x16x4xf32, #tpu.memory_space<vmem>>, vector<1x1x16x4xf32>
    %300 = vector.shape_cast %299 : vector<1x1x16x4xf32> to vector<16x4xf32>
    %301 = vector.shape_cast %298 : vector<16x4xf32> to vector<1x1x16x4xf32>
    tpu.vector_store %arg4[%c0_196, %c5_197, %c0_198, %c0_199], %301 {strides = array<i32>} : memref<1x16x16x4xf32, #tpu.memory_space<vmem>>, vector<1x1x16x4xf32>,
    %c108 = arith.constant 108 : index
    %c0_200 = arith.constant 0 : index
    %302 = vector.load %arg6[%c108, %c0_200] : memref<288x4xf32, #tpu.memory_space<vmem>>, vector<16x4xf32>
    %c0_201 = arith.constant 0 : index
    %c127 = arith.constant 127 : index
    %c0_202 = arith.constant 0 : index
    %303 = vector.load %arg1[%c0_201, %c127, %c0_202] : memref<1x328x4xf32, #tpu.memory_space<vmem>>, vector<1x16x4xf32>
    %304 = vector.shape_cast %303 : vector<1x16x4xf32> to vector<16x4xf32>
    %305 = vector.broadcast %226 : vector<1x4xf32> to vector<16x4xf32>
    %306 = arith.subf %302, %305 : vector<16x4xf32>
    %307 = vector.broadcast %235 : vector<1x4xf32> to vector<16x4xf32>
    %308 = arith.mulf %306, %307 : vector<16x4xf32>
    %309 = arith.addf %304, %308 : vector<16x4xf32>
    %c0_203 = arith.constant 0 : index
    %c6_204 = arith.constant 6 : index
    %c0_205 = arith.constant 0 : index
    %c0_206 = arith.constant 0 : index
    %310 = vector.load %arg4[%c0_203, %c6_204, %c0_205, %c0_206] : memref<1x16x16x4xf32, #tpu.memory_space<vmem>>, vector<1x1x16x4xf32>
    %311 = vector.shape_cast %310 : vector<1x1x16x4xf32> to vector<16x4xf32>
    %312 = vector.shape_cast %309 : vector<16x4xf32> to vector<1x1x16x4xf32>
    tpu.vector_store %arg4[%c0_203, %c6_204, %c0_205, %c0_206], %312 {strides = array<i32>} : memref<1x16x16x4xf32, #tpu.memory_space<vmem>>, vector<1x1x16x4xf32>,
    %c126 = arith.constant 126 : index
    %c0_207 = arith.constant 0 : index
    %313 = vector.load %arg6[%c126, %c0_207] : memref<288x4xf32, #tpu.memory_space<vmem>>, vector<16x4xf32>
    %c0_208 = arith.constant 0 : index
    %c145 = arith.constant 145 : index
    %c0_209 = arith.constant 0 : index
    %314 = vector.load %arg1[%c0_208, %c145, %c0_209] : memref<1x328x4xf32, #tpu.memory_space<vmem>>, vector<1x16x4xf32>
    %315 = vector.shape_cast %314 : vector<1x16x4xf32> to vector<16x4xf32>
    %316 = vector.broadcast %226 : vector<1x4xf32> to vector<16x4xf32>
    %317 = arith.subf %313, %316 : vector<16x4xf32>
    %318 = vector.broadcast %235 : vector<1x4xf32> to vector<16x4xf32>
    %319 = arith.mulf %317, %318 : vector<16x4xf32>
    %320 = arith.addf %315, %319 : vector<16x4xf32>
    %c0_210 = arith.constant 0 : index
    %c7_211 = arith.constant 7 : index
    %c0_212 = arith.constant 0 : index
    %c0_213 = arith.constant 0 : index
    %321 = vector.load %arg4[%c0_210, %c7_211, %c0_212, %c0_213] : memref<1x16x16x4xf32, #tpu.memory_space<vmem>>, vector<1x1x16x4xf32>
    %322 = vector.shape_cast %321 : vector<1x1x16x4xf32> to vector<16x4xf32>
    %323 = vector.shape_cast %320 : vector<16x4xf32> to vector<1x1x16x4xf32>
    tpu.vector_store %arg4[%c0_210, %c7_211, %c0_212, %c0_213], %323 {strides = array<i32>} : memref<1x16x16x4xf32, #tpu.memory_space<vmem>>, vector<1x1x16x4xf32>,
    %c144 = arith.constant 144 : index
    %c0_214 = arith.constant 0 : index
    %324 = vector.load %arg6[%c144, %c0_214] : memref<288x4xf32, #tpu.memory_space<vmem>>, vector<16x4xf32>
    %c0_215 = arith.constant 0 : index
    %c163 = arith.constant 163 : index
    %c0_216 = arith.constant 0 : index
    %325 = vector.load %arg1[%c0_215, %c163, %c0_216] : memref<1x328x4xf32, #tpu.memory_space<vmem>>, vector<1x16x4xf32>
    %326 = vector.shape_cast %325 : vector<1x16x4xf32> to vector<16x4xf32>
    %327 = vector.broadcast %226 : vector<1x4xf32> to vector<16x4xf32>
    %328 = arith.subf %324, %327 : vector<16x4xf32>
    %329 = vector.broadcast %235 : vector<1x4xf32> to vector<16x4xf32>
    %330 = arith.mulf %328, %329 : vector<16x4xf32>
    %331 = arith.addf %326, %330 : vector<16x4xf32>
    %c0_217 = arith.constant 0 : index
    %c8_218 = arith.constant 8 : index
    %c0_219 = arith.constant 0 : index
    %c0_220 = arith.constant 0 : index
    %332 = vector.load %arg4[%c0_217, %c8_218, %c0_219, %c0_220] : memref<1x16x16x4xf32, #tpu.memory_space<vmem>>, vector<1x1x16x4xf32>
    %333 = vector.shape_cast %332 : vector<1x1x16x4xf32> to vector<16x4xf32>
    %334 = vector.shape_cast %331 : vector<16x4xf32> to vector<1x1x16x4xf32>
    tpu.vector_store %arg4[%c0_217, %c8_218, %c0_219, %c0_220], %334 {strides = array<i32>} : memref<1x16x16x4xf32, #tpu.memory_space<vmem>>, vector<1x1x16x4xf32>,
    %c162 = arith.constant 162 : index
    %c0_221 = arith.constant 0 : index
    %335 = vector.load %arg6[%c162, %c0_221] : memref<288x4xf32, #tpu.memory_space<vmem>>, vector<16x4xf32>
    %c0_222 = arith.constant 0 : index
    %c181 = arith.constant 181 : index
    %c0_223 = arith.constant 0 : index
    %336 = vector.load %arg1[%c0_222, %c181, %c0_223] : memref<1x328x4xf32, #tpu.memory_space<vmem>>, vector<1x16x4xf32>
    %337 = vector.shape_cast %336 : vector<1x16x4xf32> to vector<16x4xf32>
    %338 = vector.broadcast %226 : vector<1x4xf32> to vector<16x4xf32>
    %339 = arith.subf %335, %338 : vector<16x4xf32>
    %340 = vector.broadcast %235 : vector<1x4xf32> to vector<16x4xf32>
    %341 = arith.mulf %339, %340 : vector<16x4xf32>
    %342 = arith.addf %337, %341 : vector<16x4xf32>
    %c0_224 = arith.constant 0 : index
    %c9 = arith.constant 9 : index
    %c0_225 = arith.constant 0 : index
    %c0_226 = arith.constant 0 : index
    %343 = vector.load %arg4[%c0_224, %c9, %c0_225, %c0_226] : memref<1x16x16x4xf32, #tpu.memory_space<vmem>>, vector<1x1x16x4xf32>
    %344 = vector.shape_cast %343 : vector<1x1x16x4xf32> to vector<16x4xf32>
    %345 = vector.shape_cast %342 : vector<16x4xf32> to vector<1x1x16x4xf32>
    tpu.vector_store %arg4[%c0_224, %c9, %c0_225, %c0_226], %345 {strides = array<i32>} : memref<1x16x16x4xf32, #tpu.memory_space<vmem>>, vector<1x1x16x4xf32>,
    %c180 = arith.constant 180 : index
    %c0_227 = arith.constant 0 : index
    %346 = vector.load %arg6[%c180, %c0_227] : memref<288x4xf32, #tpu.memory_space<vmem>>, vector<16x4xf32>
    %c0_228 = arith.constant 0 : index
    %c199 = arith.constant 199 : index
    %c0_229 = arith.constant 0 : index
    %347 = vector.load %arg1[%c0_228, %c199, %c0_229] : memref<1x328x4xf32, #tpu.memory_space<vmem>>, vector<1x16x4xf32>
    %348 = vector.shape_cast %347 : vector<1x16x4xf32> to vector<16x4xf32>
    %349 = vector.broadcast %226 : vector<1x4xf32> to vector<16x4xf32>
    %350 = arith.subf %346, %349 : vector<16x4xf32>
    %351 = vector.broadcast %235 : vector<1x4xf32> to vector<16x4xf32>
    %352 = arith.mulf %350, %351 : vector<16x4xf32>
    %353 = arith.addf %348, %352 : vector<16x4xf32>
    %c0_230 = arith.constant 0 : index
    %c10 = arith.constant 10 : index
    %c0_231 = arith.constant 0 : index
    %c0_232 = arith.constant 0 : index
    %354 = vector.load %arg4[%c0_230, %c10, %c0_231, %c0_232] : memref<1x16x16x4xf32, #tpu.memory_space<vmem>>, vector<1x1x16x4xf32>
    %355 = vector.shape_cast %354 : vector<1x1x16x4xf32> to vector<16x4xf32>
    %356 = vector.shape_cast %353 : vector<16x4xf32> to vector<1x1x16x4xf32>
    tpu.vector_store %arg4[%c0_230, %c10, %c0_231, %c0_232], %356 {strides = array<i32>} : memref<1x16x16x4xf32, #tpu.memory_space<vmem>>, vector<1x1x16x4xf32>,
    %c198 = arith.constant 198 : index
    %c0_233 = arith.constant 0 : index
    %357 = vector.load %arg6[%c198, %c0_233] : memref<288x4xf32, #tpu.memory_space<vmem>>, vector<16x4xf32>
    %c0_234 = arith.constant 0 : index
    %c217 = arith.constant 217 : index
    %c0_235 = arith.constant 0 : index
    %358 = vector.load %arg1[%c0_234, %c217, %c0_235] : memref<1x328x4xf32, #tpu.memory_space<vmem>>, vector<1x16x4xf32>
    %359 = vector.shape_cast %358 : vector<1x16x4xf32> to vector<16x4xf32>
    %360 = vector.broadcast %226 : vector<1x4xf32> to vector<16x4xf32>
    %361 = arith.subf %357, %360 : vector<16x4xf32>
    %362 = vector.broadcast %235 : vector<1x4xf32> to vector<16x4xf32>
    %363 = arith.mulf %361, %362 : vector<16x4xf32>
    %364 = arith.addf %359, %363 : vector<16x4xf32>
    %c0_236 = arith.constant 0 : index
    %c11 = arith.constant 11 : index
    %c0_237 = arith.constant 0 : index
    %c0_238 = arith.constant 0 : index
    %365 = vector.load %arg4[%c0_236, %c11, %c0_237, %c0_238] : memref<1x16x16x4xf32, #tpu.memory_space<vmem>>, vector<1x1x16x4xf32>
    %366 = vector.shape_cast %365 : vector<1x1x16x4xf32> to vector<16x4xf32>
    %367 = vector.shape_cast %364 : vector<16x4xf32> to vector<1x1x16x4xf32>
    tpu.vector_store %arg4[%c0_236, %c11, %c0_237, %c0_238], %367 {strides = array<i32>} : memref<1x16x16x4xf32, #tpu.memory_space<vmem>>, vector<1x1x16x4xf32>,
    %c216 = arith.constant 216 : index
    %c0_239 = arith.constant 0 : index
    %368 = vector.load %arg6[%c216, %c0_239] : memref<288x4xf32, #tpu.memory_space<vmem>>, vector<16x4xf32>
    %c0_240 = arith.constant 0 : index
    %c235 = arith.constant 235 : index
    %c0_241 = arith.constant 0 : index
    %369 = vector.load %arg1[%c0_240, %c235, %c0_241] : memref<1x328x4xf32, #tpu.memory_space<vmem>>, vector<1x16x4xf32>
    %370 = vector.shape_cast %369 : vector<1x16x4xf32> to vector<16x4xf32>
    %371 = vector.broadcast %226 : vector<1x4xf32> to vector<16x4xf32>
    %372 = arith.subf %368, %371 : vector<16x4xf32>
    %373 = vector.broadcast %235 : vector<1x4xf32> to vector<16x4xf32>
    %374 = arith.mulf %372, %373 : vector<16x4xf32>
    %375 = arith.addf %370, %374 : vector<16x4xf32>
    %c0_242 = arith.constant 0 : index
    %c12 = arith.constant 12 : index
    %c0_243 = arith.constant 0 : index
    %c0_244 = arith.constant 0 : index
    %376 = vector.load %arg4[%c0_242, %c12, %c0_243, %c0_244] : memref<1x16x16x4xf32, #tpu.memory_space<vmem>>, vector<1x1x16x4xf32>
    %377 = vector.shape_cast %376 : vector<1x1x16x4xf32> to vector<16x4xf32>
    %378 = vector.shape_cast %375 : vector<16x4xf32> to vector<1x1x16x4xf32>
    tpu.vector_store %arg4[%c0_242, %c12, %c0_243, %c0_244], %378 {strides = array<i32>} : memref<1x16x16x4xf32, #tpu.memory_space<vmem>>, vector<1x1x16x4xf32>,
    %c234 = arith.constant 234 : index
    %c0_245 = arith.constant 0 : index
    %379 = vector.load %arg6[%c234, %c0_245] : memref<288x4xf32, #tpu.memory_space<vmem>>, vector<16x4xf32>
    %c0_246 = arith.constant 0 : index
    %c253 = arith.constant 253 : index
    %c0_247 = arith.constant 0 : index
    %380 = vector.load %arg1[%c0_246, %c253, %c0_247] : memref<1x328x4xf32, #tpu.memory_space<vmem>>, vector<1x16x4xf32>
    %381 = vector.shape_cast %380 : vector<1x16x4xf32> to vector<16x4xf32>
    %382 = vector.broadcast %226 : vector<1x4xf32> to vector<16x4xf32>
    %383 = arith.subf %379, %382 : vector<16x4xf32>
    %384 = vector.broadcast %235 : vector<1x4xf32> to vector<16x4xf32>
    %385 = arith.mulf %383, %384 : vector<16x4xf32>
    %386 = arith.addf %381, %385 : vector<16x4xf32>
    %c0_248 = arith.constant 0 : index
    %c13 = arith.constant 13 : index
    %c0_249 = arith.constant 0 : index
    %c0_250 = arith.constant 0 : index
    %387 = vector.load %arg4[%c0_248, %c13, %c0_249, %c0_250] : memref<1x16x16x4xf32, #tpu.memory_space<vmem>>, vector<1x1x16x4xf32>
    %388 = vector.shape_cast %387 : vector<1x1x16x4xf32> to vector<16x4xf32>
    %389 = vector.shape_cast %386 : vector<16x4xf32> to vector<1x1x16x4xf32>
    tpu.vector_store %arg4[%c0_248, %c13, %c0_249, %c0_250], %389 {strides = array<i32>} : memref<1x16x16x4xf32, #tpu.memory_space<vmem>>, vector<1x1x16x4xf32>,
    %c252 = arith.constant 252 : index
    %c0_251 = arith.constant 0 : index
    %390 = vector.load %arg6[%c252, %c0_251] : memref<288x4xf32, #tpu.memory_space<vmem>>, vector<16x4xf32>
    %c0_252 = arith.constant 0 : index
    %c271 = arith.constant 271 : index
    %c0_253 = arith.constant 0 : index
    %391 = vector.load %arg1[%c0_252, %c271, %c0_253] : memref<1x328x4xf32, #tpu.memory_space<vmem>>, vector<1x16x4xf32>
    %392 = vector.shape_cast %391 : vector<1x16x4xf32> to vector<16x4xf32>
    %393 = vector.broadcast %226 : vector<1x4xf32> to vector<16x4xf32>
    %394 = arith.subf %390, %393 : vector<16x4xf32>
    %395 = vector.broadcast %235 : vector<1x4xf32> to vector<16x4xf32>
    %396 = arith.mulf %394, %395 : vector<16x4xf32>
    %397 = arith.addf %392, %396 : vector<16x4xf32>
    %c0_254 = arith.constant 0 : index
    %c14 = arith.constant 14 : index
    %c0_255 = arith.constant 0 : index
    %c0_256 = arith.constant 0 : index
    %398 = vector.load %arg4[%c0_254, %c14, %c0_255, %c0_256] : memref<1x16x16x4xf32, #tpu.memory_space<vmem>>, vector<1x1x16x4xf32>
    %399 = vector.shape_cast %398 : vector<1x1x16x4xf32> to vector<16x4xf32>
    %400 = vector.shape_cast %397 : vector<16x4xf32> to vector<1x1x16x4xf32>
    tpu.vector_store %arg4[%c0_254, %c14, %c0_255, %c0_256], %400 {strides = array<i32>} : memref<1x16x16x4xf32, #tpu.memory_space<vmem>>, vector<1x1x16x4xf32>,
    %c270_257 = arith.constant 270 : index
    %c0_258 = arith.constant 0 : index
    %401 = vector.load %arg6[%c270_257, %c0_258] : memref<288x4xf32, #tpu.memory_space<vmem>>, vector<16x4xf32>
    %c0_259 = arith.constant 0 : index
    %c289 = arith.constant 289 : index
    %c0_260 = arith.constant 0 : index
    %402 = vector.load %arg1[%c0_259, %c289, %c0_260] : memref<1x328x4xf32, #tpu.memory_space<vmem>>, vector<1x16x4xf32>
    %403 = vector.shape_cast %402 : vector<1x16x4xf32> to vector<16x4xf32>
    %404 = vector.broadcast %226 : vector<1x4xf32> to vector<16x4xf32>
    %405 = arith.subf %401, %404 : vector<16x4xf32>
    %406 = vector.broadcast %235 : vector<1x4xf32> to vector<16x4xf32>
    %407 = arith.mulf %405, %406 : vector<16x4xf32>
    %408 = arith.addf %403, %407 : vector<16x4xf32>
    %c0_261 = arith.constant 0 : index
    %c15 = arith.constant 15 : index
    %c0_262 = arith.constant 0 : index
    %c0_263 = arith.constant 0 : index
    %409 = vector.load %arg4[%c0_261, %c15, %c0_262, %c0_263] : memref<1x16x16x4xf32, #tpu.memory_space<vmem>>, vector<1x1x16x4xf32>
    %410 = vector.shape_cast %409 : vector<1x1x16x4xf32> to vector<16x4xf32>
    %411 = vector.shape_cast %408 : vector<16x4xf32> to vector<1x1x16x4xf32>
    tpu.vector_store %arg4[%c0_261, %c15, %c0_262, %c0_263], %411 {strides = array<i32>} : memref<1x16x16x4xf32, #tpu.memory_space<vmem>>, vector<1x1x16x4xf32>,
    return
  }
  func.func @transform_0(%arg0: i32) -> (i32, i32, i32) {
    %c0_i32 = arith.constant 0 : i32
    %c0_i32_0 = arith.constant 0 : i32
    %c0_i32_1 = arith.constant 0 : i32
    return %arg0, %c0_i32, %c0_i32_0 : i32, i32, i32
  }
  func.func @transform_1(%arg0: i32) -> (i32, i32, i32) {
    %c0_i32 = arith.constant 0 : i32
    %c0_i32_0 = arith.constant 0 : i32
    %c0_i32_1 = arith.constant 0 : i32
    %c0_i32_2 = arith.constant 0 : i32
    return %c0_i32, %c0_i32_0, %c0_i32_1 : i32, i32, i32
  }
  func.func @transform_2(%arg0: i32) -> (i32, i32, i32) {
    %c0_i32 = arith.constant 0 : i32
    %c0_i32_0 = arith.constant 0 : i32
    %c0_i32_1 = arith.constant 0 : i32
    %c0_i32_2 = arith.constant 0 : i32
    return %c0_i32, %c0_i32_0, %c0_i32_1 : i32, i32, i32
  }
  func.func @transform_3(%arg0: i32) -> (i32, i32, i32, i32) {
    %c0_i32 = arith.constant 0 : i32
    %c0_i32_0 = arith.constant 0 : i32
    %c0_i32_1 = arith.constant 0 : i32
    %c0_i32_2 = arith.constant 0 : i32
    return %arg0, %c0_i32, %c0_i32_0, %c0_i32_1 : i32, i32, i32, i32
  }
}

</mosaic_0001>

<bundles_post_ra>
// kernel: residual_block_forward.1
= control target key start
LH: loop header
LB: loop body
LE: loop exit
PB: predicated region body
PF: predicated region fallthrough
CT: control target
= control target key end

     0   :  { %s10156_s12 = smov 0   ;;  %s15494_s0 = inlined_call_operand.vmem [shape: f32[2,328,4], index: 0, kind: input, shape index: {}]   ;;  %s15495_s1 = inlined_call_operand.vmem [shape: bf16[9,4,4], index: 1, kind: input, shape index: {}]   ;;  %s15496_s2 = inlined_call_operand.vmem [shape: bf16[9,4,4], index: 2, kind: input, shape index: {}]   ;;  %s15497_s3 = inlined_call_operand.vmem [shape: f32[2,16,16,4], index: 3, kind: output, shape index: {}]  }
   0x1 LB: > { %s8242_s13 = sadd.s32 4294967295, %s10132_s12   ;;  %p8246_p0 = scmp.ge.s32.totalorder %s10132_s12, 1  ;;  %s10132_s12 = sphi %s10156_s12, %s13_s12  }
   0x2   : > { %p137_p1 = scmp.lt.s32.totalorder %s10132_s12, 3 }
   0x4   : > { %p138_p2 = pnand %p8246_p0, %p137_p1 }
   0x6   : > { %141 = sbr.rel (%p138_p2) target bundleno = 1847 (0x737), region = 32 }
   0xb   : > { %v8250_v0 = vld [vmem:[%s15495_s1 + $0x2] sm:$0x3]  ;;  %vm15514_vm0 = vcmask 1041408   ;;  %p161_p3 = scmp.lt.s32.totalorder %s8242_s13, 1  ;;  %v15511_v1 = vmov 0.0   ;;  %vm10135_vm1 = vmmov 0  }
   0xc   : > { %8983 = vmatprep.subr.bf16.mxu0 %v15511_v1  ;;  %v349_v2 = vsel %vm15514_vm0, %v8250_v0, 0  ;;  %8985 = vmatprep.mubr.msk.bf16.mxu0 %vm10135_vm1, %v15511_v1  ;;  %v230_v3 = vld [vmem:[%s15495_s1] sm:$0x3]  ;;  %vm15516_vm2 = vcmask 31744   ;;  %v8309_v49 = vld [vmem:[%s15495_s1 + $0x6] sm:$0x3] }
   0xd   : > { %8984 = vmatpush3.bf16.msra.mxu0 %v349_v2  ;;  %s16506_s13 = smov (!%p161_p3, %s8242_s13), 1  ;;  %v593_v4 = vsel %vm15514_vm0, %v230_v3, 0  ;;  %10027 = vmatprep.subr.bf16.mxu1 %v15511_v1  ;;  %v1234_v50 = vsel %vm15514_vm0, %v8309_v49, 0 }
   0xe   : > { %9061 = vmatprep.subr.bf16.mxu0 %v15511_v1  ;;  %10028 = vmatpush3.bf16.msra.mxu1 %v593_v4  ;;  %s10038_s18 = smul.u32 328, %s16506_s13  ;;  %s8631_s5 = sshll.u32 %s16506_s13, 8 }
   0xf   : > { %9079 = vmatprep.mubr.msk.bf16.mxu1 %vm10135_vm1, %v15511_v1  ;;  %9217 = vmatprep.subr.bf16.mxu1 %v15511_v1  ;;  %s15301_s7 = scalar_lea.vmem %s15497_s3, %s8631_s5 }
  0x10   : > { %s10186_s21 = scalar_lea.vmem %s15494_s0, %s10038_s18 }
  0x11   : > { %v231_v5 = vld [vmem:[%s10186_s21 + $0x1] sm:$0xff]  ;;  %v232_v6 = vld [vmem:[%s10186_s21 + $0x9] sm:$0xff]  ;;  %v233_v10 = vld [vmem:[%s10186_s21 + $0x11] sm:$0xff] }
  0x12   : > { %v268_v7 = vpack.c.bf16 %v232_v6, %v231_v5  ;;  %v182_v8 = vld [vmem:[%s10186_s21 + $0x40] sm:$0xff]  ;;  %v183_v9 = vld [vmem:[%s10186_s21 + $0x48] sm:$0xff]  ;;  %v184_v14 = vld [vmem:[%s10186_s21 + $0x50] sm:$0xff] }
  0x13   : > { %v234_v11 = vld [vmem:[%s10186_s21 + $0x19] sm:$0xff]  ;;  %v215_v12 = vpack.c.bf16 %v183_v9, %v182_v8  ;;  %v235_v17 = vld [vmem:[%s10186_s21 + $0x21] sm:$0xff]  ;;  %v236_v18 = vld [vmem:[%s10186_s21 + $0x29] sm:$0xff] }
  0x14   : > { %8986 = vmatmul.mubr.msk.bf16.vlgmr.msra.gmra.mxu0 %vm15516_vm2, %v268_v7  ;;  %v269_v13 = vpack.c.bf16 %v234_v11, %v233_v10  ;;  %v185_v15 = vld [vmem:[%s10186_s21 + $0x58] sm:$0xff]  ;;  %v270_v19 = vpack.c.bf16 %v236_v18, %v235_v17  ;;  %v186_v20 = vld [vmem:[%s10186_s21 + $0x60] sm:$0xff]  ;;  %v187_v21 = vld [vmem:[%s10186_s21 + $0x68] sm:$0xff] }
  0x15   : > { %9062 = vmatpush3.bf16.msra.mxu0 %v593_v4  ;;  %8989 = vmatprep.mubr.msk.bf16.mxu0 %vm10135_vm1, %v15511_v1  ;;  %v216_v16 = vpack.c.bf16 %v185_v15, %v184_v14  ;;  %v217_v22 = vpack.c.bf16 %v187_v21, %v186_v20  ;;  %v237_v23 = vld [vmem:[%s10186_s21 + $0x31] sm:$0xff]  ;;  %v238_v24 = vld [vmem:[%s10186_s21 + $0x39] sm:$0xff]  ;;  %v239_v29 = vld [vmem:[%s10186_s21 + $0x41] sm:$0xff] }
  0x16   : > { %9139 = vmatprep.subr.bf16.mxu0 %v15511_v1  ;;  %9080 = vmatmul.mubr.msk.bf16.vlgmr.msra.gmra.mxu1 %vm15516_vm2, %v215_v12  ;;  %v271_v25 = vpack.c.bf16 %v238_v24, %v237_v23  ;;  %v188_v26 = vld [vmem:[%s10186_s21 + $0x70] sm:$0xff]  ;;  %v189_v27 = vld [vmem:[%s10186_s21 + $0x78] sm:$0xff]  ;;  %v190_v32 = vld [vmem:[%s10186_s21 + $0x80] sm:$0xff] }
  0x17   : > { %9083 = vmatprep.mubr.msk.bf16.mxu1 %vm10135_vm1, %v15511_v1  ;;  %v218_v28 = vpack.c.bf16 %v189_v27, %v188_v26  ;;  %v240_v30 = vld [vmem:[%s10186_s21 + $0x49] sm:$0xff]  ;;  %v241_v35 = vld [vmem:[%s10186_s21 + $0x51] sm:$0xff]  ;;  %v242_v36 = vld [vmem:[%s10186_s21 + $0x59] sm:$0xff]  ;;  %9218 = vmatpush3.bf16.msra.mxu1 %v1234_v50 }
  0x18   : > { %v272_v31 = vpack.c.bf16 %v240_v30, %v239_v29  ;;  %v191_v33 = vld [vmem:[%s10186_s21 + $0x88] sm:$0xff]  ;;  %v273_v37 = vpack.c.bf16 %v242_v36, %v241_v35  ;;  %v192_v38 = vld [vmem:[%s10186_s21 + $0x90] sm:$0xff]  ;;  %v193_v39 = vld [vmem:[%s10186_s21 + $0x98] sm:$0xff]  ;;  %9373 = vmatprep.subr.bf16.mxu1 %v15511_v1 }
  0x19   : > { %v219_v34 = vpack.c.bf16 %v191_v33, %v190_v32  ;;  %v220_v40 = vpack.c.bf16 %v193_v39, %v192_v38  ;;  %v243_v41 = vld [vmem:[%s10186_s21 + $0x61] sm:$0xff]  ;;  %v244_v42 = vld [vmem:[%s10186_s21 + $0x69] sm:$0xff]  ;;  %v245_v47 = vld [vmem:[%s10186_s21 + $0x71] sm:$0xff] }
  0x1a   : > { %v274_v43 = vpack.c.bf16 %v244_v42, %v243_v41  ;;  %v194_v44 = vld [vmem:[%s10186_s21 + $0xa0] sm:$0xff]  ;;  %v195_v45 = vld [vmem:[%s10186_s21 + $0xa8] sm:$0xff]  ;;  %v196_v52 = vld [vmem:[%s10186_s21 + $0xb0] sm:$0xff] }
  0x1b   : > { %v221_v46 = vpack.c.bf16 %v195_v45, %v194_v44  ;;  %v246_v48 = vld [vmem:[%s10186_s21 + $0x79] sm:$0xff]  ;;  %v247_v55 = vld [vmem:[%s10186_s21 + $0x81] sm:$0xff]  ;;  %v248_v56 = vld [vmem:[%s10186_s21 + $0x89] sm:$0xff] }
  0x1c   : > { %8990 = vmatmul.mubr.msk.bf16.gmra.mxu0 %vm15516_vm2, %v269_v13  ;;  %v275_v51 = vpack.c.bf16 %v246_v48, %v245_v47  ;;  %v197_v53 = vld [vmem:[%s10186_s21 + $0xb8] sm:$0xff]  ;;  %v276_v57 = vpack.c.bf16 %v248_v56, %v247_v55  ;;  %v198_v58 = vld [vmem:[%s10186_s21 + $0xc0] sm:$0xff]  ;;  %v199_v59 = vld [vmem:[%s10186_s21 + $0xc8] sm:$0xff] }
  0x1d   : > { %8993 = vmatprep.mubr.msk.bf16.mxu0 %vm10135_vm1, %v15511_v1  ;;  %v222_v54 = vpack.c.bf16 %v197_v53, %v196_v52  ;;  %v223_v60 = vpack.c.bf16 %v199_v59, %v198_v58  ;;  %v249_v61 = vld [vmem:[%s10186_s21 + $0x91] sm:$0xff]  ;;  %v250_v62 = vld [vmem:[%s10186_s21 + $0x99] sm:$0xff]  ;;  %v251_v4 = vld [vmem:[%s10186_s21 + $0xa1] sm:$0xff] }
  0x1e   : > { %9084 = vmatmul.mubr.msk.bf16.gmra.mxu1 %vm15516_vm2, %v216_v16  ;;  %v277_v63 = vpack.c.bf16 %v250_v62, %v249_v61  ;;  %v200_v0 = vld [vmem:[%s10186_s21 + $0xd0] sm:$0xff]  ;;  %v201_v2 = vld [vmem:[%s10186_s21 + $0xd8] sm:$0xff]  ;;  %v202_v7 = vld [vmem:[%s10186_s21 + $0xe0] sm:$0xff] }
  0x1f   : > { %9087 = vmatprep.mubr.msk.bf16.mxu1 %vm10135_vm1, %v15511_v1  ;;  %v224_v3 = vpack.c.bf16 %v201_v2, %v200_v0  ;;  %v252_v5 = vld [vmem:[%s10186_s21 + $0xa9] sm:$0xff]  ;;  %v253_v10 = vld [vmem:[%s10186_s21 + $0xb1] sm:$0xff]  ;;  %v254_v11 = vld [vmem:[%s10186_s21 + $0xb9] sm:$0xff] }
  0x20   : > { %v278_v6 = vpack.c.bf16 %v252_v5, %v251_v4  ;;  %v203_v8 = vld [vmem:[%s10186_s21 + $0xe8] sm:$0xff]  ;;  %v279_v12 = vpack.c.bf16 %v254_v11, %v253_v10  ;;  %v204_v13 = vld [vmem:[%s10186_s21 + $0xf0] sm:$0xff]  ;;  %v205_v14 = vld [vmem:[%s10186_s21 + $0xf8] sm:$0xff] }
  0x21   : > { %v225_v9 = vpack.c.bf16 %v203_v8, %v202_v7  ;;  %v226_v15 = vpack.c.bf16 %v205_v14, %v204_v13  ;;  %v255_v16 = vld [vmem:[%s10186_s21 + $0xc1] sm:$0xff]  ;;  %v256_v17 = vld [vmem:[%s10186_s21 + $0xc9] sm:$0xff]  ;;  %v258_v23 = vld [vmem:[%s10186_s21 + $0xd9] sm:$0xff] }
  0x22   : > { %v280_v18 = vpack.c.bf16 %v256_v17, %v255_v16  ;;  %v207_v20 = vld [vmem:[%s10186_s21 + $0x108] sm:$0xff]  ;;  %v209_v26 = vld [vmem:[%s10186_s21 + $0x118] sm:$0xff]  ;;  %v174_v56 = vld [vmem:[%s10186_s21] sm:$0xff] }
  0x23   : > { %v260_v29 = vld [vmem:[%s10186_s21 + $0xe9] sm:$0xff]  ;;  %v261_v33 = vld [vmem:[%s10186_s21 + $0xf1] sm:$0xff]  ;;  %v263_v39 = vld [vmem:[%s10186_s21 + $0x101] sm:$0xff] }
  0x24   : > { %8994 = vmatmul.mubr.msk.bf16.gmra.mxu0 %vm15516_vm2, %v270_v19  ;;  %v206_v19 = vld [vmem:[%s10186_s21 + $0x100] sm:$0xff]  ;;  %v1118_v36 = vld [vmem:[%s10186_s21 + $0x12] sm:$0xff]  ;;  %v1129_v5 = vld [vmem:[%s10186_s21 + $0x6a] sm:$0xff] }
  0x25   : > { %8997 = vmatprep.mubr.msk.bf16.mxu0 %vm10135_vm1, %v15511_v1  ;;  %v227_v21 = vpack.c.bf16 %v207_v20, %v206_v19  ;;  %v1120_v42 = vld [vmem:[%s10186_s21 + $0x22] sm:$0xff]  ;;  %v265_v45 = vld [vmem:[%s10186_s21 + $0x111] sm:$0xff]  ;;  %v1123_v49 = vld [vmem:[%s10186_s21 + $0x3a] sm:$0xff] }
  0x26   : > { %9088 = vmatmul.mubr.msk.bf16.gmra.mxu1 %vm15516_vm2, %v217_v22  ;;  %v257_v22 = vld [vmem:[%s10186_s21 + $0xd1] sm:$0xff]  ;;  %v1124_v53 = vld [vmem:[%s10186_s21 + $0x42] sm:$0xff]  ;;  %v1127_v61 = vld [vmem:[%s10186_s21 + $0x5a] sm:$0xff] }
  0x27   : > { %9091 = vmatprep.mubr.msk.bf16.mxu1 %vm10135_vm1, %v15511_v1  ;;  %v281_v24 = vpack.c.bf16 %v258_v23, %v257_v22  ;;  %v1122_v48 = vld [vmem:[%s10186_s21 + $0x32] sm:$0xff]  ;;  %v8289_v58 = vld [vmem:[%s15495_s1 + $0x4] sm:$0x3]  ;;  %v179_v8 = vld [vmem:[%s10186_s21 + $0x28] sm:$0xff] }
  0x28   : > { %v10373_v50 = vpack.c.bf16 %v1123_v49, %v1122_v48  ;;  %v895_v62 = vsel %vm15514_vm0, %v8289_v58, 0  ;;  %v176_v0 = vld [vmem:[%s10186_s21 + $0x10] sm:$0xff]  ;;  %v177_v2 = vld [vmem:[%s10186_s21 + $0x18] sm:$0xff]  ;;  %v1128_v4 = vld [vmem:[%s10186_s21 + $0x62] sm:$0xff] }
  0x29   : > { %v178_v7 = vld [vmem:[%s10186_s21 + $0x20] sm:$0xff]  ;;  %v1130_v10 = vld [vmem:[%s10186_s21 + $0x72] sm:$0xff]  ;;  %v1133_v17 = vld [vmem:[%s10186_s21 + $0x8a] sm:$0xff] }
  0x2a   : > { %v1131_v11 = vld [vmem:[%s10186_s21 + $0x7a] sm:$0xff]  ;;  %v180_v13 = vld [vmem:[%s10186_s21 + $0x30] sm:$0xff]  ;;  %v1132_v16 = vld [vmem:[%s10186_s21 + $0x82] sm:$0xff] }
  0x2b   : > { %v181_v14 = vld [vmem:[%s10186_s21 + $0x38] sm:$0xff]  ;;  %v779_v19 = vld [vmem:[%s10186_s21 + $0x2] sm:$0xff]  ;;  %v780_v20 = vld [vmem:[%s10186_s21 + $0xa] sm:$0xff] }
  0x2c   : > { %8998 = vmatmul.mubr.msk.bf16.gmra.mxu0 %vm15516_vm2, %v271_v25  ;;  %v208_v25 = vld [vmem:[%s10186_s21 + $0x110] sm:$0xff]  ;;  %v816_v22 = vpack.c.bf16 %v780_v20, %v779_v19 }
  0x2d   : > { %9001 = vmatprep.mubr.msk.bf16.mxu0 %vm10135_vm1, %v15511_v1  ;;  %v228_v27 = vpack.c.bf16 %v209_v26, %v208_v25  ;;  %v1134_v23 = vld [vmem:[%s10186_s21 + $0x92] sm:$0xff] }
  0x2e   : > { %9092 = vmatmul.mubr.msk.bf16.gmra.mxu1 %vm15516_vm2, %v218_v28  ;;  %v259_v28 = vld [vmem:[%s10186_s21 + $0xe1] sm:$0xff] }
  0x2f   : > { %9095 = vmatprep.mubr.msk.bf16.mxu1 %vm10135_vm1, %v15511_v1  ;;  %v282_v30 = vpack.c.bf16 %v260_v29, %v259_v28  ;;  %v1137_v28 = vld [vmem:[%s10186_s21 + $0xaa] sm:$0xff] }
  0x34   : > { %9002 = vmatmul.mubr.msk.bf16.gmra.mxu0 %vm15516_vm2, %v272_v31  ;;  %v210_v31 = vld [vmem:[%s10186_s21 + $0x120] sm:$0x3] }
  0x35   : > { %9005 = vmatprep.mubr.msk.bf16.mxu0 %vm10135_vm1, %v15511_v1  ;;  %v229_v32 = vpack.c.bf16 %v210_v31, %v210_v31 }
  0x36   : > { %9096 = vmatmul.mubr.msk.bf16.gmra.mxu1 %vm15516_vm2, %v219_v34  ;;  %v262_v34 = vld [vmem:[%s10186_s21 + $0xf9] sm:$0xff] }
  0x37   : > { %9099 = vmatprep.mubr.msk.bf16.mxu1 %vm10135_vm1, %v15511_v1  ;;  %v283_v35 = vpack.c.bf16 %v262_v34, %v261_v33  ;;  %v1138_v34 = vld [vmem:[%s10186_s21 + $0xb2] sm:$0xff] }
  0x3c   : > { %9006 = vmatmul.mubr.msk.bf16.gmra.mxu0 %vm15516_vm2, %v273_v37  ;;  %v1119_v37 = vld [vmem:[%s10186_s21 + $0x1a] sm:$0xff] }
  0x3d   : > { %9009 = vmatprep.mubr.msk.bf16.mxu0 %vm10135_vm1, %v15511_v1  ;;  %v10347_v38 = vpack.c.bf16 %v1119_v37, %v1118_v36 }
  0x3e   : > { %9100 = vmatmul.mubr.msk.bf16.gmra.mxu1 %vm15516_vm2, %v220_v40  ;;  %v264_v40 = vld [vmem:[%s10186_s21 + $0x109] sm:$0xff] }
  0x3f   : > { %9103 = vmatprep.mubr.msk.bf16.mxu1 %vm10135_vm1, %v15511_v1  ;;  %v284_v41 = vpack.c.bf16 %v264_v40, %v263_v39 }
  0x44   : > { %9010 = vmatmul.mubr.msk.bf16.gmra.mxu0 %vm15516_vm2, %v274_v43  ;;  %v1121_v43 = vld [vmem:[%s10186_s21 + $0x2a] sm:$0xff] }
  0x45   : > { %9013 = vmatprep.mubr.msk.bf16.mxu0 %vm10135_vm1, %v15511_v1  ;;  %v10360_v44 = vpack.c.bf16 %v1121_v43, %v1120_v42 }
  0x46   : > { %9104 = vmatmul.mubr.msk.bf16.gmra.mxu1 %vm15516_vm2, %v221_v46  ;;  %v266_v46 = vld [vmem:[%s10186_s21 + $0x119] sm:$0xff] }
  0x47   : > { %9107 = vmatprep.mubr.msk.bf16.mxu1 %vm10135_vm1, %v15511_v1  ;;  %v285_v47 = vpack.c.bf16 %v266_v46, %v265_v45  ;;  %v1140_v46 = vld [vmem:[%s10186_s21 + $0xc2] sm:$0xff] }
  0x4c   : > { %9014 = vmatmul.mubr.msk.bf16.gmra.mxu0 %vm15516_vm2, %v275_v51  ;;  %v267_v51 = vld [vmem:[%s10186_s21 + $0x121] sm:$0x3] }
  0x4d   : > { %9017 = vmatprep.mubr.msk.bf16.mxu0 %vm10135_vm1, %v15511_v1  ;;  %v286_v52 = vpack.c.bf16 %v267_v51, %v267_v51 }
  0x4e   : > { %9108 = vmatmul.mubr.msk.bf16.gmra.mxu1 %vm15516_vm2, %v222_v54  ;;  %v1125_v54 = vld [vmem:[%s10186_s21 + $0x4a] sm:$0xff] }
  0x4f   : > { %9111 = vmatprep.mubr.msk.bf16.mxu1 %vm10135_vm1, %v15511_v1  ;;  %v10385_v55 = vpack.c.bf16 %v1125_v54, %v1124_v53 }
  0x54   : > { %9018 = vmatmul.mubr.msk.bf16.gmra.mxu0 %vm15516_vm2, %v276_v57  ;;  %v175_v57 = vld [vmem:[%s10186_s21 + $0x8] sm:$0xff] }
  0x55   : > { %9021 = vmatprep.mubr.msk.bf16.mxu0 %vm10135_vm1, %v15511_v1  ;;  %v211_v59 = vpack.c.bf16 %v175_v57, %v174_v56 }
  0x56   : > { %9112 = vmatmul.mubr.msk.bf16.gmra.mxu1 %vm15516_vm2, %v223_v60  ;;  %v1126_v60 = vld [vmem:[%s10186_s21 + $0x52] sm:$0xff] }
  0x57   : > { %9115 = vmatprep.mubr.msk.bf16.mxu1 %vm10135_vm1, %v15511_v1 }
  0x5c   : > { %9022 = vmatmul.mubr.msk.bf16.gmra.mxu0 %vm15516_vm2, %v277_v63  ;;  %v10402_v63 = vpack.c.bf16 %v1127_v61, %v1126_v60  ;;  %v1142_v60 = vld [vmem:[%s10186_s21 + $0xd2] sm:$0xff] }
  0x5d   : > { %9025 = vmatprep.mubr.msk.bf16.mxu0 %vm10135_vm1, %v15511_v1 }
  0x5e   : > { %9116 = vmatmul.mubr.msk.bf16.gmra.mxu1 %vm15516_vm2, %v224_v3  ;;  %v212_v3 = vpack.c.bf16 %v177_v2, %v176_v0 }
  0x5f   : > { %9119 = vmatprep.mubr.msk.bf16.mxu1 %vm10135_vm1, %v15511_v1 }
  0x64   : > { %9026 = vmatmul.mubr.msk.bf16.gmra.mxu0 %vm15516_vm2, %v278_v6  ;;  %v10416_v6 = vpack.c.bf16 %v1129_v5, %v1128_v4 }
  0x65   : > { %9029 = vmatprep.mubr.msk.bf16.mxu0 %vm10135_vm1, %v15511_v1 }
  0x66   : > { %9120 = vmatmul.mubr.msk.bf16.gmra.mxu1 %vm15516_vm2, %v225_v9  ;;  %v213_v9 = vpack.c.bf16 %v179_v8, %v178_v7 }
  0x67   : > { %9123 = vmatprep.mubr.msk.bf16.mxu1 %vm10135_vm1, %v15511_v1 }
  0x6c   : > { %9030 = vmatmul.mubr.msk.bf16.gmra.mxu0 %vm15516_vm2, %v279_v12  ;;  %v10429_v12 = vpack.c.bf16 %v1131_v11, %v1130_v10  ;;  %v1145_v10 = vld [vmem:[%s10186_s21 + $0xea] sm:$0xff] }
  0x6d   : > { %9033 = vmatprep.mubr.msk.bf16.mxu0 %vm10135_vm1, %v15511_v1 }
  0x6e   : > { %9124 = vmatmul.mubr.msk.bf16.gmra.mxu1 %vm15516_vm2, %v226_v15  ;;  %v214_v15 = vpack.c.bf16 %v181_v14, %v180_v13 }
  0x6f   : > { %9127 = vmatprep.mubr.msk.bf16.mxu1 %vm10135_vm1, %v15511_v1 }
  0x74   : > { %9034 = vmatmul.mubr.msk.bf16.gmra.mxu0 %vm15516_vm2, %v280_v18  ;;  %v10442_v18 = vpack.c.bf16 %v1133_v17, %v1132_v16 }
  0x75   : > { %9037 = vmatprep.mubr.msk.bf16.mxu0 %vm10135_vm1, %v15511_v1 }
  0x76   : > { %9128 = vmatmul.mubr.msk.bf16.gmra.mxu1 %vm15516_vm2, %v227_v21  ;;  %v8329_v21 = vld [vmem:[%s15495_s1 + $0x8] sm:$0x3] }
  0x77   : > { %9131 = vmatprep.mubr.msk.bf16.mxu1 %vm10135_vm1, %v15511_v1  ;;  %v1573_v25 = vsel %vm15514_vm0, %v8329_v21, 0 }
  0x7c   : > { %9038 = vmatmul.mubr.msk.bf16.gmra.mxu0 %vm15516_vm2, %v281_v24  ;;  %v1135_v24 = vld [vmem:[%s10186_s21 + $0x9a] sm:$0xff] }
  0x7d   : > { %9041 = vmatprep.mubr.msk.bf16.mxu0 %vm10135_vm1, %v15511_v1  ;;  %v10459_v26 = vpack.c.bf16 %v1135_v24, %v1134_v23  ;;  %v1147_v23 = vld [vmem:[%s10186_s21 + $0xfa] sm:$0xff] }
  0x7e   : > { %9132 = vmatmul.mubr.msk.bf16.gmra.mxu1 %vm15516_vm2, %v228_v27  ;;  %v1136_v27 = vld [vmem:[%s10186_s21 + $0xa2] sm:$0xff] }
  0x7f   : > { %9135 = vmatprep.mubr.msk.bf16.mxu1 %vm10135_vm1, %v15511_v1  ;;  %v10471_v29 = vpack.c.bf16 %v1137_v28, %v1136_v27 }
  0x84   : > { %9042 = vmatmul.mubr.msk.bf16.gmra.mxu0 %vm15516_vm2, %v282_v30 }
  0x85   : > { %9045 = vmatprep.mubr.msk.bf16.mxu0 %vm10135_vm1, %v15511_v1 }
  0x86   : > { %9136 = vmatmul.mubr.msk.bf16.gmra.mxu1 %vm15516_vm2, %v229_v32 }
  0x87   : > { %9219 = vmatprep.mubr.msk.bf16.mxu1 %vm10135_vm1, %v15511_v1 }
  0x8c   : > { %9046 = vmatmul.mubr.msk.bf16.gmra.mxu0 %vm15516_vm2, %v283_v35  ;;  %v1139_v35 = vld [vmem:[%s10186_s21 + $0xba] sm:$0xff] }
  0x8d   : > { %9049 = vmatprep.mubr.msk.bf16.mxu0 %vm10135_vm1, %v15511_v1  ;;  %v10489_v39 = vpack.c.bf16 %v1139_v35, %v1138_v34 }
  0x8e   : > { %9220 = vmatmul.mubr.msk.bf16.vlgmr.msra.gmra.mxu1 %vm15516_vm2, %v10347_v38 }
  0x8f   : > { %9223 = vmatprep.mubr.msk.bf16.mxu1 %vm10135_vm1, %v15511_v1 }
  0x94   : > { %9050 = vmatmul.mubr.msk.bf16.gmra.mxu0 %vm15516_vm2, %v284_v41 }
  0x95   : > { %9053 = vmatprep.mubr.msk.bf16.mxu0 %vm10135_vm1, %v15511_v1 }
  0x96   : > { %9224 = vmatmul.mubr.msk.bf16.gmra.mxu1 %vm15516_vm2, %v10360_v44 }
  0x97   : > { %9227 = vmatprep.mubr.msk.bf16.mxu1 %vm10135_vm1, %v15511_v1 }
  0x9c   : > { %9054 = vmatmul.mubr.msk.bf16.gmra.mxu0 %vm15516_vm2, %v285_v47  ;;  %v1141_v47 = vld [vmem:[%s10186_s21 + $0xca] sm:$0xff] }
  0x9d   : > { %9057 = vmatprep.mubr.msk.bf16.mxu0 %vm10135_vm1, %v15511_v1  ;;  %v10513_v53 = vpack.c.bf16 %v1141_v47, %v1140_v46 }
  0x9e   : > { %9228 = vmatmul.mubr.msk.bf16.gmra.mxu1 %vm15516_vm2, %v10373_v50 }
  0x9f   : > { %9231 = vmatprep.mubr.msk.bf16.mxu1 %vm10135_vm1, %v15511_v1 }
  0xa4   : > { %9058 = vmatmul.mubr.msk.bf16.gmra.mxu0 %vm15516_vm2, %v286_v52 }
  0xa5   : > { %9063 = vmatprep.mubr.msk.bf16.mxu0 %vm10135_vm1, %v15511_v1 }
  0xa6   : > { %9232 = vmatmul.mubr.msk.bf16.gmra.mxu1 %vm15516_vm2, %v10385_v55 }
  0xa7   : > { %9235 = vmatprep.mubr.msk.bf16.mxu1 %vm10135_vm1, %v15511_v1 }
  0xac   : > { %9064 = vmatmul.mubr.msk.bf16.vlgmr.msra.gmra.mxu0 %vm15516_vm2, %v211_v59 }
  0xad   : > { %9140 = vmatpush3.bf16.msra.mxu0 %v895_v62  ;;  %9067 = vmatprep.mubr.msk.bf16.mxu0 %vm10135_vm1, %v15511_v1 }
  0xae   : > { %9295 = vmatprep.subr.bf16.mxu0 %v15511_v1  ;;  %9236 = vmatmul.mubr.msk.bf16.gmra.mxu1 %vm15516_vm2, %v10402_v63 }
  0xaf   : > { %9239 = vmatprep.mubr.msk.bf16.mxu1 %vm10135_vm1, %v15511_v1 }
  0xb4   : > { %9068 = vmatmul.mubr.msk.bf16.gmra.mxu0 %vm15516_vm2, %v212_v3 }
  0xb5   : > { %9071 = vmatprep.mubr.msk.bf16.mxu0 %vm10135_vm1, %v15511_v1 }
  0xb6   : > { %9240 = vmatmul.mubr.msk.bf16.gmra.mxu1 %vm15516_vm2, %v10416_v6 }
  0xb7   : > { %9243 = vmatprep.mubr.msk.bf16.mxu1 %vm10135_vm1, %v15511_v1 }
  0xbc   : > { %9072 = vmatmul.mubr.msk.bf16.gmra.mxu0 %vm15516_vm2, %v213_v9  ;;  %v1144_v9 = vld [vmem:[%s10186_s21 + $0xe2] sm:$0xff] }
  0xbd   : > { %9075 = vmatprep.mubr.msk.bf16.mxu0 %vm10135_vm1, %v15511_v1  ;;  %v10552_v14 = vpack.c.bf16 %v1145_v10, %v1144_v9 }
  0xbe   : > { %9244 = vmatmul.mubr.msk.bf16.gmra.mxu1 %vm15516_vm2, %v10429_v12 }
  0xbf   : > { %9247 = vmatprep.mubr.msk.bf16.mxu1 %vm10135_vm1, %v15511_v1 }
  0xc4   : > { %9076 = vmatmul.mubr.msk.bf16.gmra.mxu0 %vm15516_vm2, %v214_v15 }
  0xc5   : > { %9141 = vmatprep.mubr.msk.bf16.mxu0 %vm10135_vm1, %v15511_v1 }
  0xc6   : > { %9248 = vmatmul.mubr.msk.bf16.gmra.mxu1 %vm15516_vm2, %v10442_v18 }
  0xc7   : > { %9251 = vmatprep.mubr.msk.bf16.mxu1 %vm10135_vm1, %v15511_v1 }
  0xcc   : > { %9142 = vmatmul.mubr.msk.bf16.vlgmr.msra.gmra.mxu0 %vm15516_vm2, %v816_v22  ;;  %v1146_v22 = vld [vmem:[%s10186_s21 + $0xf2] sm:$0xff] }
  0xcd   : > { %9296 = vmatpush3.bf16.msra.mxu0 %v1573_v25  ;;  %9145 = vmatprep.mubr.msk.bf16.mxu0 %vm10135_vm1, %v15511_v1  ;;  %v10573_v28 = vpack.c.bf16 %v1147_v23, %v1146_v22 }
  0xce   : > { %9451 = vmatprep.subr.bf16.mxu0 %v15511_v1  ;;  %9252 = vmatmul.mubr.msk.bf16.gmra.mxu1 %vm15516_vm2, %v10459_v26 }
  0xcf   : > { %9255 = vmatprep.mubr.msk.bf16.mxu1 %vm10135_vm1, %v15511_v1 }
  0xd4   : > { %v10473_v30 = vpop.f32.mrf.mxu0  ;;  %9146 = vmatmul.mubr.msk.bf16.gmra.mxu0 %vm15516_vm2, %v10347_v38 }
  0xd5   : > { %9149 = vmatprep.mubr.msk.bf16.mxu0 %vm10135_vm1, %v15511_v1 }
  0xd6   : > { %v8987_v31 = vpop.f32.mrf.mxu0  ;;  %v661_v32 = vpop.f32.mrf.mxu1  ;;  %9256 = vmatmul.mubr.msk.bf16.gmra.mxu1 %vm15516_vm2, %v10471_v29 }
  0xd7   : > { %9259 = vmatprep.mubr.msk.bf16.mxu1 %vm10135_vm1, %v15511_v1 }
  0xd8   : > { %v10481_v33 = vpop.f32.mrf.mxu0  ;;  %v9081_v36 = vpop.f32.mrf.mxu1 }
  0xda   : > { %v8988_v37 = vpop.f32.mrf.mxu0  ;;  %v10487_v38 = vpop.f32.mrf.mxu1 }
  0xdc   : > { %v10491_v40 = vpop.f32.mrf.mxu0  ;;  %9150 = vmatmul.mubr.msk.bf16.gmra.mxu0 %vm15516_vm2, %v10360_v44  ;;  %v9082_v41 = vpop.f32.mrf.mxu1  ;;  %v8349_v44 = vld [vmem:[%s15495_s1 + $0xa] sm:$0x3] }
  0xdd   : > { %9153 = vmatprep.mubr.msk.bf16.mxu0 %vm10135_vm1, %v15511_v1  ;;  %v1912_v51 = vsel %vm15514_vm0, %v8349_v44, 0  ;;  %v1149_v41 = vld [vmem:[%s10186_s21 + $0x10a] sm:$0xff] }
  0xde   : > { %v8991_v42 = vpop.f32.mrf.mxu0  ;;  %v10497_v43 = vpop.f32.mrf.mxu1  ;;  %9260 = vmatmul.mubr.msk.bf16.gmra.mxu1 %vm15516_vm2, %v10489_v39 }
  0xdf   : > { %9263 = vmatprep.mubr.msk.bf16.mxu1 %vm10135_vm1, %v15511_v1  ;;  %9374 = vmatpush3.bf16.msra.mxu1 %v1912_v51 }
  0xe0   : > { %v10501_v45 = vpop.f32.mrf.mxu0  ;;  %v9085_v48 = vpop.f32.mrf.mxu1  ;;  %9529 = vmatprep.subr.bf16.mxu1 %v15511_v1 }
  0xe2   : > { %v8992_v49 = vpop.f32.mrf.mxu0  ;;  %v10511_v52 = vpop.f32.mrf.mxu1 }
  0xe4   : > { %v10515_v54 = vpop.f32.mrf.mxu0  ;;  %9154 = vmatmul.mubr.msk.bf16.gmra.mxu0 %vm15516_vm2, %v10373_v50  ;;  %v9086_v56 = vpop.f32.mrf.mxu1  ;;  %v1143_v50 = vld [vmem:[%s10186_s21 + $0xda] sm:$0xff] }
  0xe5   : > { %9157 = vmatprep.mubr.msk.bf16.mxu0 %vm10135_vm1, %v15511_v1  ;;  %v10532_v2 = vpack.c.bf16 %v1143_v50, %v1142_v60  ;;  %v1151_v60 = vld [vmem:[%s10186_s21 + $0x11a] sm:$0xff] }
  0xe6   : > { %v8995_v57 = vpop.f32.mrf.mxu0  ;;  %v677_v58 = vpop.f32.mrf.mxu1  ;;  %9264 = vmatmul.mubr.msk.bf16.gmra.mxu1 %vm15516_vm2, %v10513_v53 }
  0xe7   : > { %9267 = vmatprep.mubr.msk.bf16.mxu1 %vm10135_vm1, %v15511_v1  ;;  %v1150_v57 = vld [vmem:[%s10186_s21 + $0x112] sm:$0xff] }
  0xe8   : > { %v10524_v59 = vpop.f32.mrf.mxu0  ;;  %v9089_v61 = vpop.f32.mrf.mxu1 }
  0xea   : > { %v8996_v62 = vpop.f32.mrf.mxu0  ;;  %v10530_v0 = vpop.f32.mrf.mxu1 }
  0xeb   : > { %v10616_v62 = vpack.c.bf16 %v1151_v60, %v1150_v57 }
  0xec   : > { %v10534_v3 = vpop.f32.mrf.mxu0  ;;  %9158 = vmatmul.mubr.msk.bf16.gmra.mxu0 %vm15516_vm2, %v10385_v55  ;;  %v9090_v4 = vpop.f32.mrf.mxu1 }
  0xed   : > { %9161 = vmatprep.mubr.msk.bf16.mxu0 %vm10135_vm1, %v15511_v1 }
  0xee   : > { %v8999_v5 = vpop.f32.mrf.mxu0  ;;  %v10540_v7 = vpop.f32.mrf.mxu1  ;;  %9268 = vmatmul.mubr.msk.bf16.gmra.mxu1 %vm15516_vm2, %v10532_v2 }
  0xef   : > { %9271 = vmatprep.mubr.msk.bf16.mxu1 %vm10135_vm1, %v15511_v1 }
  0xf0   : > { %v10544_v8 = vpop.f32.mrf.mxu0  ;;  %v9093_v55 = vpop.f32.mrf.mxu1 }
  0xf2   : > { %v9000_v11 = vpop.f32.mrf.mxu0  ;;  %v10550_v13 = vpop.f32.mrf.mxu1 }
  0xf3   : > { %v1152_v11 = vld [vmem:[%s10186_s21 + $0x122] sm:$0xff] }
  0xf4   : > { %v417_v15 = vpop.f32.mrf.mxu0  ;;  %9162 = vmatmul.mubr.msk.bf16.gmra.mxu0 %vm15516_vm2, %v10402_v63  ;;  %v9094_v17 = vpop.f32.mrf.mxu1 }
  0xf5   : > { %v10556_v16 = vadd.f32 %v661_v32, %v417_v15  ;;  %9165 = vmatprep.mubr.msk.bf16.mxu0 %vm10135_vm1, %v15511_v1  ;;  %v1153_v15 = vld [vmem:[%s10186_s21 + $0x12a] sm:$0xff] }
  0xf6   : > { %v9003_v19 = vpop.f32.mrf.mxu0  ;;  %v10560_v20 = vpop.f32.mrf.mxu1  ;;  %9272 = vmatmul.mubr.msk.bf16.gmra.mxu1 %vm15516_vm2, %v10552_v14 }
  0xf7   : > { %9275 = vmatprep.mubr.msk.bf16.mxu1 %vm10135_vm1, %v15511_v1 }
  0xf8   : > { %v420_v21 = vpop.f32.mrf.mxu0  ;;  %v9097_v24 = vpop.f32.mrf.mxu1 }
  0xf9   : > { %v10569_v63 = vadd.f32 %v10487_v38, %v420_v21  ;;  %v1148_v38 = vld [vmem:[%s10186_s21 + $0x102] sm:$0xff]  ;;  %v1172_v21 = vpack.c.bf16 %v1153_v15, %v1152_v11  ;;  %v1799_v15 = vld [vmem:[%s10186_s21 + $0x2c] sm:$0xff] }
  0xfa   : > { %v9004_v25 = vpop.f32.mrf.mxu0  ;;  %v10571_v27 = vpop.f32.mrf.mxu1  ;;  %v10595_v47 = vpack.c.bf16 %v1149_v41, %v1148_v38  ;;  %v1798_v11 = vld [vmem:[%s10186_s21 + $0x24] sm:$0xff] }
  0xfc   : > { %v425_v31 = vpop.f32.mrf.mxu0  ;;  %9166 = vmatmul.mubr.msk.bf16.gmra.mxu0 %vm15516_vm2, %v10416_v6  ;;  %v9098_v34 = vpop.f32.mrf.mxu1 }
  0xfd   : > { %v10578_v32 = vadd.f32 %v10497_v43, %v425_v31  ;;  %9169 = vmatprep.mubr.msk.bf16.mxu0 %vm10135_vm1, %v15511_v1  ;;  %v1154_v34 = vld [vmem:[%s10186_s21 + $0x132] sm:$0x3] }
  0xfe   : > { %v9007_v35 = vpop.f32.mrf.mxu0  ;;  %v10582_v36 = vpop.f32.mrf.mxu1  ;;  %9276 = vmatmul.mubr.msk.bf16.gmra.mxu1 %vm15516_vm2, %v10573_v28  ;;  %v1173_v38 = vpack.c.bf16 %v1154_v34, %v1154_v34 }
  0xff   : > { %9279 = vmatprep.mubr.msk.bf16.mxu1 %vm10135_vm1, %v15511_v1 }
 0x100   : > { %v428_v37 = vpop.f32.mrf.mxu0  ;;  %v9101_v42 = vpop.f32.mrf.mxu1 }
 0x101   : > { %v10591_v6 = vadd.f32 %v10511_v52, %v428_v37 }
 0x102   : > { %v9008_v43 = vpop.f32.mrf.mxu0  ;;  %v10593_v46 = vpop.f32.mrf.mxu1 }
 0x104   : > { %v433_v48 = vpop.f32.mrf.mxu0  ;;  %9170 = vmatmul.mubr.msk.bf16.gmra.mxu0 %vm15516_vm2, %v10429_v12  ;;  %v9102_v49 = vpop.f32.mrf.mxu1 }
 0x105   : > { %v10599_v44 = vadd.f32 %v677_v58, %v433_v48  ;;  %9173 = vmatprep.mubr.msk.bf16.mxu0 %vm10135_vm1, %v15511_v1 }
 0x106   : > { %v9011_v51 = vpop.f32.mrf.mxu0  ;;  %v10603_v52 = vpop.f32.mrf.mxu1  ;;  %9280 = vmatmul.mubr.msk.bf16.gmra.mxu1 %vm15516_vm2, %v10595_v47 }
 0x107   : > { %9283 = vmatprep.mubr.msk.bf16.mxu1 %vm10135_vm1, %v15511_v1  ;;  %v1796_v51 = vld [vmem:[%s10186_s21 + $0x14] sm:$0xff] }
 0x108   : > { %v436_v56 = vpop.f32.mrf.mxu0  ;;  %v9105_v58 = vpop.f32.mrf.mxu1 }
 0x109   : > { %v10612_v12 = vadd.f32 %v10530_v0, %v436_v56  ;;  %v1797_v56 = vld [vmem:[%s10186_s21 + $0x1c] sm:$0xff] }
 0x10a   : > { %v9012_v50 = vpop.f32.mrf.mxu0  ;;  %v10614_v61 = vpop.f32.mrf.mxu1  ;;  %v1833_v58 = vpack.c.bf16 %v1797_v56, %v1796_v51 }
 0x10c   : > { %v441_v4 = vpop.f32.mrf.mxu0  ;;  %9174 = vmatmul.mubr.msk.bf16.gmra.mxu0 %vm15516_vm2, %v10442_v18  ;;  %v9106_v9 = vpop.f32.mrf.mxu1 }
 0x10d   : > { %v10621_v5 = vadd.f32 %v10540_v7, %v441_v4  ;;  %9177 = vmatprep.mubr.msk.bf16.mxu0 %vm10135_vm1, %v15511_v1 }
 0x10e   : > { %v9015_v0 = vpop.f32.mrf.mxu0  ;;  %v10625_v10 = vpop.f32.mrf.mxu1  ;;  %9284 = vmatmul.mubr.msk.bf16.gmra.mxu1 %vm15516_vm2, %v10616_v62 }
 0x10f   : > { %9287 = vmatprep.mubr.msk.bf16.mxu1 %vm10135_vm1, %v15511_v1 }
 0x110   : > { %v444_v55 = vpop.f32.mrf.mxu0  ;;  %v9109_v7 = vpop.f32.mrf.mxu1 }
 0x111   : > { %v10634_v18 = vadd.f32 %v10550_v13, %v444_v55 }
 0x112   : > { %v9016_v17 = vpop.f32.mrf.mxu0  ;;  %v10636_v19 = vpop.f32.mrf.mxu1 }
 0x114   : > { %v449_v22 = vpop.f32.mrf.mxu0  ;;  %9178 = vmatmul.mubr.msk.bf16.gmra.mxu0 %vm15516_vm2, %v10459_v26  ;;  %v9110_v24 = vpop.f32.mrf.mxu1 }
 0x115   : > { %v10641_v23 = vadd.f32 %v10560_v20, %v449_v22  ;;  %9181 = vmatprep.mubr.msk.bf16.mxu0 %vm10135_vm1, %v15511_v1 }
 0x116   : > { %v9019_v25 = vpop.f32.mrf.mxu0  ;;  %v10645_v31 = vpop.f32.mrf.mxu1  ;;  %9288 = vmatmul.mubr.msk.bf16.gmra.mxu1 %vm15516_vm2, %v1172_v21  ;;  %v10694_v21 = vpack.c.bf16 %v1799_v15, %v1798_v11 }
 0x117   : > { %9291 = vmatprep.mubr.msk.bf16.mxu1 %vm10135_vm1, %v15511_v1 }
 0x118   : > { %v452_v13 = vpop.f32.mrf.mxu0  ;;  %v9113_v20 = vpop.f32.mrf.mxu1  ;;  %15583 = vst [vmem:[#allocation4_spill] sm:$0xff] %v10694_v21 }
 0x119   : > { %v10652_v26 = vadd.f32 %v10571_v27, %v452_v13  ;;  %v1800_v20 = vld [vmem:[%s10186_s21 + $0x34] sm:$0xff] }
 0x11a   : > { %v9020_v35 = vpop.f32.mrf.mxu0  ;;  %v10654_v37 = vpop.f32.mrf.mxu1 }
 0x11b   : > { %v1801_v35 = vld [vmem:[%s10186_s21 + $0x3c] sm:$0xff] }
 0x11c   : > { %v457_v41 = vpop.f32.mrf.mxu0  ;;  %9182 = vmatmul.mubr.msk.bf16.gmra.mxu0 %vm15516_vm2, %v10471_v29  ;;  %v9114_v43 = vpop.f32.mrf.mxu1 }
 0x11d   : > { %v10659_v42 = vadd.f32 %v10582_v36, %v457_v41  ;;  %9185 = vmatprep.mubr.msk.bf16.mxu0 %vm10135_vm1, %v15511_v1  ;;  %v10716_v43 = vpack.c.bf16 %v1801_v35, %v1800_v20 }
 0x11e   : > { %v9023_v48 = vpop.f32.mrf.mxu0  ;;  %v10663_v27 = vpop.f32.mrf.mxu1  ;;  %9292 = vmatmul.mubr.msk.bf16.gmra.mxu1 %vm15516_vm2, %v1173_v38 }
 0x11f   : > { %9375 = vmatprep.mubr.msk.bf16.mxu1 %vm10135_vm1, %v15511_v1  ;;  %15584 = vst [vmem:[#allocation5_spill] sm:$0xff] %v10716_v43 }
 0x120   : > { %v460_v49 = vpop.f32.mrf.mxu0  ;;  %v9117_v36 = vpop.f32.mrf.mxu1 }
 0x121   : > { %v10671_v29 = vadd.f32 %v10593_v46, %v460_v49 }
 0x122   : > { %v9024_v57 = vpop.f32.mrf.mxu0  ;;  %v10673_v60 = vpop.f32.mrf.mxu1 }
 0x123   : > { %v1802_v57 = vld [vmem:[%s10186_s21 + $0x44] sm:$0xff] }
 0x124   : > { %v465_v50 = vpop.f32.mrf.mxu0  ;;  %9186 = vmatmul.mubr.msk.bf16.gmra.mxu0 %vm15516_vm2, %v10489_v39  ;;  %v9118_v9 = vpop.f32.mrf.mxu1 }
 0x125   : > { %v10678_v4 = vadd.f32 %v10603_v52, %v465_v50  ;;  %9189 = vmatprep.mubr.msk.bf16.mxu0 %vm10135_vm1, %v15511_v1 }
 0x126   : > { %v9027_v0 = vpop.f32.mrf.mxu0  ;;  %v10682_v46 = vpop.f32.mrf.mxu1  ;;  %9376 = vmatmul.mubr.msk.bf16.vlgmr.msra.gmra.mxu1 %vm15516_vm2, %v1833_v58  ;;  %v1803_v58 = vld [vmem:[%s10186_s21 + $0x4c] sm:$0xff] }
 0x127   : > { %9379 = vmatprep.mubr.msk.bf16.mxu1 %vm10135_vm1, %v15511_v1  ;;  %v10738_v0 = vpack.c.bf16 %v1803_v58, %v1802_v57 }
 0x128   : > { %v468_v55 = vpop.f32.mrf.mxu0  ;;  %v9121_v52 = vpop.f32.mrf.mxu1 }
 0x129   : > { %v10690_v39 = vadd.f32 %v10614_v61, %v468_v55  ;;  %15585 = vst [vmem:[#allocation6_spill] sm:$0xff] %v10738_v0 }
 0x12a   : > { %v9028_v7 = vpop.f32.mrf.mxu0  ;;  %v10692_v17 = vpop.f32.mrf.mxu1 }
 0x12c   : > { %v473_v22 = vpop.f32.mrf.mxu0  ;;  %9190 = vmatmul.mubr.msk.bf16.gmra.mxu0 %vm15516_vm2, %v10513_v53  ;;  %v9122_v25 = vpop.f32.mrf.mxu1 }
 0x12d   : > { %v10699_v24 = vadd.f32 %v10625_v10, %v473_v22  ;;  %9193 = vmatprep.mubr.msk.bf16.mxu0 %vm10135_vm1, %v15511_v1  ;;  %v1804_v22 = vld [vmem:[%s10186_s21 + $0x54] sm:$0xff]  ;;  %v1805_v25 = vld [vmem:[%s10186_s21 + $0x5c] sm:$0xff] }
 0x12e   : > { %v9031_v61 = vpop.f32.mrf.mxu0  ;;  %v10703_v13 = vpop.f32.mrf.mxu1  ;;  %9380 = vmatmul.mubr.msk.bf16.gmra.mxu1 %vm15516_vm2, %v10694_v21  ;;  %v10760_v20 = vpack.c.bf16 %v1805_v25, %v1804_v22  ;;  %v1808_v22 = vld [vmem:[%s10186_s21 + $0x74] sm:$0xff] }
 0x12f   : > { %9383 = vmatprep.mubr.msk.bf16.mxu1 %vm10135_vm1, %v15511_v1  ;;  %v1470_v21 = vld [vmem:[%s10186_s21 + $0x7b] sm:$0xff] }
 0x130   : > { %v476_v34 = vpop.f32.mrf.mxu0  ;;  %v9125_v10 = vpop.f32.mrf.mxu1  ;;  %15586 = vst [vmem:[#allocation7_spill] sm:$0xff] %v10760_v20 }
 0x131   : > { %v10712_v53 = vadd.f32 %v10636_v19, %v476_v34 }
 0x132   : > { %v9032_v38 = vpop.f32.mrf.mxu0  ;;  %v10714_v41 = vpop.f32.mrf.mxu1 }
 0x134   : > { %v481_v48 = vpop.f32.mrf.mxu0  ;;  %9194 = vmatmul.mubr.msk.bf16.gmra.mxu0 %vm15516_vm2, %v10532_v2  ;;  %v9126_v51 = vpop.f32.mrf.mxu1 }
 0x135   : > { %v10721_v49 = vadd.f32 %v10645_v31, %v481_v48  ;;  %9197 = vmatprep.mubr.msk.bf16.mxu0 %vm10135_vm1, %v15511_v1 }
 0x136   : > { %v9035_v19 = vpop.f32.mrf.mxu0  ;;  %v10725_v56 = vpop.f32.mrf.mxu1  ;;  %9384 = vmatmul.mubr.msk.bf16.gmra.mxu1 %vm15516_vm2, %v10716_v43 }
 0x137   : > { %9387 = vmatprep.mubr.msk.bf16.mxu1 %vm10135_vm1, %v15511_v1  ;;  %v1806_v19 = vld [vmem:[%s10186_s21 + $0x64] sm:$0xff] }
 0x138   : > { %v484_v36 = vpop.f32.mrf.mxu0  ;;  %v9129_v31 = vpop.f32.mrf.mxu1 }
 0x139   : > { %v10734_v2 = vadd.f32 %v10654_v37, %v484_v36  ;;  %v1807_v36 = vld [vmem:[%s10186_s21 + $0x6c] sm:$0xff] }
 0x13a   : > { %v9036_v50 = vpop.f32.mrf.mxu0  ;;  %v10736_v9 = vpop.f32.mrf.mxu1  ;;  %v10780_v31 = vpack.c.bf16 %v1807_v36, %v1806_v19 }
 0x13c   : > { %v489_v55 = vpop.f32.mrf.mxu0  ;;  %9198 = vmatmul.mubr.msk.bf16.gmra.mxu0 %vm15516_vm2, %v10552_v14  ;;  %v9130_v15 = vpop.f32.mrf.mxu1  ;;  %15589 = vst [vmem:[#allocation10_spill] sm:$0xff] %v10780_v31 }
 0x13d   : > { %v10743_v11 = vadd.f32 %v10663_v27, %v489_v55  ;;  %9201 = vmatprep.mubr.msk.bf16.mxu0 %vm10135_vm1, %v15511_v1 }
 0x13e   : > { %v9039_v37 = vpop.f32.mrf.mxu0  ;;  %v10747_v52 = vpop.f32.mrf.mxu1  ;;  %9388 = vmatmul.mubr.msk.bf16.gmra.mxu1 %vm15516_vm2, %v10738_v0 }
 0x13f   : > { %9391 = vmatprep.mubr.msk.bf16.mxu1 %vm10135_vm1, %v15511_v1 }
 0x140   : > { %v492_v7 = vpop.f32.mrf.mxu0  ;;  %v9133_v27 = vpop.f32.mrf.mxu1 }
 0x141   : > { %v10756_v14 = vadd.f32 %v10673_v60, %v492_v7 }
 0x142   : > { %v9040_v61 = vpop.f32.mrf.mxu0  ;;  %v10758_v34 = vpop.f32.mrf.mxu1 }
 0x144   : > { %v497_v35 = vpop.f32.mrf.mxu0  ;;  %9202 = vmatmul.mubr.msk.bf16.gmra.mxu0 %vm15516_vm2, %v10573_v28  ;;  %v9134_v38 = vpop.f32.mrf.mxu1 }
 0x145   : > { %v10765_v10 = vadd.f32 %v10682_v46, %v497_v35  ;;  %9205 = vmatprep.mubr.msk.bf16.mxu0 %vm10135_vm1, %v15511_v1 }
 0x146   : > { %v9043_v60 = vpop.f32.mrf.mxu0  ;;  %v10769_v48 = vpop.f32.mrf.mxu1  ;;  %9392 = vmatmul.mubr.msk.bf16.gmra.mxu1 %vm15516_vm2, %v10760_v20 }
 0x147   : > { %15587 = vst [vmem:[#allocation8_spill] sm:$0xff] %v10765_v10  ;;  %9395 = vmatprep.mubr.msk.bf16.mxu1 %vm10135_vm1, %v15511_v1 }
 0x148   : > { %v500_v51 = vpop.f32.mrf.mxu0  ;;  %v9137_v46 = vpop.f32.mrf.mxu1 }
 0x149   : > { %v10778_v28 = vadd.f32 %v10692_v17, %v500_v51 }
 0x14a   : > { %v9044_v57 = vpop.f32.mrf.mxu0  ;;  %v776_v58 = vpop.f32.mrf.mxu1 }
 0x14b   : > { %15588 = vst [vmem:[#allocation9_spill] sm:$0xff] %v10778_v28 }
 0x14c   : > { %v505_v50 = vpop.f32.mrf.mxu0  ;;  %9206 = vmatmul.mubr.msk.bf16.gmra.mxu0 %vm15516_vm2, %v10595_v47  ;;  %v9138_v15 = vpop.f32.mrf.mxu1  ;;  %v1809_v47 = vld [vmem:[%s10186_s21 + $0x7c] sm:$0xff] }
 0x14d   : > { %v10785_v55 = vadd.f32 %v10703_v13, %v505_v50  ;;  %9209 = vmatprep.mubr.msk.bf16.mxu0 %vm10135_vm1, %v15511_v1  ;;  %v10802_v35 = vpack.c.bf16 %v1809_v47, %v1808_v22 }
 0x14e   : > { %v9047_v37 = vpop.f32.mrf.mxu0  ;;  %v10789_v17 = vpop.f32.mrf.mxu1  ;;  %9396 = vmatmul.mubr.msk.bf16.gmra.mxu1 %vm15516_vm2, %v10780_v31 }
 0x14f   : > { %15590 = vst [vmem:[#allocation11_spill] sm:$0xff] %v10785_v55  ;;  %9399 = vmatprep.mubr.msk.bf16.mxu1 %vm10135_vm1, %v15511_v1  ;;  %15592 = vst [vmem:[#allocation13_spill] sm:$0xff] %v10802_v35 }
 0x150   : > { %v508_v7 = vpop.f32.mrf.mxu0  ;;  %v9221_v25 = vpop.f32.mrf.mxu1 }
 0x151   : > { %v10798_v13 = vadd.f32 %v10714_v41, %v508_v7  ;;  %v815_v41 = vld [vmem:[%s10186_s21 + $0x122] sm:$0x3]  ;;  %v1457_v25 = vld [vmem:[%s10186_s21 + $0x13] sm:$0xff] }
 0x152   : > { %v9048_v27 = vpop.f32.mrf.mxu0  ;;  %v10800_v61 = vpop.f32.mrf.mxu1  ;;  %v834_v57 = vpack.c.bf16 %v815_v41, %v815_v41  ;;  %v8369_v41 = vld [vmem:[%s15495_s1 + $0xc] sm:$0x3] }
 0x153   : > { %15591 = vst [vmem:[#allocation12_spill] sm:$0xff] %v10798_v13 }
 0x154   : > { %v513_v38 = vpop.f32.mrf.mxu0  ;;  %9210 = vmatmul.mubr.msk.bf16.gmra.mxu0 %vm15516_vm2, %v10616_v62  ;;  %v9222_v51 = vpop.f32.mrf.mxu1  ;;  %v1810_v62 = vld [vmem:[%s10186_s21 + $0x84] sm:$0xff] }
 0x155   : > { %v10807_v60 = vadd.f32 %v10725_v56, %v513_v38  ;;  %9213 = vmatprep.mubr.msk.bf16.mxu0 %vm10135_vm1, %v15511_v1  ;;  %v1811_v56 = vld [vmem:[%s10186_s21 + $0x8c] sm:$0xff] }
 0x156   : > { %v9051_v19 = vpop.f32.mrf.mxu0  ;;  %v10812_v36 = vpop.f32.mrf.mxu1  ;;  %9400 = vmatmul.mubr.msk.bf16.gmra.mxu1 %vm15516_vm2, %v10802_v35  ;;  %v10825_v7 = vpack.c.bf16 %v1811_v56, %v1810_v62 }
 0x157   : > { %15593 = vst [vmem:[#allocation14_spill] sm:$0xff] %v10807_v60  ;;  %9403 = vmatprep.mubr.msk.bf16.mxu1 %vm10135_vm1, %v15511_v1 }
 0x158   : > { %v516_v46 = vpop.f32.mrf.mxu0  ;;  %v9225_v50 = vpop.f32.mrf.mxu1  ;;  %15595 = vst [vmem:[#allocation16_spill] sm:$0xff] %v10825_v7 }
 0x159   : > { %v10821_v58 = vadd.f32 %v10736_v9, %v516_v46  ;;  %v1458_v9 = vld [vmem:[%s10186_s21 + $0x1b] sm:$0xff] }
 0x15a   : > { %v9052_v15 = vpop.f32.mrf.mxu0  ;;  %v10823_v37 = vpop.f32.mrf.mxu1  ;;  %v1812_v46 = vld [vmem:[%s10186_s21 + $0x94] sm:$0xff] }
 0x15b   : > { %15594 = vst [vmem:[#allocation15_spill] sm:$0xff] %v10821_v58  ;;  %v2251_v15 = vsel %vm15514_vm0, %v8369_v41, 0 }
 0x15c   : > { %v521_v22 = vpop.f32.mrf.mxu0  ;;  %9214 = vmatmul.mubr.msk.bf16.gmra.mxu0 %vm15516_vm2, %v834_v57  ;;  %v9226_v27 = vpop.f32.mrf.mxu1  ;;  %v1813_v57 = vld [vmem:[%s10186_s21 + $0x9c] sm:$0xff] }
 0x15d   : > { %v10829_v47 = vadd.f32 %v10747_v52, %v521_v22  ;;  %9297 = vmatprep.mubr.msk.bf16.mxu0 %vm10135_vm1, %v15511_v1  ;;  %v1494_v52 = vpack.c.bf16 %v1458_v9, %v1457_v25  ;;  %v10852_v27 = vpack.c.bf16 %v1813_v57, %v1812_v46  ;;  %v1460_v9 = vld [vmem:[%s10186_s21 + $0x2b] sm:$0xff] }
 0x15e   : > { %v9055_v38 = vpop.f32.mrf.mxu0  ;;  %v10838_v51 = vpop.f32.mrf.mxu1  ;;  %9404 = vmatmul.mubr.msk.bf16.gmra.mxu1 %vm15516_vm2, %v10825_v7  ;;  %v1814_v57 = vld [vmem:[%s10186_s21 + $0xa4] sm:$0xff] }
 0x15f   : > { %15596 = vst [vmem:[#allocation17_spill] sm:$0xff] %v10829_v47  ;;  %9407 = vmatprep.mubr.msk.bf16.mxu1 %vm10135_vm1, %v15511_v1  ;;  %15598 = vst [vmem:[#allocation19_spill] sm:$0xff] %v10852_v27 }
 0x160   : > { %v524_v19 = vpop.f32.mrf.mxu0  ;;  %v9229_v56 = vpop.f32.mrf.mxu1 }
 0x161   : > { %v10847_v62 = vadd.f32 %v10758_v34, %v524_v19  ;;  %v1459_v34 = vld [vmem:[%s10186_s21 + $0x23] sm:$0xff]  ;;  %v1815_v56 = vld [vmem:[%s10186_s21 + $0xac] sm:$0xff] }
 0x162   : > { %v9056_v50 = vpop.f32.mrf.mxu0  ;;  %v10850_v22 = vpop.f32.mrf.mxu1 }
 0x163   : > { %15597 = vst [vmem:[#allocation18_spill] sm:$0xff] %v10847_v62 }
 0x164   : > { %v529_v38 = vpop.f32.mrf.mxu0  ;;  %9298 = vmatmul.mubr.msk.bf16.vlgmr.msra.gmra.mxu0 %vm15516_vm2, %v1494_v52  ;;  %v9230_v19 = vpop.f32.mrf.mxu1 }
 0x165   : > { %v10856_v25 = vadd.f32 %v10769_v48, %v529_v38  ;;  %9452 = vmatpush3.bf16.msra.mxu0 %v2251_v15  ;;  %9301 = vmatprep.mubr.msk.bf16.mxu0 %vm10135_vm1, %v15511_v1  ;;  %v1495_v48 = vpack.c.bf16 %v1460_v9, %v1459_v34  ;;  %v10873_v19 = vpack.c.bf16 %v1815_v56, %v1814_v57  ;;  %v1461_v34 = vld [vmem:[%s10186_s21 + $0x33] sm:$0xff]  ;;  %v1462_v9 = vld [vmem:[%s10186_s21 + $0x3b] sm:$0xff] }
 0x166   : > { %v9059_v41 = vpop.f32.mrf.mxu0  ;;  %9607 = vmatprep.subr.bf16.mxu0 %v15511_v1  ;;  %v10863_v46 = vpop.f32.mrf.mxu1  ;;  %9408 = vmatmul.mubr.msk.bf16.gmra.mxu1 %vm15516_vm2, %v10852_v27  ;;  %v1496_v56 = vpack.c.bf16 %v1462_v9, %v1461_v34  ;;  %v1463_v34 = vld [vmem:[%s10186_s21 + $0x43] sm:$0xff]  ;;  %v1464_v9 = vld [vmem:[%s10186_s21 + $0x4b] sm:$0xff] }
 0x167   : > { %15599 = vst [vmem:[#allocation20_spill] sm:$0xff] %v10856_v25  ;;  %9411 = vmatprep.mubr.msk.bf16.mxu1 %vm10135_vm1, %v15511_v1  ;;  %15600 = vst [vmem:[#allocation21_spill] sm:$0xff] %v10873_v19 }
 0x168   : > { %v532_v52 = vpop.f32.mrf.mxu0  ;;  %v9233_v50 = vpop.f32.mrf.mxu1 }
 0x16a   : > { %v9060_v15 = vpop.f32.mrf.mxu0  ;;  %v10871_v38 = vpop.f32.mrf.mxu1 }
 0x16b   : > { %v1817_v15 = vld [vmem:[%s10186_s21 + $0xbc] sm:$0xff] }
 0x16c   : > { %v10875_v41 = vpop.f32.mrf.mxu0  ;;  %9302 = vmatmul.mubr.msk.bf16.gmra.mxu0 %vm15516_vm2, %v1495_v48  ;;  %v9234_v52 = vpop.f32.mrf.mxu1  ;;  %v1816_v48 = vld [vmem:[%s10186_s21 + $0xb4] sm:$0xff] }
 0x16d   : > { %9305 = vmatprep.mubr.msk.bf16.mxu0 %vm10135_vm1, %v15511_v1 }
 0x16e   : > { %v9065_v27 = vpop.f32.mrf.mxu0  ;;  %v10882_v50 = vpop.f32.mrf.mxu1  ;;  %9412 = vmatmul.mubr.msk.bf16.gmra.mxu1 %vm15516_vm2, %v10873_v19 }
 0x16f   : > { %9415 = vmatprep.mubr.msk.bf16.mxu1 %vm10135_vm1, %v15511_v1  ;;  %v10894_v27 = vpack.c.bf16 %v1817_v15, %v1816_v48  ;;  %v1819_v48 = vld [vmem:[%s10186_s21 + $0xcc] sm:$0xff] }
 0x170   : > { %v10886_v57 = vpop.f32.mrf.mxu0  ;;  %v9237_v7 = vpop.f32.mrf.mxu1 }
 0x171   : > { %15601 = vst [vmem:[#allocation22_spill] sm:$0xff] %v10894_v27  ;;  %v1497_v7 = vpack.c.bf16 %v1464_v9, %v1463_v34  ;;  %v1465_v9 = vld [vmem:[%s10186_s21 + $0x53] sm:$0xff] }
 0x172   : > { %v9066_v35 = vpop.f32.mrf.mxu0  ;;  %v10892_v52 = vpop.f32.mrf.mxu1 }
 0x174   : > { %v10896_v25 = vpop.f32.mrf.mxu0  ;;  %9306 = vmatmul.mubr.msk.bf16.gmra.mxu0 %vm15516_vm2, %v1496_v56  ;;  %v9238_v19 = vpop.f32.mrf.mxu1  ;;  %v1818_v56 = vld [vmem:[%s10186_s21 + $0xc4] sm:$0xff] }
 0x175   : > { %9309 = vmatprep.mubr.msk.bf16.mxu0 %vm10135_vm1, %v15511_v1  ;;  %v10919_v20 = vpack.c.bf16 %v1819_v48, %v1818_v56  ;;  %v1821_v48 = vld [vmem:[%s10186_s21 + $0xdc] sm:$0xff] }
 0x176   : > { %v9069_v31 = vpop.f32.mrf.mxu0  ;;  %v10903_v62 = vpop.f32.mrf.mxu1  ;;  %9416 = vmatmul.mubr.msk.bf16.gmra.mxu1 %vm15516_vm2, %v10894_v27 }
 0x177   : > { %9419 = vmatprep.mubr.msk.bf16.mxu1 %vm10135_vm1, %v15511_v1  ;;  %v8389_v31 = vld [vmem:[%s15495_s1 + $0xe] sm:$0x3]  ;;  %15602 = vst [vmem:[#allocation23_spill] sm:$0xff] %v10919_v20 }
 0x178   : > { %v10907_v35 = vpop.f32.mrf.mxu0  ;;  %v9241_v15 = vpop.f32.mrf.mxu1  ;;  %v2590_v47 = vsel %vm15514_vm0, %v8389_v31, 0 }
 0x179   : > { %9530 = vmatpush3.bf16.msra.mxu1 %v2590_v47  ;;  %v1466_v15 = vld [vmem:[%s10186_s21 + $0x5b] sm:$0xff] }
 0x17a   : > { %v9070_v19 = vpop.f32.mrf.mxu0  ;;  %v10917_v27 = vpop.f32.mrf.mxu1  ;;  %v1498_v47 = vpack.c.bf16 %v1466_v15, %v1465_v9  ;;  %v1467_v9 = vld [vmem:[%s10186_s21 + $0x63] sm:$0xff]  ;;  %v1468_v15 = vld [vmem:[%s10186_s21 + $0x6b] sm:$0xff] }
 0x17c   : > { %v10921_v34 = vpop.f32.mrf.mxu0  ;;  %9310 = vmatmul.mubr.msk.bf16.gmra.mxu0 %vm15516_vm2, %v1497_v7  ;;  %v9242_v58 = vpop.f32.mrf.mxu1  ;;  %v1820_v7 = vld [vmem:[%s10186_s21 + $0xd4] sm:$0xff] }
 0x17d   : > { %9313 = vmatprep.mubr.msk.bf16.mxu0 %vm10135_vm1, %v15511_v1 }
 0x17e   : > { %v9073_v19 = vpop.f32.mrf.mxu0  ;;  %v10928_v31 = vpop.f32.mrf.mxu1  ;;  %9420 = vmatmul.mubr.msk.bf16.gmra.mxu1 %vm15516_vm2, %v10919_v20 }
 0x17f   : > { %9423 = vmatprep.mubr.msk.bf16.mxu1 %vm10135_vm1, %v15511_v1  ;;  %v10940_v19 = vpack.c.bf16 %v1821_v48, %v1820_v7  ;;  %v1823_v7 = vld [vmem:[%s10186_s21 + $0xec] sm:$0xff] }
 0x180   : > { %v10932_v56 = vpop.f32.mrf.mxu0  ;;  %v9245_v60 = vpop.f32.mrf.mxu1 }
 0x181   : > { %15603 = vst [vmem:[#allocation24_spill] sm:$0xff] %v10940_v19  ;;  %v1499_v60 = vpack.c.bf16 %v1468_v15, %v1467_v9  ;;  %v1469_v15 = vld [vmem:[%s10186_s21 + $0x73] sm:$0xff] }
 0x182   : > { %v9074_v0 = vpop.f32.mrf.mxu0  ;;  %v10938_v58 = vpop.f32.mrf.mxu1 }
 0x184   : > { %v10942_v13 = vpop.f32.mrf.mxu0  ;;  %9314 = vmatmul.mubr.msk.bf16.gmra.mxu0 %vm15516_vm2, %v1498_v47  ;;  %v9246_v20 = vpop.f32.mrf.mxu1  ;;  %v1822_v47 = vld [vmem:[%s10186_s21 + $0xe4] sm:$0xff] }
 0x185   : > { %9317 = vmatprep.mubr.msk.bf16.mxu0 %vm10135_vm1, %v15511_v1  ;;  %v630_v20 = vadd.f32 %v10875_v41, %v10473_v30  ;;  %v10963_v10 = vpack.c.bf16 %v1823_v7, %v1822_v47  ;;  %v633_v30 = vadd.f32 %v10886_v57, %v10481_v33  ;;  %v1824_v7 = vld [vmem:[%s10186_s21 + $0xf4] sm:$0xff] }
 0x186   : > { %v9077_v55 = vpop.f32.mrf.mxu0  ;;  %v10949_v43 = vpop.f32.mrf.mxu1  ;;  %9424 = vmatmul.mubr.msk.bf16.gmra.mxu1 %vm15516_vm2, %v10940_v19 }
 0x187   : > { %9427 = vmatprep.mubr.msk.bf16.mxu1 %vm10135_vm1, %v15511_v1  ;;  %15604 = vst [vmem:[#allocation25_spill] sm:$0xff] %v10963_v10 }
 0x188   : > { %v10953_v0 = vpop.f32.mrf.mxu0  ;;  %v9249_v48 = vpop.f32.mrf.mxu1 }
 0x18a   : > { %v9078_v28 = vpop.f32.mrf.mxu0  ;;  %v10961_v55 = vpop.f32.mrf.mxu1 }
 0x18c   : > { %v931_v19 = vpop.f32.mrf.mxu0  ;;  %9318 = vmatmul.mubr.msk.bf16.gmra.mxu0 %vm15516_vm2, %v1499_v60  ;;  %v9250_v48 = vpop.f32.mrf.mxu1 }
 0x18d   : > { %v1081_v9 = vadd.f32 %v931_v19, %v630_v20  ;;  %9321 = vmatprep.mubr.msk.bf16.mxu0 %vm10135_vm1, %v15511_v1  ;;  %v1500_v19 = vpack.c.bf16 %v1470_v21, %v1469_v15  ;;  %v1825_v20 = vld [vmem:[%s10186_s21 + $0xfc] sm:$0xff] }
 0x18e   : > { %v9143_v28 = vpop.f32.mrf.mxu0  ;;  %v10975_v47 = vpop.f32.mrf.mxu1  ;;  %9428 = vmatmul.mubr.msk.bf16.gmra.mxu1 %vm15516_vm2, %v10963_v10  ;;  %v10990_v10 = vpack.c.bf16 %v1825_v20, %v1824_v7 }
 0x18f   : > { %v10973_v41 = vadd.f32 %v10789_v17, %v1081_v9  ;;  %9431 = vmatprep.mubr.msk.bf16.mxu1 %vm10135_vm1, %v15511_v1  ;;  %v638_v17 = vadd.f32 %v10896_v25, %v10491_v40 }
 0x190   : > { %v934_v60 = vpop.f32.mrf.mxu0  ;;  %v9253_v28 = vpop.f32.mrf.mxu1 }
 0x191   : > { %v1082_v48 = vadd.f32 %v934_v60, %v633_v30  ;;  %v1471_v30 = vld [vmem:[%s10186_s21 + $0x83] sm:$0xff]  ;;  %v1472_v60 = vld [vmem:[%s10186_s21 + $0x8b] sm:$0xff] }
 0x192   : > { %v9144_v33 = vpop.f32.mrf.mxu0  ;;  %v10988_v9 = vpop.f32.mrf.mxu1  ;;  %v1501_v20 = vpack.c.bf16 %v1472_v60, %v1471_v30 }
 0x193   : > { %v10986_v57 = vadd.f32 %v10800_v61, %v1082_v48  ;;  %v641_v61 = vadd.f32 %v10907_v35, %v10501_v45  ;;  %v1826_v48 = vld [vmem:[%s10186_s21 + $0x104] sm:$0xff]  ;;  %v1827_v33 = vld [vmem:[%s10186_s21 + $0x10c] sm:$0xff] }
 0x194   : > { %v939_v21 = vpop.f32.mrf.mxu0  ;;  %9322 = vmatmul.mubr.msk.bf16.gmra.mxu0 %vm15516_vm2, %v1500_v19  ;;  %v9254_v28 = vpop.f32.mrf.mxu1 }
 0x195   : > { %v1083_v15 = vadd.f32 %v939_v21, %v638_v17  ;;  %9325 = vmatprep.mubr.msk.bf16.mxu0 %vm10135_vm1, %v15511_v1  ;;  %v11017_v28 = vpack.c.bf16 %v1827_v33, %v1826_v48 }
 0x196   : > { %v9147_v40 = vpop.f32.mrf.mxu0  ;;  %v11002_v7 = vpop.f32.mrf.mxu1  ;;  %9432 = vmatmul.mubr.msk.bf16.gmra.mxu1 %vm15516_vm2, %v10990_v10 }
 0x197   : > { %v11000_v25 = vadd.f32 %v10812_v36, %v1083_v15  ;;  %9435 = vmatprep.mubr.msk.bf16.mxu1 %vm10135_vm1, %v15511_v1  ;;  %v646_v36 = vadd.f32 %v10921_v34, %v10515_v54  ;;  %v1473_v40 = vld [vmem:[%s10186_s21 + $0x93] sm:$0xff] }
 0x198   : > { %v942_v19 = vpop.f32.mrf.mxu0  ;;  %v9257_v21 = vpop.f32.mrf.mxu1 }
 0x199   : > { %v1084_v17 = vadd.f32 %v942_v19, %v641_v61  ;;  %v1474_v61 = vld [vmem:[%s10186_s21 + $0x9b] sm:$0xff] }
 0x19a   : > { %v9148_v45 = vpop.f32.mrf.mxu0  ;;  %v11015_v15 = vpop.f32.mrf.mxu1  ;;  %v1502_v33 = vpack.c.bf16 %v1474_v61, %v1473_v40  ;;  %v1829_v21 = vld [vmem:[%s10186_s21 + $0x11c] sm:$0xff] }
 0x19b   : > { %v11013_v35 = vadd.f32 %v10823_v37, %v1084_v17  ;;  %v649_v37 = vadd.f32 %v10932_v56, %v10524_v59  ;;  %v1828_v17 = vld [vmem:[%s10186_s21 + $0x114] sm:$0xff] }
 0x19c   : > { %v947_v30 = vpop.f32.mrf.mxu0  ;;  %9326 = vmatmul.mubr.msk.bf16.gmra.mxu0 %vm15516_vm2, %v1501_v20  ;;  %v9258_v19 = vpop.f32.mrf.mxu1 }
 0x19d   : > { %v1085_v60 = vadd.f32 %v947_v30, %v646_v36  ;;  %9329 = vmatprep.mubr.msk.bf16.mxu0 %vm10135_vm1, %v15511_v1  ;;  %v1475_v19 = vld [vmem:[%s10186_s21 + $0xa3] sm:$0xff] }
 0x19e   : > { %v9151_v54 = vpop.f32.mrf.mxu0  ;;  %v11029_v48 = vpop.f32.mrf.mxu1  ;;  %9436 = vmatmul.mubr.msk.bf16.gmra.mxu1 %vm15516_vm2, %v11017_v28 }
 0x19f   : > { %v11027_v34 = vadd.f32 %v10838_v51, %v1085_v60  ;;  %9439 = vmatprep.mubr.msk.bf16.mxu1 %vm10135_vm1, %v15511_v1  ;;  %v654_v51 = vadd.f32 %v10942_v13, %v10534_v3  ;;  %v11044_v60 = vpack.c.bf16 %v1829_v21, %v1828_v17  ;;  %v1476_v54 = vld [vmem:[%s10186_s21 + $0xab] sm:$0xff]  ;;  %v657_v13 = vadd.f32 %v10953_v0, %v10544_v8 }
 0x1a0   : > { %v950_v20 = vpop.f32.mrf.mxu0  ;;  %v9261_v36 = vpop.f32.mrf.mxu1  ;;  %v1503_v17 = vpack.c.bf16 %v1476_v54, %v1475_v19  ;;  %v1830_v21 = vld [vmem:[%s10186_s21 + $0x124] sm:$0xff]  ;;  %v1477_v19 = vld [vmem:[%s10186_s21 + $0xb3] sm:$0xff]  ;;  %v1478_v54 = vld [vmem:[%s10186_s21 + $0xbb] sm:$0xff] }
 0x1a1   : > { %v1086_v45 = vadd.f32 %v950_v20, %v649_v37 }
 0x1a2   : > { %v9152_v59 = vpop.f32.mrf.mxu0  ;;  %v11042_v30 = vpop.f32.mrf.mxu1 }
 0x1a3   : > { %v11040_v56 = vadd.f32 %v10850_v22, %v1086_v45  ;;  %v1831_v45 = vld [vmem:[%s10186_s21 + $0x12c] sm:$0xff] }
 0x1a4   : > { %v955_v40 = vpop.f32.mrf.mxu0  ;;  %9330 = vmatmul.mubr.msk.bf16.gmra.mxu0 %vm15516_vm2, %v1502_v33  ;;  %v9262_v37 = vpop.f32.mrf.mxu1 }
 0x1a5   : > { %v1087_v61 = vadd.f32 %v955_v40, %v654_v51  ;;  %9333 = vmatprep.mubr.msk.bf16.mxu0 %vm10135_vm1, %v15511_v1  ;;  %v11069_v51 = vpack.c.bf16 %v1831_v45, %v1830_v21 }
 0x1a6   : > { %v9155_v3 = vpop.f32.mrf.mxu0  ;;  %v11056_v20 = vpop.f32.mrf.mxu1  ;;  %9440 = vmatmul.mubr.msk.bf16.gmra.mxu1 %vm15516_vm2, %v11044_v60 }
 0x1a7   : > { %v11054_v22 = vadd.f32 %v10863_v46, %v1087_v61  ;;  %9443 = vmatprep.mubr.msk.bf16.mxu1 %vm10135_vm1, %v15511_v1 }
 0x1a8   : > { %v958_v33 = vpop.f32.mrf.mxu0  ;;  %v9265_v59 = vpop.f32.mrf.mxu1 }
 0x1a9   : > { %v1088_v36 = vadd.f32 %v958_v33, %v657_v13 }
 0x1aa   : > { %v9156_v8 = vpop.f32.mrf.mxu0  ;;  %v11067_v0 = vpop.f32.mrf.mxu1 }
 0x1ab   : > { %v11065_v46 = vadd.f32 %v10871_v38, %v1088_v36 }
 0x1ac   : > { %v963_v40 = vpop.f32.mrf.mxu0  ;;  %9334 = vmatmul.mubr.msk.bf16.gmra.mxu0 %vm15516_vm2, %v1503_v17  ;;  %v9266_v37 = vpop.f32.mrf.mxu1  ;;  %v1504_v17 = vpack.c.bf16 %v1478_v54, %v1477_v19  ;;  %v1479_v19 = vld [vmem:[%s10186_s21 + $0xc3] sm:$0xff] }
 0x1ad   : > { %v1089_v61 = vadd.f32 %v963_v40, %v10556_v16  ;;  %9337 = vmatprep.mubr.msk.bf16.mxu0 %vm10135_vm1, %v15511_v1  ;;  %v1832_v16 = vld [vmem:[%s10186_s21 + $0x134] sm:$0x3] }
 0x1ae   : > { %v9159_v3 = vpop.f32.mrf.mxu0  ;;  %v11080_v13 = vpop.f32.mrf.mxu1  ;;  %9444 = vmatmul.mubr.msk.bf16.gmra.mxu1 %vm15516_vm2, %v11069_v51  ;;  %v1851_v8 = vpack.c.bf16 %v1832_v16, %v1832_v16  ;;  %v2475_v16 = vld [vmem:[%s10186_s21 + $0x2d] sm:$0xff] }
 0x1af   : > { %v11078_v38 = vadd.f32 %v10882_v50, %v1089_v61  ;;  %9447 = vmatprep.mubr.msk.bf16.mxu1 %vm10135_vm1, %v15511_v1 }
 0x1b0   : > { %v966_v33 = vpop.f32.mrf.mxu0  ;;  %v9269_v45 = vpop.f32.mrf.mxu1 }
 0x1b1   : > { %v1090_v21 = vadd.f32 %v966_v33, %v10569_v63  ;;  %v1480_v63 = vld [vmem:[%s10186_s21 + $0xcb] sm:$0xff] }
 0x1b2   : > { %v9160_v36 = vpop.f32.mrf.mxu0  ;;  %v11091_v59 = vpop.f32.mrf.mxu1 }
 0x1b3   : > { %v11089_v50 = vadd.f32 %v10892_v52, %v1090_v21 }
 0x1b4   : > { %v971_v40 = vpop.f32.mrf.mxu0  ;;  %9338 = vmatmul.mubr.msk.bf16.gmra.mxu0 %vm15516_vm2, %v1504_v17  ;;  %v9270_v54 = vpop.f32.mrf.mxu1  ;;  %v1505_v17 = vpack.c.bf16 %v1480_v63, %v1479_v19  ;;  %v1481_v63 = vld [vmem:[%s10186_s21 + $0xd3] sm:$0xff] }
 0x1b5   : > { %v1091_v61 = vadd.f32 %v971_v40, %v10578_v32  ;;  %9341 = vmatprep.mubr.msk.bf16.mxu0 %vm10135_vm1, %v15511_v1  ;;  %v2474_v32 = vld [vmem:[%s10186_s21 + $0x25] sm:$0xff] }
 0x1b6   : > { %v9163_v37 = vpop.f32.mrf.mxu0  ;;  %v11102_v3 = vpop.f32.mrf.mxu1  ;;  %9448 = vmatmul.mubr.msk.bf16.gmra.mxu1 %vm15516_vm2, %v1851_v8  ;;  %v2511_v8 = vpack.c.bf16 %v2475_v16, %v2474_v32  ;;  %v2477_v16 = vld [vmem:[%s10186_s21 + $0x3d] sm:$0xff] }
 0x1b7   : > { %v11100_v52 = vadd.f32 %v10903_v62, %v1091_v61  ;;  %9531 = vmatprep.mubr.msk.bf16.mxu1 %vm10135_vm1, %v15511_v1 }
 0x1b8   : > { %v974_v33 = vpop.f32.mrf.mxu0  ;;  %v9273_v45 = vpop.f32.mrf.mxu1 }
 0x1b9   : > { %v1092_v21 = vadd.f32 %v974_v33, %v10591_v6  ;;  %v1482_v6 = vld [vmem:[%s10186_s21 + $0xdb] sm:$0xff] }
 0x1ba   : > { %v9164_v36 = vpop.f32.mrf.mxu0  ;;  %v11113_v40 = vpop.f32.mrf.mxu1 }
 0x1bb   : > { %v11111_v62 = vadd.f32 %v10917_v27, %v1092_v21 }
 0x1bc   : > { %v979_v61 = vpop.f32.mrf.mxu0  ;;  %9342 = vmatmul.mubr.msk.bf16.gmra.mxu0 %vm15516_vm2, %v1505_v17  ;;  %v9274_v54 = vpop.f32.mrf.mxu1  ;;  %v1506_v17 = vpack.c.bf16 %v1482_v6, %v1481_v63  ;;  %v1483_v6 = vld [vmem:[%s10186_s21 + $0xe3] sm:$0xff] }
 0x1bd   : > { %v1093_v19 = vadd.f32 %v979_v61, %v10599_v44  ;;  %9345 = vmatprep.mubr.msk.bf16.mxu0 %vm10135_vm1, %v15511_v1  ;;  %v2476_v44 = vld [vmem:[%s10186_s21 + $0x35] sm:$0xff] }
 0x1be   : > { %v9167_v37 = vpop.f32.mrf.mxu0  ;;  %v11124_v33 = vpop.f32.mrf.mxu1  ;;  %9532 = vmatmul.mubr.msk.bf16.vlgmr.msra.gmra.mxu1 %vm15516_vm2, %v2511_v8  ;;  %v2512_v8 = vpack.c.bf16 %v2477_v16, %v2476_v44  ;;  %v2479_v16 = vld [vmem:[%s10186_s21 + $0x4d] sm:$0xff] }
 0x1bf   : > { %v11122_v27 = vadd.f32 %v10928_v31, %v1093_v19  ;;  %9535 = vmatprep.mubr.msk.bf16.mxu1 %vm10135_vm1, %v15511_v1 }
 0x1c0   : > { %v982_v32 = vpop.f32.mrf.mxu0  ;;  %v9277_v45 = vpop.f32.mrf.mxu1 }
 0x1c1   : > { %v1094_v21 = vadd.f32 %v982_v32, %v10612_v12  ;;  %v1484_v12 = vld [vmem:[%s10186_s21 + $0xeb] sm:$0xff] }
 0x1c2   : > { %v9168_v36 = vpop.f32.mrf.mxu0  ;;  %v11135_v61 = vpop.f32.mrf.mxu1 }
 0x1c3   : > { %v11133_v31 = vadd.f32 %v10938_v58, %v1094_v21 }
 0x1c4   : > { %v987_v19 = vpop.f32.mrf.mxu0  ;;  %9346 = vmatmul.mubr.msk.bf16.gmra.mxu0 %vm15516_vm2, %v1506_v17  ;;  %v9278_v54 = vpop.f32.mrf.mxu1  ;;  %v1507_v17 = vpack.c.bf16 %v1484_v12, %v1483_v6  ;;  %v1485_v12 = vld [vmem:[%s10186_s21 + $0xf3] sm:$0xff] }
 0x1c5   : > { %v1095_v63 = vadd.f32 %v987_v19, %v10621_v5  ;;  %9349 = vmatprep.mubr.msk.bf16.mxu0 %vm10135_vm1, %v15511_v1  ;;  %v2478_v5 = vld [vmem:[%s10186_s21 + $0x45] sm:$0xff] }
 0x1c6   : > { %v9171_v37 = vpop.f32.mrf.mxu0  ;;  %v11146_v32 = vpop.f32.mrf.mxu1  ;;  %9536 = vmatmul.mubr.msk.bf16.gmra.mxu1 %vm15516_vm2, %v2512_v8  ;;  %v2513_v8 = vpack.c.bf16 %v2479_v16, %v2478_v5  ;;  %v2481_v16 = vld [vmem:[%s10186_s21 + $0x5d] sm:$0xff] }
 0x1c7   : > { %v11144_v58 = vadd.f32 %v10949_v43, %v1095_v63  ;;  %9539 = vmatprep.mubr.msk.bf16.mxu1 %vm10135_vm1, %v15511_v1 }
 0x1c8   : > { %v990_v44 = vpop.f32.mrf.mxu0  ;;  %v9281_v45 = vpop.f32.mrf.mxu1 }
 0x1c9   : > { %v1096_v21 = vadd.f32 %v990_v44, %v10634_v18  ;;  %v1486_v18 = vld [vmem:[%s10186_s21 + $0xfb] sm:$0xff] }
 0x1ca   : > { %v9172_v36 = vpop.f32.mrf.mxu0  ;;  %v11157_v19 = vpop.f32.mrf.mxu1 }
 0x1cb   : > { %v11155_v43 = vadd.f32 %v10961_v55, %v1096_v21 }
 0x1cc   : > { %v995_v63 = vpop.f32.mrf.mxu0  ;;  %9350 = vmatmul.mubr.msk.bf16.gmra.mxu0 %vm15516_vm2, %v1507_v17  ;;  %v9282_v54 = vpop.f32.mrf.mxu1  ;;  %v1508_v17 = vpack.c.bf16 %v1486_v18, %v1485_v12  ;;  %v1487_v18 = vld [vmem:[%s10186_s21 + $0x103] sm:$0xff] }
 0x1cd   : > { %v1097_v6 = vadd.f32 %v995_v63, %v10641_v23  ;;  %9353 = vmatprep.mubr.msk.bf16.mxu0 %vm10135_vm1, %v15511_v1  ;;  %v2480_v23 = vld [vmem:[%s10186_s21 + $0x55] sm:$0xff] }
 0x1ce   : > { %v9175_v37 = vpop.f32.mrf.mxu0  ;;  %v11168_v44 = vpop.f32.mrf.mxu1  ;;  %9540 = vmatmul.mubr.msk.bf16.gmra.mxu1 %vm15516_vm2, %v2513_v8  ;;  %v2514_v8 = vpack.c.bf16 %v2481_v16, %v2480_v23  ;;  %v2483_v16 = vld [vmem:[%s10186_s21 + $0x6d] sm:$0xff] }
 0x1cf   : > { %v11166_v55 = vadd.f32 %v10975_v47, %v1097_v6  ;;  %9543 = vmatprep.mubr.msk.bf16.mxu1 %vm10135_vm1, %v15511_v1 }
 0x1d0   : > { %v998_v5 = vpop.f32.mrf.mxu0  ;;  %v9285_v45 = vpop.f32.mrf.mxu1 }
 0x1d1   : > { %v1098_v21 = vadd.f32 %v998_v5, %v10652_v26  ;;  %v1488_v26 = vld [vmem:[%s10186_s21 + $0x10b] sm:$0xff] }
 0x1d2   : > { %v9176_v36 = vpop.f32.mrf.mxu0  ;;  %v11179_v63 = vpop.f32.mrf.mxu1 }
 0x1d3   : > { %v11177_v47 = vadd.f32 %v10988_v9, %v1098_v21 }
 0x1d4   : > { %v1003_v6 = vpop.f32.mrf.mxu0  ;;  %9354 = vmatmul.mubr.msk.bf16.gmra.mxu0 %vm15516_vm2, %v1508_v17  ;;  %v9286_v54 = vpop.f32.mrf.mxu1  ;;  %v1509_v17 = vpack.c.bf16 %v1488_v26, %v1487_v18  ;;  %v1489_v26 = vld [vmem:[%s10186_s21 + $0x113] sm:$0xff] }
 0x1d5   : > { %v1099_v12 = vadd.f32 %v1003_v6, %v10659_v42  ;;  %9357 = vmatprep.mubr.msk.bf16.mxu0 %vm10135_vm1, %v15511_v1  ;;  %v2482_v42 = vld [vmem:[%s10186_s21 + $0x65] sm:$0xff] }
 0x1d6   : > { %v9179_v37 = vpop.f32.mrf.mxu0  ;;  %v11190_v5 = vpop.f32.mrf.mxu1  ;;  %9544 = vmatmul.mubr.msk.bf16.gmra.mxu1 %vm15516_vm2, %v2514_v8  ;;  %v2515_v8 = vpack.c.bf16 %v2483_v16, %v2482_v42  ;;  %v2485_v16 = vld [vmem:[%s10186_s21 + $0x7d] sm:$0xff] }
 0x1d7   : > { %v11188_v9 = vadd.f32 %v11002_v7, %v1099_v12  ;;  %9547 = vmatprep.mubr.msk.bf16.mxu1 %vm10135_vm1, %v15511_v1 }
 0x1d8   : > { %v1006_v23 = vpop.f32.mrf.mxu0  ;;  %v9289_v45 = vpop.f32.mrf.mxu1 }
 0x1d9   : > { %v1100_v21 = vadd.f32 %v1006_v23, %v10671_v29  ;;  %v1490_v29 = vld [vmem:[%s10186_s21 + $0x11b] sm:$0xff] }
 0x1da   : > { %v9180_v36 = vpop.f32.mrf.mxu0  ;;  %v11201_v6 = vpop.f32.mrf.mxu1 }
 0x1db   : > { %v11199_v7 = vadd.f32 %v11015_v15, %v1100_v21 }
 0x1dc   : > { %v1011_v12 = vpop.f32.mrf.mxu0  ;;  %9358 = vmatmul.mubr.msk.bf16.gmra.mxu0 %vm15516_vm2, %v1509_v17  ;;  %v9290_v54 = vpop.f32.mrf.mxu1  ;;  %v1510_v17 = vpack.c.bf16 %v1490_v29, %v1489_v26  ;;  %v1491_v29 = vld [vmem:[%s10186_s21 + $0x123] sm:$0xff] }
 0x1dd   : > { %v1101_v18 = vadd.f32 %v1011_v12, %v10678_v4  ;;  %9361 = vmatprep.mubr.msk.bf16.mxu0 %vm10135_vm1, %v15511_v1  ;;  %v2484_v4 = vld [vmem:[%s10186_s21 + $0x75] sm:$0xff]  ;;  %v1492_v54 = vld [vmem:[%s10186_s21 + $0x12b] sm:$0xff] }
 0x1de   : > { %v9183_v37 = vpop.f32.mrf.mxu0  ;;  %v11212_v23 = vpop.f32.mrf.mxu1  ;;  %9548 = vmatmul.mubr.msk.bf16.gmra.mxu1 %vm15516_vm2, %v2515_v8 }
 0x1df   : > { %v11210_v15 = vadd.f32 %v11029_v48, %v1101_v18  ;;  %9551 = vmatprep.mubr.msk.bf16.mxu1 %vm10135_vm1, %v15511_v1  ;;  %v2516_v18 = vpack.c.bf16 %v2485_v16, %v2484_v4  ;;  %v1511_v16 = vpack.c.bf16 %v1492_v54, %v1491_v29  ;;  %v1493_v29 = vld [vmem:[%s10186_s21 + $0x133] sm:$0x3] }
 0x1e0   : > { %v1014_v42 = vpop.f32.mrf.mxu0  ;;  %v9293_v45 = vpop.f32.mrf.mxu1 }
 0x1e1   : > { %v1102_v21 = vadd.f32 %v1014_v42, %v10690_v39 }
 0x1e2   : > { %v9184_v36 = vpop.f32.mrf.mxu0  ;;  %v1417_v12 = vpop.f32.mrf.mxu1 }
 0x1e3   : > { %v11221_v48 = vadd.f32 %v11042_v30, %v1102_v21 }
 0x1e4   : > { %v1019_v8 = vpop.f32.mrf.mxu0  ;;  %9362 = vmatmul.mubr.msk.bf16.gmra.mxu0 %vm15516_vm2, %v1510_v17  ;;  %v9294_v39 = vpop.f32.mrf.mxu1  ;;  %v2487_v17 = vld [vmem:[%s10186_s21 + $0x8d] sm:$0xff] }
 0x1e5   : > { %v1103_v26 = vadd.f32 %v1019_v8, %v10699_v24  ;;  %9365 = vmatprep.mubr.msk.bf16.mxu0 %vm10135_vm1, %v15511_v1  ;;  %v2486_v24 = vld [vmem:[%s10186_s21 + $0x85] sm:$0xff] }
 0x1e6   : > { %v9187_v37 = vpop.f32.mrf.mxu0  ;;  %v11232_v30 = vpop.f32.mrf.mxu1  ;;  %9552 = vmatmul.mubr.msk.bf16.gmra.mxu1 %vm15516_vm2, %v2516_v18  ;;  %v2517_v18 = vpack.c.bf16 %v2487_v17, %v2486_v24 }
 0x1e7   : > { %v11230_v42 = vadd.f32 %v11056_v20, %v1103_v26  ;;  %9555 = vmatprep.mubr.msk.bf16.mxu1 %vm10135_vm1, %v15511_v1 }
 0x1e8   : > { %v1022_v4 = vpop.f32.mrf.mxu0  ;;  %v9377_v45 = vpop.f32.mrf.mxu1 }
 0x1e9   : > { %v1104_v21 = vadd.f32 %v1022_v4, %v10712_v53  ;;  %v1512_v4 = vpack.c.bf16 %v1493_v29, %v1493_v29 }
 0x1ea   : > { %v9188_v36 = vpop.f32.mrf.mxu0  ;;  %v11243_v20 = vpop.f32.mrf.mxu1 }
 0x1eb   : > { %v11241_v12 = vadd.f32 %v11067_v0, %v1104_v21 }
 0x1ec   : > { %v1027_v8 = vpop.f32.mrf.mxu0  ;;  %9366 = vmatmul.mubr.msk.bf16.gmra.mxu0 %vm15516_vm2, %v1511_v16  ;;  %v9378_v53 = vpop.f32.mrf.mxu1  ;;  %v2488_v16 = vld [vmem:[%s10186_s21 + $0x95] sm:$0xff] }
 0x1ed   : > { %v1105_v26 = vadd.f32 %v1027_v8, %v10721_v49  ;;  %9369 = vmatprep.mubr.msk.bf16.mxu0 %vm10135_vm1, %v15511_v1  ;;  %v2489_v49 = vld [vmem:[%s10186_s21 + $0x9d] sm:$0xff] }
 0x1ee   : > { %v9191_v54 = vpop.f32.mrf.mxu0  ;;  %v11253_v0 = vpop.f32.mrf.mxu1  ;;  %9556 = vmatmul.mubr.msk.bf16.gmra.mxu1 %vm15516_vm2, %v2517_v18  ;;  %v2518_v36 = vpack.c.bf16 %v2489_v49, %v2488_v16 }
 0x1ef   : > { %v11251_v39 = vadd.f32 %v11080_v13, %v1105_v26  ;;  %9559 = vmatprep.mubr.msk.bf16.mxu1 %vm10135_vm1, %v15511_v1 }
 0x1f0   : > { %v1030_v37 = vpop.f32.mrf.mxu0  ;;  %v9381_v17 = vpop.f32.mrf.mxu1 }
 0x1f1   : > { %v1106_v24 = vadd.f32 %v1030_v37, %v10734_v2  ;;  %v2491_v37 = vld [vmem:[%s10186_s21 + $0xad] sm:$0xff] }
 0x1f2   : > { %v9192_v21 = vpop.f32.mrf.mxu0  ;;  %v11264_v13 = vpop.f32.mrf.mxu1 }
 0x1f3   : > { %v11262_v45 = vadd.f32 %v11091_v59, %v1106_v24  ;;  %v8409_v59 = vld [vmem:[%s15495_s1 + $0x10] sm:$0x3] }
 0x1f4   : > { %v1035_v18 = vpop.f32.mrf.mxu0  ;;  %9370 = vmatmul.mubr.msk.bf16.gmra.mxu0 %vm15516_vm2, %v1512_v4  ;;  %v9382_v26 = vpop.f32.mrf.mxu1 }
 0x1f5   : > { %v1107_v8 = vadd.f32 %v1035_v18, %v10743_v11  ;;  %9453 = vmatprep.mubr.msk.bf16.mxu0 %vm10135_vm1, %v15511_v1  ;;  %v2490_v11 = vld [vmem:[%s10186_s21 + $0xa5] sm:$0xff] }
 0x1f6   : > { %v9195_v2 = vpop.f32.mrf.mxu0  ;;  %v11276_v53 = vpop.f32.mrf.mxu1  ;;  %9560 = vmatmul.mubr.msk.bf16.gmra.mxu1 %vm15516_vm2, %v2518_v36  ;;  %v2519_v21 = vpack.c.bf16 %v2491_v37, %v2490_v11  ;;  %v15605_v18 = vld [vmem:[#allocation4_spill] sm:$0xff]  ;;  %v2492_v11 = vld [vmem:[%s10186_s21 + $0xb5] sm:$0xff]  ;;  %v2493_v37 = vld [vmem:[%s10186_s21 + $0xbd] sm:$0xff] }
 0x1f7   : > { %v11271_v29 = vadd.f32 %v11102_v3, %v1107_v8  ;;  %9563 = vmatprep.mubr.msk.bf16.mxu1 %vm10135_vm1, %v15511_v1  ;;  %v2929_v3 = vsel %vm15514_vm0, %v8409_v59, 0  ;;  %v15606_v8 = vld [vmem:[#allocation8_spill] sm:$0xff] }
 0x1f8   : > { %v1038_v54 = vpop.f32.mrf.mxu0  ;;  %v9385_v16 = vpop.f32.mrf.mxu1 }
 0x1f9   : > { %v1108_v4 = vadd.f32 %v1038_v54, %v10756_v14 }
 0x1fa   : > { %v9196_v49 = vpop.f32.mrf.mxu0  ;;  %v11288_v17 = vpop.f32.mrf.mxu1 }
 0x1fb   : > { %v11286_v24 = vadd.f32 %v11113_v40, %v1108_v4  ;;  %v15607_v4 = vld [vmem:[#allocation9_spill] sm:$0xff] }
 0x1fc   : > { %v1043_v36 = vpop.f32.mrf.mxu0  ;;  %9454 = vmatmul.mubr.msk.bf16.vlgmr.msra.gmra.mxu0 %vm15516_vm2, %v15605_v18  ;;  %v9386_v14 = vpop.f32.mrf.mxu1  ;;  %v2520_v18 = vpack.c.bf16 %v2493_v37, %v2492_v11  ;;  %v2494_v11 = vld [vmem:[%s10186_s21 + $0xc5] sm:$0xff]  ;;  %v2495_v37 = vld [vmem:[%s10186_s21 + $0xcd] sm:$0xff] }
 0x1fd   : > { %v1109_v26 = vadd.f32 %v1043_v36, %v15606_v8  ;;  %9608 = vmatpush3.bf16.msra.mxu0 %v2929_v3  ;;  %9457 = vmatprep.mubr.msk.bf16.mxu0 %vm10135_vm1, %v15511_v1 }
 0x1fe   : > { %v9199_v2 = vpop.f32.mrf.mxu0  ;;  %v11298_v40 = vpop.f32.mrf.mxu1  ;;  %9564 = vmatmul.mubr.msk.bf16.gmra.mxu1 %vm15516_vm2, %v2519_v21  ;;  %v15608_v21 = vld [vmem:[#allocation5_spill] sm:$0xff] }
 0x1ff   : > { %v11296_v59 = vadd.f32 %v11124_v33, %v1109_v26  ;;  %9567 = vmatprep.mubr.msk.bf16.mxu1 %vm10135_vm1, %v15511_v1  ;;  %v15609_v26 = vld [vmem:[#allocation11_spill] sm:$0xff] }
 0x200   : > { %v1046_v54 = vpop.f32.mrf.mxu0  ;;  %v9389_v49 = vpop.f32.mrf.mxu1 }
 0x201   : > { %v1110_v16 = vadd.f32 %v1046_v54, %v15607_v4 }
 0x202   : > { %v9200_v3 = vpop.f32.mrf.mxu0  ;;  %v11309_v33 = vpop.f32.mrf.mxu1 }
 0x203   : > { %v11307_v36 = vadd.f32 %v11135_v61, %v1110_v16  ;;  %v15611_v16 = vld [vmem:[#allocation12_spill] sm:$0xff] }
 0x204   : > { %v1051_v8 = vpop.f32.mrf.mxu0  ;;  %9458 = vmatmul.mubr.msk.bf16.gmra.mxu0 %vm15516_vm2, %v15608_v21  ;;  %v9390_v2 = vpop.f32.mrf.mxu1 }
 0x205   : > { %v1111_v14 = vadd.f32 %v1051_v8, %v15609_v26  ;;  %9461 = vmatprep.mubr.msk.bf16.mxu0 %vm10135_vm1, %v15511_v1 }
 0x206   : > { %v9203_v54 = vpop.f32.mrf.mxu0  ;;  %v11319_v49 = vpop.f32.mrf.mxu1  ;;  %9568 = vmatmul.mubr.msk.bf16.gmra.mxu1 %vm15516_vm2, %v2520_v18  ;;  %v15613_v18 = vld [vmem:[#allocation6_spill] sm:$0xff] }
 0x207   : > { %v11317_v4 = vadd.f32 %v11146_v32, %v1111_v14  ;;  %9571 = vmatprep.mubr.msk.bf16.mxu1 %vm10135_vm1, %v15511_v1  ;;  %v2521_v14 = vpack.c.bf16 %v2495_v37, %v2494_v11  ;;  %v15614_v54 = vld [vmem:[#allocation14_spill] sm:$0xff] }
 0x208   : > { %v1054_v61 = vpop.f32.mrf.mxu0  ;;  %v9393_v8 = vpop.f32.mrf.mxu1  ;;  %v2496_v11 = vld [vmem:[%s10186_s21 + $0xd5] sm:$0xff]  ;;  %v2497_v37 = vld [vmem:[%s10186_s21 + $0xdd] sm:$0xff] }
 0x209   : > { %15610 = vst [vmem:[#allocation4_spill] sm:$0xff] %v11317_v4  ;;  %v1112_v3 = vadd.f32 %v1054_v61, %v15611_v16  ;;  %v15615_v4 = vmov 0.0  }
 0x20a   : > { %v9204_v21 = vpop.f32.mrf.mxu0  ;;  %v11330_v32 = vpop.f32.mrf.mxu1 }
 0x20b   : > { %v11328_v26 = vadd.f32 %v11157_v19, %v1112_v3  ;;  %v15617_v3 = vld [vmem:[#allocation15_spill] sm:$0xff] }
 0x20c   : > { %v1059_v2 = vpop.f32.mrf.mxu0  ;;  %9462 = vmatmul.mubr.msk.bf16.gmra.mxu0 %vm15516_vm2, %v15613_v18  ;;  %v9394_v61 = vpop.f32.mrf.mxu1 }
 0x20d   : > { %15612 = vst [vmem:[#allocation8_spill] sm:$0xff] %v11328_v26  ;;  %v1113_v1 = vadd.f32 %v1059_v2, %v15614_v54  ;;  %9465 = vmatprep.mubr.msk.bf16.mxu0 %vm10135_vm1, %v15615_v4 }
 0x20e   : > { %v9207_v16 = vpop.f32.mrf.mxu0  ;;  %v11340_v21 = vpop.f32.mrf.mxu1  ;;  %9572 = vmatmul.mubr.msk.bf16.gmra.mxu1 %vm15516_vm2, %v2521_v14  ;;  %v15619_v14 = vld [vmem:[#allocation7_spill] sm:$0xff] }
 0x20f   : > { %v11338_v8 = vadd.f32 %v11168_v44, %v1113_v1  ;;  %9575 = vmatprep.mubr.msk.bf16.mxu1 %vm10135_vm1, %v15615_v4  ;;  %v2522_v44 = vpack.c.bf16 %v2497_v37, %v2496_v11  ;;  %v2498_v11 = vld [vmem:[%s10186_s21 + $0xe5] sm:$0xff]  ;;  %v2499_v37 = vld [vmem:[%s10186_s21 + $0xed] sm:$0xff] }
 0x210   : > { %v1062_v19 = vpop.f32.mrf.mxu0  ;;  %v9397_v18 = vpop.f32.mrf.mxu1 }
 0x211   : > { %15616 = vst [vmem:[#allocation9_spill] sm:$0xff] %v11338_v8  ;;  %v1114_v2 = vadd.f32 %v1062_v19, %v15617_v3  ;;  %v15620_v8 = vld [vmem:[#allocation17_spill] sm:$0xff] }
 0x212   : > { %v9208_v54 = vpop.f32.mrf.mxu0  ;;  %v11351_v1 = vpop.f32.mrf.mxu1 }
 0x213   : > { %v11349_v61 = vadd.f32 %v11179_v63, %v1114_v2  ;;  %v15622_v2 = vld [vmem:[#allocation18_spill] sm:$0xff] }
 0x214   : > { %v1067_v16 = vpop.f32.mrf.mxu0  ;;  %9466 = vmatmul.mubr.msk.bf16.gmra.mxu0 %vm15516_vm2, %v15619_v14  ;;  %v9398_v19 = vpop.f32.mrf.mxu1 }
 0x215   : > { %15618 = vst [vmem:[#allocation5_spill] sm:$0xff] %v11349_v61  ;;  %v1115_v26 = vadd.f32 %v1067_v16, %v15620_v8  ;;  %9469 = vmatprep.mubr.msk.bf16.mxu0 %vm10135_vm1, %v15615_v4 }
 0x216   : > { %v9211_v3 = vpop.f32.mrf.mxu0  ;;  %v11361_v54 = vpop.f32.mrf.mxu1  ;;  %9576 = vmatmul.mubr.msk.bf16.gmra.mxu1 %vm15516_vm2, %v2522_v44  ;;  %v15623_v44 = vld [vmem:[#allocation10_spill] sm:$0xff] }
 0x217   : > { %v11359_v18 = vadd.f32 %v11190_v5, %v1115_v26  ;;  %9579 = vmatprep.mubr.msk.bf16.mxu1 %vm10135_vm1, %v15615_v4  ;;  %v2523_v26 = vpack.c.bf16 %v2499_v37, %v2498_v11  ;;  %v2500_v11 = vld [vmem:[%s10186_s21 + $0xf5] sm:$0xff]  ;;  %v2501_v37 = vld [vmem:[%s10186_s21 + $0xfd] sm:$0xff] }
 0x218   : > { %v1070_v63 = vpop.f32.mrf.mxu0  ;;  %v9401_v16 = vpop.f32.mrf.mxu1 }
 0x219   : > { %15621 = vst [vmem:[#allocation11_spill] sm:$0xff] %v11359_v18  ;;  %v1116_v8 = vadd.f32 %v1070_v63, %v15622_v2  ;;  %v15624_v18 = vld [vmem:[#allocation20_spill] sm:$0xff] }
 0x21a   : > { %v9212_v14 = vpop.f32.mrf.mxu0  ;;  %v11372_v5 = vpop.f32.mrf.mxu1 }
 0x21b   : > { %v11370_v19 = vadd.f32 %v11201_v6, %v1116_v8 }
 0x21c   : > { %v1075_v3 = vpop.f32.mrf.mxu0  ;;  %9470 = vmatmul.mubr.msk.bf16.gmra.mxu0 %vm15516_vm2, %v15623_v44  ;;  %v9402_v63 = vpop.f32.mrf.mxu1  ;;  %v2524_v44 = vpack.c.bf16 %v2501_v37, %v2500_v11  ;;  %v2502_v11 = vld [vmem:[%s10186_s21 + $0x105] sm:$0xff]  ;;  %v2503_v37 = vld [vmem:[%s10186_s21 + $0x10d] sm:$0xff] }
 0x21d   : > { %v1117_v61 = vadd.f32 %v1075_v3, %v15624_v18  ;;  %9473 = vmatprep.mubr.msk.bf16.mxu0 %vm10135_vm1, %v15615_v4 }
 0x21e   : > { %v9215_v2 = vpop.f32.mrf.mxu0  ;;  %v11382_v14 = vpop.f32.mrf.mxu1  ;;  %9580 = vmatmul.mubr.msk.bf16.gmra.mxu1 %vm15516_vm2, %v2523_v26 }
 0x21f   : > { %v11380_v16 = vadd.f32 %v11212_v23, %v1117_v61  ;;  %9583 = vmatprep.mubr.msk.bf16.mxu1 %vm10135_vm1, %v15615_v4  ;;  %v15625_v23 = vld [vmem:[#allocation13_spill] sm:$0xff] }
 0x220   : > { %v1078_v6 = vpop.f32.mrf.mxu0  ;;  %v9405_v18 = vpop.f32.mrf.mxu1 }
 0x222   : > { %v9216_v8 = vpop.f32.mrf.mxu0  ;;  %v11389_v3 = vpop.f32.mrf.mxu1 }
 0x224   : > { %v1609_v63 = vpop.f32.mrf.mxu0  ;;  %9474 = vmatmul.mubr.msk.bf16.gmra.mxu0 %vm15516_vm2, %v15625_v23  ;;  %v9406_v26 = vpop.f32.mrf.mxu1 }
 0x225   : > { %v1759_v61 = vadd.f32 %v1609_v63, %v10973_v41  ;;  %9477 = vmatprep.mubr.msk.bf16.mxu0 %vm10135_vm1, %v15615_v4 }
 0x226   : > { %v9299_v2 = vpop.f32.mrf.mxu0  ;;  %v11399_v18 = vpop.f32.mrf.mxu1  ;;  %9584 = vmatmul.mubr.msk.bf16.gmra.mxu1 %vm15516_vm2, %v2524_v44  ;;  %v15627_v44 = vld [vmem:[#allocation16_spill] sm:$0xff] }
 0x227   : > { %v11397_v6 = vadd.f32 %v11232_v30, %v1759_v61  ;;  %9587 = vmatprep.mubr.msk.bf16.mxu1 %vm10135_vm1, %v15615_v4  ;;  %v2525_v61 = vpack.c.bf16 %v2503_v37, %v2502_v11  ;;  %v2504_v11 = vld [vmem:[%s10186_s21 + $0x115] sm:$0xff]  ;;  %v2505_v37 = vld [vmem:[%s10186_s21 + $0x11d] sm:$0xff] }
 0x228   : > { %v1612_v8 = vpop.f32.mrf.mxu0  ;;  %v9409_v63 = vpop.f32.mrf.mxu1 }
 0x229   : > { %15626 = vst [vmem:[#allocation12_spill] sm:$0xff] %v11397_v6  ;;  %v1760_v41 = vadd.f32 %v1612_v8, %v10986_v57 }
 0x22a   : > { %v9300_v23 = vpop.f32.mrf.mxu0  ;;  %v11410_v30 = vpop.f32.mrf.mxu1 }
 0x22b   : > { %v11408_v26 = vadd.f32 %v11243_v20, %v1760_v41 }
 0x22c   : > { %v1617_v2 = vpop.f32.mrf.mxu0  ;;  %9478 = vmatmul.mubr.msk.bf16.gmra.mxu0 %vm15516_vm2, %v15627_v44  ;;  %v9410_v57 = vpop.f32.mrf.mxu1 }
 0x22d   : > { %v1761_v6 = vadd.f32 %v1617_v2, %v11000_v25  ;;  %9481 = vmatprep.mubr.msk.bf16.mxu0 %vm10135_vm1, %v15615_v4 }
 0x22e   : > { %v9303_v8 = vpop.f32.mrf.mxu0  ;;  %v11420_v23 = vpop.f32.mrf.mxu1  ;;  %9588 = vmatmul.mubr.msk.bf16.gmra.mxu1 %vm15516_vm2, %v2525_v61  ;;  %v15628_v61 = vld [vmem:[#allocation19_spill] sm:$0xff] }
 0x22f   : > { %v11418_v63 = vadd.f32 %v11253_v0, %v1761_v6  ;;  %9591 = vmatprep.mubr.msk.bf16.mxu1 %vm10135_vm1, %v15615_v4  ;;  %v2526_v6 = vpack.c.bf16 %v2505_v37, %v2504_v11  ;;  %v2506_v11 = vld [vmem:[%s10186_s21 + $0x125] sm:$0xff]  ;;  %v2507_v37 = vld [vmem:[%s10186_s21 + $0x12d] sm:$0xff] }
 0x230   : > { %v1620_v20 = vpop.f32.mrf.mxu0  ;;  %v9413_v41 = vpop.f32.mrf.mxu1 }
 0x231   : > { %v1762_v25 = vadd.f32 %v1620_v20, %v11013_v35 }
 0x232   : > { %v9304_v2 = vpop.f32.mrf.mxu0  ;;  %v11431_v0 = vpop.f32.mrf.mxu1 }
 0x233   : > { %v11429_v44 = vadd.f32 %v11264_v13, %v1762_v25 }
 0x234   : > { %v1625_v57 = vpop.f32.mrf.mxu0  ;;  %9482 = vmatmul.mubr.msk.bf16.gmra.mxu0 %vm15516_vm2, %v15628_v61  ;;  %v9414_v35 = vpop.f32.mrf.mxu1 }
 0x235   : > { %v1763_v8 = vadd.f32 %v1625_v57, %v11027_v34  ;;  %9485 = vmatprep.mubr.msk.bf16.mxu0 %vm10135_vm1, %v15615_v4 }
 0x236   : > { %v9307_v20 = vpop.f32.mrf.mxu0  ;;  %v11441_v2 = vpop.f32.mrf.mxu1  ;;  %9592 = vmatmul.mubr.msk.bf16.gmra.mxu1 %vm15516_vm2, %v2526_v6  ;;  %v15629_v6 = vld [vmem:[#allocation21_spill] sm:$0xff] }
 0x237   : > { %v11439_v41 = vadd.f32 %v11276_v53, %v1763_v8  ;;  %9595 = vmatprep.mubr.msk.bf16.mxu1 %vm10135_vm1, %v15615_v4  ;;  %v2527_v8 = vpack.c.bf16 %v2507_v37, %v2506_v11  ;;  %v2508_v11 = vld [vmem:[%s10186_s21 + $0x135] sm:$0xff]  ;;  %v2509_v37 = vld [vmem:[%s10186_s21 + $0x13d] sm:$0xff] }
 0x238   : > { %v1628_v13 = vpop.f32.mrf.mxu0  ;;  %v9417_v25 = vpop.f32.mrf.mxu1 }
 0x239   : > { %v1764_v34 = vadd.f32 %v1628_v13, %v11040_v56 }
 0x23a   : > { %v9308_v57 = vpop.f32.mrf.mxu0  ;;  %v11452_v53 = vpop.f32.mrf.mxu1 }
 0x23b   : > { %v11450_v61 = vadd.f32 %v11288_v17, %v1764_v34 }
 0x23c   : > { %v1633_v35 = vpop.f32.mrf.mxu0  ;;  %9486 = vmatmul.mubr.msk.bf16.gmra.mxu0 %vm15516_vm2, %v15629_v6  ;;  %v9418_v56 = vpop.f32.mrf.mxu1 }
 0x23d   : > { %v1765_v20 = vadd.f32 %v1633_v35, %v11054_v22  ;;  %9489 = vmatprep.mubr.msk.bf16.mxu0 %vm10135_vm1, %v15615_v4 }
 0x23e   : > { %v9311_v13 = vpop.f32.mrf.mxu0  ;;  %v11462_v57 = vpop.f32.mrf.mxu1  ;;  %9596 = vmatmul.mubr.msk.bf16.gmra.mxu1 %vm15516_vm2, %v2527_v8 }
 0x23f   : > { %v11460_v25 = vadd.f32 %v11298_v40, %v1765_v20  ;;  %9599 = vmatprep.mubr.msk.bf16.mxu1 %vm10135_vm1, %v15615_v4  ;;  %v2528_v20 = vpack.c.bf16 %v2509_v37, %v2508_v11  ;;  %v15631_v13 = vld [vmem:[#allocation22_spill] sm:$0xff]  ;;  %v2510_v11 = vld [vmem:[%s10186_s21 + $0x145] sm:$0x3] }
 0x240   : > { %v1636_v17 = vpop.f32.mrf.mxu0  ;;  %v9421_v34 = vpop.f32.mrf.mxu1 }
 0x241   : > { %15630 = vst [vmem:[#allocation6_spill] sm:$0xff] %v11460_v25  ;;  %v1766_v22 = vadd.f32 %v1636_v17, %v11065_v46 }
 0x242   : > { %v9312_v35 = vpop.f32.mrf.mxu0  ;;  %v11473_v40 = vpop.f32.mrf.mxu1 }
 0x243   : > { %v11471_v6 = vadd.f32 %v11309_v33, %v1766_v22 }
 0x244   : > { %v1641_v56 = vpop.f32.mrf.mxu0  ;;  %9490 = vmatmul.mubr.msk.bf16.gmra.mxu0 %vm15516_vm2, %v15631_v13  ;;  %v9422_v25 = vpop.f32.mrf.mxu1  ;;  %v15632_v13 = vld [vmem:[#allocation23_spill] sm:$0xff] }
 0x245   : > { %v1767_v8 = vadd.f32 %v1641_v56, %v11078_v38  ;;  %9493 = vmatprep.mubr.msk.bf16.mxu0 %vm10135_vm1, %v15615_v4 }
 0x246   : > { %v9315_v46 = vpop.f32.mrf.mxu0  ;;  %v11483_v34 = vpop.f32.mrf.mxu1  ;;  %9600 = vmatmul.mubr.msk.bf16.gmra.mxu1 %vm15516_vm2, %v2528_v20 }
 0x247   : > { %v11481_v17 = vadd.f32 %v11319_v49, %v1767_v8  ;;  %9603 = vmatprep.mubr.msk.bf16.mxu1 %vm10135_vm1, %v15615_v4  ;;  %v2529_v49 = vpack.c.bf16 %v2510_v11, %v2510_v11 }
 0x248   : > { %v1644_v33 = vpop.f32.mrf.mxu0  ;;  %v9425_v38 = vpop.f32.mrf.mxu1 }
 0x249   : > { %v1768_v37 = vadd.f32 %v1644_v33, %v11089_v50 }
 0x24a   : > { %v9316_v22 = vpop.f32.mrf.mxu0  ;;  %v11493_v25 = vpop.f32.mrf.mxu1 }
 0x24b   : > { %v11491_v35 = vadd.f32 %v11330_v32, %v1768_v37 }
 0x24c   : > { %v1649_v56 = vpop.f32.mrf.mxu0  ;;  %9494 = vmatmul.mubr.msk.bf16.gmra.mxu0 %vm15516_vm2, %v15632_v13  ;;  %v9426_v8 = vpop.f32.mrf.mxu1  ;;  %v15633_v13 = vld [vmem:[#allocation24_spill] sm:$0xff] }
 0x24d   : > { %v1769_v20 = vadd.f32 %v1649_v56, %v11100_v52  ;;  %9497 = vmatprep.mubr.msk.bf16.mxu0 %vm10135_vm1, %v15615_v4 }
 0x24e   : > { %v9319_v46 = vpop.f32.mrf.mxu0  ;;  %v11503_v33 = vpop.f32.mrf.mxu1  ;;  %9604 = vmatmul.mubr.msk.bf16.gmra.mxu1 %vm15516_vm2, %v2529_v49 }
 0x24f   : > { %v11501_v50 = vadd.f32 %v11340_v21, %v1769_v20 }
 0x250   : > { %v1652_v32 = vpop.f32.mrf.mxu0  ;;  %v9429_v37 = vpop.f32.mrf.mxu1 }
 0x251   : > { %v1770_v11 = vadd.f32 %v1652_v32, %v11111_v62 }
 0x252   : > { %v9320_v38 = vpop.f32.mrf.mxu0  ;;  %v11510_v52 = vpop.f32.mrf.mxu1 }
 0x253   : > { %v11508_v22 = vadd.f32 %v11351_v1, %v1770_v11 }
 0x254   : > { %v1657_v56 = vpop.f32.mrf.mxu0  ;;  %9498 = vmatmul.mubr.msk.bf16.gmra.mxu0 %vm15516_vm2, %v15633_v13  ;;  %v9430_v49 = vpop.f32.mrf.mxu1 }
 0x255   : > { %v1771_v21 = vadd.f32 %v1657_v56, %v11122_v27  ;;  %9501 = vmatprep.mubr.msk.bf16.mxu0 %vm10135_vm1, %v15615_v4  ;;  %v15634_v56 = vld [vmem:[#allocation25_spill] sm:$0xff] }
 0x256   : > { %v9323_v20 = vpop.f32.mrf.mxu0  ;;  %v11520_v8 = vpop.f32.mrf.mxu1 }
 0x257   : > { %v11518_v62 = vadd.f32 %v11361_v54, %v1771_v21 }
 0x258   : > { %v1660_v1 = vpop.f32.mrf.mxu0  ;;  %v9433_v32 = vpop.f32.mrf.mxu1 }
 0x259   : > { %v1772_v46 = vadd.f32 %v1660_v1, %v11133_v31 }
 0x25a   : > { %v9324_v11 = vpop.f32.mrf.mxu0  ;;  %v11526_v38 = vpop.f32.mrf.mxu1 }
 0x25b   : > { %v11524_v37 = vadd.f32 %v11372_v5, %v1772_v46 }
 0x25c   : > { %v1665_v27 = vpop.f32.mrf.mxu0  ;;  %9502 = vmatmul.mubr.msk.bf16.gmra.mxu0 %vm15516_vm2, %v15634_v56  ;;  %v9434_v54 = vpop.f32.mrf.mxu1 }
 0x25d   : > { %v1773_v13 = vadd.f32 %v1665_v27, %v11144_v58  ;;  %9505 = vmatprep.mubr.msk.bf16.mxu0 %vm10135_vm1, %v15615_v4 }
 0x25e   : > { %v9327_v21 = vpop.f32.mrf.mxu0  ;;  %v11536_v49 = vpop.f32.mrf.mxu1 }
 0x25f   : > { %v11534_v31 = vadd.f32 %v11382_v14, %v1773_v13 }
 0x260   : > { %v1668_v5 = vpop.f32.mrf.mxu0  ;;  %v9437_v1 = vpop.f32.mrf.mxu1 }
 0x261   : > { %v1774_v20 = vadd.f32 %v1668_v5, %v11155_v43 }
 0x262   : > { %v9328_v46 = vpop.f32.mrf.mxu0  ;;  %v11542_v11 = vpop.f32.mrf.mxu1 }
 0x263   : > { %v11540_v32 = vadd.f32 %v11389_v3, %v1774_v20 }
 0x264   : > { %v1673_v58 = vpop.f32.mrf.mxu0  ;;  %9506 = vmatmul.mubr.msk.bf16.gmra.mxu0 %vm15516_vm2, %v10990_v10  ;;  %v9438_v14 = vpop.f32.mrf.mxu1 }
 0x265   : > { %v1775_v27 = vadd.f32 %v1673_v58, %v11166_v55  ;;  %9509 = vmatprep.mubr.msk.bf16.mxu0 %vm10135_vm1, %v15615_v4 }
 0x266   : > { %v9331_v56 = vpop.f32.mrf.mxu0  ;;  %v11552_v13 = vpop.f32.mrf.mxu1 }
 0x267   : > { %v11550_v43 = vadd.f32 %v11399_v18, %v1775_v27 }
 0x268   : > { %v1676_v3 = vpop.f32.mrf.mxu0  ;;  %v9441_v21 = vpop.f32.mrf.mxu1 }
 0x269   : > { %v1776_v54 = vadd.f32 %v1676_v3, %v11177_v47 }
 0x26a   : > { %v9332_v5 = vpop.f32.mrf.mxu0  ;;  %v11558_v10 = vpop.f32.mrf.mxu1 }
 0x26b   : > { %v11556_v20 = vadd.f32 %v11410_v30, %v1776_v54 }
 0x26c   : > { %v1681_v55 = vpop.f32.mrf.mxu0  ;;  %9510 = vmatmul.mubr.msk.bf16.gmra.mxu0 %vm15516_vm2, %v11017_v28  ;;  %v9442_v18 = vpop.f32.mrf.mxu1 }
 0x26d   : > { %v1777_v1 = vadd.f32 %v1681_v55, %v11188_v9  ;;  %9513 = vmatprep.mubr.msk.bf16.mxu0 %vm10135_vm1, %v15615_v4 }
 0x26e   : > { %v9335_v46 = vpop.f32.mrf.mxu0  ;;  %v11568_v58 = vpop.f32.mrf.mxu1 }
 0x26f   : > { %v11566_v47 = vadd.f32 %v11420_v23, %v1777_v1 }
 0x270   : > { %v1684_v30 = vpop.f32.mrf.mxu0  ;;  %v9445_v14 = vpop.f32.mrf.mxu1 }
 0x271   : > { %v1778_v27 = vadd.f32 %v1684_v30, %v11199_v7 }
 0x272   : > { %v9336_v56 = vpop.f32.mrf.mxu0  ;;  %v11574_v28 = vpop.f32.mrf.mxu1 }
 0x273   : > { %v11572_v3 = vadd.f32 %v11431_v0, %v1778_v27  ;;  %v2170_v27 = vld [vmem:[%s10186_s21 + $0x13c] sm:$0xff] }
 0x274   : > { %v1689_v9 = vpop.f32.mrf.mxu0  ;;  %9514 = vmatmul.mubr.msk.bf16.gmra.mxu0 %vm15516_vm2, %v11044_v60  ;;  %v9446_v23 = vpop.f32.mrf.mxu1 }
 0x275   : > { %v1779_v54 = vadd.f32 %v1689_v9, %v11210_v15  ;;  %9517 = vmatprep.mubr.msk.bf16.mxu0 %vm10135_vm1, %v15615_v4 }
 0x276   : > { %v9339_v7 = vpop.f32.mrf.mxu0  ;;  %v11584_v0 = vpop.f32.mrf.mxu1 }
 0x277   : > { %v11582_v21 = vadd.f32 %v11441_v2, %v1779_v54  ;;  %v2169_v2 = vld [vmem:[%s10186_s21 + $0x134] sm:$0xff] }
 0x278   : > { %v1692_v5 = vpop.f32.mrf.mxu0  ;;  %v9449_v1 = vpop.f32.mrf.mxu1  ;;  %v2189_v54 = vpack.c.bf16 %v2170_v27, %v2169_v2 }
 0x279   : > { %v1780_v55 = vadd.f32 %v1692_v5, %v11221_v48 }
 0x27a   : > { %v9340_v18 = vpop.f32.mrf.mxu0  ;;  %v2095_v15 = vpop.f32.mrf.mxu1 }
 0x27b   : > { %v11588_v60 = vadd.f32 %v11452_v53, %v1780_v55 }
 0x27c   : > { %v1697_v46 = vpop.f32.mrf.mxu0  ;;  %9518 = vmatmul.mubr.msk.bf16.gmra.mxu0 %vm15516_vm2, %v11069_v51  ;;  %v9450_v14 = vpop.f32.mrf.mxu1 }
 0x27d   : > { %v1781_v30 = vadd.f32 %v1697_v46, %v11230_v42  ;;  %9521 = vmatprep.mubr.msk.bf16.mxu0 %vm10135_vm1, %v15615_v4 }
 0x27e   : > { %v9343_v48 = vpop.f32.mrf.mxu0  ;;  %v11600_v53 = vpop.f32.mrf.mxu1 }
 0x27f   : > { %v11598_v56 = vadd.f32 %v11462_v57, %v1781_v30  ;;  %v2171_v57 = vld [vmem:[%s10186_s21 + $0x144] sm:$0x3] }
 0x280   : > { %v1700_v9 = vpop.f32.mrf.mxu0  ;;  %v9533_v51 = vpop.f32.mrf.mxu1  ;;  %v2190_v30 = vpack.c.bf16 %v2171_v57, %v2171_v57 }
 0x281   : > { %v1782_v23 = vadd.f32 %v1700_v9, %v11241_v12 }
 0x282   : > { %v9344_v7 = vpop.f32.mrf.mxu0  ;;  %v11606_v5 = vpop.f32.mrf.mxu1 }
 0x283   : > { %v11604_v42 = vadd.f32 %v11473_v40, %v1782_v23  ;;  %v2814_v23 = vld [vmem:[%s10186_s21 + $0x2e] sm:$0xff] }
 0x284   : > { %v1705_v55 = vpop.f32.mrf.mxu0  ;;  %9522 = vmatmul.mubr.msk.bf16.gmra.mxu0 %vm15516_vm2, %v2189_v54  ;;  %v9534_v18 = vpop.f32.mrf.mxu1 }
 0x285   : > { %v1783_v1 = vadd.f32 %v1705_v55, %v11251_v39  ;;  %9525 = vmatprep.mubr.msk.bf16.mxu0 %vm10135_vm1, %v15615_v4 }
 0x286   : > { %v9347_v12 = vpop.f32.mrf.mxu0  ;;  %v11616_v40 = vpop.f32.mrf.mxu1 }
 0x287   : > { %v11614_v15 = vadd.f32 %v11483_v34, %v1783_v1  ;;  %v2813_v34 = vld [vmem:[%s10186_s21 + $0x26] sm:$0xff] }
 0x288   : > { %v1708_v46 = vpop.f32.mrf.mxu0  ;;  %v9537_v27 = vpop.f32.mrf.mxu1  ;;  %v2850_v1 = vpack.c.bf16 %v2814_v23, %v2813_v34 }
 0x289   : > { %v1784_v2 = vadd.f32 %v1708_v46, %v11262_v45  ;;  %v2816_v27 = vld [vmem:[%s10186_s21 + $0x3e] sm:$0xff] }
 0x28a   : > { %v9348_v14 = vpop.f32.mrf.mxu0  ;;  %v11622_v48 = vpop.f32.mrf.mxu1 }
 0x28b   : > { %v11620_v39 = vadd.f32 %v11493_v25, %v1784_v2 }
 0x28c   : > { %v1713_v9 = vpop.f32.mrf.mxu0  ;;  %9526 = vmatmul.mubr.msk.bf16.gmra.mxu0 %vm15516_vm2, %v2190_v30  ;;  %v9538_v51 = vpop.f32.mrf.mxu1 }
 0x28d   : > { %v1785_v54 = vadd.f32 %v1713_v9, %v11271_v29  ;;  %9609 = vmatprep.mubr.msk.bf16.mxu0 %vm10135_vm1, %v15615_v4 }
 0x28e   : > { %v9351_v45 = vpop.f32.mrf.mxu0  ;;  %v11633_v25 = vpop.f32.mrf.mxu1 }
 0x28f   : > { %v11631_v7 = vadd.f32 %v11503_v33, %v1785_v54  ;;  %v2815_v33 = vld [vmem:[%s10186_s21 + $0x36] sm:$0xff] }
 0x290   : > { %v1716_v55 = vpop.f32.mrf.mxu0  ;;  %v9541_v18 = vpop.f32.mrf.mxu1  ;;  %v2851_v34 = vpack.c.bf16 %v2816_v27, %v2815_v33 }
 0x291   : > { %v1786_v57 = vadd.f32 %v1716_v55, %v11286_v24 }
 0x292   : > { %v9352_v29 = vpop.f32.mrf.mxu0  ;;  %v11639_v46 = vpop.f32.mrf.mxu1 }
 0x293   : > { %v11637_v12 = vadd.f32 %v11510_v52, %v1786_v57  ;;  %v15635_v57 = vld [vmem:[#allocation4_spill] sm:$0xff] }
 0x294   : > { %v1721_v30 = vpop.f32.mrf.mxu0  ;;  %9610 = vmatmul.mubr.msk.bf16.vlgmr.msra.gmra.mxu0 %vm15516_vm2, %v2850_v1  ;;  %v9542_v14 = vpop.f32.mrf.mxu1  ;;  %v2818_v29 = vld [vmem:[%s10186_s21 + $0x4e] sm:$0xff] }
 0x295   : > { %v1787_v2 = vadd.f32 %v1721_v30, %v11296_v59  ;;  %9613 = vmatprep.mubr.msk.bf16.mxu0 %vm10135_vm1, %v15615_v4  ;;  %v15636_v14 = vld [vmem:[#allocation8_spill] sm:$0xff] }
 0x296   : > { %v9355_v24 = vpop.f32.mrf.mxu0  ;;  %v11650_v52 = vpop.f32.mrf.mxu1 }
 0x297   : > { %v11648_v9 = vadd.f32 %v11520_v8, %v1787_v2  ;;  %v2817_v8 = vld [vmem:[%s10186_s21 + $0x46] sm:$0xff] }
 0x298   : > { %v1724_v54 = vpop.f32.mrf.mxu0  ;;  %v9545_v51 = vpop.f32.mrf.mxu1  ;;  %v2852_v27 = vpack.c.bf16 %v2818_v29, %v2817_v8 }
 0x299   : > { %v1788_v23 = vadd.f32 %v1724_v54, %v11307_v36 }
 0x29a   : > { %v9356_v59 = vpop.f32.mrf.mxu0  ;;  %v11656_v55 = vpop.f32.mrf.mxu1 }
 0x29b   : > { %v11654_v45 = vadd.f32 %v11526_v38, %v1788_v23 }
 0x29c   : > { %v1729_v1 = vpop.f32.mrf.mxu0  ;;  %9614 = vmatmul.mubr.msk.bf16.gmra.mxu0 %vm15516_vm2, %v2851_v34  ;;  %v9546_v30 = vpop.f32.mrf.mxu1 }
 0x29d   : > { %v1789_v18 = vadd.f32 %v1729_v1, %v15635_v57  ;;  %9617 = vmatprep.mubr.msk.bf16.mxu0 %vm10135_vm1, %v15615_v4  ;;  %v15637_v1 = vld [vmem:[#allocation9_spill] sm:$0xff] }
 0x29e   : > { %v9359_v36 = vpop.f32.mrf.mxu0  ;;  %v11667_v38 = vpop.f32.mrf.mxu1 }
 0x29f   : > { %v11665_v2 = vadd.f32 %v11536_v49, %v1789_v18  ;;  %v2819_v49 = vld [vmem:[%s10186_s21 + $0x56] sm:$0xff]  ;;  %v2820_v18 = vld [vmem:[%s10186_s21 + $0x5e] sm:$0xff] }
 0x2a0   : > { %v1732_v33 = vpop.f32.mrf.mxu0  ;;  %v9549_v54 = vpop.f32.mrf.mxu1 }
 0x2a1   : > { %v1790_v24 = vadd.f32 %v1732_v33, %v15636_v14  ;;  %v2853_v33 = vpack.c.bf16 %v2820_v18, %v2819_v49  ;;  %v15638_v14 = vld [vmem:[#allocation5_spill] sm:$0xff] }
 0x2a2   : > { %v9360_v34 = vpop.f32.mrf.mxu0  ;;  %v11673_v51 = vpop.f32.mrf.mxu1 }
 0x2a3   : > { %v11671_v23 = vadd.f32 %v11542_v11, %v1790_v24 }
 0x2a4   : > { %v1737_v59 = vpop.f32.mrf.mxu0  ;;  %9618 = vmatmul.mubr.msk.bf16.gmra.mxu0 %vm15516_vm2, %v2852_v27  ;;  %v9550_v8 = vpop.f32.mrf.mxu1 }
 0x2a5   : > { %v1791_v57 = vadd.f32 %v1737_v59, %v15637_v1  ;;  %9621 = vmatprep.mubr.msk.bf16.mxu0 %vm10135_vm1, %v15615_v4  ;;  %v15640_v8 = vld [vmem:[#allocation11_spill] sm:$0xff] }
 0x2a6   : > { %v9363_v29 = vpop.f32.mrf.mxu0  ;;  %v11684_v11 = vpop.f32.mrf.mxu1 }
 0x2a7   : > { %v11682_v30 = vadd.f32 %v11552_v13, %v1791_v57  ;;  %v2821_v13 = vld [vmem:[%s10186_s21 + $0x66] sm:$0xff]  ;;  %v2822_v57 = vld [vmem:[%s10186_s21 + $0x6e] sm:$0xff] }
 0x2a8   : > { %v1740_v36 = vpop.f32.mrf.mxu0  ;;  %v9553_v24 = vpop.f32.mrf.mxu1 }
 0x2a9   : > { %v1792_v27 = vadd.f32 %v1740_v36, %v15638_v14 }
 0x2aa   : > { %v9364_v54 = vpop.f32.mrf.mxu0  ;;  %v11690_v59 = vpop.f32.mrf.mxu1 }
 0x2ab   : > { %v11688_v34 = vadd.f32 %v11558_v10, %v1792_v27  ;;  %v2854_v27 = vpack.c.bf16 %v2822_v57, %v2821_v13 }
 0x2ac   : > { %v1745_v1 = vpop.f32.mrf.mxu0  ;;  %9622 = vmatmul.mubr.msk.bf16.gmra.mxu0 %vm15516_vm2, %v2853_v33  ;;  %v9554_v49 = vpop.f32.mrf.mxu1 }
 0x2ad   : > { %15639 = vst [vmem:[#allocation14_spill] sm:$0xff] %v11688_v34  ;;  %v1793_v29 = vadd.f32 %v1745_v1, %v15640_v8  ;;  %9625 = vmatprep.mubr.msk.bf16.mxu0 %vm10135_vm1, %v15615_v4 }
 0x2ae   : > { %v9367_v18 = vpop.f32.mrf.mxu0  ;;  %v11701_v10 = vpop.f32.mrf.mxu1 }
 0x2af   : > { %v11699_v36 = vadd.f32 %v11568_v58, %v1793_v29  ;;  %v2823_v58 = vld [vmem:[%s10186_s21 + $0x76] sm:$0xff]  ;;  %v2824_v29 = vld [vmem:[%s10186_s21 + $0x7e] sm:$0xff] }
 0x2b0   : > { %v1748_v14 = vpop.f32.mrf.mxu0  ;;  %v9557_v24 = vpop.f32.mrf.mxu1 }
 0x2b1   : > { %v1794_v33 = vadd.f32 %v1748_v14, %v11370_v19  ;;  %v2855_v14 = vpack.c.bf16 %v2824_v29, %v2823_v58 }
 0x2b2   : > { %v9368_v54 = vpop.f32.mrf.mxu0  ;;  %v11707_v8 = vpop.f32.mrf.mxu1 }
 0x2b3   : > { %v11705_v1 = vadd.f32 %v11574_v28, %v1794_v33 }
 0x2b4   : > { %v1753_v34 = vpop.f32.mrf.mxu0  ;;  %9626 = vmatmul.mubr.msk.bf16.gmra.mxu0 %vm15516_vm2, %v2854_v27  ;;  %v9558_v19 = vpop.f32.mrf.mxu1 }
 0x2b5   : > { %15641 = vst [vmem:[#allocation15_spill] sm:$0xff] %v11705_v1  ;;  %v1795_v49 = vadd.f32 %v1753_v34, %v11380_v16  ;;  %9629 = vmatprep.mubr.msk.bf16.mxu0 %vm10135_vm1, %v15615_v4  ;;  %v15643_v34 = vld [vmem:[#allocation12_spill] sm:$0xff] }
 0x2b6   : > { %v9371_v13 = vpop.f32.mrf.mxu0  ;;  %v11718_v28 = vpop.f32.mrf.mxu1  ;;  %v2825_v19 = vld [vmem:[%s10186_s21 + $0x86] sm:$0xff] }
 0x2b7   : > { %v11716_v57 = vadd.f32 %v11584_v0, %v1795_v49  ;;  %v2826_v13 = vld [vmem:[%s10186_s21 + $0x8e] sm:$0xff] }
 0x2b8   : > { %v1756_v18 = vpop.f32.mrf.mxu0  ;;  %v9561_v33 = vpop.f32.mrf.mxu1 }
 0x2b9   : > { %15642 = vst [vmem:[#allocation7_spill] sm:$0xff] %v11716_v57  ;;  %v2856_v33 = vpack.c.bf16 %v2826_v13, %v2825_v19 }
 0x2ba   : > { %v9372_v27 = vpop.f32.mrf.mxu0  ;;  %v11720_v24 = vpop.f32.mrf.mxu1 }
 0x2bc   : > { %v2287_v16 = vpop.f32.mrf.mxu0  ;;  %9630 = vmatmul.mubr.msk.bf16.gmra.mxu0 %vm15516_vm2, %v2855_v14  ;;  %v9562_v0 = vpop.f32.mrf.mxu1 }
 0x2bd   : > { %v2437_v54 = vadd.f32 %v2287_v16, %v15643_v34  ;;  %9633 = vmatprep.mubr.msk.bf16.mxu0 %vm10135_vm1, %v15615_v4 }
 0x2be   : > { %v9455_v49 = vpop.f32.mrf.mxu0  ;;  %v11731_v29 = vpop.f32.mrf.mxu1 }
 0x2bf   : > { %v11729_v58 = vadd.f32 %v11600_v53, %v2437_v54  ;;  %v2827_v53 = vld [vmem:[%s10186_s21 + $0x96] sm:$0xff]  ;;  %v2828_v54 = vld [vmem:[%s10186_s21 + $0x9e] sm:$0xff] }
 0x2c0   : > { %v2290_v18 = vpop.f32.mrf.mxu0  ;;  %v9565_v27 = vpop.f32.mrf.mxu1 }
 0x2c1   : > { %v2438_v14 = vadd.f32 %v2290_v18, %v11408_v26  ;;  %v2857_v18 = vpack.c.bf16 %v2828_v54, %v2827_v53 }
 0x2c2   : > { %v9456_v16 = vpop.f32.mrf.mxu0  ;;  %v11737_v57 = vpop.f32.mrf.mxu1 }
 0x2c3   : > { %v11735_v34 = vadd.f32 %v11606_v5, %v2438_v14 }
 0x2c4   : > { %v2295_v1 = vpop.f32.mrf.mxu0  ;;  %9634 = vmatmul.mubr.msk.bf16.gmra.mxu0 %vm15516_vm2, %v2856_v33  ;;  %v9566_v19 = vpop.f32.mrf.mxu1 }
 0x2c5   : > { %v2439_v0 = vadd.f32 %v2295_v1, %v11418_v63  ;;  %9637 = vmatprep.mubr.msk.bf16.mxu0 %vm10135_vm1, %v15615_v4 }
 0x2c6   : > { %v9459_v26 = vpop.f32.mrf.mxu0  ;;  %v11748_v5 = vpop.f32.mrf.mxu1 }
 0x2c7   : > { %v11746_v13 = vadd.f32 %v11616_v40, %v2439_v0  ;;  %v2829_v40 = vld [vmem:[%s10186_s21 + $0xa6] sm:$0xff]  ;;  %v2830_v0 = vld [vmem:[%s10186_s21 + $0xae] sm:$0xff] }
 0x2c8   : > { %v2298_v49 = vpop.f32.mrf.mxu0  ;;  %v9569_v14 = vpop.f32.mrf.mxu1 }
 0x2c9   : > { %v2440_v33 = vadd.f32 %v2298_v49, %v11429_v44  ;;  %v2858_v49 = vpack.c.bf16 %v2830_v0, %v2829_v40 }
 0x2ca   : > { %v9460_v63 = vpop.f32.mrf.mxu0  ;;  %v11754_v27 = vpop.f32.mrf.mxu1 }
 0x2cb   : > { %v11752_v1 = vadd.f32 %v11622_v48, %v2440_v33 }
 0x2cc   : > { %v2303_v16 = vpop.f32.mrf.mxu0  ;;  %9638 = vmatmul.mubr.msk.bf16.gmra.mxu0 %vm15516_vm2, %v2857_v18  ;;  %v9570_v53 = vpop.f32.mrf.mxu1 }
 0x2cd   : > { %v2441_v19 = vadd.f32 %v2303_v16, %v11439_v41  ;;  %9641 = vmatprep.mubr.msk.bf16.mxu0 %vm10135_vm1, %v15615_v4  ;;  %v15646_v53 = vld [vmem:[#allocation6_spill] sm:$0xff] }
 0x2ce   : > { %v9463_v44 = vpop.f32.mrf.mxu0  ;;  %v11765_v48 = vpop.f32.mrf.mxu1 }
 0x2cf   : > { %v11763_v54 = vadd.f32 %v11633_v25, %v2441_v19  ;;  %v2831_v25 = vld [vmem:[%s10186_s21 + $0xb6] sm:$0xff]  ;;  %v2832_v19 = vld [vmem:[%s10186_s21 + $0xbe] sm:$0xff] }
 0x2d0   : > { %v2306_v26 = vpop.f32.mrf.mxu0  ;;  %v9573_v33 = vpop.f32.mrf.mxu1 }
 0x2d1   : > { %15644 = vst [vmem:[#allocation17_spill] sm:$0xff] %v11763_v54  ;;  %v2442_v18 = vadd.f32 %v2306_v26, %v11450_v61 }
 0x2d2   : > { %v9464_v41 = vpop.f32.mrf.mxu0  ;;  %v11771_v63 = vpop.f32.mrf.mxu1 }
 0x2d3   : > { %v11769_v14 = vadd.f32 %v11639_v46, %v2442_v18  ;;  %v2859_v18 = vpack.c.bf16 %v2832_v19, %v2831_v25 }
 0x2d4   : > { %v2311_v16 = vpop.f32.mrf.mxu0  ;;  %9642 = vmatmul.mubr.msk.bf16.gmra.mxu0 %vm15516_vm2, %v2858_v49  ;;  %v9574_v40 = vpop.f32.mrf.mxu1 }
 0x2d5   : > { %15645 = vst [vmem:[#allocation18_spill] sm:$0xff] %v11769_v14  ;;  %v2443_v44 = vadd.f32 %v2311_v16, %v15646_v53  ;;  %9645 = vmatprep.mubr.msk.bf16.mxu0 %vm10135_vm1, %v15615_v4 }
 0x2d6   : > { %v9467_v61 = vpop.f32.mrf.mxu0  ;;  %v11782_v46 = vpop.f32.mrf.mxu1 }
 0x2d7   : > { %v11780_v0 = vadd.f32 %v11650_v52, %v2443_v44  ;;  %v2833_v52 = vld [vmem:[%s10186_s21 + $0xc6] sm:$0xff]  ;;  %v2834_v44 = vld [vmem:[%s10186_s21 + $0xce] sm:$0xff] }
 0x2d8   : > { %v2314_v26 = vpop.f32.mrf.mxu0  ;;  %v9577_v33 = vpop.f32.mrf.mxu1 }
 0x2d9   : > { %15647 = vst [vmem:[#allocation10_spill] sm:$0xff] %v11780_v0  ;;  %v2444_v49 = vadd.f32 %v2314_v26, %v11471_v6  ;;  %v2860_v26 = vpack.c.bf16 %v2834_v44, %v2833_v52 }
 0x2da   : > { %v9468_v41 = vpop.f32.mrf.mxu0  ;;  %v11788_v53 = vpop.f32.mrf.mxu1 }
 0x2db   : > { %v11786_v16 = vadd.f32 %v11656_v55, %v2444_v49 }
 0x2dc   : > { %v2319_v14 = vpop.f32.mrf.mxu0  ;;  %9646 = vmatmul.mubr.msk.bf16.gmra.mxu0 %vm15516_vm2, %v2859_v18  ;;  %v9578_v25 = vpop.f32.mrf.mxu1 }
 0x2dd   : > { %15648 = vst [vmem:[#allocation20_spill] sm:$0xff] %v11786_v16  ;;  %v2445_v40 = vadd.f32 %v2319_v14, %v11481_v17  ;;  %9649 = vmatprep.mubr.msk.bf16.mxu0 %vm10135_vm1, %v15615_v4 }
 0x2de   : > { %v9471_v6 = vpop.f32.mrf.mxu0  ;;  %v11799_v55 = vpop.f32.mrf.mxu1 }
 0x2df   : > { %v11797_v19 = vadd.f32 %v11667_v38, %v2445_v40  ;;  %v2835_v38 = vld [vmem:[%s10186_s21 + $0xd6] sm:$0xff]  ;;  %v2836_v40 = vld [vmem:[%s10186_s21 + $0xde] sm:$0xff] }
 0x2e0   : > { %v2322_v61 = vpop.f32.mrf.mxu0  ;;  %v9581_v49 = vpop.f32.mrf.mxu1 }
 0x2e1   : > { %15649 = vst [vmem:[#allocation13_spill] sm:$0xff] %v11797_v19  ;;  %v2446_v18 = vadd.f32 %v2322_v61, %v11491_v35  ;;  %v2861_v61 = vpack.c.bf16 %v2836_v40, %v2835_v38 }
 0x2e2   : > { %v9472_v17 = vpop.f32.mrf.mxu0  ;;  %v11805_v33 = vpop.f32.mrf.mxu1 }
 0x2e3   : > { %v11803_v14 = vadd.f32 %v11673_v51, %v2446_v18 }
 0x2e4   : > { %v2327_v41 = vpop.f32.mrf.mxu0  ;;  %9650 = vmatmul.mubr.msk.bf16.gmra.mxu0 %vm15516_vm2, %v2860_v26  ;;  %v9582_v52 = vpop.f32.mrf.mxu1 }
 0x2e5   : > { %15650 = vst [vmem:[#allocation16_spill] sm:$0xff] %v11803_v14  ;;  %v2447_v25 = vadd.f32 %v2327_v41, %v11501_v50  ;;  %9653 = vmatprep.mubr.msk.bf16.mxu0 %vm10135_vm1, %v15615_v4 }
 0x2e6   : > { %v9475_v35 = vpop.f32.mrf.mxu0  ;;  %v11816_v51 = vpop.f32.mrf.mxu1 }
 0x2e7   : > { %v11814_v44 = vadd.f32 %v11684_v11, %v2447_v25  ;;  %v2837_v11 = vld [vmem:[%s10186_s21 + $0xe6] sm:$0xff]  ;;  %v2838_v25 = vld [vmem:[%s10186_s21 + $0xee] sm:$0xff] }
 0x2e8   : > { %v2330_v6 = vpop.f32.mrf.mxu0  ;;  %v9585_v18 = vpop.f32.mrf.mxu1 }
 0x2e9   : > { %15651 = vst [vmem:[#allocation19_spill] sm:$0xff] %v11814_v44  ;;  %v2448_v26 = vadd.f32 %v2330_v6, %v11508_v22  ;;  %v2862_v6 = vpack.c.bf16 %v2838_v25, %v2837_v11 }
 0x2ea   : > { %v9476_v50 = vpop.f32.mrf.mxu0  ;;  %v11822_v17 = vpop.f32.mrf.mxu1 }
 0x2eb   : > { %v11820_v49 = vadd.f32 %v11690_v59, %v2448_v26 }
 0x2ec   : > { %v2335_v41 = vpop.f32.mrf.mxu0  ;;  %9654 = vmatmul.mubr.msk.bf16.gmra.mxu0 %vm15516_vm2, %v2861_v61  ;;  %v9586_v38 = vpop.f32.mrf.mxu1 }
 0x2ed   : > { %15652 = vst [vmem:[#allocation21_spill] sm:$0xff] %v11820_v49  ;;  %v2449_v52 = vadd.f32 %v2335_v41, %v11518_v62  ;;  %9657 = vmatprep.mubr.msk.bf16.mxu0 %vm10135_vm1, %v15615_v4 }
 0x2ee   : > { %v9479_v22 = vpop.f32.mrf.mxu0  ;;  %v11833_v59 = vpop.f32.mrf.mxu1 }
 0x2ef   : > { %v11831_v40 = vadd.f32 %v11701_v10, %v2449_v52  ;;  %v2839_v10 = vld [vmem:[%s10186_s21 + $0xf6] sm:$0xff]  ;;  %v2840_v52 = vld [vmem:[%s10186_s21 + $0xfe] sm:$0xff] }
 0x2f0   : > { %v2338_v35 = vpop.f32.mrf.mxu0  ;;  %v9589_v26 = vpop.f32.mrf.mxu1 }
 0x2f1   : > { %15653 = vst [vmem:[#allocation22_spill] sm:$0xff] %v11831_v40  ;;  %v2450_v61 = vadd.f32 %v2338_v35, %v11524_v37  ;;  %v2863_v35 = vpack.c.bf16 %v2840_v52, %v2839_v10  ;;  %v3188_v52 = vlaneseq }
 0x2f2   : > { %v9480_v62 = vpop.f32.mrf.mxu0  ;;  %v11839_v50 = vpop.f32.mrf.mxu1 }
 0x2f3   : > { %v11837_v18 = vadd.f32 %v11707_v8, %v2450_v61 }
 0x2f4   : > { %v2343_v41 = vpop.f32.mrf.mxu0  ;;  %9658 = vmatmul.mubr.msk.bf16.gmra.mxu0 %vm15516_vm2, %v2862_v6  ;;  %v9590_v11 = vpop.f32.mrf.mxu1 }
 0x2f5   : > { %15654 = vst [vmem:[#allocation23_spill] sm:$0xff] %v11837_v18  ;;  %v2451_v38 = vadd.f32 %v2343_v41, %v11534_v31  ;;  %9661 = vmatprep.mubr.msk.bf16.mxu0 %vm10135_vm1, %v15615_v4 }
 0x2f6   : > { %v9483_v37 = vpop.f32.mrf.mxu0  ;;  %v11850_v8 = vpop.f32.mrf.mxu1 }
 0x2f7   : > { %v11848_v25 = vadd.f32 %v11718_v28, %v2451_v38  ;;  %v2841_v28 = vld [vmem:[%s10186_s21 + $0x106] sm:$0xff]  ;;  %v2842_v38 = vld [vmem:[%s10186_s21 + $0x10e] sm:$0xff] }
 0x2f8   : > { %v2346_v22 = vpop.f32.mrf.mxu0  ;;  %v9593_v61 = vpop.f32.mrf.mxu1 }
 0x2f9   : > { %15655 = vst [vmem:[#allocation24_spill] sm:$0xff] %v11848_v25  ;;  %v2452_v6 = vadd.f32 %v2346_v22, %v11540_v32  ;;  %v11870_v61 = vshrl.u32 %v3188_v52, 7 }
 0x2fa   : > { %v9484_v31 = vpop.f32.mrf.mxu0  ;;  %v11856_v62 = vpop.f32.mrf.mxu1 }
 0x2fb   : > { %v11854_v26 = vadd.f32 %v11720_v24, %v2452_v6  ;;  %v2864_v6 = vpack.c.bf16 %v2842_v38, %v2841_v28  ;;  %v2844_v28 = vld [vmem:[%s10186_s21 + $0x11e] sm:$0xff]  ;;  %v11884_v38 = vmul.u32.u64.low 3817748708, %v11870_v61  ;;  %v11885_v52 = vmul.u32.u64.high 3817748708, %v11870_v61, %v11884_v38 }
 0x2fc   : > { %v2351_v41 = vpop.f32.mrf.mxu0  ;;  %9662 = vmatmul.mubr.msk.bf16.gmra.mxu0 %vm15516_vm2, %v2863_v35  ;;  %v9594_v10 = vpop.f32.mrf.mxu1  ;;  %v11945_v18 = vadd.s32 56, %v11870_v61 }
 0x2fd   : > { %15656 = vst [vmem:[#allocation25_spill] sm:$0xff] %v11854_v26  ;;  %v2453_v11 = vadd.f32 %v2351_v41, %v11550_v43  ;;  %9665 = vmatprep.mubr.msk.bf16.mxu0 %vm10135_vm1, %v15615_v4 }
 0x2fe   : > { %v9487_v32 = vpop.f32.mrf.mxu0  ;;  %v11867_v37 = vpop.f32.mrf.mxu1 }
 0x2ff   : > { %v11865_v24 = vadd.f32 %v11731_v29, %v2453_v11  ;;  %v2843_v11 = vld [vmem:[%s10186_s21 + $0x116] sm:$0xff] }
 0x300   : > { %v2354_v22 = vpop.f32.mrf.mxu0  ;;  %v9597_v43 = vpop.f32.mrf.mxu1 }
 0x301   : > { %15657 = vst [vmem:[#allocation4_spill] sm:$0xff] %v11865_v24  ;;  %v2454_v35 = vadd.f32 %v2354_v22, %v11556_v20  ;;  %v2865_v43 = vpack.c.bf16 %v2844_v28, %v2843_v11 }
 0x302   : > { %v9488_v31 = vpop.f32.mrf.mxu0  ;;  %v11875_v10 = vpop.f32.mrf.mxu1 }
 0x303   : > { %v11873_v41 = vadd.f32 %v11737_v57, %v2454_v35  ;;  %v11888_v57 = vadd.s32 8, %v11870_v61 }
 0x304   : > { %v2359_v32 = vpop.f32.mrf.mxu0  ;;  %9666 = vmatmul.mubr.msk.bf16.gmra.mxu0 %vm15516_vm2, %v2864_v6  ;;  %v9598_v20 = vpop.f32.mrf.mxu1 }
 0x305   : > { %15658 = vst [vmem:[#allocation8_spill] sm:$0xff] %v11873_v41  ;;  %v2455_v29 = vadd.f32 %v2359_v32, %v11566_v47  ;;  %9669 = vmatprep.mubr.msk.bf16.mxu0 %vm10135_vm1, %v15615_v4  ;;  %v11897_v41 = vmul.u32.u64.low 3817748708, %v11888_v57  ;;  %v11898_v38 = vmul.u32.u64.high 3817748708, %v11888_v57, %v11897_v41 }
 0x306   : > { %v9491_v22 = vpop.f32.mrf.mxu0  ;;  %v11893_v6 = vpop.f32.mrf.mxu1  ;;  %v2845_v41 = vld [vmem:[%s10186_s21 + $0x126] sm:$0xff] }
 0x307   : > { %v11891_v35 = vadd.f32 %v11748_v5, %v2455_v29  ;;  %v11901_v22 = vadd.s32 16, %v11870_v61  ;;  %v3279_v40 = vshrl.u32 %v11898_v38, 4 }
 0x308   : > { %v2362_v47 = vpop.f32.mrf.mxu0  ;;  %v9601_v32 = vpop.f32.mrf.mxu1 }
 0x309   : > { %15659 = vst [vmem:[#allocation9_spill] sm:$0xff] %v11891_v35  ;;  %v2456_v31 = vadd.f32 %v2362_v47, %v11572_v3  ;;  %v11909_v35 = vadd.s32 24, %v11870_v61  ;;  %v11913_v3 = vadd.s32 32, %v11870_v61  ;;  %v2846_v47 = vld [vmem:[%s10186_s21 + $0x12e] sm:$0xff] }
 0x30a   : > { %v9492_v20 = vpop.f32.mrf.mxu0  ;;  %v11906_v29 = vpop.f32.mrf.mxu1 }
 0x30b   : > { %v11904_v5 = vadd.f32 %v11754_v27, %v2456_v31  ;;  %v3268_v31 = vshrl.u32 %v11885_v52, 4 }
 0x30c   : > { %v2367_v11 = vpop.f32.mrf.mxu0  ;;  %9670 = vmatmul.mubr.msk.bf16.gmra.mxu0 %vm15516_vm2, %v2865_v43  ;;  %v9602_v27 = vpop.f32.mrf.mxu1  ;;  %v11926_v43 = vadd.s32 40, %v11870_v61 }
 0x30d   : > { %15660 = vst [vmem:[#allocation5_spill] sm:$0xff] %v11904_v5  ;;  %v2457_v28 = vadd.f32 %v2367_v11, %v11582_v21  ;;  %9673 = vmatprep.mubr.msk.bf16.mxu0 %vm10135_vm1, %v15615_v4  ;;  %v11922_v20 = vmul.u32.u64.low 3817748708, %v11901_v22  ;;  %v11923_v5 = vmul.u32.u64.high 3817748708, %v11901_v22, %v11922_v20  ;;  %v11938_v27 = vadd.s32 48, %v11870_v61 }
 0x30e   : > { %v9495_v32 = vpop.f32.mrf.mxu0  ;;  %v11931_v21 = vpop.f32.mrf.mxu1  ;;  %v11934_v11 = vmul.u32.u64.low 3817748708, %v11909_v35  ;;  %v11935_v26 = vmul.u32.u64.high 3817748708, %v11909_v35, %v11934_v11  ;;  %v11941_v25 = vmul.u32.u64.low 3817748708, %v11913_v3  ;;  %v11942_v20 = vmul.u32.u64.high 3817748708, %v11913_v3, %v11941_v25 }
 0x30f   : > { %v11929_v24 = vadd.f32 %v11765_v48, %v2457_v28  ;;  %v2866_v32 = vpack.c.bf16 %v2846_v47, %v2845_v41  ;;  %v3269_v28 = vmul.u32 18, %v3268_v31  ;;  %v11971_v31 = vld [vmem:[%s10186_s21 + $0x146] sm:$0x3] }
 0x310   : > { %v2370_v52 = vpop.f32.mrf.mxu0  ;;  %v11950_v49 = vmul.u32.u64.low 3817748708, %v11926_v43  ;;  %v11951_v41 = vmul.u32.u64.high 3817748708, %v11926_v43, %v11950_v49  ;;  %v11957_v25 = vmul.u32.u64.low 3817748708, %v11938_v27  ;;  %v11958_v44 = vmul.u32.u64.high 3817748708, %v11938_v27, %v11957_v25 }
 0x311   : > { %15661 = vst [vmem:[#allocation11_spill] sm:$0xff] %v11929_v24  ;;  %v2458_v48 = vadd.f32 %v2370_v52, %v11588_v60  ;;  %v9605_v24 = vpop.f32.mrf.mxu1  ;;  %v2847_v49 = vld [vmem:[%s10186_s21 + $0x136] sm:$0xff]  ;;  %v11974_v52 = vsub.s32 %v11870_v61, %v3269_v28  ;;  %v3301_v16 = vshrl.u32 %v11935_v26, 4  ;;  %v3312_v28 = vshrl.u32 %v11942_v20, 4 }
 0x312   : > { %v9496_v11 = vpop.f32.mrf.mxu0  ;;  %v11962_v60 = vmul.u32.u64.low 3817748708, %v11945_v18  ;;  %v11963_v24 = vmul.u32.u64.high 3817748708, %v11945_v18, %v11962_v60 }
 0x313   : > { %v11954_v47 = vadd.f32 %v11771_v63, %v2458_v48  ;;  %v2773_v14 = vpop.f32.mrf.mxu1  ;;  %v2848_v63 = vld [vmem:[%s10186_s21 + $0x13e] sm:$0xff]  ;;  %v3280_v11 = vmul.u32 18, %v3279_v40  ;;  %vm3658_vm3 = vcmp.ne.s32.totalorder %v11974_v52, 0  ;;  %vm3694_vm4 = vcmp.lt.s32.totalorder %v11974_v52, 0 }
 0x314   : > { %v2375_v19 = vpop.f32.mrf.mxu0  ;;  %9674 = vmatmul.mubr.msk.bf16.gmra.mxu0 %vm15516_vm2, %v2866_v32  ;;  %v3290_v32 = vshrl.u32 %v11923_v5, 4  ;;  %v2867_v60 = vpack.c.bf16 %v2848_v63, %v2847_v49  ;;  %v8429_v40 = vld [vmem:[%s15496_s2 + $0x2] sm:$0x3]  ;;  %vm12080_vm11 = vmand %vm3694_vm4, %vm3658_vm3 }
 0x315   : > { %15662 = vst [vmem:[#allocation12_spill] sm:$0xff] %v11954_v47  ;;  %v2459_v38 = vadd.f32 %v2375_v19, %v11598_v56  ;;  %9677 = vmatprep.mubr.msk.bf16.mxu0 %vm10135_vm1, %v15615_v4  ;;  %v9606_v14 = vpop.f32.mrf.mxu1  ;;  %v11981_v56 = vadd.s32 64, %v11870_v61  ;;  %v2868_v47 = vpack.c.bf16 %v11971_v31, %v11971_v31  ;;  %10029 = vmatprep.subr.msk.bf16.mxu1 %vm15514_vm0, %v8429_v40  ;;  %v5014_v49 = vsel %vm15514_vm0, %v8429_v40, 0 }
 0x316   : > { %v9499_v48 = vpop.f32.mrf.mxu0  ;;  %v12002_v26 = vsub.s32 %v11888_v57, %v3280_v11  ;;  %v3291_v20 = vmul.u32 18, %v3290_v32  ;;  %v12006_v31 = vadd.s32 80, %v11870_v61  ;;  %9686 = vmatpush3.bf16.msra.mxu1 %v5014_v49  ;;  %v3302_v57 = vmul.u32 18, %v3301_v16 }
 0x317   : > { %v11978_v25 = vadd.f32 %v11782_v46, %v2459_v38  ;;  %v11992_v46 = vadd.s32 18, %v11974_v52  ;;  %v11995_v38 = vadd.s32 72, %v11870_v61  ;;  %v3334_v48 = vshrl.u32 %v11958_v44, 4 }
 0x318   : > { %v2378_v19 = vpop.f32.mrf.mxu0  ;;  %v3313_v11 = vmul.u32 18, %v3312_v28  ;;  %v12019_v32 = vadd.s32 88, %v11870_v61  ;;  %vm3659_vm5 = vcmp.ne.s32.totalorder %v12002_v26, 0  ;;  %v12033_v16 = vsub.s32 %v11901_v22, %v3291_v20 }
 0x319   : > { %15663 = vst [vmem:[#allocation6_spill] sm:$0xff] %v11978_v25  ;;  %v2460_v5 = vadd.f32 %v2378_v19, %v11604_v42  ;;  %v3323_v42 = vshrl.u32 %v11951_v41, 4  ;;  %v12013_v19 = vmul.u32.u64.low 3817748708, %v11981_v56  ;;  %v12014_v40 = vmul.u32.u64.high 3817748708, %v11981_v56, %v12013_v19 }
 0x31a   : > { %v9500_v63 = vpop.f32.mrf.mxu0  ;;  %v3345_v41 = vshrl.u32 %v11963_v24, 4  ;;  %v12036_v24 = vmul.u32.u64.low 3817748708, %v12006_v31  ;;  %v12037_v28 = vmul.u32.u64.high 3817748708, %v12006_v31, %v12036_v24  ;;  %vm3695_vm6 = vcmp.lt.s32.totalorder %v12002_v26, 0 }
 0x31b   : > { %v12009_v14 = vadd.f32 %v11788_v53, %v2460_v5  ;;  %v12025_v53 = vmul.u32.u64.low 3817748708, %v11995_v38  ;;  %v12026_v44 = vmul.u32.u64.high 3817748708, %v11995_v38, %v12025_v53  ;;  %v12029_v5 = vadd.s32 96, %v11870_v61  ;;  %vm12091_vm13 = vmand %vm3695_vm6, %vm3659_vm5 }
 0x31c   : > { %v2383_v63 = vpop.f32.mrf.mxu0  ;;  %9678 = vmatmul.mubr.msk.bf16.gmra.mxu0 %vm15516_vm2, %v2867_v60  ;;  %v3324_v19 = vmul.u32 18, %v3323_v42  ;;  %v12052_v24 = vsub.s32 %v11913_v3, %v3313_v11  ;;  %vm3660_vm7 = vcmp.ne.s32.totalorder %v12033_v16, 0  ;;  %vm3696_vm8 = vcmp.lt.s32.totalorder %v12033_v16, 0 }
 0x31d   : > { %15664 = vst [vmem:[#allocation26_spill] sm:$0xff] %v12009_v14  ;;  %v2461_v49 = vadd.f32 %v2383_v63, %v11614_v15  ;;  %9681 = vmatprep.mubr.msk.bf16.mxu0 %vm10135_vm1, %v15615_v4  ;;  %v3335_v63 = vmul.u32 18, %v3334_v48  ;;  %v12044_v4 = vsub.s32 %v11909_v35, %v3302_v57  ;;  %v3767_v48 = vadd.s32 18, %v12002_v26  ;;  %vm12108_vm15 = vmand %vm3696_vm8, %vm3660_vm7 }
 0x31e   : > { %v9503_v60 = vpop.f32.mrf.mxu0  ;;  %v12047_v14 = vmul.u32.u64.low 3817748708, %v12019_v32  ;;  %v12048_v22 = vmul.u32.u64.high 3817748708, %v12019_v32, %v12047_v14  ;;  %v12062_v35 = vadd.s32 104, %v11870_v61  ;;  %v3325_v3 = vsub.s32 %v11926_v43, %v3324_v19 }
 0x31f   : > { %v12040_v15 = vadd.f32 %v11799_v55, %v2461_v49  ;;  %v3346_v60 = vmul.u32 18, %v3345_v41  ;;  %v12055_v55 = vmul.u32.u64.low 3817748708, %v12029_v5  ;;  %v12056_v49 = vmul.u32.u64.high 3817748708, %v12029_v5, %v12055_v55 }
 0x320   : > { %v2386_v53 = vpop.f32.mrf.mxu0  ;;  %v3356_v57 = vshrl.u32 %v12014_v40, 4  ;;  %vm3661_vm9 = vcmp.ne.s32.totalorder %v12044_v4, 0  ;;  %vm3697_vm10 = vcmp.lt.s32.totalorder %v12044_v4, 0  ;;  %v3336_v41 = vsub.s32 %v11938_v27, %v3335_v63 }
 0x321   : > { %15665 = vst [vmem:[#allocation27_spill] sm:$0xff] %v12040_v15  ;;  %v2462_v20 = vadd.f32 %v2386_v53, %v11620_v39  ;;  %v3768_v39 = vadd.s32 18, %v12033_v16  ;;  %v3347_v53 = vsub.s32 %v11945_v18, %v3346_v60  ;;  %vm3662_vm12 = vcmp.ne.s32.totalorder %v12052_v24, 0  ;;  %vm12116_vm4 = vmand %vm3697_vm10, %vm3661_vm9 }
 0x322   : > { %v9504_v42 = vpop.f32.mrf.mxu0  ;;  %v3367_v40 = vshrl.u32 %v12026_v44, 4  ;;  %vm3698_vm14 = vcmp.lt.s32.totalorder %v12052_v24, 0  ;;  %v3378_v18 = vshrl.u32 %v12037_v28, 4  ;;  %vm3663_vm1 = vcmp.ne.s32.totalorder %v3325_v3, 0 }
 0x323   : > { %v12065_v14 = vadd.f32 %v11805_v33, %v2462_v20  ;;  %v12098_v27 = vmul.u32.u64.low 3817748708, %v12062_v35  ;;  %v12099_v63 = vmul.u32.u64.high 3817748708, %v12062_v35, %v12098_v27  ;;  %vm3699_vm3 = vcmp.lt.s32.totalorder %v3325_v3, 0  ;;  %vm12126_vm7 = vmand %vm3698_vm14, %vm3662_vm12 }
 0x324   : > { %v2391_v11 = vpop.f32.mrf.mxu0  ;;  %9682 = vmatmul.mubr.msk.bf16.gmra.mxu0 %vm15516_vm2, %v2868_v47  ;;  %v3769_v47 = vadd.s32 18, %v12044_v4  ;;  %v3357_v20 = vmul.u32 18, %v3356_v57  ;;  %vm3664_vm5 = vcmp.ne.s32.totalorder %v3336_v41, 0  ;;  %vm3700_vm6 = vcmp.lt.s32.totalorder %v3336_v41, 0  ;;  %vm12140_vm9 = vmand %vm3699_vm3, %vm3663_vm1 }
 0x325   : > { %15666 = vst [vmem:[#allocation28_spill] sm:$0xff] %v12065_v14  ;;  %v2463_v33 = vadd.f32 %v2391_v11, %v11631_v7  ;;  %vm3665_vm0 = vcmp.ne.s32.totalorder %v3347_v53, 0  ;;  %vm3701_vm8 = vcmp.lt.s32.totalorder %v3347_v53, 0  ;;  %v3368_v11 = vmul.u32 18, %v3367_v40  ;;  %vm12149_vm10 = vmand %vm3700_vm6, %vm3664_vm5 }
 0x326   : > { %v9507_v19 = vpop.f32.mrf.mxu0  ;;  %v12154_v43 = vsub.s32 %v11981_v56, %v3357_v20  ;;  %v12159_v14 = vsel %vm12091_vm13, %v3767_v48, %v12002_v26  ;;  %v12175_v7 = vsel %vm12116_vm4, %v3769_v47, %v12044_v4  ;;  %v3411_v4 = vshrl.u32 %v12099_v63, 4 }
 0x327   : > { %v12102_v60 = vadd.f32 %v11816_v51, %v2463_v33  ;;  %v3389_v51 = vshrl.u32 %v12048_v22, 4  ;;  %v3400_v33 = vshrl.u32 %v12056_v49, 4  ;;  %v12135_v22 = vsel %vm12080_vm11, %v11992_v46, %v11974_v52  ;;  %15684 = vst [vmem:[#allocation32_spill] sm:$0xff] %v12159_v14  ;;  %vm3737_vm11 = vmand %vm3701_vm8, %vm3665_vm0 }
 0x328   : > { %v2394_v55 = vpop.f32.mrf.mxu0  ;;  %15678 = vst [vmem:[#allocation30_spill] sm:$0xff] %v12135_v22  ;;  %v3772_v52 = vadd.s32 18, %v3336_v41  ;;  %v3773_v46 = vadd.s32 18, %v3347_v53  ;;  %15686 = vst [vmem:[#allocation34_spill] sm:$0xff] %v12175_v7  ;;  %v12178_v26 = vsub.s32 %v11995_v38, %v3368_v11  ;;  %vm3666_vm0 = vcmp.ne.s32.totalorder %v12154_v43, 0 }
 0x329   : > { %15671 = vst [vmem:[#allocation29_spill] sm:$0xff] %v12102_v60  ;;  %v2464_v42 = vadd.f32 %v2394_v55, %v11637_v12  ;;  %v3770_v12 = vadd.s32 18, %v12052_v24  ;;  %v3771_v55 = vadd.s32 18, %v3325_v3  ;;  %v3379_v60 = vmul.u32 18, %v3378_v18 }
 0x32a   : > { %v9508_v19 = vpop.f32.mrf.mxu0  ;;  %v3390_v18 = vmul.u32 18, %v3389_v51  ;;  %v3401_v48 = vmul.u32 18, %v3400_v33  ;;  %v12198_v38 = vsel %vm12149_vm10, %v3772_v52, %v3336_v41  ;;  %v12200_v20 = vsel %vm3737_vm11, %v3773_v46, %v3347_v53 }
 0x32b   : > { %v12145_v40 = vadd.f32 %v11822_v17, %v2464_v42  ;;  %v12164_v17 = vsel %vm12108_vm15, %v3768_v39, %v12033_v16  ;;  %v12169_v42 = vadd.s32 112, %v11870_v61  ;;  %v12183_v39 = vsel %vm12126_vm7, %v3770_v12, %v12052_v24  ;;  %15690 = vst [vmem:[#allocation38_spill] sm:$0xff] %v12198_v38  ;;  %15691 = vst [vmem:[#allocation39_spill] sm:$0xff] %v12200_v20 }
 0x32c   : > { %v2399_v19 = vpop.f32.mrf.mxu0  ;;  %15685 = vst [vmem:[#allocation33_spill] sm:$0xff] %v12164_v17  ;;  %15687 = vst [vmem:[#allocation35_spill] sm:$0xff] %v12183_v39  ;;  %v12187_v44 = vsel %vm12140_vm9, %v3771_v55, %v3325_v3  ;;  %v12203_v24 = vadd.s32 18, %v12154_v43  ;;  %vm3702_vm12 = vcmp.lt.s32.totalorder %v12154_v43, 0  ;;  %v12215_v41 = vadd.s32 120, %v11870_v61 }
 0x32d   : > { %15681 = vst [vmem:[#allocation31_spill] sm:$0xff] %v12145_v40  ;;  %v2465_v56 = vadd.f32 %v2399_v19, %v11648_v9  ;;  %15688 = vst [vmem:[#allocation36_spill] sm:$0xff] %v12187_v44  ;;  %v12190_v9 = vsub.s32 %v12006_v31, %v3379_v60  ;;  %v12208_v31 = vsub.s32 %v12019_v32, %v3390_v18  ;;  %vm3667_vm13 = vcmp.ne.s32.totalorder %v12178_v26, 0 }
 0x32e   : > { %v9511_v16 = vpop.f32.mrf.mxu0  ;;  %vm3703_vm14 = vcmp.lt.s32.totalorder %v12178_v26, 0  ;;  %v12221_v63 = vsub.s32 %v12029_v5, %v3401_v48  ;;  %v12224_v32 = vadd.s32 18, %v12178_v26  ;;  %v3412_v51 = vmul.u32 18, %v3411_v4  ;;  %vm12303_vm8 = vmand %vm3702_vm12, %vm3666_vm0 }
 0x32f   : > { %v12194_v47 = vadd.f32 %v11833_v59, %v2465_v56  ;;  %v12211_v59 = vmul.u32.u64.low 3817748708, %v12169_v42  ;;  %v12212_v3 = vmul.u32.u64.high 3817748708, %v12169_v42, %v12211_v59  ;;  %vm3668_vm15 = vcmp.ne.s32.totalorder %v12190_v9, 0  ;;  %vm12318_vm9 = vmand %vm3703_vm14, %vm3667_vm13 }
 0x330   : > { %v2402_v28 = vpop.f32.mrf.mxu0  ;;  %v12228_v57 = vadd.s32 128, %v11870_v61  ;;  %vm3704_vm1 = vcmp.lt.s32.totalorder %v12190_v9, 0  ;;  %v12238_v5 = vadd.s32 136, %v11870_v61  ;;  %vm3669_vm3 = vcmp.ne.s32.totalorder %v12208_v31, 0 }
 0x331   : > { %15689 = vst [vmem:[#allocation37_spill] sm:$0xff] %v12194_v47  ;;  %v2466_v53 = vadd.f32 %v2402_v28, %v11654_v45  ;;  %v12235_v45 = vadd.s32 18, %v12190_v9  ;;  %v12242_v12 = vmul.u32.u64.low 3817748708, %v12215_v41  ;;  %v12243_v27 = vmul.u32.u64.high 3817748708, %v12215_v41, %v12242_v12  ;;  %vm12332_vm10 = vmand %vm3704_vm1, %vm3668_vm15 }
 0x332   : > { %v9512_v60 = vpop.f32.mrf.mxu0  ;;  %v12246_v55 = vadd.s32 144, %v11870_v61  ;;  %vm3705_vm4 = vcmp.lt.s32.totalorder %v12208_v31, 0  ;;  %v12251_v49 = vadd.s32 18, %v12208_v31  ;;  %vm3670_vm5 = vcmp.ne.s32.totalorder %v12221_v63, 0 }
 0x333   : > { %v12231_v11 = vadd.f32 %v11839_v50, %v2466_v53  ;;  %v12255_v46 = vsub.s32 %v12062_v35, %v3412_v51  ;;  %v12258_v19 = vmul.u32.u64.low 3817748708, %v12228_v57  ;;  %v12259_v18 = vmul.u32.u64.high 3817748708, %v12228_v57, %v12258_v19  ;;  %vm12345_vm0 = vmand %vm3705_vm4, %vm3669_vm3 }
 0x334   : > { %v2407_v33 = vpop.f32.mrf.mxu0  ;;  %v12262_v56 = vadd.s32 152, %v11870_v61  ;;  %v12268_v48 = vmul.u32.u64.low 3817748708, %v12238_v5  ;;  %v12269_v16 = vmul.u32.u64.high 3817748708, %v12238_v5, %v12268_v48  ;;  %v12272_v4 = vadd.s32 160, %v11870_v61 }
 0x335   : > { %15692 = vst [vmem:[#allocation40_spill] sm:$0xff] %v12231_v11  ;;  %v2467_v50 = vadd.f32 %v2407_v33, %v11665_v2  ;;  %v3422_v35 = vshrl.u32 %v12212_v3, 4  ;;  %v12276_v59 = vmul.u32.u64.low 3817748708, %v12246_v55  ;;  %v12277_v53 = vmul.u32.u64.high 3817748708, %v12246_v55, %v12276_v59 }
 0x336   : > { %v9515_v52 = vpop.f32.mrf.mxu0  ;;  %v12280_v60 = vadd.s32 168, %v11870_v61  ;;  %vm3706_vm6 = vcmp.lt.s32.totalorder %v12221_v63, 0  ;;  %v3778_v51 = vadd.s32 18, %v12221_v63  ;;  %v12286_v33 = vadd.s32 176, %v11870_v61 }
 0x337   : > { %v12265_v2 = vadd.f32 %v11850_v8, %v2467_v50  ;;  %vm3671_vm7 = vcmp.ne.s32.totalorder %v12255_v46, 0  ;;  %v12290_v3 = vmul.u32.u64.low 3817748708, %v12262_v56  ;;  %v12291_v50 = vmul.u32.u64.high 3817748708, %v12262_v56, %v12290_v3  ;;  %vm12362_vm12 = vmand %vm3706_vm6, %vm3670_vm5 }
 0x338   : > { %v2410_v28 = vpop.f32.mrf.mxu0  ;;  %v12294_v52 = vadd.s32 184, %v11870_v61  ;;  %v12312_v59 = vadd.s32 192, %v11870_v61  ;;  %v3433_v3 = vshrl.u32 %v12243_v27, 4  ;;  %vm3707_vm11 = vcmp.lt.s32.totalorder %v12255_v46, 0 }
 0x339   : > { %15693 = vst [vmem:[#allocation41_spill] sm:$0xff] %v12265_v2  ;;  %v2468_v8 = vadd.f32 %v2410_v28, %v11671_v23  ;;  %v12308_v48 = vmul.u32.u64.low 3817748708, %v12272_v4  ;;  %v12309_v28 = vmul.u32.u64.high 3817748708, %v12272_v4, %v12308_v48  ;;  %vm12381_vm13 = vmand %vm3707_vm11, %vm3671_vm7 }
 0x33a   : > { %v9516_v12 = vpop.f32.mrf.mxu0  ;;  %v12352_v40 = vmul.u32.u64.low 3817748708, %v12294_v52  ;;  %v12353_v15 = vmul.u32.u64.high 3817748708, %v12294_v52, %v12352_v40 }
 0x33b   : > { %v12297_v19 = vadd.f32 %v11856_v62, %v2468_v8  ;;  %v3423_v8 = vmul.u32 18, %v3422_v35  ;;  %v12338_v35 = vmul.u32.u64.low 3817748708, %v12286_v33  ;;  %v12339_v47 = vmul.u32.u64.high 3817748708, %v12286_v33, %v12338_v35 }
 0x33c   : > { %v2415_v12 = vpop.f32.mrf.mxu0 }
 0x33d   : > { %15694 = vst [vmem:[#allocation42_spill] sm:$0xff] %v12297_v19  ;;  %v12324_v19 = vmul.u32.u64.low 3817748708, %v12280_v60  ;;  %v12325_v2 = vmul.u32.u64.high 3817748708, %v12280_v60, %v12324_v19  ;;  %v2469_v48 = vadd.f32 %v2415_v12, %v11682_v30  ;;  %v3444_v12 = vshrl.u32 %v12259_v18, 4 }
 0x33e   : > { %v9519_v27 = vpop.f32.mrf.mxu0  ;;  %v3779_v19 = vadd.s32 18, %v12255_v46  ;;  %v12368_v0 = vmul.u32.u64.low 3817748708, %v12312_v59  ;;  %v12369_v18 = vmul.u32.u64.high 3817748708, %v12312_v59, %v12368_v0 }
 0x33f   : > { %v12356_v25 = vadd.f32 %v11867_v37, %v2469_v48  ;;  %v3455_v27 = vshrl.u32 %v12269_v16, 4  ;;  %v12375_v37 = vsel %vm12303_vm8, %v12203_v24, %v12154_v43  ;;  %v12386_v16 = vsub.s32 %v12169_v42, %v3423_v8 }
 0x340   : > { %v2418_v20 = vpop.f32.mrf.mxu0  ;;  %15706 = vst [vmem:[#allocation44_spill] sm:$0xff] %v12375_v37  ;;  %v3434_v48 = vmul.u32 18, %v3433_v3  ;;  %v3466_v0 = vshrl.u32 %v12277_v53, 4  ;;  %v12394_v43 = vsel %vm12318_vm9, %v12224_v32, %v12178_v26  ;;  %v12400_v24 = vsel %vm12332_vm10, %v12235_v45, %v12190_v9 }
 0x341   : > { %15703 = vst [vmem:[#allocation43_spill] sm:$0xff] %v12356_v25  ;;  %v15709_v25 = vld [vmem:[#allocation14_spill] sm:$0xff]  ;;  %15711 = vst [vmem:[#allocation45_spill] sm:$0xff] %v12400_v24  ;;  %v12403_v42 = vadd.s32 200, %v11870_v61  ;;  %v12414_v26 = vsel %vm12362_vm12, %v3778_v51, %v12221_v63  ;;  %v3477_v32 = vshrl.u32 %v12291_v50, 4  ;;  %v12423_v11 = vsel %vm12381_vm13, %v3779_v19, %v12255_v46 }
 0x342   : > { %v2470_v54 = vadd.f32 %v2418_v20, %v15709_v25  ;;  %15710 = vst [vmem:[#allocation14_spill] sm:$0xff] %v12394_v43  ;;  %v9520_v23 = vpop.f32.mrf.mxu0  ;;  %v12409_v25 = vsel %vm12345_vm0, %v12251_v49, %v12208_v31  ;;  %15713 = vst [vmem:[#allocation47_spill] sm:$0xff] %v12414_v26  ;;  %v3445_v20 = vmul.u32 18, %v3444_v12  ;;  %v3456_v45 = vmul.u32 18, %v3455_v27 }
 0x343   : > { %15712 = vst [vmem:[#allocation46_spill] sm:$0xff] %v12409_v25  ;;  %15714 = vst [vmem:[#allocation48_spill] sm:$0xff] %v12423_v11  ;;  %v3488_v31 = vshrl.u32 %v12309_v28, 4  ;;  %vm3672_vm14 = vcmp.ne.s32.totalorder %v12386_v16, 0  ;;  %v12428_v63 = vsub.s32 %v12215_v41, %v3434_v48  ;;  %v3467_v53 = vmul.u32 18, %v3466_v0 }
 0x344   : > { %v12418_v9 = vadd.f32 %v11875_v10, %v2470_v54  ;;  %v2423_v49 = vpop.f32.mrf.mxu0  ;;  %v3499_v51 = vshrl.u32 %v12325_v2, 4  ;;  %v3510_v10 = vshrl.u32 %v12339_v47, 4  ;;  %vm3708_vm15 = vcmp.lt.s32.totalorder %v12386_v16, 0 }
 0x345   : > { %v2471_v54 = vadd.f32 %v2423_v49, %v11699_v36  ;;  %v12434_v50 = vmul.u32.u64.low 3817748708, %v12403_v42  ;;  %v12435_v46 = vmul.u32.u64.high 3817748708, %v12403_v42, %v12434_v50  ;;  %v12439_v28 = vsub.s32 %v12228_v57, %v3445_v20  ;;  %vm12478_vm8 = vmand %vm3708_vm15, %vm3672_vm14  ;;  %v15718_v20 = vld [vmem:[#allocation7_spill] sm:$0xff] }
 0x346   : > { %v9523_v62 = vpop.f32.mrf.mxu0  ;;  %v3478_v8 = vmul.u32 18, %v3477_v32  ;;  %v3521_v41 = vshrl.u32 %v12353_v15, 4  ;;  %v12446_v36 = vsub.s32 %v12238_v5, %v3456_v45  ;;  %v3489_v47 = vmul.u32 18, %v3488_v31  ;;  %v15715_v15 = vld [vmem:[#allocation15_spill] sm:$0xff] }
 0x347   : > { %v12443_v3 = vadd.f32 %v11893_v6, %v2471_v54  ;;  %v3532_v2 = vshrl.u32 %v12369_v18, 4  ;;  %v12450_v19 = vadd.s32 18, %v12386_v16  ;;  %vm3673_vm1 = vcmp.ne.s32.totalorder %v12428_v63, 0 }
 0x348   : > { %v2426_v30 = vpop.f32.mrf.mxu0  ;;  %v12454_v57 = vsub.s32 %v12246_v55, %v3467_v53  ;;  %v3500_v12 = vmul.u32 18, %v3499_v51  ;;  %vm3709_vm3 = vcmp.lt.s32.totalorder %v12428_v63, 0  ;;  %v12459_v6 = vadd.s32 18, %v12428_v63 }
 0x349   : > { %v2472_v35 = vadd.f32 %v2426_v30, %v15715_v15  ;;  %v3511_v5 = vmul.u32 18, %v3510_v10  ;;  %vm3674_vm4 = vcmp.ne.s32.totalorder %v12439_v28, 0  ;;  %vm3710_vm5 = vcmp.lt.s32.totalorder %v12439_v28, 0  ;;  %vm12495_vm11 = vmand %vm3709_vm3, %vm3673_vm1 }
 0x34a   : > { %v9524_v27 = vpop.f32.mrf.mxu0  ;;  %v12464_v18 = vsub.s32 %v12262_v56, %v3478_v8  ;;  %v3522_v40 = vmul.u32 18, %v3521_v41  ;;  %vm3675_vm6 = vcmp.ne.s32.totalorder %v12446_v36, 0  ;;  %v12471_v48 = vsub.s32 %v12272_v4, %v3489_v47  ;;  %vm12508_vm12 = vmand %vm3710_vm5, %vm3674_vm4 }
 0x34b   : > { %v12467_v55 = vadd.f32 %v11906_v29, %v2472_v35  ;;  %v3533_v0 = vmul.u32 18, %v3532_v2  ;;  %vm3711_vm9 = vcmp.lt.s32.totalorder %v12446_v36, 0  ;;  %vm3676_vm10 = vcmp.ne.s32.totalorder %v12454_v57, 0 }
 0x34c   : > { %v2431_v23 = vpop.f32.mrf.mxu0  ;;  %v12485_v29 = vsub.s32 %v12280_v60, %v3500_v12  ;;  %v12488_v4 = vadd.s32 208, %v11870_v61  ;;  %vm3712_vm0 = vcmp.lt.s32.totalorder %v12454_v57, 0  ;;  %v12501_v31 = vsub.s32 %v12286_v33, %v3511_v5  ;;  %vm12525_vm15 = vmand %vm3711_vm9, %vm3675_vm6 }
 0x34d   : > { %v2473_v32 = vadd.f32 %v2431_v23, %v15718_v20  ;;  %v3543_v60 = vshrl.u32 %v12435_v46, 4  ;;  %v3782_v51 = vadd.s32 18, %v12439_v28  ;;  %vm3677_vm13 = vcmp.ne.s32.totalorder %v12464_v18, 0  ;;  %vm12537_vm5 = vmand %vm3712_vm0, %vm3676_vm10 }
 0x34e   : > { %v9527_v49 = vpop.f32.mrf.mxu0  ;;  %vm3713_vm14 = vcmp.lt.s32.totalorder %v12464_v18, 0  ;;  %v12516_v33 = vsub.s32 %v12294_v52, %v3522_v40  ;;  %vm3678_vm1 = vcmp.ne.s32.totalorder %v12471_v48, 0  ;;  %vm3714_vm3 = vcmp.lt.s32.totalorder %v12471_v48, 0 }
 0x34f   : > { %v12519_v54 = vadd.f32 %v11931_v21, %v2473_v32  ;;  %v3534_v50 = vsub.s32 %v12312_v59, %v3533_v0  ;;  %vm3679_vm6 = vcmp.ne.s32.totalorder %v12485_v29, 0  ;;  %vm3715_vm9 = vcmp.lt.s32.totalorder %v12485_v29, 0  ;;  %vm12550_vm2 = vmand %vm3713_vm14, %vm3677_vm13 }
 0x350   : > { %v2434_v46 = vpop.f32.mrf.mxu0  ;;  %v12544_v52 = vmul.u32.u64.low 3817748708, %v12488_v4  ;;  %v12545_v62 = vmul.u32.u64.high 3817748708, %v12488_v4, %v12544_v52  ;;  %v3783_v59 = vadd.s32 18, %v12446_v36  ;;  %vm3680_vm10 = vcmp.ne.s32.totalorder %v12501_v31, 0  ;;  %vm12562_vm7 = vmand %vm3714_vm3, %vm3678_vm1 }
 0x351   : > { %v3544_v41 = vmul.u32 18, %v3543_v60  ;;  %v3784_v2 = vadd.s32 18, %v12454_v57  ;;  %v3785_v30 = vadd.s32 18, %v12464_v18  ;;  %vm3717_vm14 = vcmp.lt.s32.totalorder %v12516_v33, 0  ;;  %vm12574_vm4 = vmand %vm3715_vm9, %vm3679_vm6 }
 0x352   : > { %v9528_v47 = vpop.f32.mrf.mxu0  ;;  %vm4210_vm0 = vcmp.eq.s32.totalorder %v12135_v22, 17  ;;  %v3786_v15 = vadd.s32 18, %v12471_v48  ;;  %v3787_v5 = vadd.s32 18, %v12485_v29  ;;  %vm3682_vm1 = vcmp.ne.s32.totalorder %v3534_v50, 0 }
 0x353   : > { %vm3718_vm3 = vcmp.lt.s32.totalorder %v3534_v50, 0  ;;  %vm15518_vm13 = vcmp.lt.s32.totalorder %v12164_v17, 16  ;;  %v12584_v40 = vsel %vm12478_vm8, %v12450_v19, %v12386_v16  ;;  %v12590_v0 = vsel %vm12495_vm11, %v12459_v6, %v12428_v63 }
 0x354   : > { %v2965_v27 = vpop.f32.mrf.mxu0  ;;  %15733 = vst [vmem:[#allocation15_spill] sm:$0xff] %v12584_v40  ;;  %15734 = vst [vmem:[#allocation7_spill] sm:$0xff] %v12590_v0  ;;  %vm15735_vm6 = vcmp.lt.s32.totalorder %v12501_v31, 0  ;;  %v3788_v20 = vadd.s32 18, %v12501_v31  ;;  %v12602_v56 = vadd.s32 216, %v11870_v61  ;;  %vm15738_vm8 = vcmp.ne.s32.totalorder %v12516_v33, 0 }
 0x355   : > { %vm12596_vm9 = vmand %vm15735_vm6, %vm3680_vm10  ;;  %v12605_v16 = vadd.f32 %v2965_v27, %v11729_v58  ;;  %v3789_v19 = vadd.s32 18, %v12516_v33  ;;  %v3790_v6 = vadd.s32 18, %v3534_v50  ;;  %v12617_v32 = vsub.s32 %v12403_v42, %v3544_v41 }
 0x356   : > { %vm12611_vm11 = vmand %vm3717_vm14, %vm15738_vm8  ;;  %v9611_v45 = vpop.f32.mrf.mxu0  ;;  %v12622_v58 = vsel %vm12508_vm12, %v3782_v51, %v12439_v28  ;;  %v12627_v60 = vsel %vm12525_vm15, %v3783_v59, %v12446_v36  ;;  %v12632_v49 = vsel %vm12537_vm5, %v3784_v2, %v12454_v57  ;;  %v12641_v53 = vadd.s32 224, %v11870_v61 }
 0x357   : > { %15741 = vst [vmem:[#allocation49_spill] sm:$0xff] %v12622_v58  ;;  %15742 = vst [vmem:[#allocation50_spill] sm:$0xff] %v12627_v60  ;;  %vm15746_vm12 = vcmp.lt.s32.totalorder %v12135_v22, 16  ;;  %vm3190_vm15 = vcmp.lt.s32.totalorder %v11870_v61, 2  ;;  %vm4211_vm14 = vcmp.eq.s32.totalorder %v12159_v14, 17  ;;  %v12651_v36 = vsel %vm12550_vm2, %v3785_v30, %v12464_v18 }
 0x358   : > { %15743 = vst [vmem:[#allocation51_spill] sm:$0xff] %v12632_v49  ;;  %vm12636_vm10 = vmand %vm3718_vm3, %vm3682_vm1  ;;  %v3946_v28 = vsel %vm15746_vm12, %v12605_v16, 0.0  ;;  %v12656_v57 = vsel %vm12562_vm7, %v3786_v15, %v12471_v48  ;;  %v12661_v51 = vsel %vm12574_vm4, %v3787_v5, %v12485_v29  ;;  %v2968_v10 = vpop.f32.mrf.mxu0  ;;  %vm4175_vm5 = vcmp.eq.s32.totalorder %v12159_v14, 16 }
 0x359   : > { %15747 = vst [vmem:[#allocation52_spill] sm:$0xff] %v12651_v36  ;;  %15748 = vst [vmem:[#allocation53_spill] sm:$0xff] %v12656_v57  ;;  %vm15517_vm1 = vcmp.lt.s32.totalorder %v12175_v7, 16  ;;  %v12668_v18 = vsel %vm12596_vm9, %v3788_v20, %v12501_v31  ;;  %v3554_v46 = vshrl.u32 %v12545_v62, 4  ;;  %v3116_v52 = vadd.f32 %v2968_v10, %v11735_v34 }
 0x35a   : > { %15749 = vst [vmem:[#allocation54_spill] sm:$0xff] %v12661_v51  ;;  %15750 = vst [vmem:[#allocation55_spill] sm:$0xff] %v12668_v18  ;;  %v12672_v48 = vmul.u32.u64.low 3817748708, %v12602_v56  ;;  %v12673_v21 = vmul.u32.u64.high 3817748708, %v12602_v56, %v12672_v48  ;;  %v12679_v29 = vsel %vm12611_vm11, %v3789_v19, %v12516_v33  ;;  %v12683_v59 = vsel %vm12636_vm10, %v3790_v6, %v3534_v50  ;;  %v9612_v8 = vpop.f32.mrf.mxu0 }
 0x35b   : > { %15751 = vst [vmem:[#allocation56_spill] sm:$0xff] %v12679_v29  ;;  %15752 = vst [vmem:[#allocation57_spill] sm:$0xff] %v12683_v59  ;;  %vm3683_vm2 = vcmp.ne.s32.totalorder %v12617_v32, 0  ;;  %v4060_v31 = vmul.f32 %v3946_v28, %v3946_v28  ;;  %vm3719_vm7 = vcmp.lt.s32.totalorder %v12617_v32, 0  ;;  %v4356_v34 = vrot.slane %v12605_v16, 2 }
 0x35c   : > { %v12688_v62 = vmul.u32.u64.low 3817748708, %v12641_v53  ;;  %v12689_v41 = vmul.u32.u64.high 3817748708, %v12641_v53, %v12688_v62  ;;  %vm15753_vm4 = vcmp.lt.s32.totalorder %v12159_v14, 16  ;;  %v4357_v47 = vrot.slane %v3116_v52, 2  ;;  %v2973_v15 = vpop.f32.mrf.mxu0 }
 0x35d   : > { %v3947_v33 = vsel %vm15753_vm4, %v3116_v52, 0.0  ;;  %v3791_v50 = vadd.s32 18, %v12617_v32  ;;  %vm15754_vm3 = vcmask 31744   ;;  %vm4212_vm9 = vcmp.eq.s32.totalorder %v12164_v17, 17 }
 0x35e   : > { %v3982_v2 = vsel %vm15754_vm3, %v3946_v28, 0.0  ;;  %vm15755_vm6 = vmmov %vm15754_vm3  ;;  %v4061_v12 = vmul.f32 %v3947_v33, %v3947_v33  ;;  %vm15523_vm8 = vcmp.lt.s32.totalorder %v12183_v39, 16  ;;  %v3555_v35 = vmul.u32 18, %v3554_v46  ;;  %v9615_v42 = vpop.f32.mrf.mxu0 }
 0x35f   : > { %v3983_v30 = vsel %vm15755_vm6, %v3947_v33, 0.0  ;;  %vm15756_vm11 = vcmask 1045504   ;;  %v3117_v23 = vadd.f32 %v2973_v15, %v11746_v13  ;;  %vm4176_vm10 = vcmp.eq.s32.totalorder %v12164_v17, 16  ;;  %vm15757_vm12 = vmmov %vm15754_vm3 }
 0x360   : > { %v3984_v5 = vadd.f32 %v3983_v30, %v3982_v2  ;;  %v4358_v27 = vsel %vm15756_vm11, %v4356_v34, %v4357_v47  ;;  %v12704_v20 = vadd.s32 232, %v11870_v61  ;;  %v4096_v63 = vsel %vm15757_vm12, %v4060_v31, 0.0  ;;  %vm15758_vm4 = vmmov %vm15754_vm3  ;;  %v2976_v62 = vpop.f32.mrf.mxu0 }
 0x361   : > { %v3153_v19 = vrot.slane %v3116_v52, 6  ;;  %v4097_v6 = vsel %vm15758_vm4, %v4061_v12, 0.0  ;;  %v12711_v45 = vsel %vm4210_vm0, %v4358_v27, %v12605_v16  ;;  %v3154_v10 = vrot.slane %v3117_v23, 6  ;;  %vm12729_vm4 = vmand %vm3719_vm7, %vm3683_vm2 }
 0x362   : > { %v4098_v28 = vadd.f32 %v4097_v6, %v4096_v63  ;;  %v3948_v13 = vsel %vm15518_vm13, %v3117_v23, 0.0  ;;  %v4359_v46 = vrot.slane %v3117_v23, 2  ;;  %v15520_v48 = vrot.slane %v12605_v16, 6  ;;  %vm15762_vm2 = vmmov %vm15754_vm3 }
 0x363   : > { %v3985_v8 = vsel %vm15754_vm3, %v3948_v13, 0.0  ;;  %v4062_v31 = vmul.f32 %v3948_v13, %v3948_v13  ;;  %vm4213_vm6 = vcmp.eq.s32.totalorder %v12175_v7, 17  ;;  %vm15519_vm11 = vcmp.lt.s32.totalorder %v12187_v44, 16  ;;  %vm15763_vm7 = vmmov %vm15762_vm2 }
 0x364   : > { %v3565_v34 = vshrl.u32 %v12673_v21, 4  ;;  %v3224_v33 = vsel %vm3190_vm15, %v3153_v19, %v3154_v10  ;;  %v3986_v2 = vadd.f32 %v3985_v8, %v3984_v5  ;;  %vm15759_vm0 = vcmask 1045504  }
 0x365   : > { %v4360_v30 = vsel %vm15759_vm0, %v4357_v47, %v4359_v46  ;;  %v3118_v12 = vadd.f32 %v2976_v62, %v11752_v1  ;;  %vm4177_vm12 = vcmp.eq.s32.totalorder %v12175_v7, 16  ;;  %v3225_v21 = vsel %vm3190_vm15, %v15520_v48, %v3153_v19  ;;  %v9616_v47 = vpop.f32.mrf.mxu0 }
 0x366   : > { %v4099_v5 = vsel %vm15754_vm3, %v4062_v31, 0.0  ;;  %v4466_v1 = vsel %vm4211_vm14, %v4360_v30, %v3116_v52  ;;  %v12741_v27 = vsub.s32 %v12488_v4, %v3555_v35  ;;  %vm4214_vm14 = vcmp.eq.s32.totalorder %v12183_v39, 17  ;;  %vm15766_vm3 = vmmov %vm15762_vm2 }
 0x367   : > { %v4100_v63 = vadd.f32 %v4099_v5, %v4098_v28  ;;  %v4574_v6 = vsel %vm4175_vm5, %v3225_v21, %v4466_v1  ;;  %v3155_v42 = vrot.slane %v3118_v12, 6  ;;  %v3949_v13 = vsel %vm15517_vm1, %v3118_v12, 0.0  ;;  %v2981_v62 = vpop.f32.mrf.mxu0  ;;  %v15765_v28 = vld [vmem:[#allocation17_spill] sm:$0xff] }
 0x368   : > { %4610 = vst.msk [vmem:[#allocation2 + $0x1b] sm:$0xff] %vm15762_vm2, %v4574_v6  ;;  %v3987_v19 = vsel %vm15763_vm7, %v3949_v13, 0.0  ;;  %v4063_v8 = vmul.f32 %v3949_v13, %v3949_v13  ;;  %v4361_v31 = vrot.slane %v3118_v12, 2  ;;  %vm15521_vm0 = vcmp.lt.s32.totalorder %v12198_v38, 16 }
 0x369   : > { %v12754_v4 = vsel %vm12729_vm4, %v3791_v50, %v12617_v32  ;;  %v3223_v52 = vsel %vm3190_vm15, %v3154_v10, %v3155_v42  ;;  %v3988_v35 = vadd.f32 %v3987_v19, %v3986_v2  ;;  %v3119_v30 = vadd.f32 %v2981_v62, %v15765_v28  ;;  %v9619_v47 = vpop.f32.mrf.mxu0  ;;  %vm15768_vm4 = vmmov %vm15766_vm3  ;;  %v15769_v19 = vld [vmem:[#allocation39_spill] sm:$0xff] }
 0x36a   : > { %15764 = vst [vmem:[#allocation58_spill] sm:$0xff] %v12754_v4  ;;  %vm4178_vm5 = vcmp.eq.s32.totalorder %v12183_v39, 16  ;;  %v3566_v21 = vmul.u32 18, %v3565_v34  ;;  %v4101_v5 = vsel %vm15766_vm3, %v4063_v8, 0.0  ;;  %vm15767_vm2 = vcmask 1045504   ;;  %vm15770_vm13 = vmmov %vm15768_vm4  ;;  %v15771_v8 = vld [vmem:[#allocation18_spill] sm:$0xff] }
 0x36b   : > { %v4362_v1 = vsel %vm15767_vm2, %v4359_v46, %v4361_v31  ;;  %vm3684_vm7 = vcmp.ne.s32.totalorder %v12741_v27, 0  ;;  %vm3720_vm1 = vcmp.lt.s32.totalorder %v12741_v27, 0  ;;  %v4102_v32 = vadd.f32 %v4101_v5, %v4100_v63  ;;  %v2984_v13 = vpop.f32.mrf.mxu0 }
 0x36c   : > { %v4467_v50 = vsel %vm4212_vm9, %v4362_v1, %v3117_v23  ;;  %v3156_v10 = vrot.slane %v3119_v30, 6  ;;  %v3950_v2 = vsel %vm15523_vm8, %v3119_v30, 0.0  ;;  %v4363_v46 = vrot.slane %v3119_v30, 2 }
 0x36d   : > { %v4575_v34 = vsel %vm4176_vm10, %v3224_v33, %v4467_v50  ;;  %v3989_v15 = vsel %vm15768_vm4, %v3950_v2, 0.0  ;;  %v4064_v6 = vmul.f32 %v3950_v2, %v3950_v2  ;;  %vm4215_vm3 = vcmp.eq.s32.totalorder %v12187_v44, 17  ;;  %vm15772_vm10 = vmmov %vm15768_vm4  ;;  %v9620_v1 = vpop.f32.mrf.mxu0 }
 0x36e   : > { %vm15522_vm2 = vcmp.lt.s32.totalorder %v15769_v19, 16  ;;  %4611 = vst.msk [vmem:[#allocation2 + $0x23] sm:$0xff] %vm15770_vm13, %v4575_v34  ;;  %v3222_v23 = vsel %vm3190_vm15, %v3155_v42, %v3156_v10  ;;  %v3990_v63 = vadd.f32 %v3989_v15, %v3988_v35  ;;  %v3120_v62 = vadd.f32 %v2984_v13, %v15771_v8  ;;  %vm12794_vm13 = vmand %vm3720_vm1, %vm3684_vm7 }
 0x36f   : > { %vm4179_vm9 = vcmp.eq.s32.totalorder %v12187_v44, 16  ;;  %v3792_v33 = vadd.s32 18, %v12741_v27  ;;  %v4103_v28 = vsel %vm15772_vm10, %v4064_v6, 0.0  ;;  %vm15773_vm4 = vcmask 1045504  }
 0x370   : > { %v4364_v5 = vsel %vm15773_vm4, %v4361_v31, %v4363_v46  ;;  %v12782_v47 = vmul.u32.u64.low 3817748708, %v12704_v20  ;;  %v12783_v50 = vmul.u32.u64.high 3817748708, %v12704_v20, %v12782_v47  ;;  %v4104_v2 = vadd.f32 %v4103_v28, %v4102_v32 }
 0x371   : > { %v4468_v42 = vsel %vm4213_vm6, %v4364_v5, %v3118_v12  ;;  %v3157_v35 = vrot.slane %v3120_v62, 6  ;;  %v3951_v34 = vsel %vm15519_vm11, %v3120_v62, 0.0  ;;  %v4365_v13 = vrot.slane %v3120_v62, 2  ;;  %v2989_v12 = vpop.f32.mrf.mxu0  ;;  %vm15776_vm11 = vmmov %vm15772_vm10  ;;  %v15777_v5 = vld [vmem:[#allocation10_spill] sm:$0xff] }
 0x372   : > { %v4576_v15 = vsel %vm4177_vm12, %v3223_v52, %v4468_v42  ;;  %v3991_v32 = vsel %vm15772_vm10, %v3951_v34, 0.0  ;;  %v4065_v6 = vmul.f32 %v3951_v34, %v3951_v34  ;;  %vm4216_vm6 = vcmp.eq.s32.totalorder %v12198_v38, 17  ;;  %vm15778_vm12 = vmmov %vm15772_vm10 }
 0x373   : > { %vm15527_vm4 = vcmp.lt.s32.totalorder %v12375_v37, 16  ;;  %4612 = vst.msk [vmem:[#allocation2 + $0x2b] sm:$0xff] %vm15776_vm11, %v4576_v15  ;;  %v3221_v8 = vsel %vm3190_vm15, %v3156_v10, %v3157_v35  ;;  %v3992_v28 = vadd.f32 %v3991_v32, %v3990_v63  ;;  %v3121_v1 = vadd.f32 %v2989_v12, %v15777_v5  ;;  %v9623_v34 = vpop.f32.mrf.mxu0  ;;  %vm15781_vm11 = vmmov %vm15772_vm10 }
 0x374   : > { %vm4180_vm1 = vcmp.eq.s32.totalorder %v12198_v38, 16  ;;  %v3576_v52 = vshrl.u32 %v12689_v41, 4  ;;  %v4105_v47 = vsel %vm15778_vm12, %v4065_v6, 0.0  ;;  %vm15779_vm7 = vcmask 1045504   ;;  %vm15782_vm12 = vmmov %vm15781_vm11 }
 0x375   : > { %v4366_v42 = vsel %vm15779_vm7, %v4363_v46, %v4365_v13  ;;  %v12814_v48 = vsel %vm12794_vm13, %v3792_v33, %v12741_v27  ;;  %v12817_v15 = vsub.s32 %v12602_v56, %v3566_v21  ;;  %v4106_v10 = vadd.f32 %v4105_v47, %v4104_v2  ;;  %v2992_v27 = vpop.f32.mrf.mxu0  ;;  %v15783_v21 = vld [vmem:[#allocation20_spill] sm:$0xff] }
 0x376   : > { %15780 = vst [vmem:[#allocation17_spill] sm:$0xff] %v12814_v48  ;;  %v4469_v63 = vsel %vm4214_vm14, %v4366_v42, %v3119_v30  ;;  %v3158_v32 = vrot.slane %v3121_v1, 6  ;;  %v3952_v41 = vsel %vm15521_vm0, %v3121_v1, 0.0  ;;  %v4367_v31 = vrot.slane %v3121_v1, 2 }
 0x377   : > { %v4577_v46 = vsel %vm4178_vm5, %v3222_v23, %v4469_v63  ;;  %v3993_v6 = vsel %vm15781_vm11, %v3952_v41, 0.0  ;;  %v4066_v12 = vmul.f32 %v3952_v41, %v3952_v41  ;;  %vm4217_vm13 = vcmp.eq.s32.totalorder %v15769_v19, 17  ;;  %vm15784_vm5 = vmmov %vm15781_vm11  ;;  %v9624_v47 = vpop.f32.mrf.mxu0 }
 0x378   : > { %vm15524_vm10 = vcmp.lt.s32.totalorder %v12394_v43, 16  ;;  %4613 = vst.msk [vmem:[#allocation2 + $0x33] sm:$0xff] %vm15782_vm12, %v4577_v46  ;;  %v3220_v56 = vsel %vm3190_vm15, %v3157_v35, %v3158_v32  ;;  %v3994_v30 = vadd.f32 %v3993_v6, %v3992_v28  ;;  %v3122_v33 = vadd.f32 %v2992_v27, %v15783_v21  ;;  %vm15785_vm12 = vmmov %vm15784_vm5 }
 0x379   : > { %vm4181_vm14 = vcmp.eq.s32.totalorder %v15769_v19, 16  ;;  %v3577_v23 = vmul.u32 18, %v3576_v52  ;;  %v4107_v2 = vsel %vm15784_vm5, %v4066_v12, 0.0  ;;  %v4368_v5 = vsel %vm15779_vm7, %v4365_v13, %v4367_v31  ;;  %v2997_v6 = vpop.f32.mrf.mxu0  ;;  %vm15786_vm0 = vmmov %vm15785_vm12  ;;  %v15787_v12 = vld [vmem:[#allocation13_spill] sm:$0xff] }
 0x37a   : > { %vm3685_vm11 = vcmp.ne.s32.totalorder %v12817_v15, 0  ;;  %v12837_v42 = vadd.s32 240, %v11870_v61  ;;  %v4108_v34 = vadd.f32 %v4107_v2, %v4106_v10  ;;  %v4470_v35 = vsel %vm4215_vm3, %v4368_v5, %v3120_v62  ;;  %vm15790_vm8 = vmmov %vm15786_vm0 }
 0x37b   : > { %v3159_v28 = vrot.slane %v3122_v33, 6  ;;  %v3953_v63 = vsel %vm15522_vm2, %v3122_v33, 0.0  ;;  %v4578_v52 = vsel %vm4179_vm9, %v3221_v8, %v4470_v35  ;;  %v4369_v46 = vrot.slane %v3122_v33, 2  ;;  %v9627_v2 = vpop.f32.mrf.mxu0 }
 0x37c   : > { %v3995_v41 = vsel %vm15785_vm12, %v3953_v63, 0.0  ;;  %v4067_v13 = vmul.f32 %v3953_v63, %v3953_v63  ;;  %vm4218_vm5 = vcmp.eq.s32.totalorder %v12375_v37, 17  ;;  %vm15526_vm7 = vcmp.lt.s32.totalorder %v12400_v24, 16  ;;  %4614 = vst.msk [vmem:[#allocation2 + $0x3b] sm:$0xff] %vm15786_vm0, %v4578_v52  ;;  %vm15788_vm12 = vmmov %vm15786_vm0 }
 0x37d   : > { %v3219_v62 = vsel %vm3190_vm15, %v3158_v32, %v3159_v28  ;;  %v3996_v10 = vadd.f32 %v3995_v41, %v3994_v30  ;;  %v3123_v27 = vadd.f32 %v2997_v6, %v15787_v12  ;;  %vm4182_vm3 = vcmp.eq.s32.totalorder %v12375_v37, 16  ;;  %v3000_v6 = vpop.f32.mrf.mxu0 }
 0x37e   : > { %vm3721_vm9 = vcmp.lt.s32.totalorder %v12817_v15, 0  ;;  %v4109_v8 = vsel %vm15788_vm12, %v4067_v13, 0.0  ;;  %vm15789_vm2 = vcmask 1045504   ;;  %v3793_v5 = vadd.s32 18, %v12817_v15 }
 0x37f   : > { %v4370_v21 = vsel %vm15789_vm2, %v4367_v31, %v4369_v46  ;;  %v12858_v47 = vsub.s32 %v12641_v53, %v3577_v23  ;;  %v4110_v35 = vadd.f32 %v4109_v8, %v4108_v34  ;;  %v3160_v30 = vrot.slane %v3123_v27, 6  ;;  %v15791_v23 = vld [vmem:[#allocation16_spill] sm:$0xff] }
 0x380   : > { %v4471_v32 = vsel %vm4216_vm6, %v4370_v21, %v3121_v1  ;;  %v3954_v63 = vsel %vm15527_vm4, %v3123_v27, 0.0  ;;  %v4371_v13 = vrot.slane %v3123_v27, 2  ;;  %vm4219_vm2 = vcmp.eq.s32.totalorder %v12394_v43, 17  ;;  %v9628_v21 = vpop.f32.mrf.mxu0 }
 0x381   : > { %v4579_v52 = vsel %vm4180_vm1, %v3220_v56, %v4471_v32  ;;  %v3997_v41 = vsel %vm15786_vm0, %v3954_v63, 0.0  ;;  %v4068_v31 = vmul.f32 %v3954_v63, %v3954_v63  ;;  %vm15532_vm12 = vcmp.lt.s32.totalorder %v12409_v25, 16  ;;  %vm15792_vm1 = vmmov %vm15786_vm0 }
 0x382   : > { %4615 = vst.msk [vmem:[#allocation2 + $0x43] sm:$0xff] %vm15790_vm8, %v4579_v52  ;;  %v3218_v53 = vsel %vm3190_vm15, %v3159_v28, %v3160_v30  ;;  %v3998_v1 = vadd.f32 %v3997_v41, %v3996_v10  ;;  %v3124_v34 = vadd.f32 %v3000_v6, %v15791_v23  ;;  %vm4183_vm6 = vcmp.eq.s32.totalorder %v12394_v43, 16  ;;  %vm12892_vm8 = vmand %vm3721_vm9, %vm3685_vm11 }
 0x383   : > { %v12875_v56 = vadd.s32 248, %v11870_v61  ;;  %v4111_v12 = vsel %vm15792_vm1, %v4068_v31, 0.0  ;;  %vm15793_vm0 = vcmask 1045504   ;;  %vm4184_vm11 = vcmp.eq.s32.totalorder %v12400_v24, 16 }
 0x384   : > { %v4372_v8 = vsel %vm15793_vm0, %v4369_v46, %v4371_v13  ;;  %v12880_v2 = vmul.u32.u64.low 3817748708, %v12837_v42  ;;  %v12881_v32 = vmul.u32.u64.high 3817748708, %v12837_v42, %v12880_v2  ;;  %v4112_v63 = vadd.f32 %v4111_v12, %v4110_v35 }
 0x385   : > { %v4472_v28 = vsel %vm4217_vm13, %v4372_v8, %v3122_v33  ;;  %v3161_v10 = vrot.slane %v3124_v34, 6  ;;  %v3955_v52 = vsel %vm15524_vm10, %v3124_v34, 0.0  ;;  %v4373_v6 = vrot.slane %v3124_v34, 2  ;;  %v3005_v33 = vpop.f32.mrf.mxu0  ;;  %vm15796_vm10 = vmmov %vm15792_vm1  ;;  %v15797_v8 = vld [vmem:[#allocation19_spill] sm:$0xff] }
 0x386   : > { %v4580_v41 = vsel %vm4181_vm14, %v3219_v62, %v4472_v28  ;;  %v3999_v35 = vsel %vm15792_vm1, %v3955_v52, 0.0  ;;  %v4069_v31 = vmul.f32 %v3955_v52, %v3955_v52  ;;  %vm4220_vm13 = vcmp.eq.s32.totalorder %v12400_v24, 17  ;;  %vm15798_vm14 = vmmov %vm15792_vm1 }
 0x387   : > { %vm15528_vm0 = vcmp.lt.s32.totalorder %v12414_v26, 16  ;;  %4616 = vst.msk [vmem:[#allocation2 + $0x4b] sm:$0xff] %vm15796_vm10, %v4580_v41  ;;  %v3217_v23 = vsel %vm3190_vm15, %v3160_v30, %v3161_v10  ;;  %v4000_v12 = vadd.f32 %v3999_v35, %v3998_v1  ;;  %v3125_v21 = vadd.f32 %v3005_v33, %v15797_v8  ;;  %v9631_v52 = vpop.f32.mrf.mxu0 }
 0x388   : > { %v3587_v62 = vshrl.u32 %v12783_v50, 4  ;;  %v4113_v2 = vsel %vm15798_vm14, %v4069_v31, 0.0  ;;  %vm15799_vm9 = vcmask 1045504   ;;  %v12912_v44 = vsel %vm12892_vm8, %v3793_v5, %v12817_v15  ;;  %v15802_v5 = vld [vmem:[#allocation21_spill] sm:$0xff] }
 0x389   : > { %v4374_v28 = vsel %vm15799_vm9, %v4371_v13, %v4373_v6  ;;  %15800 = vst [vmem:[#allocation18_spill] sm:$0xff] %v12912_v44  ;;  %vm3686_vm10 = vcmp.ne.s32.totalorder %v12858_v47, 0  ;;  %v4114_v30 = vadd.f32 %v4113_v2, %v4112_v63  ;;  %v3162_v41 = vrot.slane %v3125_v21, 6  ;;  %v3008_v46 = vpop.f32.mrf.mxu0  ;;  %vm15801_vm9 = vmmov %vm15792_vm1 }
 0x38a   : > { %v4473_v1 = vsel %vm4218_vm5, %v4374_v28, %v3123_v27  ;;  %v3956_v50 = vsel %vm15526_vm7, %v3125_v21, 0.0  ;;  %v4375_v33 = vrot.slane %v3125_v21, 2  ;;  %vm4221_vm8 = vcmp.eq.s32.totalorder %v12409_v25, 17 }
 0x38b   : > { %v4581_v35 = vsel %vm4182_vm3, %v3218_v53, %v4473_v1  ;;  %v4001_v13 = vsel %vm15792_vm1, %v3956_v50, 0.0  ;;  %v4070_v31 = vmul.f32 %v3956_v50, %v3956_v50  ;;  %vm15531_vm14 = vcmp.lt.s32.totalorder %v12423_v11, 16  ;;  %v9632_v2 = vpop.f32.mrf.mxu0 }
 0x38c   : > { %4617 = vst.msk [vmem:[#allocation2 + $0x53] sm:$0xff] %vm15801_vm9, %v4581_v35  ;;  %v3216_v15 = vsel %vm3190_vm15, %v3161_v10, %v3162_v41  ;;  %v4002_v27 = vadd.f32 %v4001_v13, %v4000_v12  ;;  %v3126_v63 = vadd.f32 %v3008_v46, %v15802_v5  ;;  %vm4185_vm5 = vcmp.eq.s32.totalorder %v12409_v25, 16  ;;  %vm15804_vm9 = vmmov %vm15792_vm1  ;;  %v15806_v5 = vld [vmem:[#allocation22_spill] sm:$0xff] }
 0x38d   : > { %vm3722_vm3 = vcmp.lt.s32.totalorder %v12858_v47, 0  ;;  %v4115_v53 = vsel %vm15792_vm1, %v4070_v31, 0.0  ;;  %vm15803_vm7 = vcmask 1045504   ;;  %v3013_v46 = vpop.f32.mrf.mxu0  ;;  %vm15536_vm1 = vcmp.lt.s32.totalorder %v12584_v40, 16  ;;  %vm15805_vm4 = vmmov %vm15804_vm9 }
 0x38e   : > { %v4376_v8 = vsel %vm15803_vm7, %v4373_v6, %v4375_v33  ;;  %v12933_v28 = vmul.u32.u64.low 3817748708, %v12875_v56  ;;  %v12934_v52 = vmul.u32.u64.high 3817748708, %v12875_v56, %v12933_v28  ;;  %v4116_v1 = vadd.f32 %v4115_v53, %v4114_v30 }
 0x38f   : > { %v4474_v10 = vsel %vm4219_vm2, %v4376_v8, %v3124_v34  ;;  %v3163_v12 = vrot.slane %v3126_v63, 6  ;;  %v3957_v50 = vsel %vm15532_vm12, %v3126_v63, 0.0  ;;  %v4377_v31 = vrot.slane %v3126_v63, 2  ;;  %v9635_v28 = vpop.f32.mrf.mxu0 }
 0x390   : > { %v4582_v35 = vsel %vm4183_vm6, %v3217_v23, %v4474_v10  ;;  %v4003_v13 = vsel %vm15804_vm9, %v3957_v50, 0.0  ;;  %v4071_v6 = vmul.f32 %v3957_v50, %v3957_v50  ;;  %vm4222_vm7 = vcmp.eq.s32.totalorder %v12414_v26, 17  ;;  %vm15807_vm6 = vmmov %vm15805_vm4 }
 0x391   : > { %4618 = vst.msk [vmem:[#allocation2 + $0x5b] sm:$0xff] %vm15805_vm4, %v4582_v35  ;;  %v3215_v34 = vsel %vm3190_vm15, %v3162_v41, %v3163_v12  ;;  %v4004_v30 = vadd.f32 %v4003_v13, %v4002_v27  ;;  %v3127_v53 = vadd.f32 %v3013_v46, %v15806_v5  ;;  %vm4186_vm2 = vcmp.eq.s32.totalorder %v12414_v26, 16  ;;  %vm12965_vm4 = vmand %vm3722_vm3, %vm3686_vm10 }
 0x392   : > { %v3794_v23 = vadd.s32 18, %v12858_v47  ;;  %v4117_v8 = vsel %vm15807_vm6, %v4071_v6, 0.0  ;;  %vm15808_vm9 = vcmask 1045504   ;;  %v3588_v10 = vmul.u32 18, %v3587_v62 }
 0x393   : > { %v4378_v2 = vsel %vm15808_vm9, %v4375_v33, %v4377_v31  ;;  %v12955_v50 = vadd.s32 256, %v11870_v61  ;;  %v4118_v35 = vadd.f32 %v4117_v8, %v4116_v1  ;;  %v3164_v27 = vrot.slane %v3127_v53, 6 }
 0x394   : > { %v4475_v41 = vsel %vm4220_vm13, %v4378_v2, %v3125_v21  ;;  %v3958_v13 = vsel %vm15528_vm0, %v3127_v53, 0.0  ;;  %v4379_v46 = vrot.slane %v3127_v53, 2  ;;  %v3016_v21 = vpop.f32.mrf.mxu0  ;;  %vm4223_vm13 = vcmp.eq.s32.totalorder %v12423_v11, 17  ;;  %vm15811_vm0 = vmmov %vm15807_vm6  ;;  %v15812_v2 = vld [vmem:[#allocation23_spill] sm:$0xff] }
 0x395   : > { %v4583_v62 = vsel %vm4184_vm11, %v3216_v15, %v4475_v41  ;;  %v4005_v33 = vsel %vm15807_vm6, %v3958_v13, 0.0  ;;  %v4072_v1 = vmul.f32 %v3958_v13, %v3958_v13  ;;  %vm15533_vm9 = vcmp.lt.s32.totalorder %v12590_v0, 16  ;;  %vm15813_vm11 = vmmov %vm15811_vm0 }
 0x396   : > { %4619 = vst.msk [vmem:[#allocation2 + $0x63] sm:$0xff] %vm15811_vm0, %v4583_v62  ;;  %v3214_v5 = vsel %vm3190_vm15, %v3163_v12, %v3164_v27  ;;  %v4006_v8 = vadd.f32 %v4005_v33, %v4004_v30  ;;  %v3128_v28 = vadd.f32 %v3016_v21, %v15812_v2  ;;  %vm4187_vm10 = vcmp.eq.s32.totalorder %v12423_v11, 16  ;;  %v9636_v43 = vpop.f32.mrf.mxu0 }
 0x397   : > { %v3598_v15 = vshrl.u32 %v12881_v32, 4  ;;  %v4119_v41 = vsel %vm15813_vm11, %v4072_v1, 0.0  ;;  %vm15814_vm3 = vcmask 1045504   ;;  %v12985_v24 = vsel %vm12965_vm4, %v3794_v23, %v12858_v47  ;;  %vm15816_vm11 = vmmov %vm15811_vm0  ;;  %v15817_v23 = vld [vmem:[#allocation24_spill] sm:$0xff] }
 0x398   : > { %v4380_v13 = vsel %vm15814_vm3, %v4377_v31, %v4379_v46  ;;  %15815 = vst [vmem:[#allocation10_spill] sm:$0xff] %v12985_v24  ;;  %v12988_v62 = vsub.s32 %v12704_v20, %v3588_v10  ;;  %v4120_v12 = vadd.f32 %v4119_v41, %v4118_v35  ;;  %v3165_v33 = vrot.slane %v3128_v28, 6  ;;  %v3021_v47 = vpop.f32.mrf.mxu0 }
 0x399   : > { %v4476_v30 = vsel %vm4221_vm8, %v4380_v13, %v3126_v63  ;;  %v3959_v32 = vsel %vm15531_vm14, %v3128_v28, 0.0  ;;  %v4381_v6 = vrot.slane %v3128_v28, 2  ;;  %vm4224_vm4 = vcmp.eq.s32.totalorder %v12584_v40, 17 }
 0x39a   : > { %v4584_v31 = vsel %vm4185_vm5, %v3215_v34, %v4476_v30  ;;  %v4007_v43 = vsel %vm15811_vm0, %v3959_v32, 0.0  ;;  %v4073_v1 = vmul.f32 %v3959_v32, %v3959_v32  ;;  %vm15535_vm6 = vcmp.lt.s32.totalorder %v12622_v58, 16  ;;  %vm15818_vm5 = vmmov %vm15811_vm0  ;;  %v9639_v2 = vpop.f32.mrf.mxu0 }
 0x39b   : > { %4620 = vst.msk [vmem:[#allocation2 + $0x6b] sm:$0xff] %vm15816_vm11, %v4584_v31  ;;  %v3213_v20 = vsel %vm3190_vm15, %v3164_v27, %v3165_v33  ;;  %v4008_v63 = vadd.f32 %v4007_v43, %v4006_v8  ;;  %v3129_v10 = vadd.f32 %v3021_v47, %v15817_v23  ;;  %vm4188_vm8 = vcmp.eq.s32.totalorder %v12584_v40, 16  ;;  %vm15819_vm11 = vmmov %vm15818_vm5  ;;  %v15821_v43 = vld [vmem:[#allocation25_spill] sm:$0xff] }
 0x39c   : > { %v3599_v34 = vmul.u32 18, %v3598_v15  ;;  %v4121_v35 = vsel %vm15818_vm5, %v4073_v1, 0.0  ;;  %v4382_v21 = vsel %vm15814_vm3, %v4379_v46, %v4381_v6  ;;  %vm3687_vm0 = vcmp.ne.s32.totalorder %v12988_v62, 0  ;;  %v3024_v31 = vpop.f32.mrf.mxu0  ;;  %vm15820_vm12 = vmmov %vm15819_vm11 }
 0x39d   : > { %vm3723_vm14 = vcmp.lt.s32.totalorder %v12988_v62, 0  ;;  %v4122_v41 = vadd.f32 %v4121_v35, %v4120_v12  ;;  %v4477_v13 = vsel %vm4222_vm7, %v4382_v21, %v3127_v53  ;;  %v3166_v27 = vrot.slane %v3129_v10, 6 }
 0x39e   : > { %v3960_v8 = vsel %vm15536_vm1, %v3129_v10, 0.0  ;;  %v4585_v15 = vsel %vm4186_vm2, %v3214_v5, %v4477_v13  ;;  %v4383_v46 = vrot.slane %v3129_v10, 2  ;;  %vm4225_vm5 = vcmp.eq.s32.totalorder %v12590_v0, 17  ;;  %vm15822_vm2 = vmmov %vm15819_vm11  ;;  %v9640_v35 = vpop.f32.mrf.mxu0 }
 0x39f   : > { %v4009_v30 = vsel %vm15819_vm11, %v3960_v8, 0.0  ;;  %v4074_v32 = vmul.f32 %v3960_v8, %v3960_v8  ;;  %vm15534_vm3 = vcmp.lt.s32.totalorder %v12627_v60, 16  ;;  %4621 = vst.msk [vmem:[#allocation2 + $0x73] sm:$0xff] %vm15820_vm12, %v4585_v15  ;;  %v3212_v53 = vsel %vm3190_vm15, %v3165_v33, %v3166_v27  ;;  %vm13038_vm12 = vmand %vm3723_vm14, %vm3687_vm0 }
 0x3a0   : > { %v4010_v12 = vadd.f32 %v4009_v30, %v4008_v63  ;;  %v3130_v1 = vadd.f32 %v3024_v31, %v15821_v43  ;;  %vm4189_vm7 = vcmp.eq.s32.totalorder %v12590_v0, 16  ;;  %v3795_v5 = vadd.s32 18, %v12988_v62 }
 0x3a1   : > { %v4123_v47 = vsel %vm15822_vm2, %v4074_v32, 0.0  ;;  %vm15823_vm11 = vcmask 1045504   ;;  %v13026_v21 = vmul.u32.u64.low 3817748708, %v12955_v50  ;;  %v13027_v2 = vmul.u32.u64.high 3817748708, %v12955_v50, %v13026_v21 }
 0x3a2   : > { %v4384_v23 = vsel %vm15823_vm11, %v4381_v6, %v4383_v46  ;;  %v4124_v13 = vadd.f32 %v4123_v47, %v4122_v41  ;;  %v3167_v63 = vrot.slane %v3130_v1, 6  ;;  %v3961_v8 = vsel %vm15533_vm9, %v3130_v1, 0.0  ;;  %vm15826_vm9 = vmmov %vm15822_vm2  ;;  %v15827_v47 = vld [vmem:[#allocation4_spill] sm:$0xff] }
 0x3a3   : > { %v4478_v33 = vsel %vm4223_vm13, %v4384_v23, %v3128_v28  ;;  %v4011_v41 = vsel %vm15822_vm2, %v3961_v8, 0.0  ;;  %v4075_v30 = vmul.f32 %v3961_v8, %v3961_v8  ;;  %v4385_v32 = vrot.slane %v3130_v1, 2  ;;  %v3029_v28 = vpop.f32.mrf.mxu0 }
 0x3a4   : > { %v4586_v15 = vsel %vm4187_vm10, %v3213_v20, %v4478_v33  ;;  %vm4226_vm13 = vcmp.eq.s32.totalorder %v12622_v58, 17  ;;  %vm15539_vm11 = vcmp.lt.s32.totalorder %v12632_v49, 16  ;;  %v3211_v31 = vsel %vm3190_vm15, %v3166_v27, %v3167_v63  ;;  %vm15828_vm10 = vmmov %vm15822_vm2 }
 0x3a5   : > { %4622 = vst.msk [vmem:[#allocation2 + $0x7b] sm:$0xff] %vm15826_vm9, %v4586_v15  ;;  %v4012_v43 = vadd.f32 %v4011_v41, %v4010_v12  ;;  %v3131_v23 = vadd.f32 %v3029_v28, %v15827_v47  ;;  %vm4190_vm14 = vcmp.eq.s32.totalorder %v12622_v58, 16  ;;  %v3609_v20 = vshrl.u32 %v12934_v52, 4  ;;  %v9643_v33 = vpop.f32.mrf.mxu0  ;;  %vm15831_vm9 = vmmov %vm15822_vm2 }
 0x3a6   : > { %v4125_v35 = vsel %vm15828_vm10, %v4075_v30, 0.0  ;;  %vm15829_vm0 = vcmask 1045504   ;;  %v13058_v8 = vsel %vm13038_vm12, %v3795_v5, %v12988_v62  ;;  %v13061_v15 = vsub.s32 %v12837_v42, %v3599_v34  ;;  %vm15832_vm10 = vmmov %vm15831_vm9  ;;  %v15833_v34 = vld [vmem:[#allocation8_spill] sm:$0xff] }
 0x3a7   : > { %v4386_v21 = vsel %vm15829_vm0, %v4383_v46, %v4385_v32  ;;  %15830 = vst [vmem:[#allocation20_spill] sm:$0xff] %v13058_v8  ;;  %v4126_v27 = vadd.f32 %v4125_v35, %v4124_v13  ;;  %v3168_v41 = vrot.slane %v3131_v23, 6  ;;  %v3962_v52 = vsel %vm15535_vm6, %v3131_v23, 0.0  ;;  %v3032_v62 = vpop.f32.mrf.mxu0 }
 0x3a8   : > { %v4479_v12 = vsel %vm4224_vm4, %v4386_v21, %v3129_v10  ;;  %v4013_v30 = vsel %vm15831_vm9, %v3962_v52, 0.0  ;;  %v4076_v28 = vmul.f32 %v3962_v52, %v3962_v52  ;;  %v4387_v6 = vrot.slane %v3131_v23, 2 }
 0x3a9   : > { %v4587_v46 = vsel %vm4188_vm8, %v3212_v53, %v4479_v12  ;;  %vm4227_vm12 = vcmp.eq.s32.totalorder %v12627_v60, 17  ;;  %vm15537_vm2 = vcmp.lt.s32.totalorder %v12651_v36, 16  ;;  %v3210_v42 = vsel %vm3190_vm15, %v3167_v63, %v3168_v41  ;;  %vm15834_vm8 = vmmov %vm15831_vm9  ;;  %v9644_v35 = vpop.f32.mrf.mxu0 }
 0x3aa   : > { %4623 = vst.msk [vmem:[#allocation2 + $0x83] sm:$0xff] %vm15832_vm10, %v4587_v46  ;;  %v4014_v10 = vadd.f32 %v4013_v30, %v4012_v43  ;;  %v3132_v5 = vadd.f32 %v3032_v62, %v15833_v34  ;;  %vm4191_vm4 = vcmp.eq.s32.totalorder %v12627_v60, 16  ;;  %v3610_v53 = vmul.u32 18, %v3609_v20  ;;  %vm15835_vm10 = vmmov %vm15834_vm8 }
 0x3ab   : > { %v4127_v13 = vsel %vm15834_vm8, %v4076_v28, 0.0  ;;  %v4388_v47 = vsel %vm15829_vm0, %v4385_v32, %v4387_v6  ;;  %vm3688_vm9 = vcmp.ne.s32.totalorder %v13061_v15, 0  ;;  %v13081_v21 = vadd.s32 264, %v11870_v61  ;;  %v3037_v30 = vpop.f32.mrf.mxu0 }
 0x3ac   : > { %v4128_v33 = vadd.f32 %v4127_v13, %v4126_v27  ;;  %v4480_v63 = vsel %vm4225_vm5, %v4388_v47, %v3130_v1  ;;  %v3169_v43 = vrot.slane %v3132_v5, 6  ;;  %v3963_v12 = vsel %vm15534_vm3, %v3132_v5, 0.0  ;;  %v8485_v1 = vld [vmem:[%s15496_s2 + $0x6] sm:$0x3]  ;;  %vm15836_vm5 = vmmov %vm15835_vm10 }
 0x3ad   : > { %v4588_v20 = vsel %vm4189_vm7, %v3211_v31, %v4480_v63  ;;  %v4015_v52 = vsel %vm15835_vm10, %v3963_v12, 0.0  ;;  %v4077_v32 = vmul.f32 %v3963_v12, %v3963_v12  ;;  %v4389_v46 = vrot.slane %v3132_v5, 2  ;;  %v15837_v31 = vld [vmem:[#allocation9_spill] sm:$0xff]  ;;  %vm15839_vm6 = vmmov %vm15836_vm5  ;;  %v9647_v47 = vpop.f32.mrf.mxu0 }
 0x3ae   : > { %vm4228_vm8 = vcmp.eq.s32.totalorder %v12632_v49, 17  ;;  %vm15538_vm0 = vcmp.lt.s32.totalorder %v12656_v57, 16  ;;  %4624 = vst.msk [vmem:[#allocation2 + $0x8b] sm:$0xff] %vm15836_vm5, %v4588_v20  ;;  %v3209_v27 = vsel %vm3190_vm15, %v3168_v41, %v3169_v43  ;;  %v4016_v28 = vadd.f32 %v4015_v52, %v4014_v10 }
 0x3af   : > { %v3133_v62 = vadd.f32 %v3037_v30, %v15837_v31  ;;  %vm4192_vm7 = vcmp.eq.s32.totalorder %v12632_v49, 16  ;;  %vm3724_vm10 = vcmp.lt.s32.totalorder %v13061_v15, 0  ;;  %vm15838_vm3 = vcmask 1041408   ;;  %v3040_v31 = vpop.f32.mrf.mxu0 }
 0x3b0   : > { %10032 = vmatprep.subr.msk.bf16.mxu0 %vm15838_vm3, %v8485_v1  ;;  %v4129_v34 = vsel %vm15839_vm6, %v4077_v32, 0.0  ;;  %vm15840_vm1 = vcmask 1045504   ;;  %v3796_v35 = vadd.s32 18, %v13061_v15  ;;  %vm15841_vm5 = vmmov %vm15838_vm3  ;;  %vm15541_vm3 = vcmp.lt.s32.totalorder %v12661_v51, 16 }
 0x3b1   : > { %v4390_v13 = vsel %vm15840_vm1, %v4387_v6, %v4389_v46  ;;  %v5864_v63 = vsel %vm15841_vm5, %v8485_v1, 0  ;;  %v4130_v12 = vadd.f32 %v4129_v34, %v4128_v33  ;;  %v3170_v10 = vrot.slane %v3133_v62, 6  ;;  %vm15842_vm5 = vmmov %vm15839_vm6  ;;  %v15843_v1 = vld [vmem:[#allocation5_spill] sm:$0xff] }
 0x3b2   : > { %v4481_v41 = vsel %vm4226_vm13, %v4390_v13, %v3131_v23  ;;  %v3964_v20 = vsel %vm15539_vm11, %v3133_v62, 0.0  ;;  %9800 = vmatpush3.bf16.msra.mxu0 %v5864_v63  ;;  %v4391_v30 = vrot.slane %v3133_v62, 2  ;;  %vm4229_vm1 = vcmp.eq.s32.totalorder %v12651_v36, 17  ;;  %v9648_v63 = vpop.f32.mrf.mxu0 }
 0x3b3   : > { %v4589_v52 = vsel %vm4190_vm14, %v3210_v42, %v4481_v41  ;;  %v4017_v32 = vsel %vm15839_vm6, %v3964_v20, 0.0  ;;  %v4078_v6 = vmul.f32 %v3964_v20, %v3964_v20  ;;  %v3208_v23 = vsel %vm3190_vm15, %v3169_v43, %v3170_v10  ;;  %vm15844_vm14 = vmmov %vm15842_vm5 }
 0x3b4   : > { %4625 = vst.msk [vmem:[#allocation2 + $0x93] sm:$0xff] %vm15842_vm5, %v4589_v52  ;;  %v4018_v33 = vadd.f32 %v4017_v32, %v4016_v28  ;;  %v3134_v34 = vadd.f32 %v3040_v31, %v15843_v1  ;;  %vm4193_vm13 = vcmp.eq.s32.totalorder %v12651_v36, 16  ;;  %v13121_v42 = vsub.s32 %v12875_v56, %v3610_v53  ;;  %vm13138_vm5 = vmand %vm3724_vm10, %vm3688_vm9 }
 0x3b5   : > { %v4131_v13 = vsel %vm15844_vm14, %v4078_v6, 0.0  ;;  %vm15845_vm6 = vcmask 1045504   ;;  %v13126_v41 = vmul.u32.u64.low 3817748708, %v13081_v21  ;;  %v13127_v20 = vmul.u32.u64.high 3817748708, %v13081_v21, %v13126_v41 }
 0x3b6   : > { %v4392_v47 = vsel %vm15845_vm6, %v4389_v46, %v4391_v30  ;;  %v4132_v52 = vadd.f32 %v4131_v13, %v4130_v12  ;;  %v3171_v28 = vrot.slane %v3134_v34, 6  ;;  %v3965_v32 = vsel %vm15537_vm2, %v3134_v34, 0.0  ;;  %vm15848_vm2 = vmmov %vm15844_vm14  ;;  %v15849_v13 = vld [vmem:[#allocation11_spill] sm:$0xff] }
 0x3b7   : > { %v4482_v43 = vsel %vm4227_vm12, %v4392_v47, %v3132_v5  ;;  %v4019_v46 = vsel %vm15844_vm14, %v3965_v32, 0.0  ;;  %v4079_v12 = vmul.f32 %v3965_v32, %v3965_v32  ;;  %v4393_v6 = vrot.slane %v3134_v34, 2  ;;  %v3045_v5 = vpop.f32.mrf.mxu0 }
 0x3b8   : > { %v4590_v53 = vsel %vm4191_vm4, %v3209_v27, %v4482_v43  ;;  %vm4230_vm12 = vcmp.eq.s32.totalorder %v12656_v57, 17  ;;  %vm15544_vm6 = vcmp.lt.s32.totalorder %v12668_v18, 16  ;;  %v3207_v31 = vsel %vm3190_vm15, %v3170_v10, %v3171_v28  ;;  %vm15850_vm4 = vmmov %vm15848_vm2 }
 0x3b9   : > { %4626 = vst.msk [vmem:[#allocation2 + $0x9b] sm:$0xff] %vm15848_vm2, %v4590_v53  ;;  %v4020_v1 = vadd.f32 %v4019_v46, %v4018_v33  ;;  %v3135_v47 = vadd.f32 %v3045_v5, %v15849_v13  ;;  %vm4194_vm9 = vcmp.eq.s32.totalorder %v12656_v57, 16  ;;  %v13153_v27 = vadd.s32 272, %v11870_v61  ;;  %v9651_v43 = vpop.f32.mrf.mxu0 }
 0x3ba   : > { %v4133_v63 = vsel %vm15850_vm4, %v4079_v12, 0.0  ;;  %vm15851_vm10 = vcmask 1045504   ;;  %v13160_v32 = vsel %vm13138_vm5, %v3796_v35, %v13061_v15  ;;  %v3620_v10 = vshrl.u32 %v13027_v2, 4  ;;  %vm15853_vm4 = vmmov %vm15848_vm2 }
 0x3bb   : > { %v4394_v41 = vsel %vm15851_vm10, %v4391_v30, %v4393_v6  ;;  %15852 = vst [vmem:[#allocation13_spill] sm:$0xff] %v13160_v32  ;;  %v4134_v33 = vadd.f32 %v4133_v63, %v4132_v52  ;;  %v3172_v46 = vrot.slane %v3135_v47, 6  ;;  %v3966_v5 = vsel %vm15538_vm0, %v3135_v47, 0.0  ;;  %v3048_v56 = vpop.f32.mrf.mxu0  ;;  %vm15855_vm10 = vmmov %vm15848_vm2 }
 0x3bc   : > { %v4483_v53 = vsel %vm4228_vm8, %v4394_v41, %v3133_v62  ;;  %v4021_v30 = vsel %vm15848_vm2, %v3966_v5, 0.0  ;;  %v4080_v13 = vmul.f32 %v3966_v5, %v3966_v5  ;;  %v4395_v43 = vrot.slane %v3135_v47, 2  ;;  %v15854_v62 = vld [vmem:[#allocation12_spill] sm:$0xff]  ;;  %vm15858_vm11 = vmmov %vm15855_vm10 }
 0x3bd   : > { %v4591_v12 = vsel %vm4192_vm7, %v3208_v23, %v4483_v53  ;;  %vm4231_vm5 = vcmp.eq.s32.totalorder %v12661_v51, 17  ;;  %vm15543_vm14 = vcmp.lt.s32.totalorder %v12679_v29, 16  ;;  %v3206_v2 = vsel %vm3190_vm15, %v3171_v28, %v3172_v46  ;;  %v4902_v23 = vld [vmem:[%s15496_s2] sm:$0x3]  ;;  %v9652_v41 = vpop.f32.mrf.mxu0 }
 0x3be   : > { %4627 = vst.msk [vmem:[#allocation2 + $0xa3] sm:$0xff] %vm15853_vm4, %v4591_v12  ;;  %v4022_v15 = vadd.f32 %v4021_v30, %v4020_v1  ;;  %v3136_v35 = vadd.f32 %v3048_v56, %v15854_v62  ;;  %vm4195_vm8 = vcmp.eq.s32.totalorder %v12661_v51, 16  ;;  %vm3689_vm7 = vcmp.ne.s32.totalorder %v13121_v42, 0 }
 0x3bf   : > { %v4135_v52 = vsel %vm15855_vm10, %v4080_v13, 0.0  ;;  %vm15856_vm2 = vcmask 1045504   ;;  %vm3725_vm4 = vcmp.lt.s32.totalorder %v13121_v42, 0  ;;  %v3797_v28 = vadd.s32 18, %v13121_v42  ;;  %v3053_v62 = vpop.f32.mrf.mxu0 }
 0x3c0   : > { %v4396_v63 = vsel %vm15856_vm2, %v4393_v6, %v4395_v43  ;;  %vm15857_vm0 = vcmask 1041408   ;;  %v4136_v1 = vadd.f32 %v4135_v52, %v4134_v33  ;;  %v3173_v5 = vrot.slane %v3136_v35, 6 }
 0x3c1   : > { %10030 = vmatprep.subr.msk.bf16.mxu1 %vm15857_vm0, %v4902_v23  ;;  %v4484_v53 = vsel %vm4229_vm1, %v4396_v63, %v3134_v34  ;;  %v3967_v12 = vsel %vm15541_vm3, %v3136_v35, 0.0  ;;  %v4397_v56 = vrot.slane %v3136_v35, 2  ;;  %vm4232_vm2 = vcmp.eq.s32.totalorder %v12668_v18, 17  ;;  %v15859_v23 = vld [vmem:[#allocation6_spill] sm:$0xff] }
 0x3c2   : > { %v4592_v30 = vsel %vm4193_vm13, %v3207_v31, %v4484_v53  ;;  %v4023_v6 = vsel %vm15855_vm10, %v3967_v12, 0.0  ;;  %v4081_v13 = vmul.f32 %v3967_v12, %v3967_v12  ;;  %vm15542_vm0 = vcmp.lt.s32.totalorder %v12683_v59, 16  ;;  %vm15860_vm13 = vmmov %vm15855_vm10  ;;  %v9655_v53 = vpop.f32.mrf.mxu0 }
 0x3c3   : > { %4628 = vst.msk [vmem:[#allocation2 + $0xab] sm:$0xff] %vm15858_vm11, %v4592_v30  ;;  %v3205_v34 = vsel %vm3190_vm15, %v3172_v46, %v3173_v5  ;;  %v4024_v33 = vadd.f32 %v4023_v6, %v4022_v15  ;;  %v3137_v52 = vadd.f32 %v3053_v62, %v15859_v23  ;;  %vm4196_vm1 = vcmp.eq.s32.totalorder %v12668_v18, 16  ;;  %vm13215_vm11 = vmand %vm3725_vm4, %vm3689_vm7 }
 0x3c4   : > { %v3621_v31 = vmul.u32 18, %v3620_v10  ;;  %v4137_v63 = vsel %vm15860_vm13, %v4081_v13, 0.0  ;;  %vm15861_vm10 = vcmask 1045504   ;;  %vm15864_vm3 = vmmov %vm15860_vm13  ;;  %vm4197_vm7 = vcmp.eq.s32.totalorder %v12679_v29, 16 }
 0x3c5   : > { %v4398_v41 = vsel %vm15861_vm10, %v4395_v43, %v4397_v56  ;;  %v13203_v12 = vmul.u32.u64.low 3817748708, %v13153_v27  ;;  %v13204_v60 = vmul.u32.u64.high 3817748708, %v13153_v27, %v13203_v12  ;;  %v4138_v30 = vadd.f32 %v4137_v63, %v4136_v1 }
 0x3c6   : > { %v4485_v46 = vsel %vm4230_vm12, %v4398_v41, %v3135_v47  ;;  %v3174_v15 = vrot.slane %v3137_v52, 6  ;;  %v3968_v6 = vsel %vm15544_vm6, %v3137_v52, 0.0  ;;  %v4399_v62 = vrot.slane %v3137_v52, 2  ;;  %v3056_v47 = vpop.f32.mrf.mxu0  ;;  %v15865_v41 = vld [vmem:[#allocation26_spill] sm:$0xff] }
 0x3c7   : > { %v4593_v43 = vsel %vm4194_vm9, %v3206_v2, %v4485_v46  ;;  %v4025_v1 = vsel %vm15860_vm13, %v3968_v6, 0.0  ;;  %v4082_v13 = vmul.f32 %v3968_v6, %v3968_v6  ;;  %vm4233_vm12 = vcmp.eq.s32.totalorder %v12679_v29, 17  ;;  %vm15866_vm9 = vmmov %vm15864_vm3 }
 0x3c8   : > { %vm15546_vm10 = vcmp.lt.s32.totalorder %v12754_v4, 16  ;;  %4629 = vst.msk [vmem:[#allocation2 + $0xb3] sm:$0xff] %vm15864_vm3, %v4593_v43  ;;  %v3204_v23 = vsel %vm3190_vm15, %v3173_v5, %v3174_v15  ;;  %v4026_v63 = vadd.f32 %v4025_v1, %v4024_v33  ;;  %v3138_v53 = vadd.f32 %v3056_v47, %v15865_v41  ;;  %v9656_v6 = vpop.f32.mrf.mxu0 }
 0x3c9   : > { %v13230_v2 = vadd.s32 280, %v11870_v61  ;;  %v4139_v12 = vsel %vm15866_vm9, %v4082_v13, 0.0  ;;  %vm15867_vm4 = vcmask 1045504   ;;  %v13237_v43 = vsel %vm13215_vm11, %v3797_v28, %v13121_v42  ;;  %vm15869_vm9 = vmmov %vm15864_vm3  ;;  %v15870_v28 = vld [vmem:[#allocation27_spill] sm:$0xff] }
 0x3ca   : > { %v4400_v46 = vsel %vm15867_vm4, %v4397_v56, %v4399_v62  ;;  %15868 = vst [vmem:[#allocation16_spill] sm:$0xff] %v13237_v43  ;;  %v13240_v5 = vsub.s32 %v12955_v50, %v3621_v31  ;;  %v4140_v33 = vadd.f32 %v4139_v12, %v4138_v30  ;;  %v3175_v47 = vrot.slane %v3138_v53, 6  ;;  %v3061_v42 = vpop.f32.mrf.mxu0 }
 0x3cb   : > { %v4486_v1 = vsel %vm4231_vm5, %v4400_v46, %v3136_v35  ;;  %v3969_v41 = vsel %vm15543_vm14, %v3138_v53, 0.0  ;;  %v4401_v10 = vrot.slane %v3138_v53, 2  ;;  %vm4234_vm11 = vcmp.eq.s32.totalorder %v12683_v59, 17 }
 0x3cc   : > { %v4594_v56 = vsel %vm4195_vm8, %v3205_v34, %v4486_v1  ;;  %v4027_v13 = vsel %vm15864_vm3, %v3969_v41, 0.0  ;;  %v4083_v6 = vmul.f32 %v3969_v41, %v3969_v41  ;;  %vm15547_vm13 = vcmp.lt.s32.totalorder %v12814_v48, 16  ;;  %vm15871_vm8 = vmmov %vm15864_vm3  ;;  %v9659_v46 = vpop.f32.mrf.mxu0 }
 0x3cd   : > { %4630 = vst.msk [vmem:[#allocation2 + $0xbb] sm:$0xff] %vm15869_vm9, %v4594_v56  ;;  %v3203_v50 = vsel %vm3190_vm15, %v3174_v15, %v3175_v47  ;;  %v4028_v35 = vadd.f32 %v4027_v13, %v4026_v63  ;;  %v3139_v31 = vadd.f32 %v3061_v42, %v15870_v28  ;;  %vm4198_vm5 = vcmp.eq.s32.totalorder %v12683_v59, 16 }
 0x3ce   : > { %v3631_v34 = vshrl.u32 %v13127_v20, 4  ;;  %v4141_v30 = vsel %vm15871_vm8, %v4083_v6, 0.0  ;;  %v4402_v12 = vsel %vm15867_vm4, %v4399_v62, %v4401_v10  ;;  %v3064_v28 = vpop.f32.mrf.mxu0  ;;  %vm4235_vm9 = vcmp.eq.s32.totalorder %v12754_v4, 17  ;;  %vm15872_vm4 = vmmov %vm15864_vm3 }
 0x3cf   : > { %v13260_v1 = vmul.u32.u64.low 3817748708, %v13230_v2  ;;  %v13261_v41 = vmul.u32.u64.high 3817748708, %v13230_v2, %v13260_v1  ;;  %v4142_v56 = vadd.f32 %v4141_v30, %v4140_v33  ;;  %v4487_v15 = vsel %vm4232_vm2, %v4402_v12, %v3137_v52  ;;  %v15873_v30 = vld [vmem:[#allocation28_spill] sm:$0xff] }
 0x3d0   : > { %v3176_v63 = vrot.slane %v3139_v31, 6  ;;  %v3970_v13 = vsel %vm15542_vm0, %v3139_v31, 0.0  ;;  %v4595_v20 = vsel %vm4196_vm1, %v3204_v23, %v4487_v15  ;;  %v4403_v62 = vrot.slane %v3139_v31, 2  ;;  %v9660_v1 = vpop.f32.mrf.mxu0 }
 0x3d1   : > { %v4029_v6 = vsel %vm15864_vm3, %v3970_v13, 0.0  ;;  %v4084_v42 = vmul.f32 %v3970_v13, %v3970_v13  ;;  %vm15551_vm8 = vcmp.lt.s32.totalorder %v12912_v44, 16  ;;  %4631 = vst.msk [vmem:[#allocation2 + $0xc3] sm:$0xff] %vm15872_vm4, %v4595_v20  ;;  %v3140_v12 = vadd.f32 %v3064_v28, %v15873_v30  ;;  %vm15875_vm4 = vmmov %vm15864_vm3 }
 0x3d2   : > { %v3202_v52 = vsel %vm3190_vm15, %v3175_v47, %v3176_v63  ;;  %v4030_v33 = vadd.f32 %v4029_v6, %v4028_v35  ;;  %vm4199_vm2 = vcmp.eq.s32.totalorder %v12754_v4, 16  ;;  %vm3690_vm1 = vcmp.ne.s32.totalorder %v13240_v5, 0  ;;  %vm15876_vm6 = vmmov %vm15875_vm4 }
 0x3d3   : > { %v4143_v23 = vsel %vm15864_vm3, %v4084_v42, 0.0  ;;  %vm15874_vm0 = vcmask 1045504   ;;  %vm3726_vm14 = vcmp.lt.s32.totalorder %v13240_v5, 0  ;;  %v3632_v15 = vmul.u32 18, %v3631_v34 }
 0x3d4   : > { %v4404_v46 = vsel %vm15874_vm0, %v4401_v10, %v4403_v62  ;;  %v4144_v13 = vadd.f32 %v4143_v23, %v4142_v56  ;;  %v3177_v47 = vrot.slane %v3140_v12, 6  ;;  %v3971_v35 = vsel %vm15546_vm10, %v3140_v12, 0.0  ;;  %v3069_v10 = vpop.f32.mrf.mxu0  ;;  %v15877_v56 = vld [vmem:[#allocation29_spill] sm:$0xff]  ;;  %vm15880_vm10 = vmmov %vm15876_vm6 }
 0x3d5   : > { %v4488_v20 = vsel %vm4233_vm12, %v4404_v46, %v3138_v53  ;;  %v4031_v28 = vsel %vm15875_vm4, %v3971_v35, 0.0  ;;  %v4085_v42 = vmul.f32 %v3971_v35, %v3971_v35  ;;  %v4405_v30 = vrot.slane %v3140_v12, 2 }
 0x3d6   : > { %v4596_v6 = vsel %vm4197_vm7, %v3203_v50, %v4488_v20  ;;  %vm4236_vm0 = vcmp.eq.s32.totalorder %v12814_v48, 17  ;;  %vm15549_vm3 = vcmp.lt.s32.totalorder %v12985_v24, 16  ;;  %v3201_v53 = vsel %vm3190_vm15, %v3176_v63, %v3177_v47  ;;  %vm15878_vm7 = vmmov %vm15875_vm4  ;;  %v9663_v20 = vpop.f32.mrf.mxu0 }
 0x3d7   : > { %4632 = vst.msk [vmem:[#allocation2 + $0xcb] sm:$0xff] %vm15876_vm6, %v4596_v6  ;;  %v4032_v34 = vadd.f32 %v4031_v28, %v4030_v33  ;;  %v3141_v23 = vadd.f32 %v3069_v10, %v15877_v56  ;;  %vm4200_vm12 = vcmp.eq.s32.totalorder %v12814_v48, 16  ;;  %v3798_v50 = vadd.s32 18, %v13240_v5 }
 0x3d8   : > { %v4145_v46 = vsel %vm15878_vm7, %v4085_v42, 0.0  ;;  %vm15879_vm4 = vcmask 1045504   ;;  %v13299_v35 = vsub.s32 %v13081_v21, %v3632_v15  ;;  %v3642_v6 = vshrl.u32 %v13204_v60, 4  ;;  %v3072_v20 = vpop.f32.mrf.mxu0 }
 0x3d9   : > { %v4406_v1 = vsel %vm15879_vm4, %v4403_v62, %v4405_v30  ;;  %v4146_v51 = vadd.f32 %v4145_v46, %v4144_v13  ;;  %v3178_v33 = vrot.slane %v3141_v23, 6  ;;  %v3972_v28 = vsel %vm15547_vm13, %v3141_v23, 0.0 }
 0x3da   : > { %v4489_v63 = vsel %vm4234_vm11, %v4406_v1, %v3139_v31  ;;  %v4033_v42 = vsel %vm15876_vm6, %v3972_v28, 0.0  ;;  %v4086_v62 = vmul.f32 %v3972_v28, %v3972_v28  ;;  %v4407_v56 = vrot.slane %v3141_v23, 2  ;;  %v15881_v31 = vld [vmem:[#allocation31_spill] sm:$0xff]  ;;  %v9664_v1 = vpop.f32.mrf.mxu0 }
 0x3db   : > { %v4597_v10 = vsel %vm4198_vm5, %v3202_v52, %v4489_v63  ;;  %vm4237_vm7 = vcmp.eq.s32.totalorder %v12912_v44, 17  ;;  %v3200_v60 = vsel %vm3190_vm15, %v3177_v47, %v3178_v33  ;;  %v4034_v21 = vadd.f32 %v4033_v42, %v4032_v34  ;;  %vm15882_vm5 = vmmov %vm15876_vm6 }
 0x3dc   : > { %4633 = vst.msk [vmem:[#allocation2 + $0xd3] sm:$0xff] %vm15880_vm10, %v4597_v10  ;;  %v3142_v15 = vadd.f32 %v3072_v20, %v15881_v31  ;;  %vm4201_vm11 = vcmp.eq.s32.totalorder %v12912_v44, 16  ;;  %v3653_v52 = vshrl.u32 %v13261_v41, 4  ;;  %v4147_v13 = vsel %vm15882_vm5, %v4086_v62, 0.0  ;;  %vm15883_vm6 = vmmov %vm15879_vm4  ;;  %v3077_v20 = vpop.f32.mrf.mxu0  ;;  %v15887_v31 = vld [vmem:[#allocation37_spill] sm:$0xff] }
 0x3dd   : > { %v4408_v46 = vsel %vm15883_vm6, %v4405_v30, %v4407_v56  ;;  %vm13323_vm10 = vmand %vm3726_vm14, %vm3690_vm1  ;;  %vm3691_vm13 = vcmp.ne.s32.totalorder %v13299_v35, 0  ;;  %vm3727_vm4 = vcmp.lt.s32.totalorder %v13299_v35, 0  ;;  %v4148_v47 = vadd.f32 %v4147_v13, %v4146_v51 }
 0x3de   : > { %v4490_v41 = vsel %vm4235_vm9, %v4408_v46, %v3140_v12  ;;  %v3179_v34 = vrot.slane %v3142_v15, 6  ;;  %v3973_v30 = vsel %vm15551_vm8, %v3142_v15, 0.0  ;;  %v4409_v62 = vrot.slane %v3142_v15, 2  ;;  %vm15886_vm6 = vmmov %vm15882_vm5 }
 0x3df   : > { %v4598_v28 = vsel %vm4199_vm2, %v3201_v53, %v4490_v41  ;;  %v4035_v10 = vsel %vm15882_vm5, %v3973_v30, 0.0  ;;  %v4087_v42 = vmul.f32 %v3973_v30, %v3973_v30  ;;  %vm4238_vm14 = vcmp.eq.s32.totalorder %v12985_v24, 17  ;;  %vm15889_vm2 = vmmov %vm15882_vm5  ;;  %v9667_v41 = vpop.f32.mrf.mxu0 }
 0x3e0   : > { %vm15550_vm1 = vcmp.lt.s32.totalorder %v13160_v32, 16  ;;  %4634 = vst.msk [vmem:[#allocation2 + $0xdb] sm:$0xff] %vm15886_vm6, %v4598_v28  ;;  %v3199_v51 = vsel %vm3190_vm15, %v3178_v33, %v3179_v34  ;;  %v4036_v12 = vadd.f32 %v4035_v10, %v4034_v21  ;;  %v3143_v13 = vadd.f32 %v3077_v20, %v15887_v31  ;;  %vm15893_vm6 = vmmov %vm15889_vm2  ;;  %v15895_v20 = vld [vmem:[#allocation40_spill] sm:$0xff] }
 0x3e1   : > { %vm4202_vm9 = vcmp.eq.s32.totalorder %v12985_v24, 16  ;;  %v13346_v53 = vsel %vm13323_vm10, %v3798_v50, %v13240_v5  ;;  %v4149_v46 = vsel %vm15889_vm2, %v4087_v42, 0.0  ;;  %vm15890_vm5 = vcmask 1045504   ;;  %vm13359_vm10 = vmand %vm3727_vm4, %vm3691_vm13 }
 0x3e2   : > { %15888 = vst [vmem:[#allocation19_spill] sm:$0xff] %v13346_v53  ;;  %v4410_v1 = vsel %vm15890_vm5, %v4407_v56, %v4409_v62  ;;  %v3799_v30 = vadd.s32 18, %v13299_v35  ;;  %v3643_v28 = vmul.u32 18, %v3642_v6  ;;  %v4150_v4 = vadd.f32 %v4149_v46, %v4148_v47  ;;  %vm15894_vm5 = vmmov %vm15893_vm6 }
 0x3e3   : > { %v4491_v33 = vsel %vm4236_vm0, %v4410_v1, %v3141_v23  ;;  %v3180_v21 = vrot.slane %v3143_v13, 6  ;;  %v3974_v10 = vsel %vm15549_vm3, %v3143_v13, 0.0  ;;  %v4411_v63 = vrot.slane %v3143_v13, 2  ;;  %v3080_v23 = vpop.f32.mrf.mxu0 }
 0x3e4   : > { %v4599_v50 = vsel %vm4200_vm12, %v3200_v60, %v4491_v33  ;;  %v4037_v6 = vsel %vm15893_vm6, %v3974_v10, 0.0  ;;  %v4088_v56 = vmul.f32 %v3974_v10, %v3974_v10  ;;  %vm4239_vm0 = vcmp.eq.s32.totalorder %v13058_v8, 17  ;;  %vm15896_vm12 = vmmov %vm15894_vm5 }
 0x3e5   : > { %vm3869_vm2 = vcmp.lt.s32.totalorder %v13237_v43, 16  ;;  %4635 = vst.msk [vmem:[#allocation2 + $0xe3] sm:$0xff] %vm15894_vm5, %v4599_v50  ;;  %v3198_v47 = vsel %vm3190_vm15, %v3179_v34, %v3180_v21  ;;  %v4038_v42 = vadd.f32 %v4037_v6, %v4036_v12  ;;  %v3144_v31 = vadd.f32 %v3080_v23, %v15895_v20  ;;  %v9668_v41 = vpop.f32.mrf.mxu0 }
 0x3e6   : > { %vm4203_vm13 = vcmp.eq.s32.totalorder %v13058_v8, 16  ;;  %v3654_v60 = vmul.u32 18, %v3653_v52  ;;  %v4151_v46 = vsel %vm15896_vm12, %v4088_v56, 0.0  ;;  %vm15897_vm4 = vcmask 1045504  }
 0x3e7   : > { %v4412_v1 = vsel %vm15897_vm4, %v4409_v62, %v4411_v63  ;;  %v13378_v33 = vsel %vm13359_vm10, %v3799_v30, %v13299_v35  ;;  %v13381_v10 = vsub.s32 %v13153_v27, %v3643_v28  ;;  %v4152_v34 = vadd.f32 %v4151_v46, %v4150_v4  ;;  %v3085_v35 = vpop.f32.mrf.mxu0  ;;  %vm15900_vm4 = vmmov %vm15894_vm5 }
 0x3e8   : > { %15898 = vst [vmem:[#allocation21_spill] sm:$0xff] %v13378_v33  ;;  %v4492_v12 = vsel %vm4237_vm7, %v4412_v1, %v3142_v15  ;;  %v3181_v50 = vrot.slane %v3144_v31, 6  ;;  %vm15899_vm6 = vcmp.lt.s32.totalorder %v13058_v8, 16  ;;  %v4413_v5 = vrot.slane %v3144_v31, 2  ;;  %v15901_v15 = vld [vmem:[#allocation41_spill] sm:$0xff] }
 0x3e9   : > { %v3975_v52 = vsel %vm15899_vm6, %v3144_v31, 0.0  ;;  %v4600_v62 = vsel %vm4201_vm11, %v3199_v51, %v4492_v12  ;;  %vm4240_vm10 = vcmp.eq.s32.totalorder %v13160_v32, 17  ;;  %vm3870_vm12 = vcmp.lt.s32.totalorder %v13346_v53, 16  ;;  %vm15902_vm11 = vmmov %vm15900_vm4  ;;  %v9671_v20 = vpop.f32.mrf.mxu0 }
 0x3ea   : > { %v4039_v6 = vsel %vm15894_vm5, %v3975_v52, 0.0  ;;  %v4089_v56 = vmul.f32 %v3975_v52, %v3975_v52  ;;  %4636 = vst.msk [vmem:[#allocation2 + $0xeb] sm:$0xff] %vm15900_vm4, %v4600_v62  ;;  %v3197_v4 = vsel %vm3190_vm15, %v3180_v21, %v3181_v50  ;;  %v3145_v30 = vadd.f32 %v3085_v35, %v15901_v15  ;;  %vm15904_vm3 = vmmov %vm15902_vm11  ;;  %v15906_v52 = vld [vmem:[#allocation42_spill] sm:$0xff] }
 0x3eb   : > { %v4040_v27 = vadd.f32 %v4039_v6, %v4038_v42  ;;  %vm4204_vm7 = vcmp.eq.s32.totalorder %v13160_v32, 16  ;;  %v13398_v51 = vsub.s32 %v13230_v2, %v3654_v60  ;;  %vm15903_vm6 = vcmask 1045504   ;;  %v3088_v12 = vpop.f32.mrf.mxu0 }
 0x3ec   : > { %v4153_v28 = vsel %vm15902_vm11, %v4089_v56, 0.0  ;;  %v4414_v23 = vsel %vm15903_vm6, %v4411_v63, %v4413_v5  ;;  %vm3692_vm5 = vcmp.ne.s32.totalorder %v13381_v10, 0  ;;  %vm3728_vm4 = vcmp.lt.s32.totalorder %v13381_v10, 0  ;;  %vm15905_vm6 = vmmov %vm15904_vm3 }
 0x3ed   : > { %v4154_v46 = vadd.f32 %v4153_v28, %v4152_v34  ;;  %v4493_v21 = vsel %vm4238_vm14, %v4414_v23, %v3143_v13  ;;  %v3182_v42 = vrot.slane %v3145_v30, 6  ;;  %v3976_v1 = vsel %vm15550_vm1, %v3145_v30, 0.0  ;;  %v9672_v35 = vpop.f32.mrf.mxu0 }
 0x3ee   : > { %v4601_v2 = vsel %vm4202_vm9, %v3198_v47, %v4493_v21  ;;  %v4041_v60 = vsel %vm15904_vm3, %v3976_v1, 0.0  ;;  %v4090_v41 = vmul.f32 %v3976_v1, %v3976_v1  ;;  %v4415_v63 = vrot.slane %v3145_v30, 2  ;;  %vm15907_vm9 = vmmov %vm15904_vm3 }
 0x3ef   : > { %vm4241_vm11 = vcmp.eq.s32.totalorder %v13237_v43, 17  ;;  %4637 = vst.msk [vmem:[#allocation2 + $0xf3] sm:$0xff] %vm15905_vm6, %v4601_v2  ;;  %v3196_v34 = vsel %vm3190_vm15, %v3181_v50, %v3182_v42  ;;  %v4042_v13 = vadd.f32 %v4041_v60, %v4040_v27  ;;  %v3146_v62 = vadd.f32 %v3088_v12, %v15906_v52  ;;  %vm3764_vm6 = vmand %vm3728_vm4, %vm3692_vm5  ;;  %v15910_v2 = vld [vmem:[#allocation43_spill] sm:$0xff] }
 0x3f0   : > { %vm4205_vm14 = vcmp.eq.s32.totalorder %v13237_v43, 16  ;;  %v3800_v6 = vadd.s32 18, %v13381_v10  ;;  %v4155_v47 = vsel %vm15907_vm9, %v4090_v41, 0.0  ;;  %vm15908_vm3 = vcmask 1045504  }
 0x3f1   : > { %v4416_v56 = vsel %vm15908_vm3, %v4413_v5, %v4415_v63  ;;  %vm3693_vm1 = vcmp.ne.s32.totalorder %v13398_v51, 0  ;;  %vm3729_vm8 = vcmp.lt.s32.totalorder %v13398_v51, 0  ;;  %v4156_v15 = vadd.f32 %v4155_v47, %v4154_v46  ;;  %v3093_v46 = vpop.f32.mrf.mxu0 }
 0x3f2   : > { %v4494_v50 = vsel %vm4239_vm0, %v4416_v56, %v3144_v31  ;;  %v3183_v27 = vrot.slane %v3146_v62, 6  ;;  %v3977_v28 = vsel %vm3869_vm2, %v3146_v62, 0.0  ;;  %v4417_v21 = vrot.slane %v3146_v62, 2  ;;  %vm15909_vm0 = vmmov %vm15907_vm9 }
 0x3f3   : > { %v4602_v5 = vsel %vm4203_vm13, %v3197_v4, %v4494_v50  ;;  %v4043_v23 = vsel %vm15907_vm9, %v3977_v28, 0.0  ;;  %v4091_v20 = vmul.f32 %v3977_v28, %v3977_v28  ;;  %vm4242_vm3 = vcmp.eq.s32.totalorder %v13346_v53, 17  ;;  %vm15911_vm4 = vmmov %vm15909_vm0  ;;  %v9675_v12 = vpop.f32.mrf.mxu0 }
 0x3f4   : > { %4638 = vst.msk [vmem:[#allocation2 + $0xfb] sm:$0xff] %vm15909_vm0, %v4602_v5  ;;  %v3195_v31 = vsel %vm3190_vm15, %v3182_v42, %v3183_v27  ;;  %v4044_v1 = vadd.f32 %v4043_v23, %v4042_v13  ;;  %v3147_v60 = vadd.f32 %v3093_v46, %v15910_v2  ;;  %vm3871_vm5 = vcmp.lt.s32.totalorder %v13378_v33, 16  ;;  %vm3765_vm9 = vmand %vm3729_vm8, %vm3693_vm1 }
 0x3f5   : > { %v4157_v41 = vsel %vm15911_vm4, %v4091_v20, 0.0  ;;  %vm15912_vm13 = vcmask 1045504   ;;  %v13442_v52 = vsel %vm3764_vm6, %v3800_v6, %v13381_v10  ;;  %v3801_v47 = vadd.s32 18, %v13398_v51  ;;  %vm15914_vm6 = vmmov %vm15909_vm0 }
 0x3f6   : > { %v4418_v4 = vsel %vm15912_vm13, %v4415_v63, %v4417_v21  ;;  %15913 = vst [vmem:[#allocation22_spill] sm:$0xff] %v13442_v52  ;;  %v4158_v56 = vadd.f32 %v4157_v41, %v4156_v15  ;;  %v3184_v42 = vrot.slane %v3147_v60, 6  ;;  %v3978_v13 = vsel %vm3870_vm12, %v3147_v60, 0.0  ;;  %v3096_v15 = vpop.f32.mrf.mxu0  ;;  %vm15915_vm4 = vmmov %vm15909_vm0  ;;  %v4680_v8 = vld [vmem:[#allocation2 + $0xf3] sm:$0xff] }
 0x3f7   : > { %v4495_v35 = vsel %vm4240_vm10, %v4418_v4, %v3145_v30  ;;  %v4045_v10 = vsel %vm15914_vm6, %v3978_v13, 0.0  ;;  %v4092_v6 = vmul.f32 %v3978_v13, %v3978_v13  ;;  %v4419_v50 = vrot.slane %v3147_v60, 2  ;;  %vm15916_vm8 = vmmov %vm15912_vm13 }
 0x3f8   : > { %v4603_v63 = vsel %vm4204_vm7, %v3196_v34, %v4495_v35  ;;  %v3194_v30 = vsel %vm3190_vm15, %v3183_v27, %v3184_v42  ;;  %v4046_v28 = vadd.f32 %v4045_v10, %v4044_v1  ;;  %v3148_v5 = vadd.f32 %v3096_v15, %v12418_v9  ;;  %v9676_v34 = vpop.f32.mrf.mxu0  ;;  %vm15919_vm13 = vmmov %vm15909_vm0 }
 0x3f9   : > { %4639 = vst.msk [vmem:[#allocation2 + $0x103] sm:$0xff] %vm15909_vm0, %v4603_v63  ;;  %vm3872_vm10 = vcmp.lt.s32.totalorder %v13442_v52, 16  ;;  %v4159_v23 = vsel %vm15915_vm4, %v4092_v6, 0.0  ;;  %v4420_v20 = vsel %vm15916_vm8, %v4417_v21, %v4419_v50  ;;  %v13464_v46 = vsel %vm3765_vm9, %v3801_v47, %v13398_v51  ;;  %vm15920_vm6 = vmmov %vm15909_vm0 }
 0x3fa   : > { %15917 = vst [vmem:[#allocation23_spill] sm:$0xff] %v13464_v46  ;;  %vm172_vm1 = vcmask 27648   ;;  %vm4174_vm7 = vcmp.eq.s32.totalorder %v12135_v22, 16  ;;  %v4160_v2 = vadd.f32 %v4159_v23, %v4158_v56  ;;  %v4496_v27 = vsel %vm4241_vm11, %v4420_v20, %v3146_v62  ;;  %v3101_v47 = vpop.f32.mrf.mxu0  ;;  %vm15921_vm11 = vmmov %vm15909_vm0 }
 0x3fb   : > { %v3185_v1 = vrot.slane %v3148_v5, 6  ;;  %v3979_v9 = vsel %vm3871_vm5, %v3148_v5, 0.0  ;;  %v15918_v41 = vmov 0.0   ;;  %v4604_v21 = vsel %vm4205_vm14, %v3195_v31, %v4496_v27  ;;  %vm15922_vm14 = vmmov %vm15916_vm8 }
 0x3fc   : > { %173 = vst.msk [vmem:[#allocation2 + $0x144] sm:$0xf] %vm172_vm1, %v15918_v41  ;;  %v4047_v4 = vsel %vm15919_vm13, %v3979_v9, 0.0  ;;  %v4093_v51 = vmul.f32 %v3979_v9, %v3979_v9  ;;  %v4421_v12 = vrot.slane %v3148_v5, 2  ;;  %vm4206_vm9 = vcmp.eq.s32.totalorder %v13346_v53, 16  ;;  %v9679_v63 = vpop.f32.mrf.mxu0  ;;  %vm15923_vm8 = vmmov %vm15920_vm6 }
 0x3fd   : > { %4640 = vst.msk [vmem:[#allocation2 + $0x10b] sm:$0xff] %vm15920_vm6, %v4604_v21  ;;  %v3193_v62 = vsel %vm3190_vm15, %v3184_v42, %v3185_v1  ;;  %v4048_v56 = vadd.f32 %v4047_v4, %v4046_v28  ;;  %v3149_v35 = vadd.f32 %v3101_v47, %v12443_v3  ;;  %vm4243_vm0 = vcmp.eq.s32.totalorder %v13378_v33, 17  ;;  %vm15924_vm13 = vmmov %vm15920_vm6 }
 0x3fe   : > { %v4161_v13 = vsel %vm15921_vm11, %v4093_v51, 0.0  ;;  %v4422_v31 = vsel %vm15922_vm14, %v4419_v50, %v4421_v12  ;;  %vm3873_vm4 = vcmp.lt.s32.totalorder %v13464_v46, 16  ;;  %v3104_v34 = vpop.f32.mrf.mxu0  ;;  %vm4207_vm1 = vcmp.eq.s32.totalorder %v13378_v33, 16  ;;  %vm15926_vm11 = vmmov %vm15922_vm14  ;;  %v4678_v33 = vld [vmem:[#allocation2 + $0xe3] sm:$0xff] }
 0x3ff   : > { %v4162_v10 = vadd.f32 %v4161_v13, %v4160_v2  ;;  %v4497_v6 = vsel %vm4242_vm3, %v4422_v31, %v3147_v60  ;;  %v3186_v15 = vrot.slane %v3149_v35, 6  ;;  %v3980_v42 = vsel %vm3872_vm10, %v3149_v35, 0.0  ;;  %vm15925_vm3 = vmmov %vm15920_vm6 }
 0x400   : > { %v4605_v28 = vsel %vm4206_vm9, %v3194_v30, %v4497_v6  ;;  %v4049_v3 = vsel %vm15923_vm8, %v3980_v42, 0.0  ;;  %v4094_v23 = vmul.f32 %v3980_v42, %v3980_v42  ;;  %v4423_v20 = vrot.slane %v3149_v35, 2  ;;  %v9680_v9 = vpop.f32.mrf.mxu0  ;;  %vm15927_vm14 = vmmov %vm15925_vm3  ;;  %v4682_v43 = vld [vmem:[#allocation2 + $0x103] sm:$0xff] }
 0x401   : > { %4641 = vst.msk [vmem:[#allocation2 + $0x113] sm:$0xff] %vm15924_vm13, %v4605_v28  ;;  %v3192_v50 = vsel %vm3190_vm15, %v3185_v1, %v3186_v15  ;;  %v4050_v2 = vadd.f32 %v4049_v3, %v4048_v56  ;;  %v3150_v60 = vadd.f32 %v3104_v34, %v12467_v55  ;;  %vm4208_vm6 = vcmp.eq.s32.totalorder %v13442_v52, 16  ;;  %vm15928_vm8 = vmmov %vm15925_vm3 }
 0x402   : > { %v4163_v27 = vsel %vm15925_vm3, %v4094_v23, 0.0  ;;  %vm4244_vm9 = vcmp.eq.s32.totalorder %v13442_v52, 17  ;;  %v4424_v30 = vsel %vm15926_vm11, %v4421_v12, %v4423_v20  ;;  %v3109_v13 = vpop.f32.mrf.mxu0  ;;  %v15929_v31 = vrot.slane %v12605_v16, 6 }
 0x403   : > { %v4164_v41 = vadd.f32 %v4163_v27, %v4162_v10  ;;  %v4498_v21 = vsel %vm4243_vm0, %v4424_v30, %v3148_v5  ;;  %v3187_v4 = vrot.slane %v3150_v60, 6  ;;  %v3981_v1 = vsel %vm3873_vm4, %v3150_v60, 0.0  ;;  %vm15930_vm0 = vmmov %vm15925_vm3 }
 0x404   : > { %v4606_v51 = vsel %vm4207_vm1, %v3193_v62, %v4498_v21  ;;  %v4051_v55 = vsel %vm15927_vm14, %v3981_v1, 0.0  ;;  %v4095_v47 = vmul.f32 %v3981_v1, %v3981_v1  ;;  %v4425_v56 = vrot.slane %v3150_v60, 2  ;;  %vm15931_vm1 = vmmov %vm15926_vm11  ;;  %v9683_v16 = vpop.f32.mrf.mxu0  ;;  %v4683_v24 = vld [vmem:[#allocation2 + $0x10b] sm:$0xff] }
 0x405   : > { %4642 = vst.msk [vmem:[#allocation2 + $0x11b] sm:$0xff] %vm15928_vm8, %v4606_v51  ;;  %v3226_v12 = vsel %vm3190_vm15, %v3187_v4, %v15929_v31  ;;  %v4052_v63 = vadd.f32 %v4051_v55, %v4050_v2  ;;  %v3151_v5 = vadd.f32 %v3109_v13, %v12519_v54  ;;  %v3191_v10 = vsel %vm3190_vm15, %v3186_v15, %v3187_v4  ;;  %vm15932_vm3 = vmmov %vm15930_vm0  ;;  %v13547_v16 = vld [vmem:[#allocation2 + $0x43] sm:$0xff] }
 0x406   : > { %v4165_v62 = vsel %vm15930_vm0, %v4095_v47, 0.0  ;;  %v4426_v6 = vsel %vm15931_vm1, %v4423_v20, %v4425_v56  ;;  %v4573_v42 = vsel %vm4174_vm7, %v3226_v12, %v12711_v45  ;;  %vm4245_vm13 = vcmp.eq.s32.totalorder %v13464_v46, 17  ;;  %v3112_v15 = vpop.f32.mrf.mxu0  ;;  %vm15933_vm7 = vmmov %vm15930_vm0 }
 0x407   : > { %v4053_v28 = vrot.slane %v4052_v63, 4  ;;  %v4166_v3 = vadd.f32 %v4165_v62, %v4164_v41  ;;  %v4499_v23 = vsel %vm4244_vm9, %v4426_v6, %v3149_v35  ;;  %4609 = vst.msk [vmem:[#allocation2 + $0x13] sm:$0xff] %vm15932_vm3, %v4573_v42  ;;  %v4427_v61 = vrot.slane %v3151_v5, 2  ;;  %vm15934_vm11 = vmmov %vm15931_vm1  ;;  %v13528_v41 = vld [vmem:[%s15496_s2 + $0xa] sm:$0x3]  ;;  %v13537_v5 = vld [vmem:[#allocation2 + $0x1b] sm:$0xff] }
 0x408   : > { %v4607_v54 = vsel %vm4208_vm6, %v3192_v50, %v4499_v23  ;;  %vm4209_vm15 = vcmp.eq.s32.totalorder %v13464_v46, 16  ;;  %v9684_v27 = vpop.f32.mrf.mxu0  ;;  %vm15935_vm6 = vmmov %vm15930_vm0  ;;  %vm15936_vm9 = vcmask 1041408   ;;  %v13541_v62 = vld [vmem:[#allocation2 + $0x2b] sm:$0xff]  ;;  %v13543_v6 = vld [vmem:[#allocation2 + $0x33] sm:$0xff]  ;;  %vm4833_vm14 = vcmask 24576  }
 0x409   : > { %v4054_v20 = vadd.f32 %v4053_v28, %v4052_v63  ;;  %v4167_v34 = vrot.slane %v4166_v3, 4  ;;  %4643 = vst.msk [vmem:[#allocation2 + $0x123] sm:$0xff] %vm15933_vm7, %v4607_v54  ;;  %v4428_v45 = vsel %vm15934_vm11, %v4425_v56, %v4427_v61  ;;  %10034 = vmatprep.subr.msk.bf16.mxu0 %vm15936_vm9, %v13528_v41  ;;  %v13545_v42 = vld [vmem:[#allocation2 + $0x3b] sm:$0xff]  ;;  %v13549_v28 = vld [vmem:[#allocation2 + $0x4b] sm:$0xff]  ;;  %v13555_v61 = vld [vmem:[#allocation2 + $0x63] sm:$0xff]  ;;  %vm4840_vm1 = vcmask 25600  }
 0x40a   : > { %v4500_v2 = vsel %vm4245_vm13, %v4428_v45, %v3150_v60  ;;  %v13553_v23 = vld [vmem:[#allocation2 + $0x5b] sm:$0xff]  ;;  %vm15937_vm8 = vmmov %vm15930_vm0 }
 0x40b   : > { %v4055_v30 = vrot.slane %v4054_v20, 2  ;;  %v4168_v9 = vadd.f32 %v4167_v34, %v4166_v3  ;;  %v4608_v35 = vsel %vm4209_vm15, %v3191_v10, %v4500_v2  ;;  %v13539_v10 = vld [vmem:[#allocation2 + $0x23] sm:$0xff]  ;;  %v13551_v3 = vld [vmem:[#allocation2 + $0x53] sm:$0xff]  ;;  %v13565_v45 = vld [vmem:[#allocation2 + $0x7b] sm:$0xff] }
 0x40c   : > { %4644 = vst.msk [vmem:[#allocation2 + $0x12b] sm:$0xff] %vm15935_vm6, %v4608_v35  ;;  %v13563_v34 = vld [vmem:[#allocation2 + $0x73] sm:$0xff]  ;;  %v13575_v35 = vld [vmem:[#allocation2 + $0x83] sm:$0xff]  ;;  %v4685_v44 = vld [vmem:[#allocation2 + $0x11b] sm:$0xff] }
 0x40d   : > { %v4056_v50 = vadd.f32 %v4055_v30, %v4054_v20  ;;  %v4169_v21 = vrot.slane %v4168_v9, 2  ;;  %v13561_v20 = vld [vmem:[#allocation2 + $0x6b] sm:$0xff]  ;;  %vm15938_vm13 = vmmov %vm15930_vm0 }
 0x40e   : > { %v13557_v54 = vld [vmem:[#allocation2 + $0x13] sm:$0xff]  ;;  %vm15939_vm3 = vmmov %vm15930_vm0 }
 0x40f   : > { %v4057_v4 = vrot.slane %v4056_v50, 1  ;;  %v4170_v1 = vadd.f32 %v4169_v21, %v4168_v9  ;;  %v13579_v21 = vld [vmem:[#allocation2 + $0x93] sm:$0xff]  ;;  %vm15940_vm15 = vmmov %vm15930_vm0 }
 0x410   : > { %v13559_v15 = vld [vmem:[#allocation2 + $0x123] sm:$0xff]  ;;  %vm15941_vm7 = vmmov %vm15930_vm0 }
 0x411   : > { %v4058_v51 = vadd.f32 %v4057_v4, %v4056_v50  ;;  %v4171_v60 = vrot.slane %v4170_v1, 1  ;;  %v13577_v50 = vld [vmem:[#allocation2 + $0x8b] sm:$0xff]  ;;  %vm15942_vm11 = vmmov %vm15930_vm0 }
 0x412   : > { %vm15943_vm6 = vmmov %vm15930_vm0 }
 0x413   : > { %v4172_v55 = vadd.f32 %v4171_v60, %v4170_v1  ;;  %v13533_v47 = vmul.f32 0.00390625, %v4058_v51  ;;  %v4687_v53 = vld [vmem:[#allocation2 + $0x12b] sm:$0xff]  ;;  %vm15944_vm9 = vmmov %vm15930_vm0 }
 0x415   : > { %v4646_v56 = vmul.f32 0.00390625, %v4172_v55  ;;  %v4647_v13 = vmul.f32 %v13533_v47, %v13533_v47  ;;  %v4688_v2 = vsub.f32 %v13557_v54, %v13533_v47  ;;  %v4722_v27 = vsub.f32 %v13559_v15, %v13533_v47  ;;  %v13589_v55 = vld [vmem:[#allocation2 + $0x9b] sm:$0xff] }
 0x416   : > { %v4689_v30 = vsub.f32 %v13537_v5, %v13533_v47  ;;  %v4690_v9 = vsub.f32 %v13539_v10, %v13533_v47  ;;  %v4691_v4 = vsub.f32 %v13541_v62, %v13533_v47  ;;  %v4692_v1 = vsub.f32 %v13543_v6, %v13533_v47  ;;  %v13603_v10 = vld [vmem:[#allocation2 + $0xb3] sm:$0xff]  ;;  %v13605_v62 = vld [vmem:[#allocation2 + $0xbb] sm:$0xff]  ;;  %v13607_v6 = vld [vmem:[#allocation2 + $0xc3] sm:$0xff] }
 0x417   : > { %v4648_v31 = vsub.f32 %v4646_v56, %v4647_v13  ;;  %v4693_v51 = vsub.f32 %v13545_v42, %v13533_v47  ;;  %v4694_v60 = vsub.f32 %v13547_v16, %v13533_v47  ;;  %v13591_v56 = vld [vmem:[#allocation2 + $0xa3] sm:$0xff]  ;;  %v13593_v13 = vld [vmem:[#allocation2 + $0xab] sm:$0xff]  ;;  %v4698_v5 = vsub.f32 %v13555_v61, %v13533_v47  ;;  %v13619_v61 = vld [vmem:[#allocation2 + $0xd3] sm:$0xff] }
 0x418   : > { %v4699_v42 = vsub.f32 %v13561_v20, %v13533_v47  ;;  %v4700_v16 = vsub.f32 %v13563_v34, %v13533_v47  ;;  %v13621_v54 = vld [vmem:[#allocation2 + $0xdb] sm:$0xff]  ;;  %v4703_v15 = vsub.f32 %v13577_v50, %v13533_v47  ;;  %v4704_v20 = vsub.f32 %v13579_v21, %v13533_v47 }
 0x419   : > { %v4649_v12 = vmax.f32 %v4648_v31, 0.0  ;;  %v4695_v31 = vsub.f32 %v13549_v28, %v13533_v47  ;;  %v4701_v28 = vsub.f32 %v13565_v45, %v13533_v47  ;;  %v4705_v34 = vsub.f32 %v13589_v55, %v13533_v47  ;;  %v4681_v55 = vld [vmem:[#allocation2 + $0xfb] sm:$0xff] }
 0x41a   : > { %v4706_v45 = vsub.f32 %v13591_v56, %v13533_v47  ;;  %v4707_v46 = vsub.f32 %v13593_v13, %v13533_v47  ;;  %v4708_v52 = vsub.f32 %v13603_v10, %v13533_v47  ;;  %v4709_v50 = vsub.f32 %v13605_v62, %v13533_v47  ;;  %v4684_v62 = vld [vmem:[#allocation2 + $0x113] sm:$0xff] }
 0x41b   : > { %v4650_v63 = vadd.f32 1e-05, %v4649_v12  ;;  %v4696_v12 = vsub.f32 %v13551_v3, %v13533_v47  ;;  %v4702_v3 = vsub.f32 %v13575_v35, %v13533_v47  ;;  %v4679_v35 = vld [vmem:[#allocation2 + $0xeb] sm:$0xff]  ;;  %v4710_v21 = vsub.f32 %v13607_v6, %v13533_v47 }
 0x41c   : > { %v4712_v32 = vsub.f32 %v13619_v61, %v13533_v47  ;;  %v4713_v13 = vsub.f32 %v13621_v54, %v13533_v47  ;;  %v4714_v10 = vsub.f32 %v4678_v33, %v13533_v47  ;;  %v4715_v6 = vsub.f32 %v4679_v35, %v13533_v47 }
 0x41d   : > { %10121 = vrsqrt.f32 %v4650_v63  ;;  %v4697_v63 = vsub.f32 %v13553_v23, %v13533_v47  ;;  %v13617_v23 = vld [vmem:[#allocation2 + $0xcb] sm:$0xff]  ;;  %v4716_v48 = vsub.f32 %v4680_v8, %v13533_v47  ;;  %v4717_v59 = vsub.f32 %v4681_v55, %v13533_v47 }
 0x41e   : > { %v4711_v56 = vsub.f32 %v13617_v23, %v13533_v47  ;;  %v4718_v29 = vsub.f32 %v4682_v43, %v13533_v47  ;;  %v4719_v18 = vsub.f32 %v4683_v24, %v13533_v47  ;;  %v4720_v61 = vsub.f32 %v4684_v62, %v13533_v47 }
 0x41f   : > { %v4721_v54 = vsub.f32 %v4685_v44, %v13533_v47  ;;  %v4723_v33 = vsub.f32 %v4687_v53, %v13533_v47 }
 0x42a   : > { %v10122_v23 = vpop.eup %10121 }
 0x42b   : > { %v4724_v57 = vmul.f32 %v10122_v23, %v4688_v2  ;;  %v4758_v36 = vmul.f32 %v10122_v23, %v4722_v27  ;;  %v4725_v49 = vmul.f32 %v10122_v23, %v4689_v30  ;;  %v4726_v58 = vmul.f32 %v10122_v23, %v4690_v9 }
 0x42c   : > { %v4727_v35 = vmul.f32 %v10122_v23, %v4691_v4  ;;  %v4728_v11 = vmul.f32 %v10122_v23, %v4692_v1  ;;  %v4729_v8 = vmul.f32 %v10122_v23, %v4693_v51  ;;  %v4730_v0 = vmul.f32 %v10122_v23, %v4694_v60 }
 0x42d   : > { %v4760_v55 = vmax.f32 %v4724_v57, 0.0  ;;  %v4794_v43 = vmax.f32 %v4758_v36, 0.0  ;;  %v4731_v40 = vmul.f32 %v10122_v23, %v4695_v31  ;;  %v4732_v26 = vmul.f32 %v10122_v23, %v4696_v12 }
 0x42e   : > { %v4733_v24 = vmul.f32 %v10122_v23, %v4697_v63  ;;  %v13654_v25 = vmul.f32 %v10122_v23, %v4698_v5  ;;  %v13656_v62 = vmul.f32 %v10122_v23, %v4699_v42  ;;  %v13658_v44 = vmul.f32 %v10122_v23, %v4700_v16 }
 0x42f   : > { %4796 = vst.msk [vmem:[#allocation2 + $0x13] sm:$0xff] %vm15937_vm8, %v4760_v55  ;;  %v4737_v53 = vmul.f32 %v10122_v23, %v4701_v28  ;;  %v13662_v47 = vmul.f32 %v10122_v23, %v4702_v3  ;;  %v13664_v2 = vmul.f32 %v10122_v23, %v4703_v15  ;;  %v13666_v57 = vmul.f32 %v10122_v23, %v4704_v20  ;;  %vm15945_vm8 = vmmov %vm15930_vm0 }
 0x430   : > { %4830 = vst.msk [vmem:[#allocation2 + $0x123] sm:$0xff] %vm15930_vm0, %v4794_v43  ;;  %v13668_v36 = vmul.f32 %v10122_v23, %v4705_v34  ;;  %v13670_v27 = vmul.f32 %v10122_v23, %v4706_v45  ;;  %v13672_v30 = vmul.f32 %v10122_v23, %v4707_v46  ;;  %v13674_v9 = vmul.f32 %v10122_v23, %v4708_v52 }
 0x431   : > { %v13676_v4 = vmul.f32 %v10122_v23, %v4709_v50  ;;  %v13678_v1 = vmul.f32 %v10122_v23, %v4710_v21  ;;  %v13680_v51 = vmul.f32 %v10122_v23, %v4711_v56  ;;  %v13682_v60 = vmul.f32 %v10122_v23, %v4712_v32 }
 0x432   : > { %v13684_v31 = vmul.f32 %v10122_v23, %v4713_v13  ;;  %v13686_v12 = vmul.f32 %v10122_v23, %v4714_v10  ;;  %v13688_v63 = vmul.f32 %v10122_v23, %v4715_v6  ;;  %v13690_v5 = vmul.f32 %v10122_v23, %v4716_v48 }
 0x433   : > { %v13692_v46 = vmul.f32 %v10122_v23, %v4717_v59  ;;  %v13694_v52 = vmul.f32 %v10122_v23, %v4718_v29  ;;  %v13696_v42 = vmul.f32 %v10122_v23, %v4719_v18  ;;  %v13698_v16 = vmul.f32 %v10122_v23, %v4720_v61 }
 0x434   : > { %v13700_v28 = vmul.f32 %v10122_v23, %v4721_v54  ;;  %v4759_v32 = vmul.f32 %v10122_v23, %v4723_v33  ;;  %v4761_v3 = vmax.f32 %v4725_v49, 0.0  ;;  %v4762_v15 = vmax.f32 %v4726_v58, 0.0 }
 0x435   : > { %v4763_v20 = vmax.f32 %v4727_v35, 0.0  ;;  %v4764_v34 = vmax.f32 %v4728_v11, 0.0  ;;  %v4765_v45 = vmax.f32 %v4729_v8, 0.0  ;;  %v4766_v50 = vmax.f32 %v4730_v0, 0.0 }
 0x436   : > { %v4795_v48 = vmax.f32 %v4759_v32, 0.0  ;;  %v4767_v21 = vmax.f32 %v4731_v40, 0.0  ;;  %v4768_v59 = vmax.f32 %v4732_v26, 0.0  ;;  %v4769_v56 = vmax.f32 %v4733_v24, 0.0  ;;  %4797 = vst.msk [vmem:[#allocation2 + $0x1b] sm:$0xff] %vm15938_vm13, %v4761_v3  ;;  %vm15946_vm13 = vmmov %vm15930_vm0 }
 0x437   : > { %4798 = vst.msk [vmem:[#allocation2 + $0x23] sm:$0xff] %vm15939_vm3, %v4762_v15  ;;  %v4832_v18 = vld [vmem:[#allocation2 + $0x14] sm:$0x1]  ;;  %v4770_v29 = vmax.f32 %v13654_v25, 0.0  ;;  %v4771_v13 = vmax.f32 %v13656_v62, 0.0  ;;  %v4772_v58 = vmax.f32 %v13658_v44, 0.0  ;;  %vm15948_vm3 = vmmov %vm15930_vm0 }
 0x438   : > { %v4773_v49 = vmax.f32 %v4737_v53, 0.0  ;;  %4799 = vst.msk [vmem:[#allocation2 + $0x2b] sm:$0xff] %vm15940_vm15, %v4763_v20  ;;  %v4774_v26 = vmax.f32 %v13662_v47, 0.0  ;;  %v4775_v25 = vmax.f32 %v13664_v2, 0.0  ;;  %v4776_v11 = vmax.f32 %v13666_v57, 0.0  ;;  %vm15949_vm15 = vmmov %vm15930_vm0 }
 0x439   : > { %4800 = vst.msk [vmem:[#allocation2 + $0x33] sm:$0xff] %vm15941_vm7, %v4764_v34  ;;  %v4777_v40 = vmax.f32 %v13668_v36, 0.0  ;;  %v4778_v0 = vmax.f32 %v13670_v27, 0.0  ;;  %v4779_v10 = vmax.f32 %v13672_v30, 0.0  ;;  %v4780_v6 = vmax.f32 %v13674_v9, 0.0  ;;  %vm15950_vm7 = vmmov %vm15930_vm0 }
 0x43a   : > { %4801 = vst.msk [vmem:[#allocation2 + $0x3b] sm:$0xff] %vm15942_vm11, %v4765_v45  ;;  %v4781_v23 = vmax.f32 %v13676_v4, 0.0  ;;  %v4782_v61 = vmax.f32 %v13678_v1, 0.0  ;;  %v4783_v54 = vmax.f32 %v13680_v51, 0.0  ;;  %v4784_v33 = vmax.f32 %v13682_v60, 0.0  ;;  %vm15951_vm11 = vmmov %vm15930_vm0 }
 0x43b   : > { %4802 = vst.msk [vmem:[#allocation2 + $0x43] sm:$0xff] %vm15943_vm6, %v4766_v50  ;;  %v4785_v35 = vmax.f32 %v13684_v31, 0.0  ;;  %vm15952_vm6 = vmmov %vm15930_vm0  ;;  %v4786_v8 = vmax.f32 %v13686_v12, 0.0  ;;  %v4787_v55 = vmax.f32 %v13688_v63, 0.0  ;;  %v4788_v43 = vmax.f32 %v13690_v5, 0.0 }
 0x43c   : > { %4834 = vst.msk [vmem:[#allocation2 + $0x12] sm:$0x1] %vm4833_vm14, %v4832_v18  ;;  %vm15947_vm14 = vmmov %vm15930_vm0  ;;  %v4789_v24 = vmax.f32 %v13692_v46, 0.0  ;;  %v4790_v62 = vmax.f32 %v13694_v52, 0.0  ;;  %v4791_v44 = vmax.f32 %v13696_v42, 0.0  ;;  %v4792_v53 = vmax.f32 %v13698_v16, 0.0 }
 0x43d   : > { %4831 = vst.msk [vmem:[#allocation2 + $0x12b] sm:$0xff] %vm15944_vm9, %v4795_v48  ;;  %vm15953_vm9 = vmmov %vm15930_vm0  ;;  %v4793_v47 = vmax.f32 %v13700_v28, 0.0  ;;  %v5754_v9 = vld [vmem:[#allocation2 + $0x1a] sm:$0xff] }
 0x43e   : > { %4803 = vst.msk [vmem:[#allocation2 + $0x4b] sm:$0xff] %vm15945_vm8, %v4767_v21  ;;  %vm15954_vm8 = vmmov %vm15930_vm0  ;;  %v5755_v2 = vld [vmem:[#allocation2 + $0x22] sm:$0xff]  ;;  %v4906_v46 = vld [vmem:[#allocation2 + $0x19] sm:$0xff] }
 0x43f   : > { %4804 = vst.msk [vmem:[#allocation2 + $0x53] sm:$0xff] %vm15930_vm0, %v4768_v59  ;;  %4814 = vst.msk [vmem:[#allocation2 + $0xa3] sm:$0xff] %vm15930_vm0, %v4778_v0  ;;  %v13760_v57 = vld [vmem:[#allocation2 + $0x24] sm:$0xff]  ;;  %v10125_v45 = vld [vmem:[%s15496_s2] sm:$0x3] }
 0x440   : > { %4805 = vst.msk [vmem:[#allocation2 + $0x5b] sm:$0xff] %vm15946_vm13, %v4769_v56  ;;  %vm15955_vm13 = vmmov %vm15930_vm0  ;;  %v13762_v36 = vld [vmem:[#allocation2 + $0x2c] sm:$0xff]  ;;  %v4837_v27 = vld [vmem:[#allocation2 + $0x34] sm:$0x3] }
 0x441   : > { %4806 = vst.msk [vmem:[#allocation2 + $0x63] sm:$0xff] %vm15947_vm14, %v4770_v29  ;;  %vm15956_vm14 = vmmov %vm15930_vm0  ;;  %v5756_v4 = vld [vmem:[#allocation2 + $0x2a] sm:$0xff]  ;;  %v6442_v1 = vpack.c.bf16 %v13762_v36, %v13760_v57  ;;  %v5757_v60 = vld [vmem:[#allocation2 + $0x32] sm:$0xff] }
 0x442   : > { %4807 = vst.msk [vmem:[#allocation2 + $0x6b] sm:$0xff] %vm15948_vm3, %v4771_v13  ;;  %vm15957_vm3 = vmmov %vm15930_vm0  ;;  %v5758_v31 = vld [vmem:[#allocation2 + $0x3a] sm:$0xff]  ;;  %v13773_v12 = vpack.c.bf16 %v5756_v4, %v5755_v2  ;;  %v4908_v16 = vld [vmem:[#allocation2 + $0x29] sm:$0xff] }
 0x443   : > { %4808 = vst.msk [vmem:[#allocation2 + $0x73] sm:$0xff] %vm15949_vm15, %v4772_v58  ;;  %vm15958_vm15 = vmmov %vm15930_vm0  ;;  %v5753_v30 = vld [vmem:[#allocation2 + $0x12] sm:$0xff]  ;;  %v13779_v5 = vpack.c.bf16 %v5758_v31, %v5757_v60  ;;  %v4907_v42 = vld [vmem:[#allocation2 + $0x21] sm:$0xff] }
 0x444   : > { %4809 = vst.msk [vmem:[#allocation2 + $0x7b] sm:$0xff] %vm15950_vm7, %v4773_v49  ;;  %vm15959_vm7 = vmmov %vm15930_vm0  ;;  %v13771_v51 = vpack.c.bf16 %v5754_v9, %v5753_v30  ;;  %v5759_v20 = vld [vmem:[#allocation2 + $0x42] sm:$0xff]  ;;  %v4941_v59 = vpack.c.bf16 %v4908_v16, %v4907_v42  ;;  %v4909_v13 = vld [vmem:[#allocation2 + $0x31] sm:$0xff] }
 0x445   : > { %4810 = vst.msk [vmem:[#allocation2 + $0x83] sm:$0xff] %vm15951_vm11, %v4774_v26  ;;  %vm15960_vm11 = vmmov %vm15930_vm0  ;;  %v5760_v34 = vld [vmem:[#allocation2 + $0x4a] sm:$0xff]  ;;  %v13794_v56 = vld [vmem:[%s15496_s2 + $0x4] sm:$0x3] }
 0x446   : > { %4811 = vst.msk [vmem:[#allocation2 + $0x8b] sm:$0xff] %vm15952_vm6, %v4775_v25  ;;  %vm15961_vm6 = vmmov %vm15930_vm0  ;;  %v5761_v48 = vld [vmem:[#allocation2 + $0x52] sm:$0xff]  ;;  %v13797_v18 = vpack.c.bf16 %v5760_v34, %v5759_v20  ;;  %v4911_v49 = vld [vmem:[#allocation2 + $0x41] sm:$0xff] }
 0x447   : > { %4812 = vst.msk [vmem:[#allocation2 + $0x93] sm:$0xff] %vm15953_vm9, %v4776_v11  ;;  %vm15962_vm9 = vmmov %vm15930_vm0  ;;  %v5762_v21 = vld [vmem:[#allocation2 + $0x5a] sm:$0xff]  ;;  %v4912_v26 = vld [vmem:[#allocation2 + $0x49] sm:$0xff] }
 0x448   : > { %4813 = vst.msk [vmem:[#allocation2 + $0x9b] sm:$0xff] %vm15954_vm8, %v4777_v40  ;;  %vm15963_vm8 = vmmov %vm15930_vm0  ;;  %v13800_v29 = vpack.c.bf16 %v5762_v21, %v5761_v48  ;;  %v4910_v58 = vld [vmem:[#allocation2 + $0x39] sm:$0xff]  ;;  %v5763_v25 = vld [vmem:[#allocation2 + $0x62] sm:$0xff] }
 0x449   : > { %4815 = vst.msk [vmem:[#allocation2 + $0xab] sm:$0xff] %vm15955_vm13, %v4779_v10  ;;  %vm15964_vm13 = vmmov %vm15930_vm0  ;;  %v5764_v11 = vld [vmem:[#allocation2 + $0x6a] sm:$0xff]  ;;  %v4942_v40 = vpack.c.bf16 %v4910_v58, %v4909_v13 }
 0x44a   : > { %4816 = vst.msk [vmem:[#allocation2 + $0xb3] sm:$0xff] %vm15956_vm14, %v4780_v6  ;;  %vm15965_vm14 = vmmov %vm15930_vm0  ;;  %v5765_v0 = vld [vmem:[#allocation2 + $0x72] sm:$0xff]  ;;  %v4943_v6 = vpack.c.bf16 %v4912_v26, %v4911_v49 }
 0x44b   : > { %4817 = vst.msk [vmem:[#allocation2 + $0xbb] sm:$0xff] %vm15957_vm3, %v4781_v23  ;;  %vm15966_vm3 = vmmov %vm15930_vm0  ;;  %v5766_v10 = vld [vmem:[#allocation2 + $0x7a] sm:$0xff]  ;;  %v13809_v23 = vpack.c.bf16 %v5764_v11, %v5763_v25 }
 0x44c   : > { %4818 = vst.msk [vmem:[#allocation2 + $0xc3] sm:$0xff] %vm15958_vm15, %v4782_v61  ;;  %vm15967_vm15 = vmmov %vm15930_vm0  ;;  %v13812_v61 = vpack.c.bf16 %v5766_v10, %v5765_v0  ;;  %v4918_v30 = vld [vmem:[#allocation2 + $0x79] sm:$0xff]  ;;  %v4919_v9 = vld [vmem:[#allocation2 + $0x81] sm:$0xff] }
 0x44d   : > { %4819 = vst.msk [vmem:[#allocation2 + $0xcb] sm:$0xff] %vm15959_vm7, %v4783_v54  ;;  %vm15968_vm7 = vmmov %vm15930_vm0  ;;  %v4913_v54 = vld [vmem:[#allocation2 + $0x51] sm:$0xff]  ;;  %v4920_v4 = vld [vmem:[#allocation2 + $0x89] sm:$0xff] }
 0x44e   : > { %4820 = vst.msk [vmem:[#allocation2 + $0xd3] sm:$0xff] %vm15960_vm11, %v4784_v33  ;;  %vm15969_vm11 = vmmov %vm15930_vm0  ;;  %v4914_v33 = vld [vmem:[#allocation2 + $0x59] sm:$0xff]  ;;  %v4947_v42 = vpack.c.bf16 %v4920_v4, %v4919_v9  ;;  %v8561_v10 = vld [vmem:[%s15496_s2 + $0xe] sm:$0x3] }
 0x44f   : > { %4821 = vst.msk [vmem:[#allocation2 + $0xdb] sm:$0xff] %vm15961_vm6, %v4785_v35  ;;  %vm15970_vm6 = vmmov %vm15930_vm0  ;;  %v4915_v35 = vld [vmem:[#allocation2 + $0x61] sm:$0xff]  ;;  %v6094_v39 = vld [vmem:[#allocation2 + $0x8b] sm:$0xff] }
 0x450   : > { %4822 = vst.msk [vmem:[#allocation2 + $0xe3] sm:$0xff] %vm15962_vm9, %v4786_v8  ;;  %vm15971_vm9 = vcmask 1041408   ;;  %v4916_v8 = vld [vmem:[#allocation2 + $0x69] sm:$0xff]  ;;  %v6092_v37 = vld [vmem:[#allocation2 + $0x7b] sm:$0xff]  ;;  %v6095_v7 = vld [vmem:[#allocation2 + $0x93] sm:$0xff] }
 0x451   : > { %4823 = vst.msk [vmem:[#allocation2 + $0xeb] sm:$0xff] %vm15963_vm8, %v4787_v55  ;;  %v6516_v63 = vsel %vm15971_vm9, %v13528_v41, 0  ;;  %vm15972_vm8 = vmmov %vm15930_vm0  ;;  %v5767_v55 = vld [vmem:[#allocation2 + $0x82] sm:$0xff]  ;;  %v5772_v31 = vld [vmem:[#allocation2 + $0xaa] sm:$0xff] }
 0x452   : > { %4824 = vst.msk [vmem:[#allocation2 + $0xf3] sm:$0xff] %vm15930_vm0, %v4788_v43  ;;  %9801 = vmatprep.mubr.msk.bf16.mxu0 %vm15972_vm8, %v13771_v51  ;;  %vm15982_vm8 = vmmov %vm15930_vm0  ;;  %v5768_v43 = vld [vmem:[#allocation2 + $0x8a] sm:$0xff]  ;;  %v5771_v60 = vld [vmem:[#allocation2 + $0xa2] sm:$0xff] }
 0x453   : > { %4825 = vst.msk [vmem:[#allocation2 + $0xfb] sm:$0xff] %vm15964_vm13, %v4789_v24  ;;  %9802 = vmatmul.mubr.msk.bf16.vlgmr.msra.gmra.mxu0 %vm15930_vm0, %v13773_v12  ;;  %vm15973_vm13 = vmmov %vm15930_vm0  ;;  %v4944_v24 = vpack.c.bf16 %v4914_v33, %v4913_v54  ;;  %v13829_v16 = vpack.c.bf16 %v5772_v31, %v5771_v60  ;;  %v5775_v20 = vld [vmem:[#allocation2 + $0xc2] sm:$0xff]  ;;  %v4925_v58 = vld [vmem:[#allocation2 + $0xb1] sm:$0xff] }
 0x454   : > { %4826 = vst.msk [vmem:[#allocation2 + $0x103] sm:$0xff] %vm15965_vm14, %v4790_v62  ;;  %9805 = vmatprep.mubr.msk.bf16.mxu0 %vm15973_vm13, %v13779_v5  ;;  %9876 = vmatpush3.bf16.msra.mxu0 %v6516_v63  ;;  %vm15974_vm14 = vmmov %vm15971_vm9  ;;  %v5769_v62 = vld [vmem:[#allocation2 + $0x92] sm:$0xff]  ;;  %v5776_v34 = vld [vmem:[#allocation2 + $0xca] sm:$0xff] }
 0x455   : > { %4827 = vst.msk [vmem:[#allocation2 + $0x10b] sm:$0xff] %vm15966_vm3, %v4791_v44  ;;  %v5248_v50 = vsel %vm15974_vm14, %v10125_v45, 0  ;;  %vm15975_vm3 = vmmov %vm15930_vm0  ;;  %v5770_v44 = vld [vmem:[#allocation2 + $0x9a] sm:$0xff]  ;;  %v4928_v11 = vld [vmem:[#allocation2 + $0xc9] sm:$0xff] }
 0x456   : > { %4828 = vst.msk [vmem:[#allocation2 + $0x113] sm:$0xff] %vm15967_vm15, %v4792_v53  ;;  %vm15977_vm15 = vmmov %vm15930_vm0  ;;  %v4945_v53 = vpack.c.bf16 %v4916_v8, %v4915_v35  ;;  %v13822_v2 = vpack.c.bf16 %v5770_v44, %v5769_v62  ;;  %v5778_v48 = vld [vmem:[#allocation2 + $0xda] sm:$0xff]  ;;  %v6093_v38 = vld [vmem:[#allocation2 + $0x83] sm:$0xff] }
 0x457   : > { %4829 = vst.msk [vmem:[#allocation2 + $0x11b] sm:$0xff] %vm15968_vm7, %v4793_v47  ;;  %vm15978_vm7 = vmmov %vm15930_vm0  ;;  %v13819_v47 = vpack.c.bf16 %v5768_v43, %v5767_v55  ;;  %v4926_v49 = vld [vmem:[#allocation2 + $0xb9] sm:$0xff]  ;;  %v4927_v25 = vld [vmem:[#allocation2 + $0xc1] sm:$0xff] }
 0x458   : > { %4838 = vst.msk [vmem:[#allocation2] sm:$0xff] %vm15969_vm11, %v13760_v57  ;;  %vm15979_vm11 = vmmov %vm15971_vm9  ;;  %v5780_v0 = vld [vmem:[#allocation2 + $0xea] sm:$0xff]  ;;  %v4951_v35 = vpack.c.bf16 %v4928_v11, %v4927_v25  ;;  %v4931_v62 = vld [vmem:[#allocation2 + $0xe1] sm:$0xff] }
 0x459   : > { %4839 = vst.msk [vmem:[#allocation2 + $0x8] sm:$0xff] %vm15970_vm6, %v13762_v36  ;;  %vm15980_vm6 = vmmov %vm15930_vm0  ;;  %v5781_v54 = vld [vmem:[#allocation2 + $0xf2] sm:$0xff]  ;;  %v4932_v44 = vld [vmem:[#allocation2 + $0xe9] sm:$0xff] }
 0x45a   : > { %4841 = vst.msk [vmem:[#allocation2 + $0x10] sm:$0x3] %vm4840_vm1, %v4837_v27  ;;  %vm15981_vm9 = vmmov %vm15930_vm0  ;;  %v4917_v27 = vld [vmem:[#allocation2 + $0x71] sm:$0xff]  ;;  %v5782_v33 = vld [vmem:[#allocation2 + $0xfa] sm:$0xff]  ;;  %v4953_v60 = vpack.c.bf16 %v4932_v44, %v4931_v62 }
 0x45b   : > { %9806 = vmatmul.mubr.msk.bf16.gmra.mxu0 %vm15978_vm7, %v13797_v18  ;;  %vm15983_vm13 = vmmov %vm15930_vm0  ;;  %v4946_v63 = vpack.c.bf16 %v4918_v30, %v4917_v27  ;;  %v13857_v55 = vpack.c.bf16 %v5782_v33, %v5781_v54  ;;  %v4929_v43 = vld [vmem:[#allocation2 + $0xd1] sm:$0xff]  ;;  %v6411_v44 = vld [vmem:[#allocation2 + $0x44] sm:$0xff] }
 0x45c   : > { %9809 = vmatprep.mubr.msk.bf16.mxu0 %vm15980_vm6, %v13800_v29  ;;  %vm15984_vm14 = vmmov %vm15930_vm0  ;;  %v5784_v27 = vld [vmem:[#allocation2 + $0x10a] sm:$0xff]  ;;  %v4851_v62 = vld [vmem:[#allocation2 + $0x18] sm:$0xff] }
 0x45d   : > { %vm15988_vm7 = vmmov %vm15930_vm0  ;;  %v4842_v26 = vld [vmem:[#allocation2 + $0x10e] sm:$0xff]  ;;  %v13897_v57 = vld [vmem:[%s15496_s2 + $0x8] sm:$0x3] }
 0x45e   : > { %v4844_v52 = vld [vmem:[#allocation2 + $0x11e] sm:$0x3]  ;;  %vm15990_vm6 = vmmov %vm15930_vm0  ;;  %v5785_v9 = vld [vmem:[#allocation2 + $0x112] sm:$0xff] }
 0x45f   : > { %4847 = vst.msk [vmem:[#allocation2 + $0x142] sm:$0x3] %vm4840_vm1, %v4844_v52  ;;  %vm15976_vm1 = vmmov %vm15930_vm0  ;;  %v5774_v52 = vld [vmem:[#allocation2 + $0xba] sm:$0xff] }
 0x460   : > { %v4903_v28 = vld [vmem:[#allocation2 + $0x1] sm:$0xff] }
 0x461   : > { %v4904_v41 = vld [vmem:[#allocation2 + $0x9] sm:$0xff]  ;;  %v4905_v32 = vld [vmem:[#allocation2 + $0x11] sm:$0xff]  ;;  %v5786_v4 = vld [vmem:[#allocation2 + $0x11a] sm:$0xff] }
 0x462   : > { %v4939_v3 = vpack.c.bf16 %v4904_v41, %v4903_v28  ;;  %v4940_v15 = vpack.c.bf16 %v4906_v46, %v4905_v32  ;;  %v5773_v46 = vld [vmem:[#allocation2 + $0xb2] sm:$0xff]  ;;  %v4849_v25 = vld [vmem:[#allocation2 + $0x8] sm:$0xff]  ;;  %v6096_v17 = vld [vmem:[#allocation2 + $0x9b] sm:$0xff] }
 0x463   : > { %9810 = vmatmul.mubr.msk.bf16.gmra.mxu0 %vm15930_vm0, %v13809_v23  ;;  %v13832_v28 = vpack.c.bf16 %v5774_v52, %v5773_v46  ;;  %v4921_v41 = vld [vmem:[#allocation2 + $0x91] sm:$0xff]  ;;  %v4922_v32 = vld [vmem:[#allocation2 + $0x99] sm:$0xff]  ;;  %v13869_v46 = vpack.c.bf16 %v5786_v4, %v5785_v9 }
 0x464   : > { %9687 = vmatprep.mubr.msk.bf16.mxu1 %vm15975_vm3, %v4939_v3  ;;  %9813 = vmatprep.mubr.msk.bf16.mxu0 %vm15983_vm13, %v13812_v61  ;;  %vm15985_vm3 = vmmov %vm15930_vm0  ;;  %v4923_v3 = vld [vmem:[#allocation2 + $0xa1] sm:$0xff]  ;;  %v4948_v45 = vpack.c.bf16 %v4922_v32, %v4921_v41  ;;  %v4933_v52 = vld [vmem:[#allocation2 + $0xf1] sm:$0xff] }
 0x465   : > { %9688 = vmatmul.mubr.msk.bf16.vlgmr.msra.gmra.mxu1 %vm15976_vm1, %v4940_v15  ;;  %vm15986_vm1 = vmmov %vm15930_vm0  ;;  %v4924_v15 = vld [vmem:[#allocation2 + $0xa9] sm:$0xff]  ;;  %v4935_v41 = vld [vmem:[#allocation2 + $0x101] sm:$0xff] }
 0x466   : > { %9724 = vmatpush3.bf16.msra.mxu1 %v5248_v50  ;;  %9691 = vmatprep.mubr.msk.bf16.mxu1 %vm15977_vm15, %v4941_v59  ;;  %vm15987_vm15 = vmmov %vm15930_vm0  ;;  %v5777_v50 = vld [vmem:[#allocation2 + $0xd2] sm:$0xff]  ;;  %v4949_v21 = vpack.c.bf16 %v4924_v15, %v4923_v3  ;;  %v13839_v59 = vpack.c.bf16 %v5776_v34, %v5775_v20  ;;  %v4936_v32 = vld [vmem:[#allocation2 + $0x109] sm:$0xff] }
 0x467   : > { %10031 = vmatprep.subr.msk.bf16.mxu1 %vm15979_vm11, %v13794_v56  ;;  %vm15989_vm11 = vmmov %vm15930_vm0  ;;  %v13842_v13 = vpack.c.bf16 %v5778_v48, %v5777_v50  ;;  %v5787_v3 = vld [vmem:[#allocation2 + $0x122] sm:$0xff]  ;;  %v5788_v15 = vld [vmem:[#allocation2 + $0x12a] sm:$0xff]  ;;  %v4955_v50 = vpack.c.bf16 %v4936_v32, %v4935_v41 }
 0x468   : > { %vm15993_vm13 = vmmov %vm15930_vm0  ;;  %v6405_v34 = vld [vmem:[#allocation2 + $0x14] sm:$0xff]  ;;  %v5806_v48 = vpack.c.bf16 %v5788_v15, %v5787_v3  ;;  %v6414_v9 = vld [vmem:[#allocation2 + $0x5c] sm:$0xff] }
 0x469   : > { %v6415_v41 = vld [vmem:[#allocation2 + $0x64] sm:$0xff]  ;;  %v6416_v32 = vld [vmem:[#allocation2 + $0x6c] sm:$0xff]  ;;  %v6417_v15 = vld [vmem:[#allocation2 + $0x74] sm:$0xff] }
 0x46b   : > { %9814 = vmatmul.mubr.msk.bf16.gmra.mxu0 %vm15986_vm1, %v13819_v47  ;;  %vm15996_vm1 = vcmask 1041408  }
 0x46c   : > { %9817 = vmatprep.mubr.msk.bf16.mxu0 %vm15987_vm15, %v13822_v2  ;;  %10036 = vmatprep.subr.msk.bf16.mxu0 %vm15996_vm1, %v8561_v10  ;;  %vm15997_vm15 = vmmov %vm15930_vm0 }
 0x46d   : > { %9692 = vmatmul.mubr.msk.bf16.gmra.mxu1 %vm15981_vm9, %v4942_v40  ;;  %vm15991_vm9 = vmmov %vm15930_vm0  ;;  %v5779_v40 = vld [vmem:[#allocation2 + $0xe2] sm:$0xff] }
 0x46e   : > { %9695 = vmatprep.mubr.msk.bf16.mxu1 %vm15982_vm8, %v4943_v6  ;;  %vm15992_vm8 = vmmov %vm15930_vm0  ;;  %v4950_v6 = vpack.c.bf16 %v4926_v49, %v4925_v58  ;;  %v13854_v8 = vpack.c.bf16 %v5780_v0, %v5779_v40  ;;  %v4937_v58 = vld [vmem:[#allocation2 + $0x111] sm:$0xff]  ;;  %v4938_v49 = vld [vmem:[#allocation2 + $0x119] sm:$0xff] }
 0x46f   : > { %vm16007_vm1 = vmmov %vm15930_vm0  ;;  %v4956_v11 = vpack.c.bf16 %v4938_v49, %v4937_v58  ;;  %v6409_v40 = vld [vmem:[#allocation2 + $0x34] sm:$0xff]  ;;  %v6410_v0 = vld [vmem:[#allocation2 + $0x3c] sm:$0xff] }
 0x470   : > { %v13884_v33 = vpack.c.bf16 %v6410_v0, %v6409_v40  ;;  %v4860_v58 = vld [vmem:[#allocation2 + $0x60] sm:$0xff]  ;;  %v4861_v49 = vld [vmem:[#allocation2 + $0x68] sm:$0xff]  ;;  %v6421_v40 = vld [vmem:[#allocation2 + $0x94] sm:$0xff] }
 0x471   : > { %v6422_v0 = vld [vmem:[#allocation2 + $0x9c] sm:$0xff] }
 0x473   : > { %9818 = vmatmul.mubr.msk.bf16.gmra.mxu0 %vm15990_vm6, %v13829_v16  ;;  %vm16000_vm6 = vmmov %vm15930_vm0 }
 0x474   : > { %9821 = vmatprep.mubr.msk.bf16.mxu0 %vm15991_vm9, %v13832_v28  ;;  %vm16001_vm9 = vmmov %vm15930_vm0 }
 0x475   : > { %9696 = vmatmul.mubr.msk.bf16.gmra.mxu1 %vm15984_vm14, %v4944_v24  ;;  %vm15994_vm14 = vmmov %vm15930_vm0  ;;  %v4930_v24 = vld [vmem:[#allocation2 + $0xd9] sm:$0xff] }
 0x476   : > { %9699 = vmatprep.mubr.msk.bf16.mxu1 %vm15985_vm3, %v4945_v53  ;;  %vm15995_vm3 = vmmov %vm15930_vm0  ;;  %v5783_v53 = vld [vmem:[#allocation2 + $0x102] sm:$0xff]  ;;  %v4952_v30 = vpack.c.bf16 %v4930_v24, %v4929_v43 }
 0x477   : > { %4845 = vst.msk [vmem:[#allocation2 + $0x132] sm:$0xff] %vm15995_vm3, %v4842_v26  ;;  %v13864_v31 = vpack.c.bf16 %v5784_v27, %v5783_v53  ;;  %vm16006_vm3 = vmmov %vm15930_vm0  ;;  %v4848_v26 = vld [vmem:[#allocation2] sm:$0xff]  ;;  %v4853_v24 = vld [vmem:[#allocation2 + $0x28] sm:$0xff] }
 0x478   : > { %v4852_v43 = vld [vmem:[#allocation2 + $0x20] sm:$0xff]  ;;  %v6412_v53 = vld [vmem:[#allocation2 + $0x4c] sm:$0xff] }
 0x479   : > { %v4886_v4 = vpack.c.bf16 %v4853_v24, %v4852_v43  ;;  %v13900_v36 = vpack.c.bf16 %v6412_v53, %v6411_v44  ;;  %v4862_v43 = vld [vmem:[#allocation2 + $0x70] sm:$0xff]  ;;  %v4863_v24 = vld [vmem:[#allocation2 + $0x78] sm:$0xff]  ;;  %v4865_v44 = vld [vmem:[#allocation2 + $0x88] sm:$0xff] }
 0x47a   : > { %v6423_v53 = vld [vmem:[#allocation2 + $0xa4] sm:$0xff] }
 0x47b   : > { %9822 = vmatmul.mubr.msk.bf16.gmra.mxu0 %vm15993_vm13, %v13839_v59  ;;  %vm16004_vm13 = vmmov %vm15930_vm0 }
 0x47c   : > { %9825 = vmatprep.mubr.msk.bf16.mxu0 %vm15994_vm14, %v13842_v13  ;;  %vm16005_vm14 = vmmov %vm15930_vm0 }
 0x47d   : > { %9700 = vmatmul.mubr.msk.bf16.gmra.mxu1 %vm15988_vm7, %v4946_v63  ;;  %vm15998_vm7 = vmmov %vm15930_vm0  ;;  %v13866_v63 = vld [vmem:[#allocation2 + $0x116] sm:$0xff] }
 0x47e   : > { %9703 = vmatprep.mubr.msk.bf16.mxu1 %vm15989_vm11, %v4947_v42  ;;  %vm15999_vm11 = vmmov %vm15930_vm0  ;;  %16002 = vst [vmem:[#allocation24_spill] sm:$0xff] %v13866_v63  ;;  %v4934_v42 = vld [vmem:[#allocation2 + $0xf9] sm:$0xff] }
 0x47f   : > { %4846 = vst.msk [vmem:[#allocation2 + $0x13a] sm:$0xff] %vm15930_vm0, %v13866_v63  ;;  %v4954_v20 = vpack.c.bf16 %v4934_v42, %v4933_v52  ;;  %v4856_v52 = vld [vmem:[#allocation2 + $0x40] sm:$0xff]  ;;  %v4857_v42 = vld [vmem:[#allocation2 + $0x48] sm:$0xff] }
 0x480   : > { %v6104_v63 = vld [vmem:[#allocation2 + $0xdb] sm:$0xff] }
 0x483   : > { %9826 = vmatmul.mubr.msk.bf16.gmra.mxu0 %vm15999_vm11, %v13854_v8  ;;  %vm16010_vm11 = vmmov %vm15930_vm0 }
 0x484   : > { %9829 = vmatprep.mubr.msk.bf16.mxu0 %vm16000_vm6, %v13857_v55  ;;  %vm16011_vm6 = vcmask 1041408  }
 0x485   : > { %9704 = vmatmul.mubr.msk.bf16.gmra.mxu1 %vm15992_vm8, %v4948_v45  ;;  %vm16003_vm8 = vmmov %vm15930_vm0  ;;  %v6406_v45 = vld [vmem:[#allocation2 + $0x1c] sm:$0xff]  ;;  %v7168_v54 = vsel %vm16011_vm6, %v8561_v10, 0 }
 0x486   : > { %9707 = vmatprep.mubr.msk.bf16.mxu1 %vm15930_vm0, %v4949_v21  ;;  %v6441_v21 = vpack.c.bf16 %v6406_v45, %v6405_v34  ;;  %v4888_v34 = vpack.c.bf16 %v4857_v42, %v4856_v52  ;;  %v13912_v45 = vpack.c.bf16 %v6416_v32, %v6415_v41  ;;  %v4866_v52 = vld [vmem:[#allocation2 + $0x90] sm:$0xff]  ;;  %v4867_v42 = vld [vmem:[#allocation2 + $0x98] sm:$0xff]  ;;  %v4868_v41 = vld [vmem:[#allocation2 + $0xa0] sm:$0xff] }
 0x487   : > { %v4869_v32 = vld [vmem:[#allocation2 + $0xa8] sm:$0xff] }
 0x48b   : > { %9830 = vmatmul.mubr.msk.bf16.gmra.mxu0 %vm16004_vm13, %v13864_v31  ;;  %vm16014_vm13 = vmmov %vm16011_vm6 }
 0x48c   : > { %9833 = vmatprep.mubr.msk.bf16.mxu0 %vm16005_vm14, %v13869_v46  ;;  %v5538_v27 = vsel %vm16014_vm13, %v13794_v56, 0  ;;  %vm16015_vm14 = vmmov %vm15930_vm0  ;;  %v4854_v56 = vld [vmem:[#allocation2 + $0x30] sm:$0xff] }
 0x48d   : > { %9708 = vmatmul.mubr.msk.bf16.gmra.mxu1 %vm15997_vm15, %v4950_v6  ;;  %vm16008_vm15 = vmmov %vm15930_vm0  ;;  %v4884_v6 = vpack.c.bf16 %v4849_v25, %v4848_v26  ;;  %v6419_v26 = vld [vmem:[#allocation2 + $0x84] sm:$0xff]  ;;  %v6420_v25 = vld [vmem:[#allocation2 + $0x8c] sm:$0xff] }
 0x48e   : > { %9711 = vmatprep.mubr.msk.bf16.mxu1 %vm15998_vm7, %v4951_v35  ;;  %vm16009_vm7 = vmmov %vm15930_vm0  ;;  %v4850_v35 = vld [vmem:[#allocation2 + $0x10] sm:$0xff] }
 0x48f   : > { %v4885_v10 = vpack.c.bf16 %v4851_v62, %v4850_v35  ;;  %vm16024_vm13 = vmmov %vm15930_vm0  ;;  %v13925_v35 = vpack.c.bf16 %v6422_v0, %v6421_v40  ;;  %v4864_v62 = vld [vmem:[#allocation2 + $0x80] sm:$0xff]  ;;  %v4873_v40 = vld [vmem:[#allocation2 + $0xc8] sm:$0xff] }
 0x490   : > { %v6431_v0 = vld [vmem:[#allocation2 + $0xe4] sm:$0xff] }
 0x493   : > { %9834 = vmatmul.mubr.msk.bf16.gmra.mxu0 %vm16008_vm15, %v5806_v48  ;;  %vm16018_vm15 = vmmov %vm16011_vm6  ;;  %v4858_v48 = vld [vmem:[#allocation2 + $0x50] sm:$0xff] }
 0x494   : > { %9877 = vmatprep.mubr.msk.bf16.mxu0 %vm16009_vm7, %v6441_v21  ;;  %vm16019_vm7 = vmmov %vm15930_vm0  ;;  %v4859_v21 = vld [vmem:[#allocation2 + $0x58] sm:$0xff] }
 0x495   : > { %9712 = vmatmul.mubr.msk.bf16.gmra.mxu1 %vm16001_vm9, %v4952_v30  ;;  %vm16012_vm9 = vmmov %vm15930_vm0  ;;  %v6413_v30 = vld [vmem:[#allocation2 + $0x54] sm:$0xff] }
 0x496   : > { %9715 = vmatprep.mubr.msk.bf16.mxu1 %vm16003_vm8, %v4953_v60  ;;  %vm16013_vm8 = vmmov %vm15930_vm0  ;;  %v4855_v60 = vld [vmem:[#allocation2 + $0x38] sm:$0xff] }
 0x497   : > { %v4887_v3 = vpack.c.bf16 %v4855_v60, %v4854_v56  ;;  %vm16021_vm6 = vmmov %vm15930_vm0 }
 0x49b   : > { %9878 = vmatmul.mubr.msk.bf16.vlgmr.msra.gmra.mxu0 %vm16013_vm8, %v6442_v1  ;;  %v13903_v1 = vpack.c.bf16 %v6414_v9, %v6413_v30  ;;  %vm16023_vm8 = vmmov %vm15930_vm0  ;;  %v6425_v30 = vld [vmem:[#allocation2 + $0xb4] sm:$0xff]  ;;  %v6426_v9 = vld [vmem:[#allocation2 + $0xbc] sm:$0xff] }
 0x49c   : > { %9881 = vmatprep.mubr.msk.bf16.mxu0 %vm15930_vm0, %v13884_v33  ;;  %9952 = vmatpush3.bf16.msra.mxu0 %v7168_v54  ;;  %v13922_v54 = vpack.c.bf16 %v6420_v25, %v6419_v26  ;;  %v13935_v60 = vpack.c.bf16 %v6426_v9, %v6425_v30  ;;  %v4870_v26 = vld [vmem:[#allocation2 + $0xb0] sm:$0xff]  ;;  %v4871_v25 = vld [vmem:[#allocation2 + $0xb8] sm:$0xff]  ;;  %v4876_v9 = vld [vmem:[#allocation2 + $0xe0] sm:$0xff] }
 0x49d   : > { %9716 = vmatmul.mubr.msk.bf16.gmra.mxu1 %vm16006_vm3, %v4954_v20  ;;  %vm16016_vm3 = vmmov %vm15930_vm0  ;;  %v6418_v20 = vld [vmem:[#allocation2 + $0x7c] sm:$0xff] }
 0x49e   : > { %9719 = vmatprep.mubr.msk.bf16.mxu1 %vm16007_vm1, %v4955_v50  ;;  %vm16017_vm1 = vmmov %vm15930_vm0  ;;  %v13915_v50 = vpack.c.bf16 %v6418_v20, %v6417_v15  ;;  %v6428_v15 = vld [vmem:[#allocation2 + $0xcc] sm:$0xff]  ;;  %v4893_v20 = vpack.c.bf16 %v4867_v42, %v4866_v52  ;;  %v4875_v30 = vld [vmem:[#allocation2 + $0xd8] sm:$0xff] }
 0x49f   : > { %v6435_v52 = vld [vmem:[#allocation2 + $0x104] sm:$0xff]  ;;  %v6436_v42 = vld [vmem:[#allocation2 + $0x10c] sm:$0xff] }
 0x4a3   : > { %9882 = vmatmul.mubr.msk.bf16.gmra.mxu0 %vm16017_vm1, %v13900_v36  ;;  %vm16027_vm1 = vmmov %vm15930_vm0 }
 0x4a4   : > { %9885 = vmatprep.mubr.msk.bf16.mxu0 %vm16019_vm7, %v13903_v1  ;;  %vm16029_vm7 = vmmov %vm15930_vm0 }
 0x4a5   : > { %9720 = vmatmul.mubr.msk.bf16.gmra.mxu1 %vm16010_vm11, %v4956_v11  ;;  %vm16020_vm11 = vmmov %vm15930_vm0  ;;  %v4889_v11 = vpack.c.bf16 %v4859_v21, %v4858_v48  ;;  %v6430_v48 = vld [vmem:[#allocation2 + $0xdc] sm:$0xff]  ;;  %v4894_v21 = vpack.c.bf16 %v4869_v32, %v4868_v41  ;;  %v6437_v32 = vld [vmem:[#allocation2 + $0x114] sm:$0xff] }
 0x4a6   : > { %9725 = vmatprep.mubr.msk.bf16.mxu1 %vm16012_vm9, %v4884_v6  ;;  %vm16022_vm9 = vmmov %vm15930_vm0  ;;  %v4890_v6 = vpack.c.bf16 %v4861_v49, %v4860_v58 }
 0x4ab   : > { %9886 = vmatmul.mubr.msk.bf16.gmra.mxu0 %vm16022_vm9, %v13912_v45  ;;  %vm16032_vm9 = vmmov %vm15930_vm0 }
 0x4ac   : > { %9889 = vmatprep.mubr.msk.bf16.mxu0 %vm16023_vm8, %v13915_v50  ;;  %vm16033_vm8 = vmmov %vm15930_vm0 }
 0x4ad   : > { %9726 = vmatmul.mubr.msk.bf16.vlgmr.msra.gmra.mxu1 %vm16015_vm14, %v4885_v10  ;;  %vm16025_vm14 = vmmov %vm15930_vm0  ;;  %v6424_v10 = vld [vmem:[#allocation2 + $0xac] sm:$0xff] }
 0x4ae   : > { %9762 = vmatpush3.bf16.msra.mxu1 %v5538_v27  ;;  %9729 = vmatprep.mubr.msk.bf16.mxu1 %vm16016_vm3, %v4886_v4  ;;  %vm16026_vm3 = vmmov %vm15930_vm0  ;;  %v4891_v27 = vpack.c.bf16 %v4863_v24, %v4862_v43  ;;  %v4892_v4 = vpack.c.bf16 %v4865_v44, %v4864_v62  ;;  %v13932_v56 = vpack.c.bf16 %v6424_v10, %v6423_v53  ;;  %v6433_v24 = vld [vmem:[#allocation2 + $0xf4] sm:$0xff]  ;;  %v6434_v62 = vld [vmem:[#allocation2 + $0xfc] sm:$0xff] }
 0x4af   : > { %10033 = vmatprep.subr.msk.bf16.mxu1 %vm16018_vm15, %v13897_v57  ;;  %vm16028_vm15 = vmmov %vm15930_vm0  ;;  %v4895_v43 = vpack.c.bf16 %v4871_v25, %v4870_v26  ;;  %v13955_v10 = vpack.c.bf16 %v6434_v62, %v6433_v24  ;;  %v4880_v26 = vld [vmem:[#allocation2 + $0x100] sm:$0xff]  ;;  %v4881_v25 = vld [vmem:[#allocation2 + $0x108] sm:$0xff] }
 0x4b0   : > { %v6439_v24 = vld [vmem:[#allocation2 + $0x124] sm:$0xff] }
 0x4b3   : > { %9890 = vmatmul.mubr.msk.bf16.gmra.mxu0 %vm16025_vm14, %v13922_v54  ;;  %vm16035_vm14 = vmmov %vm15930_vm0 }
 0x4b4   : > { %9893 = vmatprep.mubr.msk.bf16.mxu0 %vm16026_vm3, %v13925_v35  ;;  %vm16036_vm3 = vmmov %vm15930_vm0 }
 0x4b5   : > { %9730 = vmatmul.mubr.msk.bf16.gmra.mxu1 %vm16020_vm11, %v4887_v3  ;;  %vm16030_vm11 = vmmov %vm15930_vm0  ;;  %v6427_v3 = vld [vmem:[#allocation2 + $0xc4] sm:$0xff] }
 0x4b6   : > { %9733 = vmatprep.mubr.msk.bf16.mxu1 %vm16021_vm6, %v4888_v34  ;;  %v6429_v34 = vld [vmem:[#allocation2 + $0xd4] sm:$0xff]  ;;  %vm16031_vm6 = vmmov %vm15930_vm0  ;;  %v13942_v58 = vpack.c.bf16 %v6428_v15, %v6427_v3  ;;  %v6438_v3 = vld [vmem:[#allocation2 + $0x11c] sm:$0xff] }
 0x4b7   : > { %v13945_v49 = vpack.c.bf16 %v6430_v48, %v6429_v34  ;;  %v13965_v34 = vpack.c.bf16 %v6438_v3, %v6437_v32  ;;  %v4878_v48 = vld [vmem:[#allocation2 + $0xf0] sm:$0xff]  ;;  %v7061_v32 = vld [vmem:[#allocation2 + $0x45] sm:$0xff] }
 0x4b8   : > { %v7062_v3 = vld [vmem:[#allocation2 + $0x4d] sm:$0xff] }
 0x4bb   : > { %9894 = vmatmul.mubr.msk.bf16.gmra.mxu0 %vm16029_vm7, %v13932_v56  ;;  %vm16039_vm7 = vmmov %vm15930_vm0 }
 0x4bc   : > { %9897 = vmatprep.mubr.msk.bf16.mxu0 %vm16030_vm11, %v13935_v60  ;;  %vm16040_vm11 = vmmov %vm15930_vm0 }
 0x4bd   : > { %9734 = vmatmul.mubr.msk.bf16.gmra.mxu1 %vm15930_vm0, %v4889_v11  ;;  %v4872_v11 = vld [vmem:[#allocation2 + $0xc0] sm:$0xff] }
 0x4be   : > { %9737 = vmatprep.mubr.msk.bf16.mxu1 %vm16024_vm13, %v4890_v6  ;;  %v6432_v6 = vld [vmem:[#allocation2 + $0xec] sm:$0xff]  ;;  %v4896_v44 = vpack.c.bf16 %v4873_v40, %v4872_v11  ;;  %vm16034_vm13 = vmmov %vm15930_vm0 }
 0x4bf   : > { %v13952_v53 = vpack.c.bf16 %v6432_v6, %v6431_v0  ;;  %v6440_v11 = vld [vmem:[#allocation2 + $0x12c] sm:$0xff] }
 0x4c0   : > { %v7057_v0 = vld [vmem:[#allocation2 + $0x25] sm:$0xff]  ;;  %v7058_v6 = vld [vmem:[#allocation2 + $0x2d] sm:$0xff]  ;;  %v13972_v62 = vpack.c.bf16 %v6440_v11, %v6439_v24 }
 0x4c3   : > { %9898 = vmatmul.mubr.msk.bf16.gmra.mxu0 %vm16033_vm8, %v13942_v58  ;;  %vm16043_vm8 = vmmov %vm15930_vm0 }
 0x4c4   : > { %9901 = vmatprep.mubr.msk.bf16.mxu0 %vm15930_vm0, %v13945_v49 }
 0x4c5   : > { %9738 = vmatmul.mubr.msk.bf16.gmra.mxu1 %vm16027_vm1, %v4891_v27  ;;  %v4874_v27 = vld [vmem:[#allocation2 + $0xd0] sm:$0xff]  ;;  %vm16037_vm1 = vmmov %vm15930_vm0 }
 0x4c6   : > { %9741 = vmatprep.mubr.msk.bf16.mxu1 %vm16028_vm15, %v4892_v4  ;;  %v4877_v4 = vld [vmem:[#allocation2 + $0xe8] sm:$0xff]  ;;  %v4897_v41 = vpack.c.bf16 %v4875_v30, %v4874_v27  ;;  %vm16038_vm15 = vmmov %vm15930_vm0  ;;  %v4882_v27 = vld [vmem:[#allocation2 + $0x110] sm:$0xff] }
 0x4c7   : > { %v4898_v15 = vpack.c.bf16 %v4877_v4, %v4876_v9  ;;  %v4883_v30 = vld [vmem:[#allocation2 + $0x118] sm:$0xff]  ;;  %v5427_v9 = vld [vmem:[#allocation2 + $0x2] sm:$0xff]  ;;  %v5428_v4 = vld [vmem:[#allocation2 + $0xa] sm:$0xff] }
 0x4cb   : > { %9902 = vmatmul.mubr.msk.bf16.gmra.mxu0 %vm16036_vm3, %v13952_v53  ;;  %vm16046_vm3 = vmmov %vm15930_vm0 }
 0x4cc   : > { %9905 = vmatprep.mubr.msk.bf16.mxu0 %vm16037_vm1, %v13955_v10  ;;  %vm16047_vm1 = vmmov %vm15930_vm0 }
 0x4cd   : > { %9742 = vmatmul.mubr.msk.bf16.gmra.mxu1 %vm16031_vm6, %v4893_v20  ;;  %v13962_v20 = vpack.c.bf16 %v6436_v42, %v6435_v52  ;;  %vm16041_vm6 = vmmov %vm15930_vm0  ;;  %v7059_v52 = vld [vmem:[#allocation2 + $0x35] sm:$0xff]  ;;  %v7060_v42 = vld [vmem:[#allocation2 + $0x3d] sm:$0xff] }
 0x4ce   : > { %9745 = vmatprep.mubr.msk.bf16.mxu1 %vm16032_vm9, %v4894_v21  ;;  %v4879_v21 = vld [vmem:[#allocation2 + $0xf8] sm:$0xff]  ;;  %vm16042_vm9 = vmmov %vm15930_vm0 }
 0x4cf   : > { %v4899_v40 = vpack.c.bf16 %v4879_v21, %v4878_v48  ;;  %v7094_v48 = vpack.c.bf16 %v7060_v42, %v7059_v52  ;;  %v7095_v21 = vpack.c.bf16 %v7062_v3, %v7061_v32  ;;  %v7073_v52 = vld [vmem:[#allocation2 + $0xa5] sm:$0xff]  ;;  %v7074_v42 = vld [vmem:[#allocation2 + $0xad] sm:$0xff]  ;;  %v7076_v32 = vld [vmem:[#allocation2 + $0xbd] sm:$0xff] }
 0x4d0   : > { %v7077_v3 = vld [vmem:[#allocation2 + $0xc5] sm:$0xff] }
 0x4d3   : > { %9906 = vmatmul.mubr.msk.bf16.gmra.mxu0 %vm16040_vm11, %v13962_v20  ;;  %vm16050_vm11 = vmmov %vm15930_vm0 }
 0x4d4   : > { %9909 = vmatprep.mubr.msk.bf16.mxu0 %vm16041_vm6, %v13965_v34  ;;  %vm16051_vm6 = vmmov %vm15930_vm0 }
 0x4d5   : > { %9746 = vmatmul.mubr.msk.bf16.gmra.mxu1 %vm16034_vm13, %v4895_v43  ;;  %v4900_v43 = vpack.c.bf16 %v4881_v25, %v4880_v26  ;;  %vm16044_vm13 = vmmov %vm15930_vm0  ;;  %v7063_v26 = vld [vmem:[#allocation2 + $0x55] sm:$0xff]  ;;  %v7064_v25 = vld [vmem:[#allocation2 + $0x5d] sm:$0xff] }
 0x4d6   : > { %9749 = vmatprep.mubr.msk.bf16.mxu1 %vm16035_vm14, %v4896_v44  ;;  %v7093_v44 = vpack.c.bf16 %v7058_v6, %v7057_v0  ;;  %vm16045_vm14 = vmmov %vm15930_vm0  ;;  %v7066_v0 = vld [vmem:[#allocation2 + $0x6d] sm:$0xff] }
 0x4d7   : > { %v13987_v6 = vld [vmem:[%s15496_s2 + $0xc] sm:$0x3] }
 0x4db   : > { %9910 = vmatmul.mubr.msk.bf16.gmra.mxu0 %vm15930_vm0, %v13972_v62 }
 0x4dc   : > { %9953 = vmatprep.mubr.msk.bf16.mxu0 %vm16044_vm13, %v7093_v44  ;;  %v7068_v44 = vld [vmem:[#allocation2 + $0x7d] sm:$0xff]  ;;  %vm16054_vm13 = vmmov %vm15930_vm0 }
 0x4dd   : > { %9750 = vmatmul.mubr.msk.bf16.gmra.mxu1 %vm16038_vm15, %v4897_v41  ;;  %v4901_v41 = vpack.c.bf16 %v4883_v30, %v4882_v27  ;;  %vm16048_vm15 = vmmov %vm15930_vm0  ;;  %v7069_v27 = vld [vmem:[#allocation2 + $0x85] sm:$0xff]  ;;  %v7070_v30 = vld [vmem:[#allocation2 + $0x8d] sm:$0xff] }
 0x4de   : > { %9753 = vmatprep.mubr.msk.bf16.mxu1 %vm16039_vm7, %v4898_v15  ;;  %v5463_v15 = vpack.c.bf16 %v5428_v4, %v5427_v9  ;;  %vm16049_vm7 = vcmask 1041408   ;;  %v7071_v9 = vld [vmem:[#allocation2 + $0x95] sm:$0xff]  ;;  %v7072_v4 = vld [vmem:[#allocation2 + $0x9d] sm:$0xff] }
 0x4df   : > { %v6190_v11 = vsel %vm16049_vm7, %v13897_v57, 0  ;;  %v7067_v57 = vld [vmem:[#allocation2 + $0x75] sm:$0xff] }
 0x4e3   : > { %9954 = vmatmul.mubr.msk.bf16.vlgmr.msra.gmra.mxu0 %vm16047_vm1, %v7094_v48  ;;  %vm16057_vm1 = vmmov %vm15930_vm0 }
 0x4e4   : > { %9957 = vmatprep.mubr.msk.bf16.mxu0 %vm16048_vm15, %v7095_v21  ;;  %vm16058_vm15 = vmmov %vm15930_vm0  ;;  %v7080_v21 = vld [vmem:[#allocation2 + $0xdd] sm:$0xff] }
 0x4e5   : > { %9754 = vmatmul.mubr.msk.bf16.gmra.mxu1 %vm16042_vm9, %v4899_v40  ;;  %v7065_v40 = vld [vmem:[#allocation2 + $0x65] sm:$0xff]  ;;  %vm16052_vm9 = vmmov %vm15930_vm0 }
 0x4e6   : > { %9757 = vmatprep.mubr.msk.bf16.mxu1 %vm16043_vm8, %v4900_v43  ;;  %v7096_v43 = vpack.c.bf16 %v7064_v25, %v7063_v26  ;;  %v7097_v24 = vpack.c.bf16 %v7066_v0, %v7065_v40  ;;  %vm16053_vm8 = vmmov %vm16049_vm7  ;;  %v7081_v26 = vld [vmem:[#allocation2 + $0xe5] sm:$0xff]  ;;  %v7082_v25 = vld [vmem:[#allocation2 + $0xed] sm:$0xff] }
 0x4e7   : > { %vm16059_vm7 = vmmov %vm15930_vm0  ;;  %v7084_v40 = vld [vmem:[#allocation2 + $0xfd] sm:$0xff]  ;;  %v7085_v0 = vld [vmem:[#allocation2 + $0x105] sm:$0xff] }
 0x4eb   : > { %9958 = vmatmul.mubr.msk.bf16.gmra.mxu0 %vm16052_vm9, %v7096_v43  ;;  %vm16062_vm9 = vmmov %vm15930_vm0  ;;  %v7086_v43 = vld [vmem:[#allocation2 + $0x10d] sm:$0xff] }
 0x4ec   : > { %9961 = vmatprep.mubr.msk.bf16.mxu0 %vm15930_vm0, %v7097_v24 }
 0x4ed   : > { %9758 = vmatmul.mubr.msk.bf16.gmra.mxu1 %vm16045_vm14, %v4901_v41  ;;  %vm16055_vm14 = vmmov %vm15930_vm0  ;;  %v7100_v41 = vpack.c.bf16 %v7072_v4, %v7071_v9 }
 0x4ee   : > { %9763 = vmatprep.mubr.msk.bf16.mxu1 %vm16046_vm3, %v5463_v15  ;;  %vm16056_vm3 = vmmov %vm15930_vm0  ;;  %v7078_v15 = vld [vmem:[#allocation2 + $0xcd] sm:$0xff] }
 0x4f5   : > { %9764 = vmatmul.mubr.msk.bf16.vlgmr.msra.gmra.mxu1 %vm16050_vm11, %v13771_v51  ;;  %v7098_v51 = vpack.c.bf16 %v7068_v44, %v7067_v57  ;;  %vm16060_vm11 = vmmov %vm15930_vm0  ;;  %v7088_v57 = vld [vmem:[#allocation2 + $0x11d] sm:$0xff]  ;;  %v7090_v44 = vld [vmem:[#allocation2 + $0x12d] sm:$0xff] }
 0x4f6   : > { %9838 = vmatpush3.bf16.msra.mxu1 %v6190_v11  ;;  %9767 = vmatprep.mubr.msk.bf16.mxu1 %vm16051_vm6, %v13773_v12  ;;  %v7099_v12 = vpack.c.bf16 %v7070_v30, %v7069_v27  ;;  %vm16061_vm6 = vmmov %vm15930_vm0 }
 0x4f7   : > { %10035 = vmatprep.subr.msk.bf16.mxu1 %vm16053_vm8, %v13987_v6  ;;  %9962 = vmatmul.mubr.msk.bf16.gmra.mxu0 %vm16056_vm3, %v7098_v51  ;;  %vm16063_vm8 = vmmov %vm15930_vm0  ;;  %v7089_v51 = vld [vmem:[#allocation2 + $0x125] sm:$0xff] }
 0x4f8   : > { %9965 = vmatprep.mubr.msk.bf16.mxu0 %vm16057_vm1, %v7099_v12  ;;  %vm16066_vm3 = vmmov %vm15930_vm0 }
 0x4f9   : > { %vm16067_vm1 = vmmov %vm15930_vm0 }
 0x4fd   : > { %9768 = vmatmul.mubr.msk.bf16.gmra.mxu1 %vm16054_vm13, %v13779_v5  ;;  %v7101_v5 = vpack.c.bf16 %v7074_v42, %v7073_v52  ;;  %vm16064_vm13 = vmmov %vm15930_vm0  ;;  %v7091_v52 = vld [vmem:[#allocation2 + $0x135] sm:$0xff]  ;;  %v7092_v42 = vld [vmem:[#allocation2 + $0x13d] sm:$0xff] }
 0x4fe   : > { %9771 = vmatprep.mubr.msk.bf16.mxu1 %vm16055_vm14, %v13797_v18  ;;  %v7075_v18 = vld [vmem:[#allocation2 + $0xb5] sm:$0xff]  ;;  %vm16065_vm14 = vmmov %vm15930_vm0 }
 0x4ff   : > { %9966 = vmatmul.mubr.msk.bf16.gmra.mxu0 %vm16060_vm11, %v7100_v41  ;;  %v7102_v48 = vpack.c.bf16 %v7076_v32, %v7075_v18  ;;  %vm16070_vm11 = vmmov %vm15930_vm0 }
 0x500   : > { %9969 = vmatprep.mubr.msk.bf16.mxu0 %vm16061_vm6, %v7101_v5  ;;  %vm16071_vm6 = vmmov %vm15930_vm0 }
 0x505   : > { %9772 = vmatmul.mubr.msk.bf16.gmra.mxu1 %vm16058_vm15, %v13800_v29  ;;  %v7103_v29 = vpack.c.bf16 %v7078_v15, %v7077_v3  ;;  %vm16068_vm15 = vmmov %vm15930_vm0  ;;  %v6079_v15 = vld [vmem:[#allocation2 + $0x13] sm:$0xff] }
 0x506   : > { %9775 = vmatprep.mubr.msk.bf16.mxu1 %vm16059_vm7, %v13809_v23  ;;  %v7079_v23 = vld [vmem:[#allocation2 + $0xd5] sm:$0xff]  ;;  %vm16069_vm7 = vmmov %vm15930_vm0 }
 0x507   : > { %9970 = vmatmul.mubr.msk.bf16.gmra.mxu0 %vm15930_vm0, %v7102_v48  ;;  %v7104_v11 = vpack.c.bf16 %v7080_v21, %v7079_v23  ;;  %v6080_v48 = vld [vmem:[#allocation2 + $0x1b] sm:$0xff] }
 0x508   : > { %9973 = vmatprep.mubr.msk.bf16.mxu0 %vm16064_vm13, %v7103_v29  ;;  %vm16075_vm13 = vmmov %vm15930_vm0  ;;  %v6115_v21 = vpack.c.bf16 %v6080_v48, %v6079_v15 }
 0x50d   : > { %9776 = vmatmul.mubr.msk.bf16.gmra.mxu1 %vm16062_vm9, %v13812_v61  ;;  %v7105_v61 = vpack.c.bf16 %v7082_v25, %v7081_v26  ;;  %vm16072_vm9 = vmmov %vm15930_vm0  ;;  %v6081_v25 = vld [vmem:[#allocation2 + $0x23] sm:$0xff] }
 0x50e   : > { %9779 = vmatprep.mubr.msk.bf16.mxu1 %vm16063_vm8, %v13819_v47  ;;  %v7083_v47 = vld [vmem:[#allocation2 + $0xf5] sm:$0xff]  ;;  %vm16074_vm8 = vmmov %vm15930_vm0 }
 0x50f   : > { %9974 = vmatmul.mubr.msk.bf16.gmra.mxu0 %vm16067_vm1, %v7104_v11  ;;  %v7106_v24 = vpack.c.bf16 %v7084_v40, %v7083_v47  ;;  %vm16080_vm1 = vmmov %vm15930_vm0  ;;  %v6082_v11 = vld [vmem:[#allocation2 + $0x2b] sm:$0xff]  ;;  %v6083_v47 = vld [vmem:[#allocation2 + $0x33] sm:$0xff] }
 0x510   : > { %9977 = vmatprep.mubr.msk.bf16.mxu0 %vm16068_vm15, %v7105_v61  ;;  %vm16081_vm15 = vmmov %vm15930_vm0  ;;  %v6084_v40 = vld [vmem:[#allocation2 + $0x3b] sm:$0xff] }
 0x513   : > { %v14027_v27 = vpop.f32.mrf.mxu0 }
 0x514   : > { %16073 = vst [vmem:[#allocation25_spill] sm:$0xff] %v14027_v27  ;;  %v6108_v27 = vld [vmem:[#allocation2 + $0xfb] sm:$0xff] }
 0x515   : > { %9780 = vmatmul.mubr.msk.bf16.gmra.mxu1 %vm16065_vm14, %v13822_v2  ;;  %v7107_v2 = vpack.c.bf16 %v7086_v43, %v7085_v0  ;;  %v14038_v9 = vpop.f32.mrf.mxu0  ;;  %vm16077_vm14 = vmmov %vm15930_vm0  ;;  %v6116_v43 = vpack.c.bf16 %v6082_v11, %v6081_v25 }
 0x516   : > { %9783 = vmatprep.mubr.msk.bf16.mxu1 %vm16066_vm3, %v13829_v16  ;;  %v7087_v16 = vld [vmem:[#allocation2 + $0x115] sm:$0xff]  ;;  %16076 = vst [vmem:[#allocation4_spill] sm:$0xff] %v14038_v9  ;;  %vm16079_vm3 = vmmov %vm15930_vm0 }
 0x517   : > { %9978 = vmatmul.mubr.msk.bf16.gmra.mxu0 %vm16071_vm6, %v7106_v24  ;;  %vm16087_vm6 = vcmask 1041408   ;;  %v6107_v9 = vld [vmem:[#allocation2 + $0xf3] sm:$0xff] }
 0x518   : > { %9981 = vmatprep.mubr.msk.bf16.mxu0 %vm16072_vm9, %v7107_v2  ;;  %v6842_v24 = vsel %vm16087_vm6, %v13987_v6, 0  ;;  %vm16089_vm9 = vmmov %vm15930_vm0 }
 0x51d   : > { %9784 = vmatmul.mubr.msk.bf16.gmra.mxu1 %vm16069_vm7, %v13832_v28  ;;  %v7108_v28 = vpack.c.bf16 %v7088_v57, %v7087_v16  ;;  %vm16084_vm7 = vmmov %vm15930_vm0  ;;  %v14084_v16 = vld [vmem:[%s15496_s2 + $0x10] sm:$0x3] }
 0x51e   : > { %9787 = vmatprep.mubr.msk.bf16.mxu1 %vm16070_vm11, %v13839_v59  ;;  %v7109_v59 = vpack.c.bf16 %v7090_v44, %v7089_v51  ;;  %vm16085_vm11 = vmmov %vm15930_vm0  ;;  %v6086_v51 = vld [vmem:[#allocation2 + $0x4b] sm:$0xff] }
 0x51f   : > { %9982 = vmatmul.mubr.msk.bf16.gmra.mxu0 %vm16075_vm13, %v7108_v28  ;;  %v6085_v28 = vld [vmem:[#allocation2 + $0x43] sm:$0xff]  ;;  %vm16094_vm13 = vmmov %vm16080_vm1 }
 0x520   : > { %9985 = vmatprep.mubr.msk.bf16.mxu0 %vm16077_vm14, %v7109_v59  ;;  %v6118_v15 = vpack.c.bf16 %v6086_v51, %v6085_v28  ;;  %vm16095_vm14 = vmmov %vm16080_vm1 }
 0x525   : > { %v14029_v30 = vpop.f32.mrf.mxu1  ;;  %9788 = vmatmul.mubr.msk.bf16.gmra.mxu1 %vm16074_vm8, %v13842_v13  ;;  %v14045_v13 = vpop.f32.mrf.mxu0  ;;  %vm16090_vm8 = vmmov %vm15930_vm0 }
 0x526   : > { %9791 = vmatprep.mubr.msk.bf16.mxu1 %vm15930_vm0, %v13854_v8  ;;  %16078 = vst [vmem:[#allocation8_spill] sm:$0xff] %v14045_v13  ;;  %v7110_v8 = vpack.c.bf16 %v7092_v42, %v7091_v52  ;;  %vm16091_vm0 = vmmov %vm16087_vm6  ;;  %v6087_v52 = vld [vmem:[#allocation2 + $0x53] sm:$0xff]  ;;  %v6088_v42 = vld [vmem:[#allocation2 + $0x5b] sm:$0xff] }
 0x527   : > { %v14035_v12 = vpop.f32.mrf.mxu1  ;;  %v14056_v32 = vpop.f32.mrf.mxu0  ;;  %vm16112_vm6 = vmmov %vm16080_vm1 }
 0x528   : > { %9986 = vmatmul.mubr.msk.bf16.gmra.mxu0 %vm16081_vm15, %v7110_v8  ;;  %16082 = vst [vmem:[#allocation9_spill] sm:$0xff] %v14056_v32  ;;  %vm16103_vm15 = vmmov %vm16080_vm1  ;;  %v6106_v32 = vld [vmem:[#allocation2 + $0xeb] sm:$0xff] }
 0x529   : > { %v14041_v4 = vpop.f32.mrf.mxu1  ;;  %v14062_v23 = vpop.f32.mrf.mxu0 }
 0x52a   : > { %16083 = vst [vmem:[#allocation5_spill] sm:$0xff] %v14062_v23  ;;  %v6103_v23 = vld [vmem:[#allocation2 + $0xd3] sm:$0xff] }
 0x52b   : > { %v14043_v41 = vpop.f32.mrf.mxu1  ;;  %v14071_v26 = vpop.f32.mrf.mxu0 }
 0x52c   : > { %16086 = vst [vmem:[#allocation11_spill] sm:$0xff] %v14071_v26 }
 0x52d   : > { %v14047_v5 = vpop.f32.mrf.mxu1  ;;  %9792 = vmatmul.mubr.msk.bf16.gmra.mxu1 %vm16079_vm3, %v13857_v55  ;;  %v14079_v2 = vpop.f32.mrf.mxu0  ;;  %vm16098_vm3 = vmmov %vm16080_vm1 }
 0x52e   : > { %9795 = vmatprep.mubr.msk.bf16.mxu1 %vm16080_vm1, %v13864_v31  ;;  %16088 = vst [vmem:[#allocation12_spill] sm:$0xff] %v14079_v2  ;;  %v6102_v2 = vld [vmem:[#allocation2 + $0xcb] sm:$0xff] }
 0x52f   : > { %v14053_v18 = vpop.f32.mrf.mxu1  ;;  %v14094_v6 = vpop.f32.mrf.mxu0 }
 0x530   : > { %16092 = vst [vmem:[#allocation6_spill] sm:$0xff] %v14094_v6  ;;  %v6100_v6 = vld [vmem:[#allocation2 + $0xbb] sm:$0xff] }
 0x531   : > { %v14058_v3 = vpop.f32.mrf.mxu1  ;;  %v14100_v48 = vpop.f32.mrf.mxu0 }
 0x532   : > { %16093 = vst [vmem:[#allocation26_spill] sm:$0xff] %v14100_v48  ;;  %v6099_v48 = vld [vmem:[#allocation2 + $0xb3] sm:$0xff] }
 0x533   : > { %v14060_v29 = vpop.f32.mrf.mxu1 }
 0x535   : > { %v14064_v55 = vpop.f32.mrf.mxu1  ;;  %9796 = vmatmul.mubr.msk.bf16.gmra.mxu1 %vm16084_vm7, %v13869_v46  ;;  %v6117_v46 = vpack.c.bf16 %v6084_v40, %v6083_v47  ;;  %v14108_v47 = vpop.f32.mrf.mxu0  ;;  %v6089_v40 = vld [vmem:[#allocation2 + $0x63] sm:$0xff]  ;;  %vm16104_vm7 = vmmov %vm16080_vm1 }
 0x536   : > { %9839 = vmatprep.mubr.msk.bf16.mxu1 %vm16085_vm11, %v6115_v21  ;;  %v6119_v21 = vpack.c.bf16 %v6088_v42, %v6087_v52  ;;  %16096 = vst [vmem:[#allocation27_spill] sm:$0xff] %v14108_v47  ;;  %vm16111_vm11 = vmmov %vm16080_vm1 }
 0x537   : > { %v14069_v31 = vpop.f32.mrf.mxu1  ;;  %v14114_v52 = vpop.f32.mrf.mxu0 }
 0x538   : > { %16097 = vst [vmem:[#allocation28_spill] sm:$0xff] %v14114_v52  ;;  %v6098_v52 = vld [vmem:[#allocation2 + $0xab] sm:$0xff] }
 0x539   : > { %v14073_v61 = vpop.f32.mrf.mxu1 }
 0x53b   : > { %v14075_v0 = vpop.f32.mrf.mxu1 }
 0x53d   : > { %v14086_v57 = vpop.f32.mrf.mxu1  ;;  %9840 = vmatmul.mubr.msk.bf16.vlgmr.msra.gmra.mxu1 %vm16089_vm9, %v6116_v43  ;;  %v6090_v43 = vld [vmem:[#allocation2 + $0x6b] sm:$0xff]  ;;  %vm16119_vm9 = vmmov %vm16080_vm1 }
 0x53e   : > { %9914 = vmatpush3.bf16.msra.mxu1 %v6842_v24  ;;  %9843 = vmatprep.mubr.msk.bf16.mxu1 %vm16090_vm8, %v6117_v46  ;;  %v6091_v46 = vld [vmem:[#allocation2 + $0x73] sm:$0xff]  ;;  %v6120_v51 = vpack.c.bf16 %v6090_v43, %v6089_v40  ;;  %v6122_v43 = vpack.c.bf16 %v6094_v39, %v6093_v38  ;;  %vm16120_vm8 = vmmov %vm16080_vm1 }
 0x53f   : > { %v14090_v44 = vpop.f32.mrf.mxu1  ;;  %10037 = vmatprep.subr.msk.bf16.mxu1 %vm16091_vm0, %v14084_v16  ;;  %v6121_v42 = vpack.c.bf16 %v6092_v37, %v6091_v46  ;;  %v6123_v46 = vpack.c.bf16 %v6096_v17, %v6095_v7  ;;  %v6125_v7 = vpack.c.bf16 %v6100_v6, %v6099_v48  ;;  %v6127_v48 = vpack.c.bf16 %v6104_v63, %v6103_v23  ;;  %vm16126_vm0 = vmmov %vm16080_vm1 }
 0x540   : > { %v6129_v23 = vpack.c.bf16 %v6108_v27, %v6107_v9 }
 0x541   : > { %v14096_v59 = vpop.f32.mrf.mxu1 }
 0x543   : > { %v14098_v8 = vpop.f32.mrf.mxu1 }
 0x545   : > { %v14102_v25 = vpop.f32.mrf.mxu1  ;;  %9844 = vmatmul.mubr.msk.bf16.gmra.mxu1 %vm16094_vm13, %v6118_v15  ;;  %vm16127_vm13 = vmmov %vm16126_vm0 }
 0x546   : > { %9847 = vmatprep.mubr.msk.bf16.mxu1 %vm16095_vm14, %v6119_v21  ;;  %v14122_v21 = vpop.f32.mrf.mxu0  ;;  %vm16130_vm14 = vmmov %vm16126_vm0 }
 0x547   : > { %v14106_v11 = vpop.f32.mrf.mxu1  ;;  %16099 = vst [vmem:[#allocation29_spill] sm:$0xff] %v14122_v21  ;;  %v6097_v21 = vld [vmem:[#allocation2 + $0xa3] sm:$0xff] }
 0x548   : > { %v14128_v37 = vpop.f32.mrf.mxu0  ;;  %v6124_v38 = vpack.c.bf16 %v6098_v52, %v6097_v21 }
 0x549   : > { %v14110_v24 = vpop.f32.mrf.mxu1  ;;  %16101 = vst [vmem:[#allocation37_spill] sm:$0xff] %v14128_v37 }
 0x54b   : > { %v14112_v28 = vpop.f32.mrf.mxu1 }
 0x54d   : > { %v14116_v19 = vpop.f32.mrf.mxu1  ;;  %9848 = vmatmul.mubr.msk.bf16.gmra.mxu1 %vm16098_vm3, %v6120_v51  ;;  %vm16131_vm3 = vmmov %vm16126_vm0 }
 0x54e   : > { %9851 = vmatprep.mubr.msk.bf16.mxu1 %vm16080_vm1, %v6121_v42  ;;  %v14136_v42 = vpop.f32.mrf.mxu0  ;;  %vm16134_vm1 = vmmov %vm16126_vm0 }
 0x54f   : > { %v14120_v15 = vpop.f32.mrf.mxu1  ;;  %16106 = vst [vmem:[#allocation42_spill] sm:$0xff] %v14136_v42  ;;  %v6101_v42 = vld [vmem:[#allocation2 + $0xc3] sm:$0xff] }
 0x550   : > { %v14142_v17 = vpop.f32.mrf.mxu0  ;;  %v6126_v21 = vpack.c.bf16 %v6102_v2, %v6101_v42 }
 0x551   : > { %v14124_v14 = vpop.f32.mrf.mxu1  ;;  %16109 = vst [vmem:[#allocation60_spill] sm:$0xff] %v14142_v17 }
 0x553   : > { %v14126_v40 = vpop.f32.mrf.mxu1 }
 0x554   : > { %16100 = vst [vmem:[#allocation31_spill] sm:$0xff] %v14126_v40 }
 0x555   : > { %v14130_v22 = vpop.f32.mrf.mxu1  ;;  %9852 = vmatmul.mubr.msk.bf16.gmra.mxu1 %vm16103_vm15, %v6122_v43  ;;  %vm16135_vm15 = vmmov %vm16126_vm0 }
 0x556   : > { %16102 = vst [vmem:[#allocation40_spill] sm:$0xff] %v14130_v22  ;;  %9855 = vmatprep.mubr.msk.bf16.mxu1 %vm16104_vm7, %v6123_v46  ;;  %v14150_v46 = vpop.f32.mrf.mxu0  ;;  %vm16137_vm7 = vcmask 1041408  }
 0x557   : > { %v14134_v51 = vpop.f32.mrf.mxu1  ;;  %16114 = vst [vmem:[#allocation63_spill] sm:$0xff] %v14150_v46  ;;  %v6105_v46 = vld [vmem:[#allocation2 + $0xe3] sm:$0xff] }
 0x558   : > { %16105 = vst [vmem:[#allocation41_spill] sm:$0xff] %v14134_v51  ;;  %v14156_v6 = vpop.f32.mrf.mxu0  ;;  %v6128_v42 = vpack.c.bf16 %v6106_v32, %v6105_v46 }
 0x559   : > { %v14138_v47 = vpop.f32.mrf.mxu1  ;;  %16117 = vst [vmem:[#allocation66_spill] sm:$0xff] %v14156_v6 }
 0x55a   : > { %16107 = vst [vmem:[#allocation43_spill] sm:$0xff] %v14138_v47 }
 0x55b   : > { %v14140_v39 = vpop.f32.mrf.mxu1 }
 0x55c   : > { %16108 = vst [vmem:[#allocation59_spill] sm:$0xff] %v14140_v39 }
 0x55d   : > { %v14144_v37 = vpop.f32.mrf.mxu1  ;;  %9856 = vmatmul.mubr.msk.bf16.gmra.mxu1 %vm16111_vm11, %v6124_v38  ;;  %vm16139_vm11 = vmmov %vm16126_vm0 }
 0x55e   : > { %16110 = vst [vmem:[#allocation61_spill] sm:$0xff] %v14144_v37  ;;  %9859 = vmatprep.mubr.msk.bf16.mxu1 %vm16112_vm6, %v6125_v7  ;;  %v14164_v7 = vpop.f32.mrf.mxu0  ;;  %v6113_v37 = vld [vmem:[#allocation2 + $0x123] sm:$0xff]  ;;  %vm16140_vm6 = vmmov %vm16126_vm0 }
 0x55f   : > { %v14148_v43 = vpop.f32.mrf.mxu1  ;;  %16122 = vst [vmem:[#allocation69_spill] sm:$0xff] %v14164_v7  ;;  %v6109_v7 = vld [vmem:[#allocation2 + $0x103] sm:$0xff] }
 0x560   : > { %16113 = vst [vmem:[#allocation62_spill] sm:$0xff] %v14148_v43  ;;  %v14170_v63 = vpop.f32.mrf.mxu0  ;;  %v6732_v43 = vld [vmem:[#allocation2 + $0x2c] sm:$0xff] }
 0x561   : > { %v14152_v26 = vpop.f32.mrf.mxu1  ;;  %16125 = vst [vmem:[#allocation72_spill] sm:$0xff] %v14170_v63 }
 0x562   : > { %16115 = vst [vmem:[#allocation64_spill] sm:$0xff] %v14152_v26  ;;  %v6731_v26 = vld [vmem:[#allocation2 + $0x24] sm:$0xff] }
 0x563   : > { %v14154_v52 = vpop.f32.mrf.mxu1 }
 0x564   : > { %16116 = vst [vmem:[#allocation65_spill] sm:$0xff] %v14154_v52 }
 0x565   : > { %v14158_v17 = vpop.f32.mrf.mxu1  ;;  %9860 = vmatmul.mubr.msk.bf16.gmra.mxu1 %vm16119_vm9, %v6126_v21  ;;  %vm16143_vm9 = vmmov %vm16126_vm0 }
 0x566   : > { %16118 = vst [vmem:[#allocation67_spill] sm:$0xff] %v14158_v17  ;;  %9863 = vmatprep.mubr.msk.bf16.mxu1 %vm16120_vm8, %v6127_v48  ;;  %v14178_v48 = vpop.f32.mrf.mxu0  ;;  %v6111_v17 = vld [vmem:[#allocation2 + $0x113] sm:$0xff]  ;;  %vm16144_vm8 = vmmov %vm16126_vm0 }
 0x567   : > { %v14162_v38 = vpop.f32.mrf.mxu1  ;;  %16128 = vst [vmem:[#allocation73_spill] sm:$0xff] %v14178_v48  ;;  %v6114_v48 = vld [vmem:[#allocation2 + $0x12b] sm:$0xff] }
 0x568   : > { %16121 = vst [vmem:[#allocation68_spill] sm:$0xff] %v14162_v38  ;;  %v14184_v27 = vpop.f32.mrf.mxu0 }
 0x569   : > { %v14166_v13 = vpop.f32.mrf.mxu1  ;;  %16129 = vst [vmem:[#allocation74_spill] sm:$0xff] %v14184_v27 }
 0x56a   : > { %16123 = vst [vmem:[#allocation70_spill] sm:$0xff] %v14166_v13  ;;  %v6110_v13 = vld [vmem:[#allocation2 + $0x10b] sm:$0xff] }
 0x56b   : > { %v14168_v2 = vpop.f32.mrf.mxu1  ;;  %v6130_v46 = vpack.c.bf16 %v6110_v13, %v6109_v7  ;;  %v6132_v7 = vpack.c.bf16 %v6114_v48, %v6113_v37  ;;  %v7494_v37 = vsel %vm16137_vm7, %v14084_v16, 0  ;;  %vm16163_vm7 = vmmov %vm16126_vm0 }
 0x56c   : > { %16124 = vst [vmem:[#allocation71_spill] sm:$0xff] %v14168_v2  ;;  %v6112_v2 = vld [vmem:[#allocation2 + $0x11b] sm:$0xff] }
 0x56d   : > { %v14172_v6 = vpop.f32.mrf.mxu1  ;;  %9864 = vmatmul.mubr.msk.bf16.gmra.mxu1 %vm16126_vm0, %v6128_v42  ;;  %v6131_v9 = vpack.c.bf16 %v6112_v2, %v6111_v17  ;;  %v6767_v2 = vpack.c.bf16 %v6732_v43, %v6731_v26 }
 0x56e   : > { %9867 = vmatprep.mubr.msk.bf16.mxu1 %vm16127_vm13, %v6129_v23  ;;  %v14192_v23 = vpop.f32.mrf.mxu0  ;;  %vm16147_vm13 = vmmov %vm16126_vm0 }
 0x56f   : > { %v14176_v21 = vpop.f32.mrf.mxu1  ;;  %16132 = vst [vmem:[#allocation75_spill] sm:$0xff] %v14192_v23 }
 0x570   : > { %v14198_v17 = vpop.f32.mrf.mxu0 }
 0x571   : > { %v14180_v38 = vpop.f32.mrf.mxu1  ;;  %16133 = vst [vmem:[#allocation76_spill] sm:$0xff] %v14198_v17 }
 0x573   : > { %v14182_v32 = vpop.f32.mrf.mxu1 }
 0x575   : > { %v14186_v63 = vpop.f32.mrf.mxu1  ;;  %9868 = vmatmul.mubr.msk.bf16.gmra.mxu1 %vm16130_vm14, %v6130_v46  ;;  %vm16151_vm14 = vmmov %vm16126_vm0 }
 0x576   : > { %9871 = vmatprep.mubr.msk.bf16.mxu1 %vm16131_vm3, %v6131_v9  ;;  %v14206_v9 = vpop.f32.mrf.mxu0  ;;  %vm16152_vm3 = vmmov %vm16126_vm0 }
 0x577   : > { %v14190_v42 = vpop.f32.mrf.mxu1  ;;  %16136 = vst [vmem:[#allocation77_spill] sm:$0xff] %v14206_v9 }
 0x578   : > { %v14214_v48 = vpop.f32.mrf.mxu0 }
 0x579   : > { %v14194_v52 = vpop.f32.mrf.mxu1  ;;  %16138 = vst [vmem:[#allocation78_spill] sm:$0xff] %v14214_v48 }
 0x57b   : > { %v14196_v13 = vpop.f32.mrf.mxu1 }
 0x57d   : > { %v14200_v27 = vpop.f32.mrf.mxu1  ;;  %9872 = vmatmul.mubr.msk.bf16.gmra.mxu1 %vm16134_vm1, %v6132_v7  ;;  %v14224_v7 = vpop.f32.mrf.mxu0  ;;  %vm16157_vm1 = vmmov %vm16126_vm0 }
 0x57e   : > { %9915 = vmatprep.mubr.msk.bf16.mxu1 %vm16135_vm15, %v6767_v2  ;;  %16141 = vst [vmem:[#allocation79_spill] sm:$0xff] %v14224_v7  ;;  %vm16158_vm15 = vmmov %vm16126_vm0 }
 0x57f   : > { %v14204_v46 = vpop.f32.mrf.mxu1  ;;  %v14230_v16 = vpop.f32.mrf.mxu0 }
 0x580   : > { %16142 = vst [vmem:[#allocation80_spill] sm:$0xff] %v14230_v16 }
 0x581   : > { %v14208_v23 = vpop.f32.mrf.mxu1 }
 0x583   : > { %v14210_v39 = vpop.f32.mrf.mxu1 }
 0x585   : > { %v14216_v26 = vpop.f32.mrf.mxu1  ;;  %9916 = vmatmul.mubr.msk.bf16.vlgmr.msra.gmra.mxu1 %vm16139_vm11, %v13884_v33  ;;  %vm16164_vm11 = vmmov %vm16126_vm0 }
 0x586   : > { %9990 = vmatpush3.bf16.msra.mxu1 %v7494_v37  ;;  %9919 = vmatprep.mubr.msk.bf16.mxu1 %vm16140_vm6, %v13900_v36  ;;  %v14240_v36 = vpop.f32.mrf.mxu0  ;;  %vm16169_vm6 = vmmov %vm16126_vm0 }
 0x587   : > { %v14222_v43 = vpop.f32.mrf.mxu1  ;;  %16145 = vst [vmem:[#allocation81_spill] sm:$0xff] %v14240_v36 }
 0x588   : > { %v14246_v17 = vpop.f32.mrf.mxu0 }
 0x589   : > { %v14226_v2 = vpop.f32.mrf.mxu1  ;;  %16146 = vst [vmem:[#allocation82_spill] sm:$0xff] %v14246_v17 }
 0x58b   : > { %v14228_v9 = vpop.f32.mrf.mxu1 }
 0x58d   : > { %v14232_v48 = vpop.f32.mrf.mxu1  ;;  %9920 = vmatmul.mubr.msk.bf16.gmra.mxu1 %vm16143_vm9, %v13903_v1  ;;  %vm16170_vm9 = vmmov %vm16126_vm0 }
 0x58e   : > { %9923 = vmatprep.mubr.msk.bf16.mxu1 %vm16144_vm8, %v13912_v45  ;;  %v14256_v45 = vpop.f32.mrf.mxu0  ;;  %vm16171_vm8 = vmmov %vm16126_vm0 }
 0x58f   : > { %v14238_v33 = vpop.f32.mrf.mxu1  ;;  %16148 = vst [vmem:[#allocation83_spill] sm:$0xff] %v14256_v45 }
 0x590   : > { %v14262_v51 = vpop.f32.mrf.mxu0 }
 0x591   : > { %v14242_v37 = vpop.f32.mrf.mxu1  ;;  %16150 = vst [vmem:[#allocation85_spill] sm:$0xff] %v14262_v51 }
 0x593   : > { %v14244_v7 = vpop.f32.mrf.mxu1 }
 0x595   : > { %v14248_v47 = vpop.f32.mrf.mxu1  ;;  %9924 = vmatmul.mubr.msk.bf16.gmra.mxu1 %vm16126_vm0, %v13915_v50 }
 0x596   : > { %9927 = vmatprep.mubr.msk.bf16.mxu1 %vm16147_vm13, %v13922_v54  ;;  %v14272_v54 = vpop.f32.mrf.mxu0  ;;  %vm16172_vm13 = vmmov %vm16126_vm0 }
 0x597   : > { %v14254_v1 = vpop.f32.mrf.mxu1  ;;  %16153 = vst [vmem:[#allocation86_spill] sm:$0xff] %v14272_v54 }
 0x598   : > { %v14278_v40 = vpop.f32.mrf.mxu0 }
 0x599   : > { %v14258_v16 = vpop.f32.mrf.mxu1  ;;  %16156 = vst [vmem:[#allocation89_spill] sm:$0xff] %v14278_v40 }
 0x59b   : > { %v14260_v36 = vpop.f32.mrf.mxu1 }
 0x59c   : > { %16149 = vst [vmem:[#allocation84_spill] sm:$0xff] %v14260_v36 }
 0x59d   : > { %v14264_v22 = vpop.f32.mrf.mxu1  ;;  %9928 = vmatmul.mubr.msk.bf16.gmra.mxu1 %vm16151_vm14, %v13925_v35  ;;  %vm16173_vm14 = vmmov %vm16126_vm0 }
 0x59e   : > { %9931 = vmatprep.mubr.msk.bf16.mxu1 %vm16152_vm3, %v13932_v56  ;;  %v14288_v56 = vpop.f32.mrf.mxu0  ;;  %vm16174_vm3 = vmmov %vm16126_vm0 }
 0x59f   : > { %v14270_v50 = vpop.f32.mrf.mxu1  ;;  %16159 = vst [vmem:[#allocation90_spill] sm:$0xff] %v14288_v56 }
 0x5a1   : > { %v14274_v17 = vpop.f32.mrf.mxu1 }
 0x5a2   : > { %16154 = vst [vmem:[#allocation87_spill] sm:$0xff] %v14274_v17  ;;  %v14294_v17 = vpop.f32.mrf.mxu0 }
 0x5a3   : > { %v14276_v45 = vpop.f32.mrf.mxu1  ;;  %16161 = vst [vmem:[#allocation92_spill] sm:$0xff] %v14294_v17 }
 0x5a4   : > { %16155 = vst [vmem:[#allocation88_spill] sm:$0xff] %v14276_v45 }
 0x5a5   : > { %v14280_v36 = vpop.f32.mrf.mxu1  ;;  %9932 = vmatmul.mubr.msk.bf16.gmra.mxu1 %vm16157_vm1, %v13935_v60  ;;  %vm16175_vm1 = vmmov %vm16126_vm0 }
 0x5a6   : > { %9935 = vmatprep.mubr.msk.bf16.mxu1 %vm16158_vm15, %v13942_v58  ;;  %v14304_v58 = vpop.f32.mrf.mxu0  ;;  %vm16176_vm15 = vmmov %vm16126_vm0 }
 0x5a7   : > { %v14286_v35 = vpop.f32.mrf.mxu1  ;;  %16165 = vst [vmem:[#allocation94_spill] sm:$0xff] %v14304_v58 }
 0x5a8   : > { %v14312_v17 = vpop.f32.mrf.mxu0 }
 0x5a9   : > { %v14290_v51 = vpop.f32.mrf.mxu1  ;;  %16168 = vst [vmem:[#allocation97_spill] sm:$0xff] %v14312_v17 }
 0x5ab   : > { %v14292_v54 = vpop.f32.mrf.mxu1 }
 0x5ac   : > { %16160 = vst [vmem:[#allocation91_spill] sm:$0xff] %v14292_v54  ;;  %v5293_v54 = vadd.f32 %v14172_v6, %v14029_v30  ;;  %v5296_v30 = vadd.f32 %v14180_v38, %v14041_v4  ;;  %v5301_v4 = vadd.f32 %v14190_v42, %v14053_v18  ;;  %v5304_v18 = vadd.f32 %v14196_v13, %v14060_v29 }
 0x5ad   : > { %v14296_v45 = vpop.f32.mrf.mxu1  ;;  %9936 = vmatmul.mubr.msk.bf16.gmra.mxu1 %vm16163_vm7, %v13945_v49  ;;  %v5285_v49 = vadd.f32 %v14176_v21, %v14035_v12  ;;  %vm16177_vm7 = vmmov %vm16126_vm0 }
 0x5ae   : > { %16162 = vst [vmem:[#allocation93_spill] sm:$0xff] %v14296_v45  ;;  %9939 = vmatprep.mubr.msk.bf16.mxu1 %vm16164_vm11, %v13952_v53  ;;  %vm16178_vm11 = vmmov %vm16126_vm0 }
 0x5af   : > { %v14302_v60 = vpop.f32.mrf.mxu1 }
 0x5b1   : > { %v14306_v40 = vpop.f32.mrf.mxu1 }
 0x5b2   : > { %16166 = vst [vmem:[#allocation95_spill] sm:$0xff] %v14306_v40  ;;  %v14322_v40 = vpop.f32.mrf.mxu0 }
 0x5b3   : > { %v14308_v56 = vpop.f32.mrf.mxu1 }
 0x5b4   : > { %16167 = vst [vmem:[#allocation96_spill] sm:$0xff] %v14308_v56  ;;  %v14332_v21 = vpop.f32.mrf.mxu0 }
 0x5b5   : > { %v9765_v45 = vpop.f32.mrf.mxu1  ;;  %9940 = vmatmul.mubr.msk.bf16.gmra.mxu1 %vm16169_vm6, %v13955_v10  ;;  %v5288_v10 = vadd.f32 %v14182_v32, %v14043_v41  ;;  %vm16179_vm6 = vmmov %vm16126_vm0 }
 0x5b6   : > { %v14318_v53 = vadd.f32 %v9765_v45, %v5293_v54  ;;  %9943 = vmatprep.mubr.msk.bf16.mxu1 %vm16170_vm9, %v13962_v20  ;;  %v5309_v20 = vadd.f32 %v14186_v63, %v14047_v5  ;;  %v14346_v32 = vpop.f32.mrf.mxu0  ;;  %v5312_v5 = vadd.f32 %v14194_v52, %v14058_v3  ;;  %vm16184_vm9 = vmmov %vm16126_vm0 }
 0x5b7   : > { %v5574_v58 = vpop.f32.mrf.mxu1 }
 0x5b8   : > { %v14326_v6 = vadd.f32 %v5574_v58, %v5285_v49  ;;  %v6766_v58 = vld [vmem:[#allocation2 + $0x13c] sm:$0xff] }
 0x5b9   : > { %v9766_v17 = vpop.f32.mrf.mxu1 }
 0x5ba   : > { %v14330_v56 = vadd.f32 %v9766_v17, %v5296_v30  ;;  %v6765_v17 = vld [vmem:[#allocation2 + $0x134] sm:$0xff] }
 0x5bb   : > { %v5577_v12 = vpop.f32.mrf.mxu1  ;;  %v7384_v30 = vld [vmem:[#allocation2 + $0x2e] sm:$0xff] }
 0x5bc   : > { %v14336_v45 = vadd.f32 %v5577_v12, %v5288_v10  ;;  %v14356_v12 = vpop.f32.mrf.mxu0 }
 0x5bd   : > { %v9769_v54 = vpop.f32.mrf.mxu1  ;;  %9944 = vmatmul.mubr.msk.bf16.gmra.mxu1 %vm16171_vm8, %v13965_v34  ;;  %v7383_v34 = vld [vmem:[#allocation2 + $0x26] sm:$0xff]  ;;  %vm16186_vm8 = vmmov %vm16126_vm0 }
 0x5be   : > { %v14342_v38 = vadd.f32 %v9769_v54, %v5309_v20  ;;  %9947 = vmatprep.mubr.msk.bf16.mxu1 %vm16126_vm0, %v13972_v62  ;;  %v6784_v62 = vpack.c.bf16 %v6766_v58, %v6765_v17  ;;  %v5325_v20 = vadd.f32 %v14200_v27, %v14064_v55  ;;  %v7419_v52 = vpack.c.bf16 %v7384_v30, %v7383_v34  ;;  %v14368_v13 = vpop.f32.mrf.mxu0  ;;  %v7385_v27 = vld [vmem:[#allocation2 + $0x36] sm:$0xff]  ;;  %v7386_v17 = vld [vmem:[#allocation2 + $0x3e] sm:$0xff]  ;;  %v7388_v34 = vld [vmem:[#allocation2 + $0x4e] sm:$0xff] }
 0x5bf   : > { %v5590_v41 = vpop.f32.mrf.mxu1 }
 0x5c0   : > { %v14350_v63 = vadd.f32 %v5590_v41, %v5301_v4  ;;  %v5317_v4 = vadd.f32 %v14204_v46, %v14069_v31  ;;  %v5320_v31 = vadd.f32 %v14210_v39, %v14075_v0 }
 0x5c1   : > { %v9770_v49 = vpop.f32.mrf.mxu1 }
 0x5c2   : > { %v14354_v42 = vadd.f32 %v9770_v49, %v5312_v5  ;;  %v5328_v5 = vadd.f32 %v14208_v23, %v14073_v61  ;;  %v7387_v49 = vld [vmem:[#allocation2 + $0x46] sm:$0xff] }
 0x5c3   : > { %v5593_v10 = vpop.f32.mrf.mxu1  ;;  %v7421_v23 = vpack.c.bf16 %v7388_v34, %v7387_v49 }
 0x5c4   : > { %v14360_v3 = vadd.f32 %v5593_v10, %v5304_v18  ;;  %v7420_v18 = vpack.c.bf16 %v7386_v17, %v7385_v27  ;;  %v14378_v10 = vpop.f32.mrf.mxu0  ;;  %v7391_v27 = vld [vmem:[#allocation2 + $0x66] sm:$0xff]  ;;  %v7392_v17 = vld [vmem:[#allocation2 + $0x6e] sm:$0xff] }
 0x5c5   : > { %v9773_v54 = vpop.f32.mrf.mxu1  ;;  %9948 = vmatmul.mubr.msk.bf16.gmra.mxu1 %vm16172_vm13, %v6784_v62  ;;  %v5341_v62 = vadd.f32 %v14216_v26, %v14086_v57  ;;  %v7389_v26 = vld [vmem:[#allocation2 + $0x56] sm:$0xff]  ;;  %vm16195_vm13 = vmmov %vm16126_vm0 }
 0x5c6   : > { %v14365_v41 = vadd.f32 %v9773_v54, %v5325_v20  ;;  %9991 = vmatprep.mubr.msk.bf16.mxu1 %vm16173_vm14, %v7419_v52  ;;  %v5333_v52 = vadd.f32 %v14222_v43, %v14090_v44  ;;  %v14390_v39 = vpop.f32.mrf.mxu0  ;;  %v5336_v44 = vadd.f32 %v14228_v9, %v14098_v8  ;;  %vm16203_vm14 = vmmov %vm16126_vm0 }
 0x5c7   : > { %v5606_v29 = vpop.f32.mrf.mxu1 }
 0x5c8   : > { %v14372_v55 = vadd.f32 %v5606_v29, %v5317_v4  ;;  %v5344_v4 = vadd.f32 %v14226_v2, %v14096_v59  ;;  %v7390_v29 = vld [vmem:[#allocation2 + $0x5e] sm:$0xff]  ;;  %v14400_v34 = vpop.f32.mrf.mxu0  ;;  %v7423_v2 = vpack.c.bf16 %v7392_v17, %v7391_v27  ;;  %v5373_v27 = vadd.f32 %v14248_v47, %v14116_v19  ;;  %v7397_v47 = vld [vmem:[#allocation2 + $0x96] sm:$0xff] }
 0x5c9   : > { %v9774_v58 = vpop.f32.mrf.mxu1  ;;  %v7422_v49 = vpack.c.bf16 %v7390_v29, %v7389_v26 }
 0x5ca   : > { %v14376_v46 = vadd.f32 %v9774_v58, %v5328_v5  ;;  %v14412_v9 = vpop.f32.mrf.mxu0 }
 0x5cb   : > { %v5609_v30 = vpop.f32.mrf.mxu1 }
 0x5cc   : > { %v14382_v61 = vadd.f32 %v5609_v30, %v5320_v31  ;;  %v5357_v31 = vadd.f32 %v14232_v48, %v14102_v25  ;;  %v7393_v48 = vld [vmem:[#allocation2 + $0x76] sm:$0xff] }
 0x5cd   : > { %v9777_v20 = vpop.f32.mrf.mxu1  ;;  %9992 = vmatmul.mubr.msk.bf16.vlgmr.msra.gmra.mxu1 %vm16174_vm3, %v7420_v18  ;;  %v5349_v18 = vadd.f32 %v14238_v33, %v14106_v11  ;;  %v5352_v11 = vadd.f32 %v14244_v7, %v14112_v28  ;;  %vm16205_vm3 = vmmov %vm16126_vm0 }
 0x5ce   : > { %v14387_v54 = vadd.f32 %v9777_v20, %v5341_v62  ;;  %9995 = vmatprep.mubr.msk.bf16.mxu1 %vm16175_vm1, %v7421_v23  ;;  %v5360_v23 = vadd.f32 %v14242_v37, %v14110_v24  ;;  %v7394_v20 = vld [vmem:[#allocation2 + $0x7e] sm:$0xff]  ;;  %vm16212_vm1 = vmmov %vm16126_vm0 }
 0x5cf   : > { %v5622_v0 = vpop.f32.mrf.mxu1  ;;  %v7424_v29 = vpack.c.bf16 %v7394_v20, %v7393_v48 }
 0x5d0   : > { %v14394_v57 = vadd.f32 %v5622_v0, %v5333_v52  ;;  %v7395_v0 = vld [vmem:[#allocation2 + $0x86] sm:$0xff] }
 0x5d1   : > { %v9778_v5 = vpop.f32.mrf.mxu1 }
 0x5d2   : > { %v14398_v43 = vadd.f32 %v9778_v5, %v5344_v4  ;;  %v7396_v4 = vld [vmem:[#allocation2 + $0x8e] sm:$0xff]  ;;  %v14422_v5 = vpop.f32.mrf.mxu0 }
 0x5d3   : > { %v5625_v58 = vpop.f32.mrf.mxu1  ;;  %v7425_v37 = vpack.c.bf16 %v7396_v4, %v7395_v0  ;;  %v16183_v0 = vld [vmem:[#allocation40_spill] sm:$0xff] }
 0x5d4   : > { %v14404_v59 = vadd.f32 %v5625_v58, %v5336_v44  ;;  %v5365_v44 = vadd.f32 %v14254_v1, %v14120_v15  ;;  %v14434_v7 = vpop.f32.mrf.mxu0  ;;  %v5389_v4 = vadd.f32 %v14264_v22, %v16183_v0 }
 0x5d5   : > { %v9781_v30 = vpop.f32.mrf.mxu1  ;;  %9996 = vmatmul.mubr.msk.bf16.gmra.mxu1 %vm16176_vm15, %v7422_v49  ;;  %v5376_v49 = vadd.f32 %v14258_v16, %v14124_v14  ;;  %vm16213_vm15 = vmmov %vm16126_vm0 }
 0x5d6   : > { %v14409_v62 = vadd.f32 %v9781_v30, %v5357_v31  ;;  %9999 = vmatprep.mubr.msk.bf16.mxu1 %vm16177_vm7, %v7423_v2  ;;  %v7398_v31 = vld [vmem:[#allocation2 + $0x9e] sm:$0xff]  ;;  %v7399_v30 = vld [vmem:[#allocation2 + $0xa6] sm:$0xff]  ;;  %vm16221_vm7 = vmmov %vm16126_vm0 }
 0x5d7   : > { %v5638_v8 = vpop.f32.mrf.mxu1  ;;  %v7426_v20 = vpack.c.bf16 %v7398_v31, %v7397_v47  ;;  %v7401_v47 = vld [vmem:[#allocation2 + $0xb6] sm:$0xff]  ;;  %v7402_v31 = vld [vmem:[#allocation2 + $0xbe] sm:$0xff] }
 0x5d8   : > { %v14416_v25 = vadd.f32 %v5638_v8, %v5349_v18  ;;  %v7400_v18 = vld [vmem:[#allocation2 + $0xae] sm:$0xff]  ;;  %v16180_v8 = vld [vmem:[#allocation31_spill] sm:$0xff] }
 0x5d9   : > { %v9782_v52 = vpop.f32.mrf.mxu1  ;;  %v7427_v16 = vpack.c.bf16 %v7400_v18, %v7399_v30  ;;  %v7403_v30 = vld [vmem:[#allocation2 + $0xc6] sm:$0xff]  ;;  %v7404_v18 = vld [vmem:[#allocation2 + $0xce] sm:$0xff] }
 0x5da   : > { %v14420_v33 = vadd.f32 %v9782_v52, %v5360_v23  ;;  %v16181_v23 = vld [vmem:[#allocation84_spill] sm:$0xff]  ;;  %v14444_v52 = vpop.f32.mrf.mxu0 }
 0x5db   : > { %v5641_v26 = vpop.f32.mrf.mxu1  ;;  %v5368_v15 = vadd.f32 %v16181_v23, %v16180_v8  ;;  %16182 = vst [vmem:[#allocation31_spill] sm:$0xff] %v14444_v52  ;;  %v16190_v8 = vld [vmem:[#allocation59_spill] sm:$0xff]  ;;  %v16191_v23 = vld [vmem:[#allocation88_spill] sm:$0xff] }
 0x5dc   : > { %v14426_v24 = vadd.f32 %v5641_v26, %v5352_v11  ;;  %v16185_v26 = vld [vmem:[#allocation41_spill] sm:$0xff] }
 0x5dd   : > { %v9785_v17 = vpop.f32.mrf.mxu1  ;;  %10000 = vmatmul.mubr.msk.bf16.gmra.mxu1 %vm16178_vm11, %v7424_v29  ;;  %v5381_v29 = vadd.f32 %v14270_v50, %v16185_v26  ;;  %v5384_v50 = vadd.f32 %v16191_v23, %v16190_v8  ;;  %v7429_v26 = vpack.c.bf16 %v7404_v18, %v7403_v30  ;;  %v7405_v8 = vld [vmem:[#allocation2 + $0xd6] sm:$0xff]  ;;  %v7406_v30 = vld [vmem:[#allocation2 + $0xde] sm:$0xff]  ;;  %v7407_v23 = vld [vmem:[#allocation2 + $0xe6] sm:$0xff] }
 0x5de   : > { %v14431_v58 = vadd.f32 %v9785_v17, %v5373_v27  ;;  %10003 = vmatprep.mubr.msk.bf16.mxu1 %vm16179_vm6, %v7425_v37  ;;  %v14456_v17 = vpop.f32.mrf.mxu0  ;;  %vm16222_vm11 = vmmov %vm16126_vm0 }
 0x5df   : > { %v5654_v28 = vpop.f32.mrf.mxu1  ;;  %16187 = vst [vmem:[#allocation84_spill] sm:$0xff] %v14456_v17  ;;  %vm16228_vm6 = vmmov %vm16126_vm0 }
 0x5e0   : > { %v14438_v19 = vadd.f32 %v5654_v28, %v5365_v44  ;;  %v16188_v44 = vld [vmem:[#allocation43_spill] sm:$0xff]  ;;  %v14466_v0 = vpop.f32.mrf.mxu0 }
 0x5e1   : > { %v9786_v2 = vpop.f32.mrf.mxu1  ;;  %v16189_v28 = vld [vmem:[#allocation87_spill] sm:$0xff]  ;;  %16192 = vst [vmem:[#allocation40_spill] sm:$0xff] %v14466_v0 }
 0x5e2   : > { %v14442_v1 = vadd.f32 %v9786_v2, %v5376_v49  ;;  %v5392_v49 = vadd.f32 %v16189_v28, %v16188_v44 }
 0x5e3   : > { %v5657_v48 = vpop.f32.mrf.mxu1 }
 0x5e4   : > { %v14448_v14 = vadd.f32 %v5657_v48, %v5368_v15 }
 0x5e5   : > { %v9789_v11 = vpop.f32.mrf.mxu1  ;;  %10004 = vmatmul.mubr.msk.bf16.gmra.mxu1 %vm16184_vm9, %v7426_v20  ;;  %v7428_v20 = vpack.c.bf16 %v7402_v31, %v7401_v47  ;;  %v14478_v47 = vpop.f32.mrf.mxu0  ;;  %v16197_v31 = vld [vmem:[#allocation64_spill] sm:$0xff]  ;;  %vm16293_vm9 = vmmov %vm16126_vm0 }
 0x5e6   : > { %v14453_v27 = vadd.f32 %v9789_v11, %v5389_v4  ;;  %10007 = vmatprep.mubr.msk.bf16.mxu1 %vm16186_vm8, %v7427_v16  ;;  %v16193_v4 = vld [vmem:[#allocation61_spill] sm:$0xff]  ;;  %16196 = vst [vmem:[#allocation41_spill] sm:$0xff] %v14478_v47 }
 0x5e7   : > { %v5670_v37 = vpop.f32.mrf.mxu1  ;;  %v5405_v16 = vadd.f32 %v14280_v36, %v16193_v4  ;;  %v16202_v47 = vld [vmem:[#allocation93_spill] sm:$0xff] }
 0x5e8   : > { %v14460_v22 = vadd.f32 %v5670_v37, %v5381_v29  ;;  %v16194_v37 = vld [vmem:[#allocation62_spill] sm:$0xff] }
 0x5e9   : > { %v9790_v2 = vpop.f32.mrf.mxu1  ;;  %v5397_v44 = vadd.f32 %v14286_v35, %v16194_v37  ;;  %v16201_v37 = vld [vmem:[#allocation67_spill] sm:$0xff] }
 0x5ea   : > { %v14464_v15 = vadd.f32 %v9790_v2, %v5392_v49  ;;  %v5408_v2 = vadd.f32 %v14290_v51, %v16197_v31  ;;  %v5421_v0 = vadd.f32 %v16202_v47, %v16201_v37  ;;  %v16204_v31 = vld [vmem:[#allocation68_spill] sm:$0xff] }
 0x5eb   : > { %v5673_v48 = vpop.f32.mrf.mxu1  ;;  %v5413_v17 = vadd.f32 %v14302_v60, %v16204_v31  ;;  %v16210_v37 = vld [vmem:[#allocation96_spill] sm:$0xff] }
 0x5ec   : > { %v14470_v11 = vadd.f32 %v5673_v48, %v5384_v50  ;;  %v7408_v50 = vld [vmem:[#allocation2 + $0xee] sm:$0xff] }
 0x5ed   : > { %v9793_v29 = vpop.f32.mrf.mxu1  ;;  %10008 = vmatmul.mubr.msk.bf16.gmra.mxu1 %vm16126_vm0, %v7428_v20  ;;  %v16198_v48 = vld [vmem:[#allocation65_spill] sm:$0xff]  ;;  %v16199_v20 = vld [vmem:[#allocation91_spill] sm:$0xff] }
 0x5ee   : > { %v14475_v28 = vadd.f32 %v9793_v29, %v5405_v16  ;;  %10011 = vmatprep.mubr.msk.bf16.mxu1 %vm16195_vm13, %v7429_v26  ;;  %v5400_v35 = vadd.f32 %v16199_v20, %v16198_v48  ;;  %v7430_v26 = vpack.c.bf16 %v7406_v30, %v7405_v8  ;;  %v14488_v29 = vpop.f32.mrf.mxu0  ;;  %v16207_v30 = vld [vmem:[#allocation70_spill] sm:$0xff] }
 0x5ef   : > { %v5686_v49 = vpop.f32.mrf.mxu1  ;;  %16200 = vst [vmem:[#allocation43_spill] sm:$0xff] %v14488_v29  ;;  %v7409_v20 = vld [vmem:[#allocation2 + $0xf6] sm:$0xff] }
 0x5f0   : > { %v14482_v36 = vadd.f32 %v5686_v49, %v5397_v44  ;;  %v7431_v44 = vpack.c.bf16 %v7408_v50, %v7407_v23  ;;  %v14500_v8 = vpop.f32.mrf.mxu0  ;;  %v7410_v23 = vld [vmem:[#allocation2 + $0xfe] sm:$0xff] }
 0x5f1   : > { %v9794_v18 = vpop.f32.mrf.mxu1  ;;  %16206 = vst [vmem:[#allocation87_spill] sm:$0xff] %v14500_v8 }
 0x5f2   : > { %v14486_v4 = vadd.f32 %v9794_v18, %v5408_v2  ;;  %v16208_v18 = vld [vmem:[#allocation95_spill] sm:$0xff]  ;;  %v14510_v31 = vpop.f32.mrf.mxu0 }
 0x5f3   : > { %v5689_v16 = vpop.f32.mrf.mxu1  ;;  %v5424_v48 = vadd.f32 %v16208_v18, %v16207_v30  ;;  %v16211_v30 = vld [vmem:[#allocation25_spill] sm:$0xff] }
 0x5f4   : > { %v14492_v51 = vadd.f32 %v5689_v16, %v5400_v35  ;;  %v7411_v35 = vld [vmem:[#allocation2 + $0x106] sm:$0xff]  ;;  %v7412_v16 = vld [vmem:[#allocation2 + $0x10e] sm:$0xff] }
 0x5f5   : > { %v9797_v49 = vpop.f32.mrf.mxu1  ;;  %10012 = vmatmul.mubr.msk.bf16.gmra.mxu1 %vm16203_vm14, %v7430_v26  ;;  %v16209_v26 = vld [vmem:[#allocation71_spill] sm:$0xff]  ;;  %vm16298_vm14 = vmmov %vm16126_vm0 }
 0x5f6   : > { %v14497_v52 = vadd.f32 %v9797_v49, %v5421_v0  ;;  %10015 = vmatprep.mubr.msk.bf16.mxu1 %vm16205_vm3, %v7431_v44  ;;  %v5416_v60 = vadd.f32 %v16210_v37, %v16209_v26  ;;  %v7432_v44 = vpack.c.bf16 %v7410_v23, %v7409_v20  ;;  %v14522_v20 = vpop.f32.mrf.mxu0  ;;  %v16216_v37 = vld [vmem:[#allocation8_spill] sm:$0xff] }
 0x5f7   : > { %v5702_v2 = vpop.f32.mrf.mxu1  ;;  %16215 = vst [vmem:[#allocation59_spill] sm:$0xff] %v14522_v20 }
 0x5f8   : > { %v14504_v47 = vadd.f32 %v5702_v2, %v5413_v17  ;;  %v6045_v17 = vadd.f32 %v16211_v30, %v14318_v53  ;;  %v7433_v2 = vpack.c.bf16 %v7412_v16, %v7411_v35  ;;  %v7414_v53 = vld [vmem:[#allocation2 + $0x11e] sm:$0xff]  ;;  %v7416_v16 = vld [vmem:[#allocation2 + $0x12e] sm:$0xff] }
 0x5f9   : > { %v9798_v50 = vpop.f32.mrf.mxu1 }
 0x5fa   : > { %v14508_v0 = vadd.f32 %v9798_v50, %v5424_v48  ;;  %v16214_v48 = vld [vmem:[#allocation4_spill] sm:$0xff] }
 0x5fb   : > { %v5705_v49 = vpop.f32.mrf.mxu1  ;;  %v6043_v50 = vadd.f32 %v16214_v48, %v14326_v6  ;;  %v7415_v6 = vld [vmem:[#allocation2 + $0x126] sm:$0xff]  ;;  %v14533_v48 = vpop.f32.mrf.mxu0 }
 0x5fc   : > { %v14512_v8 = vadd.f32 %v5705_v49, %v5416_v60  ;;  %v6046_v60 = vadd.f32 %v16216_v37, %v14330_v56  ;;  %16219 = vst [vmem:[#allocation88_spill] sm:$0xff] %v14533_v48  ;;  %v7435_v56 = vpack.c.bf16 %v7416_v16, %v7415_v6  ;;  %v7418_v16 = vld [vmem:[#allocation2 + $0x13e] sm:$0xff] }
 0x5fd   : > { %v9841_v18 = vpop.f32.mrf.mxu1  ;;  %10016 = vmatmul.mubr.msk.bf16.gmra.mxu1 %vm16212_vm1, %v7432_v44  ;;  %v16217_v44 = vld [vmem:[#allocation9_spill] sm:$0xff] }
 0x5fe   : > { %v14517_v29 = vadd.f32 %v9841_v18, %v6045_v17  ;;  %10019 = vmatprep.mubr.msk.bf16.mxu1 %vm16213_vm15, %v7433_v2  ;;  %v6044_v30 = vadd.f32 %v16217_v44, %v14336_v45  ;;  %v16218_v2 = vld [vmem:[#allocation24_spill] sm:$0xff]  ;;  %v16223_v45 = vld [vmem:[#allocation11_spill] sm:$0xff]  ;;  %v14545_v44 = vpop.f32.mrf.mxu0  ;;  %vm16303_vm15 = vmmov %vm16126_vm0 }
 0x5ff   : > { %v6226_v26 = vpop.f32.mrf.mxu1  ;;  %v7434_v18 = vpack.c.bf16 %v7414_v53, %v16218_v2  ;;  %16224 = vst [vmem:[#allocation61_spill] sm:$0xff] %v14545_v44 }
 0x600   : > { %v14524_v23 = vadd.f32 %v6226_v26, %v6043_v50  ;;  %v16220_v50 = vld [vmem:[#allocation5_spill] sm:$0xff]  ;;  %v14555_v48 = vpop.f32.mrf.mxu0 }
 0x601   : > { %v9842_v35 = vpop.f32.mrf.mxu1  ;;  %v6049_v26 = vadd.f32 %v16220_v50, %v14342_v38  ;;  %v7417_v38 = vld [vmem:[#allocation2 + $0x136] sm:$0xff] }
 0x602   : > { %v14528_v49 = vadd.f32 %v9842_v35, %v6046_v60  ;;  %v6047_v35 = vadd.f32 %v16223_v45, %v14350_v63  ;;  %v16227_v45 = vld [vmem:[#allocation26_spill] sm:$0xff]  ;;  %v14566_v44 = vpop.f32.mrf.mxu0 }
 0x603   : > { %v6229_v17 = vpop.f32.mrf.mxu1 }
 0x604   : > { %v14535_v20 = vadd.f32 %v6229_v17, %v6044_v30  ;;  %v16225_v30 = vld [vmem:[#allocation12_spill] sm:$0xff] }
 0x605   : > { %v9845_v37 = vpop.f32.mrf.mxu1  ;;  %10020 = vmatmul.mubr.msk.bf16.gmra.mxu1 %vm16221_vm7, %v7434_v18  ;;  %v6050_v17 = vadd.f32 %v16225_v30, %v14354_v42  ;;  %v16226_v18 = vld [vmem:[#allocation6_spill] sm:$0xff]  ;;  %v16229_v30 = vld [vmem:[#allocation27_spill] sm:$0xff]  ;;  %vm16304_vm7 = vmmov %vm16126_vm0 }
 0x606   : > { %v14540_v60 = vadd.f32 %v9845_v37, %v6049_v26  ;;  %10023 = vmatprep.mubr.msk.bf16.mxu1 %vm16222_vm11, %v7435_v56  ;;  %v6048_v26 = vadd.f32 %v16226_v18, %v14360_v3  ;;  %v7436_v37 = vpack.c.bf16 %v7418_v16, %v7417_v38  ;;  %v16230_v38 = vld [vmem:[#allocation28_spill] sm:$0xff]  ;;  %vm16305_vm11 = vmmov %vm16126_vm0 }
 0x607   : > { %v6242_v53 = vpop.f32.mrf.mxu1  ;;  %v6054_v16 = vadd.f32 %v16230_v38, %v14376_v46 }
 0x608   : > { %v14547_v2 = vadd.f32 %v6242_v53, %v6047_v35  ;;  %v6053_v35 = vadd.f32 %v16227_v45, %v14365_v41  ;;  %v16231_v41 = vld [vmem:[#allocation29_spill] sm:$0xff]  ;;  %v14576_v45 = vpop.f32.mrf.mxu0 }
 0x609   : > { %v9846_v6 = vpop.f32.mrf.mxu1  ;;  %16232 = vst [vmem:[#allocation62_spill] sm:$0xff] %v14576_v45 }
 0x60a   : > { %v14551_v50 = vadd.f32 %v9846_v6, %v6050_v17  ;;  %v6051_v17 = vadd.f32 %v16229_v30, %v14372_v55  ;;  %v16233_v55 = vld [vmem:[#allocation37_spill] sm:$0xff] }
 0x60b   : > { %v6245_v56 = vpop.f32.mrf.mxu1 }
 0x60c   : > { %v14557_v63 = vadd.f32 %v6245_v56, %v6048_v26  ;;  %v6052_v56 = vadd.f32 %v16231_v41, %v14382_v61  ;;  %v16236_v61 = vld [vmem:[#allocation60_spill] sm:$0xff] }
 0x60d   : > { %v9849_v53 = vpop.f32.mrf.mxu1  ;;  %10024 = vmatmul.mubr.msk.bf16.gmra.mxu1 %vm16228_vm6, %v7436_v37  ;;  %v6058_v41 = vadd.f32 %v16236_v61, %v14398_v43  ;;  %vm16306_vm6 = vmmov %vm16126_vm0 }
 0x60e   : > { %v14562_v42 = vadd.f32 %v9849_v53, %v6053_v35  ;;  %v6057_v53 = vadd.f32 %v16233_v55, %v14387_v54 }
 0x60f   : > { %v6258_v6 = vpop.f32.mrf.mxu1 }
 0x610   : > { %v14568_v3 = vadd.f32 %v6258_v6, %v6051_v17  ;;  %v16234_v6 = vld [vmem:[#allocation42_spill] sm:$0xff] }
 0x611   : > { %v9850_v18 = vpop.f32.mrf.mxu1  ;;  %v6055_v46 = vadd.f32 %v16234_v6, %v14394_v57  ;;  %v16239_v57 = vld [vmem:[#allocation66_spill] sm:$0xff] }
 0x612   : > { %v14572_v26 = vadd.f32 %v9850_v18, %v6054_v16  ;;  %v14586_v16 = vpop.f32.mrf.mxu0  ;;  %v6061_v6 = vadd.f32 %v16239_v57, %v14409_v62 }
 0x613   : > { %v6261_v37 = vpop.f32.mrf.mxu1  ;;  %16235 = vst [vmem:[#allocation64_spill] sm:$0xff] %v14586_v16 }
 0x614   : > { %v14578_v35 = vadd.f32 %v6261_v37, %v6052_v56  ;;  %v16237_v37 = vld [vmem:[#allocation63_spill] sm:$0xff] }
 0x615   : > { %v9853_v30 = vpop.f32.mrf.mxu1  ;;  %v6056_v54 = vadd.f32 %v16237_v37, %v14404_v59  ;;  %v16242_v59 = vld [vmem:[#allocation72_spill] sm:$0xff] }
 0x616   : > { %v14582_v17 = vadd.f32 %v9853_v30, %v6057_v53  ;;  %v14596_v53 = vpop.f32.mrf.mxu0  ;;  %v6062_v37 = vadd.f32 %v16242_v59, %v14420_v33 }
 0x617   : > { %v6274_v38 = vpop.f32.mrf.mxu1  ;;  %16238 = vst [vmem:[#allocation65_spill] sm:$0xff] %v14596_v53 }
 0x618   : > { %v14588_v18 = vadd.f32 %v6274_v38, %v6055_v46  ;;  %v16240_v38 = vld [vmem:[#allocation69_spill] sm:$0xff] }
 0x619   : > { %v9854_v45 = vpop.f32.mrf.mxu1  ;;  %v6059_v43 = vadd.f32 %v16240_v38, %v14416_v25  ;;  %v16245_v25 = vld [vmem:[#allocation74_spill] sm:$0xff] }
 0x61a   : > { %v14592_v56 = vadd.f32 %v9854_v45, %v6058_v41  ;;  %v14606_v45 = vpop.f32.mrf.mxu0  ;;  %v6065_v38 = vadd.f32 %v16245_v25, %v14431_v58 }
 0x61b   : > { %v6277_v55 = vpop.f32.mrf.mxu1  ;;  %16241 = vst [vmem:[#allocation91_spill] sm:$0xff] %v14606_v45 }
 0x61c   : > { %v14598_v30 = vadd.f32 %v6277_v55, %v6056_v54  ;;  %v16243_v55 = vld [vmem:[#allocation73_spill] sm:$0xff] }
 0x61d   : > { %v9857_v16 = vpop.f32.mrf.mxu1  ;;  %v6060_v62 = vadd.f32 %v16243_v55, %v14426_v24  ;;  %v16248_v24 = vld [vmem:[#allocation76_spill] sm:$0xff] }
 0x61e   : > { %v14602_v46 = vadd.f32 %v9857_v16, %v6061_v6  ;;  %v14616_v16 = vpop.f32.mrf.mxu0  ;;  %v6066_v55 = vadd.f32 %v16248_v24, %v14442_v1 }
 0x61f   : > { %v6290_v61 = vpop.f32.mrf.mxu1  ;;  %16244 = vst [vmem:[#allocation67_spill] sm:$0xff] %v14616_v16 }
 0x620   : > { %v14608_v41 = vadd.f32 %v6290_v61, %v6059_v43  ;;  %v16246_v61 = vld [vmem:[#allocation75_spill] sm:$0xff] }
 0x621   : > { %v9858_v53 = vpop.f32.mrf.mxu1  ;;  %v6063_v33 = vadd.f32 %v16246_v61, %v14438_v19  ;;  %v16251_v19 = vld [vmem:[#allocation78_spill] sm:$0xff] }
 0x622   : > { %v14612_v54 = vadd.f32 %v9858_v53, %v6062_v37  ;;  %v14626_v53 = vpop.f32.mrf.mxu0  ;;  %v6069_v61 = vadd.f32 %v16251_v19, %v14453_v27 }
 0x623   : > { %v6293_v57 = vpop.f32.mrf.mxu1  ;;  %16247 = vst [vmem:[#allocation93_spill] sm:$0xff] %v14626_v53 }
 0x624   : > { %v14618_v6 = vadd.f32 %v6293_v57, %v6060_v62  ;;  %v16249_v57 = vld [vmem:[#allocation77_spill] sm:$0xff] }
 0x625   : > { %v9861_v45 = vpop.f32.mrf.mxu1  ;;  %v6064_v58 = vadd.f32 %v16249_v57, %v14448_v14  ;;  %v16254_v14 = vld [vmem:[#allocation80_spill] sm:$0xff] }
 0x626   : > { %v14622_v43 = vadd.f32 %v9861_v45, %v6065_v38  ;;  %v14636_v45 = vpop.f32.mrf.mxu0  ;;  %v6070_v57 = vadd.f32 %v16254_v14, %v14464_v15 }
 0x627   : > { %v6306_v59 = vpop.f32.mrf.mxu1  ;;  %16250 = vst [vmem:[#allocation68_spill] sm:$0xff] %v14636_v45 }
 0x628   : > { %v14628_v37 = vadd.f32 %v6306_v59, %v6063_v33  ;;  %v16252_v59 = vld [vmem:[#allocation79_spill] sm:$0xff] }
 0x629   : > { %v9862_v16 = vpop.f32.mrf.mxu1  ;;  %v6067_v1 = vadd.f32 %v16252_v59, %v14460_v22  ;;  %v16257_v22 = vld [vmem:[#allocation82_spill] sm:$0xff] }
 0x62a   : > { %v14632_v62 = vadd.f32 %v9862_v16, %v6066_v55  ;;  %v14646_v16 = vpop.f32.mrf.mxu0  ;;  %v6073_v59 = vadd.f32 %v16257_v22, %v14475_v28 }
 0x62b   : > { %v6309_v25 = vpop.f32.mrf.mxu1  ;;  %16253 = vst [vmem:[#allocation70_spill] sm:$0xff] %v14646_v16 }
 0x62c   : > { %v14638_v38 = vadd.f32 %v6309_v25, %v6064_v58  ;;  %v16255_v25 = vld [vmem:[#allocation81_spill] sm:$0xff] }
 0x62d   : > { %v9865_v53 = vpop.f32.mrf.mxu1  ;;  %v6068_v27 = vadd.f32 %v16255_v25, %v14470_v11  ;;  %v16260_v11 = vld [vmem:[#allocation85_spill] sm:$0xff] }
 0x62e   : > { %v14642_v33 = vadd.f32 %v9865_v53, %v6069_v61  ;;  %v14656_v53 = vpop.f32.mrf.mxu0  ;;  %v6074_v25 = vadd.f32 %v16260_v11, %v14486_v4 }
 0x62f   : > { %v6322_v24 = vpop.f32.mrf.mxu1  ;;  %16256 = vst [vmem:[#allocation95_spill] sm:$0xff] %v14656_v53 }
 0x630   : > { %v14648_v55 = vadd.f32 %v6322_v24, %v6067_v1  ;;  %v16258_v24 = vld [vmem:[#allocation83_spill] sm:$0xff] }
 0x631   : > { %v9866_v45 = vpop.f32.mrf.mxu1  ;;  %v6071_v15 = vadd.f32 %v16258_v24, %v14482_v36  ;;  %v16263_v36 = vld [vmem:[#allocation89_spill] sm:$0xff] }
 0x632   : > { %v14652_v58 = vadd.f32 %v9866_v45, %v6070_v57  ;;  %v14666_v45 = vpop.f32.mrf.mxu0  ;;  %v6077_v24 = vadd.f32 %v16263_v36, %v14497_v52 }
 0x633   : > { %v6325_v19 = vpop.f32.mrf.mxu1  ;;  %16259 = vst [vmem:[#allocation71_spill] sm:$0xff] %v14666_v45 }
 0x634   : > { %v14658_v61 = vadd.f32 %v6325_v19, %v6068_v27  ;;  %v16261_v19 = vld [vmem:[#allocation86_spill] sm:$0xff] }
 0x635   : > { %v9869_v16 = vpop.f32.mrf.mxu1  ;;  %v6072_v28 = vadd.f32 %v16261_v19, %v14492_v51  ;;  %v16266_v51 = vld [vmem:[#allocation92_spill] sm:$0xff] }
 0x636   : > { %v14662_v1 = vadd.f32 %v9869_v16, %v6073_v59  ;;  %v14676_v16 = vpop.f32.mrf.mxu0  ;;  %v6078_v19 = vadd.f32 %v16266_v51, %v14508_v0  ;;  %v6695_v0 = vadd.f32 %v14322_v40, %v14524_v23  ;;  %v6701_v40 = vadd.f32 %v14356_v12, %v14540_v60 }
 0x637   : > { %v6338_v14 = vpop.f32.mrf.mxu1  ;;  %16262 = vst [vmem:[#allocation96_spill] sm:$0xff] %v14676_v16  ;;  %v6700_v12 = vadd.f32 %v14390_v39, %v14557_v63  ;;  %v6706_v39 = vadd.f32 %v14422_v5, %v14572_v26 }
 0x638   : > { %v14668_v57 = vadd.f32 %v6338_v14, %v6071_v15  ;;  %v16264_v14 = vld [vmem:[#allocation90_spill] sm:$0xff] }
 0x639   : > { %v9870_v53 = vpop.f32.mrf.mxu1  ;;  %v6075_v4 = vadd.f32 %v16264_v14, %v14504_v47  ;;  %v16268_v47 = vld [vmem:[#allocation97_spill] sm:$0xff] }
 0x63a   : > { %v14672_v27 = vadd.f32 %v9870_v53, %v6074_v25  ;;  %v14686_v53 = vpop.f32.mrf.mxu0  ;;  %v6697_v14 = vadd.f32 %v16268_v47, %v14517_v29  ;;  %v6696_v29 = vadd.f32 %v14346_v32, %v14535_v20  ;;  %v6702_v32 = vadd.f32 %v14378_v10, %v14551_v50 }
 0x63b   : > { %v6341_v22 = vpop.f32.mrf.mxu1  ;;  %16265 = vst [vmem:[#allocation25_spill] sm:$0xff] %v14686_v53  ;;  %v6703_v10 = vadd.f32 %v14412_v9, %v14568_v3  ;;  %v16269_v9 = vld [vmem:[#allocation31_spill] sm:$0xff] }
 0x63c   : > { %v14678_v59 = vadd.f32 %v6341_v22, %v6072_v28  ;;  %v16267_v22 = vld [vmem:[#allocation94_spill] sm:$0xff]  ;;  %v6709_v3 = vadd.f32 %v16269_v9, %v14582_v17 }
 0x63d   : > { %v9873_v45 = vpop.f32.mrf.mxu1  ;;  %v6076_v52 = vadd.f32 %v16267_v22, %v14512_v8  ;;  %v6698_v8 = vadd.f32 %v14332_v21, %v14528_v49  ;;  %v6699_v21 = vadd.f32 %v14368_v13, %v14547_v2  ;;  %v6705_v13 = vadd.f32 %v14400_v34, %v14562_v42 }
 0x63e   : > { %v14682_v15 = vadd.f32 %v9873_v45, %v6077_v24  ;;  %v14696_v45 = vpop.f32.mrf.mxu0  ;;  %v6704_v34 = vadd.f32 %v14434_v7, %v14578_v35  ;;  %v16271_v7 = vld [vmem:[#allocation40_spill] sm:$0xff] }
 0x63f   : > { %v6354_v11 = vpop.f32.mrf.mxu1  ;;  %v6710_v35 = vadd.f32 %v16271_v7, %v14592_v56 }
 0x640   : > { %v14688_v25 = vadd.f32 %v6354_v11, %v6075_v4 }
 0x641   : > { %v9874_v16 = vpop.f32.mrf.mxu1 }
 0x642   : > { %v14692_v28 = vadd.f32 %v9874_v16, %v6078_v19  ;;  %v14706_v16 = vpop.f32.mrf.mxu0 }
 0x643   : > { %v6357_v36 = vpop.f32.mrf.mxu1 }
 0x644   : > { %v14698_v24 = vadd.f32 %v6357_v36, %v6076_v52 }
 0x645   : > { %v9917_v53 = vpop.f32.mrf.mxu1 }
 0x646   : > { %v14702_v4 = vadd.f32 %v9917_v53, %v6697_v14  ;;  %v14716_v53 = vpop.f32.mrf.mxu0 }
 0x647   : > { %v6878_v11 = vpop.f32.mrf.mxu1 }
 0x648   : > { %v14708_v51 = vadd.f32 %v6878_v11, %v6695_v0  ;;  %v14726_v14 = vpop.f32.mrf.mxu0 }
 0x649   : > { %v9918_v19 = vpop.f32.mrf.mxu1 }
 0x64a   : > { %v14712_v22 = vadd.f32 %v9918_v19, %v6698_v8  ;;  %v14736_v8 = vpop.f32.mrf.mxu0 }
 0x64b   : > { %v6881_v52 = vpop.f32.mrf.mxu1 }
 0x64c   : > { %v14718_v36 = vadd.f32 %v6881_v52, %v6696_v29  ;;  %v14746_v52 = vpop.f32.mrf.mxu0 }
 0x64d   : > { %v9921_v23 = vpop.f32.mrf.mxu1 }
 0x64e   : > { %v14722_v47 = vadd.f32 %v9921_v23, %v6701_v40 }
 0x64f   : > { %v6894_v49 = vpop.f32.mrf.mxu1 }
 0x650   : > { %v14728_v0 = vadd.f32 %v6894_v49, %v6699_v21  ;;  %v14756_v21 = vpop.f32.mrf.mxu0 }
 0x651   : > { %v9922_v20 = vpop.f32.mrf.mxu1 }
 0x652   : > { %v14732_v11 = vadd.f32 %v9922_v20, %v6702_v32 }
 0x653   : > { %v6897_v60 = vpop.f32.mrf.mxu1 }
 0x654   : > { %v14738_v19 = vadd.f32 %v6897_v60, %v6700_v12  ;;  %v16270_v12 = vld [vmem:[#allocation84_spill] sm:$0xff]  ;;  %v14766_v60 = vpop.f32.mrf.mxu0 }
 0x655   : > { %v9925_v2 = vpop.f32.mrf.mxu1  ;;  %v6707_v5 = vadd.f32 %v16270_v12, %v14588_v18  ;;  %v16273_v18 = vld [vmem:[#allocation43_spill] sm:$0xff] }
 0x656   : > { %v14742_v29 = vadd.f32 %v9925_v2, %v6705_v13 }
 0x657   : > { %v6910_v50 = vpop.f32.mrf.mxu1 }
 0x658   : > { %v14748_v40 = vadd.f32 %v6910_v50, %v6703_v10  ;;  %v16272_v50 = vld [vmem:[#allocation41_spill] sm:$0xff] }
 0x659   : > { %v9926_v63 = vpop.f32.mrf.mxu1  ;;  %v6708_v17 = vadd.f32 %v16272_v50, %v14598_v30  ;;  %v6714_v30 = vadd.f32 %v14510_v31, %v14612_v54 }
 0x65a   : > { %v14752_v23 = vadd.f32 %v9926_v63, %v6706_v39  ;;  %v14776_v63 = vpop.f32.mrf.mxu0 }
 0x65b   : > { %v6913_v42 = vpop.f32.mrf.mxu1 }
 0x65c   : > { %v14758_v49 = vadd.f32 %v6913_v42, %v6704_v34  ;;  %v6713_v42 = vadd.f32 %v16273_v18, %v14602_v46 }
 0x65d   : > { %v9929_v32 = vpop.f32.mrf.mxu1 }
 0x65e   : > { %v14762_v20 = vadd.f32 %v9929_v32, %v6709_v3  ;;  %v16274_v32 = vld [vmem:[#allocation87_spill] sm:$0xff] }
 0x65f   : > { %v6926_v26 = vpop.f32.mrf.mxu1  ;;  %v6711_v56 = vadd.f32 %v16274_v32, %v14608_v41  ;;  %v16276_v41 = vld [vmem:[#allocation88_spill] sm:$0xff]  ;;  %v16277_v32 = vld [vmem:[#allocation61_spill] sm:$0xff] }
 0x660   : > { %v14768_v13 = vadd.f32 %v6926_v26, %v6707_v5  ;;  %v14786_v5 = vpop.f32.mrf.mxu0  ;;  %v6717_v18 = vadd.f32 %v16276_v41, %v14622_v43  ;;  %v6715_v31 = vadd.f32 %v16277_v32, %v14628_v37  ;;  %v6716_v43 = vadd.f32 %v14566_v44, %v14638_v38  ;;  %v16278_v37 = vld [vmem:[#allocation62_spill] sm:$0xff]  ;;  %v16279_v32 = vld [vmem:[#allocation64_spill] sm:$0xff]  ;;  %v16280_v44 = vld [vmem:[#allocation65_spill] sm:$0xff] }
 0x661   : > { %v9930_v2 = vpop.f32.mrf.mxu1  ;;  %v6721_v41 = vadd.f32 %v16278_v37, %v14642_v33  ;;  %v6722_v38 = vadd.f32 %v16280_v44, %v14652_v58 }
 0x662   : > { %v14772_v10 = vadd.f32 %v9930_v2, %v6710_v35  ;;  %v16275_v2 = vld [vmem:[#allocation59_spill] sm:$0xff] }
 0x663   : > { %v6929_v39 = vpop.f32.mrf.mxu1  ;;  %v6712_v46 = vadd.f32 %v16275_v2, %v14618_v6  ;;  %v6718_v6 = vadd.f32 %v14555_v48, %v14632_v62  ;;  %v6719_v48 = vadd.f32 %v16279_v32, %v14648_v55  ;;  %v16283_v55 = vld [vmem:[#allocation67_spill] sm:$0xff] }
 0x664   : > { %v14778_v34 = vadd.f32 %v6929_v39, %v6708_v17  ;;  %v14796_v17 = vpop.f32.mrf.mxu0 }
 0x665   : > { %v9933_v9 = vpop.f32.mrf.mxu1 }
 0x666   : > { %v14782_v3 = vadd.f32 %v9933_v9, %v6713_v42 }
 0x667   : > { %v6942_v12 = vpop.f32.mrf.mxu1 }
 0x668   : > { %v14788_v26 = vadd.f32 %v6942_v12, %v6711_v56  ;;  %v14806_v56 = vpop.f32.mrf.mxu0 }
 0x669   : > { %v9934_v7 = vpop.f32.mrf.mxu1 }
 0x66a   : > { %v14792_v35 = vadd.f32 %v9934_v7, %v6714_v30 }
 0x66b   : > { %v6945_v50 = vpop.f32.mrf.mxu1 }
 0x66c   : > { %v14798_v39 = vadd.f32 %v6945_v50, %v6712_v46  ;;  %v14816_v46 = vpop.f32.mrf.mxu0 }
 0x66d   : > { %v9937_v42 = vpop.f32.mrf.mxu1 }
 0x66e   : > { %v14802_v9 = vadd.f32 %v9937_v42, %v6717_v18 }
 0x66f   : > { %v6958_v54 = vpop.f32.mrf.mxu1 }
 0x670   : > { %v14808_v12 = vadd.f32 %v6958_v54, %v6715_v31  ;;  %v14826_v31 = vpop.f32.mrf.mxu0 }
 0x671   : > { %v9938_v30 = vpop.f32.mrf.mxu1 }
 0x672   : > { %v14812_v7 = vadd.f32 %v9938_v30, %v6718_v6  ;;  %v14836_v37 = vpop.f32.mrf.mxu0 }
 0x673   : > { %v6961_v2 = vpop.f32.mrf.mxu1 }
 0x674   : > { %v14818_v50 = vadd.f32 %v6961_v2, %v6716_v43  ;;  %v16282_v43 = vld [vmem:[#allocation91_spill] sm:$0xff] }
 0x675   : > { %v9941_v18 = vpop.f32.mrf.mxu1  ;;  %v6720_v33 = vadd.f32 %v16282_v43, %v14658_v61  ;;  %v16286_v61 = vld [vmem:[#allocation68_spill] sm:$0xff] }
 0x676   : > { %v14822_v42 = vadd.f32 %v9941_v18, %v6721_v41  ;;  %v6725_v18 = vadd.f32 %v16283_v55, %v14662_v1  ;;  %v6726_v43 = vadd.f32 %v16286_v61, %v14672_v27 }
 0x677   : > { %v6974_v62 = vpop.f32.mrf.mxu1 }
 0x678   : > { %v14828_v54 = vadd.f32 %v6974_v62, %v6719_v48  ;;  %v16285_v62 = vld [vmem:[#allocation93_spill] sm:$0xff] }
 0x679   : > { %v9942_v6 = vpop.f32.mrf.mxu1  ;;  %v6723_v58 = vadd.f32 %v16285_v62, %v14668_v57  ;;  %v16289_v57 = vld [vmem:[#allocation95_spill] sm:$0xff] }
 0x67a   : > { %v14832_v30 = vadd.f32 %v9942_v6, %v6722_v38  ;;  %v14846_v38 = vpop.f32.mrf.mxu0  ;;  %v6729_v62 = vadd.f32 %v16289_v57, %v14682_v15 }
 0x67b   : > { %v6977_v2 = vpop.f32.mrf.mxu1 }
 0x67c   : > { %16281 = vst [vmem:[#allocation4_spill] sm:$0xff] %v14832_v30  ;;  %v14838_v41 = vadd.f32 %v6977_v2, %v6720_v33  ;;  %v16288_v2 = vld [vmem:[#allocation70_spill] sm:$0xff] }
 0x67d   : > { %v9945_v32 = vpop.f32.mrf.mxu1  ;;  %v6724_v1 = vadd.f32 %v16288_v2, %v14678_v59  ;;  %v16291_v59 = vld [vmem:[#allocation96_spill] sm:$0xff] }
 0x67e   : > { %v14842_v48 = vadd.f32 %v9945_v32, %v6725_v18  ;;  %v14856_v18 = vpop.f32.mrf.mxu0  ;;  %v6730_v2 = vadd.f32 %v16291_v59, %v14692_v28 }
 0x67f   : > { %v6990_v44 = vpop.f32.mrf.mxu1 }
 0x680   : > { %16284 = vst [vmem:[#allocation8_spill] sm:$0xff] %v14842_v48  ;;  %v14848_v6 = vadd.f32 %v6990_v44, %v6723_v58  ;;  %v16290_v44 = vld [vmem:[#allocation71_spill] sm:$0xff] }
 0x681   : > { %v9946_v30 = vpop.f32.mrf.mxu1  ;;  %v6727_v27 = vadd.f32 %v16290_v44, %v14688_v25  ;;  %v7349_v25 = vadd.f32 %v14696_v45, %v14702_v4  ;;  %v7348_v4 = vadd.f32 %v14726_v14, %v14718_v36 }
 0x682   : > { %v14852_v33 = vadd.f32 %v9946_v30, %v6726_v43  ;;  %v14866_v30 = vpop.f32.mrf.mxu0 }
 0x683   : > { %v6993_v55 = vpop.f32.mrf.mxu1 }
 0x684   : > { %16287 = vst [vmem:[#allocation9_spill] sm:$0xff] %v14852_v33  ;;  %v14858_v32 = vadd.f32 %v6993_v55, %v6724_v1  ;;  %v16292_v55 = vld [vmem:[#allocation25_spill] sm:$0xff] }
 0x685   : > { %v9949_v48 = vpop.f32.mrf.mxu1  ;;  %v6728_v15 = vadd.f32 %v16292_v55, %v14698_v24  ;;  %v7350_v24 = vadd.f32 %v14716_v53, %v14712_v22  ;;  %v16294_v55 = vld [vmem:[#allocation30_spill] sm:$0xff]  ;;  %v7353_v22 = vadd.f32 %v14736_v8, %v14722_v47 }
 0x686   : > { %v14862_v58 = vadd.f32 %v9949_v48, %v6729_v62  ;;  %v14876_v48 = vpop.f32.mrf.mxu0  ;;  %vm16295_vm8 = vcmp.lt.s32.totalorder %v16294_v55, 16 }
 0x687   : > { %v7006_v61 = vpop.f32.mrf.mxu1 }
 0x688   : > { %v14868_v43 = vadd.f32 %v7006_v61, %v6727_v27  ;;  %v7347_v61 = vadd.f32 %v14706_v16, %v14708_v51  ;;  %v14884_v59 = vpop.f32.mrf.mxu0 }
 0x689   : > { %v9950_v33 = vpop.f32.mrf.mxu1 }
 0x68a   : > { %v14872_v1 = vadd.f32 %v9950_v33, %v6730_v2  ;;  %v14894_v51 = vpop.f32.mrf.mxu0 }
 0x68b   : > { %v7009_v57 = vpop.f32.mrf.mxu1 }
 0x68c   : > { %v14878_v62 = vadd.f32 %v7009_v57, %v6728_v15  ;;  %v16296_v57 = vld [vmem:[#allocation33_spill] sm:$0xff] }
 0x68d   : > { %v9993_v44 = vpop.f32.mrf.mxu1  ;;  %vm16297_vm13 = vcmp.lt.s32.totalorder %v16296_v57, 16 }
 0x68e   : > { %v7675_v27 = vadd.f32 %v9993_v44, %v7349_v25 }
 0x68f   : > { %v7530_v28 = vpop.f32.mrf.mxu1 }
 0x690   : > { %7939 = vst.msk [vmem:[#allocation3 + $0x10] sm:$0xff] %vm16293_vm9, %v7675_v27  ;;  %v7673_v33 = vadd.f32 %v7530_v28, %v7347_v61  ;;  %v7711_v25 = vsel %vm16297_vm13, %v7675_v27, 0.0  ;;  %v16299_v28 = vld [vmem:[#allocation34_spill] sm:$0xff]  ;;  %v7351_v27 = vadd.f32 %v14746_v52, %v14728_v0  ;;  %vm16307_vm9 = vmmov %vm16126_vm0 }
 0x691   : > { %v9994_v2 = vpop.f32.mrf.mxu1  ;;  %vm16300_vm3 = vcmp.lt.s32.totalorder %v16299_v28, 16  ;;  %v7748_v0 = vsel %vm16307_vm9, %v7711_v25, 0.0 }
 0x692   : > { %v7709_v15 = vsel %vm16295_vm8, %v7673_v33, 0.0  ;;  %7937 = vst.msk [vmem:[#allocation3] sm:$0xff] %vm16126_vm0, %v7673_v33  ;;  %v7676_v45 = vadd.f32 %v9994_v2, %v7350_v24  ;;  %v16301_v24 = vld [vmem:[#allocation32_spill] sm:$0xff]  ;;  %v7825_v2 = vmul.f32 %v7711_v25, %v7711_v25  ;;  %vm16308_vm8 = vmmov %vm16126_vm0  ;;  %v7357_v25 = vadd.f32 %v14776_v63, %v14742_v29 }
 0x693   : > { %v7533_v16 = vpop.f32.mrf.mxu1  ;;  %v7823_v53 = vmul.f32 %v7709_v15, %v7709_v15  ;;  %vm16302_vm1 = vcmp.lt.s32.totalorder %v16301_v24, 16  ;;  %v7745_v55 = vsel %vm16304_vm7, %v7709_v15, 0.0  ;;  %vm16316_vm7 = vmmov %vm16126_vm0  ;;  %v7355_v29 = vadd.f32 %v14786_v5, %v14748_v40 }
 0x694   : > { %7940 = vst.msk [vmem:[#allocation3 + $0x18] sm:$0xff] %vm16298_vm14, %v7676_v45  ;;  %v7674_v44 = vadd.f32 %v7533_v16, %v7348_v4  ;;  %v7712_v33 = vsel %vm16300_vm3, %v7676_v45, 0.0  ;;  %v14910_v16 = vpop.f32.mrf.mxu0  ;;  %vm16311_vm14 = vmmov %vm16126_vm0  ;;  %v7358_v5 = vadd.f32 %v14796_v17, %v14752_v23 }
 0x695   : > { %v9997_v61 = vpop.f32.mrf.mxu1  ;;  %v7859_v52 = vsel %vm16308_vm8, %v7823_v53, 0.0  ;;  %v7826_v15 = vmul.f32 %v7712_v33, %v7712_v33  ;;  %vm16312_vm3 = vmmov %vm16126_vm0 }
 0x696   : > { %v7710_v36 = vsel %vm16302_vm1, %v7674_v44, 0.0  ;;  %7938 = vst.msk [vmem:[#allocation3 + $0x8] sm:$0xff] %vm16303_vm15, %v7674_v44  ;;  %v7679_v14 = vadd.f32 %v9997_v61, %v7353_v22  ;;  %v7354_v44 = vadd.f32 %v14756_v21, %v14732_v11  ;;  %v7352_v22 = vadd.f32 %v14766_v60, %v14738_v19  ;;  %vm16313_vm1 = vmmov %vm16126_vm0  ;;  %v14927_v53 = vpop.f32.mrf.mxu0 }
 0x697   : > { %v7746_v4 = vsel %vm16305_vm11, %v7710_v36, 0.0  ;;  %v7824_v47 = vmul.f32 %v7710_v36, %v7710_v36  ;;  %v7546_v8 = vpop.f32.mrf.mxu1  ;;  %v7862_v11 = vsel %vm16312_vm3, %v7825_v2, 0.0  ;;  %v7750_v19 = vsel %vm16313_vm1, %v7712_v33, 0.0  ;;  %vm16317_vm11 = vmmov %vm16126_vm0  ;;  %v16319_v33 = vld [vmem:[#allocation39_spill] sm:$0xff] }
 0x698   : > { %v7747_v57 = vadd.f32 %v7746_v4, %v7745_v55  ;;  %7943 = vst.msk [vmem:[#allocation3 + $0x30] sm:$0xff] %vm16306_vm6, %v7679_v14  ;;  %v7677_v45 = vadd.f32 %v7546_v8, %v7351_v27  ;;  %v16309_v55 = vld [vmem:[#allocation35_spill] sm:$0xff]  ;;  %v16314_v8 = vld [vmem:[#allocation38_spill] sm:$0xff]  ;;  %vm16318_vm6 = vmmov %vm16126_vm0  ;;  %vm16320_vm9 = vcmp.lt.s32.totalorder %v16319_v33, 16 }
 0x699   : > { %v7860_v61 = vsel %vm16126_vm0, %v7824_v47, 0.0  ;;  %v9998_v28 = vpop.f32.mrf.mxu1  ;;  %vm16310_vm13 = vcmp.lt.s32.totalorder %v16309_v55, 16  ;;  %vm16315_vm15 = vcmp.lt.s32.totalorder %v16314_v8, 16  ;;  %vm16325_vm3 = vmmov %vm16126_vm0 }
 0x69a   : > { %v7749_v24 = vadd.f32 %v7748_v0, %v7747_v57  ;;  %v7861_v36 = vadd.f32 %v7860_v61, %v7859_v52  ;;  %v7713_v4 = vsel %vm16310_vm13, %v7677_v45, 0.0  ;;  %7941 = vst.msk [vmem:[#allocation3 + $0x20] sm:$0xff] %vm16311_vm14, %v7677_v45  ;;  %v7680_v27 = vadd.f32 %v9998_v28, %v7354_v44  ;;  %vm16323_vm13 = vmmov %vm16126_vm0 }
 0x69b   : > { %v7827_v21 = vmul.f32 %v7713_v4, %v7713_v4  ;;  %v7549_v60 = vpop.f32.mrf.mxu1  ;;  %v7715_v57 = vsel %vm16315_vm15, %v7679_v14, 0.0  ;;  %v7864_v44 = vsel %vm16317_vm11, %v7826_v15, 0.0  ;;  %v7752_v2 = vsel %vm16318_vm6, %v7713_v4, 0.0  ;;  %vm16324_vm14 = vmmov %vm16126_vm0 }
 0x69c   : > { %v7863_v47 = vadd.f32 %v7862_v11, %v7861_v36  ;;  %v7751_v0 = vadd.f32 %v7750_v19, %v7749_v24  ;;  %7944 = vst.msk [vmem:[#allocation3 + $0x38] sm:$0xff] %vm16316_vm7, %v7680_v27  ;;  %v7678_v45 = vadd.f32 %v7549_v60, %v7352_v22  ;;  %v7716_v52 = vsel %vm16320_vm9, %v7680_v27, 0.0  ;;  %v16321_v36 = vld [vmem:[#allocation36_spill] sm:$0xff]  ;;  %v14943_v27 = vpop.f32.mrf.mxu0  ;;  %vm16326_vm1 = vmmov %vm16126_vm0 }
 0x69d   : > { %v10001_v61 = vpop.f32.mrf.mxu1  ;;  %vm16322_vm8 = vcmp.lt.s32.totalorder %v16321_v36, 16  ;;  %v7829_v22 = vmul.f32 %v7715_v57, %v7715_v57  ;;  %v7866_v15 = vsel %vm16323_vm13, %v7827_v21, 0.0  ;;  %vm16327_vm15 = vmmov %vm16126_vm0 }
 0x69e   : > { %v7753_v63 = vadd.f32 %v7752_v2, %v7751_v0  ;;  %v7865_v28 = vadd.f32 %v7864_v44, %v7863_v47  ;;  %v7714_v14 = vsel %vm16322_vm8, %v7678_v45, 0.0  ;;  %7942 = vst.msk [vmem:[#allocation3 + $0x28] sm:$0xff] %vm16126_vm0, %v7678_v45  ;;  %v7683_v24 = vadd.f32 %v10001_v61, %v7357_v25  ;;  %v16328_v2 = vld [vmem:[#allocation44_spill] sm:$0xff]  ;;  %vm16330_vm11 = vmmov %vm16126_vm0 }
 0x69f   : > { %v7754_v55 = vsel %vm16324_vm14, %v7714_v14, 0.0  ;;  %v7828_v4 = vmul.f32 %v7714_v14, %v7714_v14  ;;  %v7562_v11 = vpop.f32.mrf.mxu1  ;;  %v7756_v47 = vsel %vm16326_vm1, %v7715_v57, 0.0  ;;  %v7830_v25 = vmul.f32 %v7716_v52, %v7716_v52  ;;  %vm16331_vm6 = vmmov %vm16126_vm0 }
 0x6a0   : > { %v7867_v19 = vadd.f32 %v7866_v15, %v7865_v28  ;;  %v7755_v60 = vadd.f32 %v7754_v55, %v7753_v63  ;;  %7947 = vst.msk [vmem:[#allocation3 + $0x50] sm:$0xff] %vm16325_vm3, %v7683_v24  ;;  %v7681_v40 = vadd.f32 %v7562_v11, %v7355_v29  ;;  %v7356_v0 = vadd.f32 %v14806_v56, %v14758_v49  ;;  %vm16332_vm9 = vmmov %vm16126_vm0  ;;  %v14959_v28 = vpop.f32.mrf.mxu0  ;;  %v16333_v56 = vld [vmem:[#allocation45_spill] sm:$0xff] }
 0x6a1   : > { %v7868_v8 = vsel %vm16327_vm15, %v7828_v4, 0.0  ;;  %v10002_v21 = vpop.f32.mrf.mxu1  ;;  %vm16329_vm7 = vcmp.lt.s32.totalorder %v16328_v2, 16  ;;  %v7870_v29 = vsel %vm16331_vm6, %v7829_v22, 0.0  ;;  %v7758_v23 = vsel %vm16332_vm9, %v7716_v52, 0.0  ;;  %vm16335_vm13 = vmmov %vm16126_vm0  ;;  %v16337_v52 = vld [vmem:[#allocation46_spill] sm:$0xff] }
 0x6a2   : > { %v7757_v45 = vadd.f32 %v7756_v47, %v7755_v60  ;;  %v7869_v44 = vadd.f32 %v7868_v8, %v7867_v19  ;;  %v7717_v33 = vsel %vm16329_vm7, %v7681_v40, 0.0  ;;  %7945 = vst.msk [vmem:[#allocation3 + $0x40] sm:$0xff] %vm16330_vm11, %v7681_v40  ;;  %v7684_v61 = vadd.f32 %v10002_v21, %v7358_v5  ;;  %vm16336_vm14 = vmmov %vm16126_vm0  ;;  %v16339_v60 = vld [vmem:[#allocation14_spill] sm:$0xff] }
 0x6a3   : > { %v7831_v17 = vmul.f32 %v7717_v33, %v7717_v33  ;;  %v7565_v57 = vpop.f32.mrf.mxu1  ;;  %v7361_v63 = vadd.f32 %v14816_v46, %v14762_v20  ;;  %vm16334_vm8 = vcmp.lt.s32.totalorder %v16333_v56, 16  ;;  %v7872_v55 = vsel %vm16335_vm13, %v7830_v25, 0.0  ;;  %vm16341_vm15 = vmmov %vm16126_vm0 }
 0x6a4   : > { %v7871_v49 = vadd.f32 %v7870_v29, %v7869_v44  ;;  %v7719_v36 = vsel %vm16334_vm8, %v7683_v24, 0.0  ;;  %v7759_v14 = vadd.f32 %v7758_v23, %v7757_v45  ;;  %7948 = vst.msk [vmem:[#allocation3 + $0x58] sm:$0xff] %vm16126_vm0, %v7684_v61  ;;  %v7682_v15 = vadd.f32 %v7565_v57, %v7356_v0  ;;  %vm16342_vm7 = vmmov %vm16126_vm0  ;;  %v14975_v0 = vpop.f32.mrf.mxu0 }
 0x6a5   : > { %v7760_v22 = vsel %vm16336_vm14, %v7717_v33, 0.0  ;;  %vm16338_vm3 = vcmp.lt.s32.totalorder %v16337_v52, 16  ;;  %v10005_v11 = vpop.f32.mrf.mxu1  ;;  %v7359_v20 = vadd.f32 %v14826_v31, %v14768_v13  ;;  %vm16340_vm1 = vcmp.lt.s32.totalorder %v16339_v60, 16  ;;  %vm16343_vm11 = vmmov %vm16126_vm0 }
 0x6a6   : > { %v7720_v4 = vsel %vm16338_vm3, %v7684_v61, 0.0  ;;  %v7761_v46 = vadd.f32 %v7760_v22, %v7759_v14  ;;  %v7873_v19 = vadd.f32 %v7872_v55, %v7871_v49  ;;  %v7718_v24 = vsel %vm16340_vm1, %v7682_v15, 0.0  ;;  %7946 = vst.msk [vmem:[#allocation3 + $0x48] sm:$0xff] %vm16341_vm15, %v7682_v15  ;;  %vm16344_vm6 = vmmov %vm16126_vm0  ;;  %v14991_v55 = vpop.f32.mrf.mxu0 }
 0x6a7   : > { %v7687_v40 = vadd.f32 %v10005_v11, %v7361_v63  ;;  %v7833_v5 = vmul.f32 %v7719_v36, %v7719_v36  ;;  %v7874_v47 = vsel %vm16342_vm7, %v7831_v17, 0.0  ;;  %v7762_v25 = vsel %vm16343_vm11, %v7718_v24, 0.0  ;;  %v7578_v21 = vpop.f32.mrf.mxu1  ;;  %vm16345_vm9 = vmmov %vm16126_vm0  ;;  %v16347_v63 = vld [vmem:[#allocation47_spill] sm:$0xff] }
 0x6a8   : > { %v7832_v8 = vmul.f32 %v7718_v24, %v7718_v24  ;;  %v7875_v45 = vadd.f32 %v7874_v47, %v7873_v19  ;;  %v7763_v44 = vadd.f32 %v7762_v25, %v7761_v46  ;;  %v7685_v13 = vadd.f32 %v7578_v21, %v7359_v20  ;;  %vm16346_vm8 = vmmov %vm16126_vm0 }
 0x6a9   : > { %7951 = vst.msk [vmem:[#allocation3 + $0x70] sm:$0xff] %vm16344_vm6, %v7687_v40  ;;  %v7362_v31 = vadd.f32 %v14836_v37, %v14772_v10  ;;  %v7764_v2 = vsel %vm16345_vm9, %v7719_v36, 0.0  ;;  %v7834_v33 = vmul.f32 %v7720_v4, %v7720_v4  ;;  %v10006_v29 = vpop.f32.mrf.mxu1  ;;  %v7360_v23 = vadd.f32 %v14846_v38, %v14778_v34  ;;  %vm16349_vm13 = vmmov %vm16344_vm6  ;;  %v16352_v38 = vld [vmem:[#allocation15_spill] sm:$0xff] }
 0x6aa   : > { %v7876_v61 = vsel %vm16346_vm8, %v7832_v8, 0.0  ;;  %v7765_v17 = vadd.f32 %v7764_v2, %v7763_v44  ;;  %vm16348_vm0 = vcmp.lt.s32.totalorder %v16347_v63, 16  ;;  %7949 = vst.msk [vmem:[#allocation3 + $0x60] sm:$0xff] %vm16349_vm13, %v7685_v13  ;;  %vm16350_vm14 = vmmov %vm16344_vm6  ;;  %v7365_v15 = vadd.f32 %v14856_v18, %v14782_v3 }
 0x6ab   : > { %v7877_v57 = vadd.f32 %v7876_v61, %v7875_v45  ;;  %v7721_v49 = vsel %vm16348_vm0, %v7685_v13, 0.0  ;;  %v7688_v56 = vadd.f32 %v10006_v29, %v7362_v31  ;;  %v7878_v14 = vsel %vm16350_vm14, %v7833_v5, 0.0  ;;  %vm16351_vm3 = vmmov %vm16344_vm6  ;;  %v7581_v36 = vpop.f32.mrf.mxu1  ;;  %v16359_v5 = vld [vmem:[#allocation48_spill] sm:$0xff]  ;;  %v15007_v13 = vpop.f32.mrf.mxu0 }
 0x6ac   : > { %v7766_v10 = vsel %vm16351_vm3, %v7720_v4, 0.0  ;;  %v7835_v37 = vmul.f32 %v7721_v49, %v7721_v49  ;;  %vm16353_vm1 = vcmp.lt.s32.totalorder %v16352_v38, 16  ;;  %vm16354_vm15 = vmmov %vm16351_vm3  ;;  %v7686_v11 = vadd.f32 %v7581_v36, %v7360_v23  ;;  %v16357_v4 = vld [vmem:[#allocation7_spill] sm:$0xff] }
 0x6ad   : > { %v7879_v34 = vadd.f32 %v7878_v14, %v7877_v57  ;;  %v7723_v22 = vsel %vm16353_vm1, %v7687_v40, 0.0  ;;  %v7767_v52 = vadd.f32 %v7766_v10, %v7765_v17  ;;  %7952 = vst.msk [vmem:[#allocation3 + $0x78] sm:$0xff] %vm16354_vm15, %v7688_v56  ;;  %vm16355_vm7 = vmmov %vm16351_vm3  ;;  %vm16358_vm6 = vcmp.lt.s32.totalorder %v16357_v4, 16  ;;  %v10009_v60 = vpop.f32.mrf.mxu1 }
 0x6ae   : > { %v7880_v20 = vsel %vm16355_vm7, %v7834_v33, 0.0  ;;  %vm16356_vm11 = vmmov %vm16351_vm3  ;;  %v7724_v19 = vsel %vm16358_vm6, %v7688_v56, 0.0  ;;  %v7363_v3 = vadd.f32 %v14866_v30, %v14788_v26  ;;  %vm16360_vm9 = vcmp.lt.s32.totalorder %v16359_v5, 16 }
 0x6af   : > { %v7768_v46 = vsel %vm16356_vm11, %v7721_v49, 0.0  ;;  %v7881_v24 = vadd.f32 %v7880_v20, %v7879_v34  ;;  %v7722_v40 = vsel %vm16360_vm9, %v7686_v11, 0.0  ;;  %vm16361_vm8 = vmmov %vm16351_vm3  ;;  %v7691_v47 = vadd.f32 %v10009_v60, %v7365_v15  ;;  %v7594_v44 = vpop.f32.mrf.mxu1  ;;  %v16367_v49 = vld [vmem:[#allocation49_spill] sm:$0xff]  ;;  %v15023_v15 = vpop.f32.mrf.mxu0  ;;  %v16376_v20 = vld [vmem:[#allocation52_spill] sm:$0xff] }
 0x6b0   : > { %v7769_v18 = vadd.f32 %v7768_v46, %v7767_v52  ;;  %7950 = vst.msk [vmem:[#allocation3 + $0x68] sm:$0xff] %vm16361_vm8, %v7686_v11  ;;  %v7837_v25 = vmul.f32 %v7723_v22, %v7723_v22  ;;  %vm16362_vm0 = vmmov %vm16351_vm3  ;;  %v7836_v45 = vmul.f32 %v7722_v40, %v7722_v40  ;;  %v7689_v26 = vadd.f32 %v7594_v44, %v7363_v3  ;;  %v16378_v60 = vld [vmem:[#allocation50_spill] sm:$0xff] }
 0x6b1   : > { %v7882_v8 = vsel %vm16362_vm0, %v7835_v37, 0.0  ;;  %vm16363_vm13 = vmmov %vm16362_vm0  ;;  %v7366_v30 = vadd.f32 %v14876_v48, %v14792_v35  ;;  %v7838_v61 = vmul.f32 %v7724_v19, %v7724_v19  ;;  %v10010_v23 = vpop.f32.mrf.mxu1  ;;  %v7364_v17 = vadd.f32 %v14884_v59, %v14798_v39  ;;  %v16372_v59 = vld [vmem:[#allocation51_spill] sm:$0xff] }
 0x6b2   : > { %v7770_v21 = vsel %vm16363_vm13, %v7722_v40, 0.0  ;;  %v7883_v31 = vadd.f32 %v7882_v8, %v7881_v24  ;;  %vm16364_vm14 = vmmov %vm16362_vm0  ;;  %vm16368_vm15 = vcmp.lt.s32.totalorder %v16367_v49, 16  ;;  %v7369_v36 = vadd.f32 %v14894_v51, %v14802_v9  ;;  %v15039_v8 = vpop.f32.mrf.mxu0 }
 0x6b3   : > { %v7771_v2 = vadd.f32 %v7770_v21, %v7769_v18  ;;  %7955 = vst.msk [vmem:[#allocation3 + $0x90] sm:$0xff] %vm16364_vm14, %v7691_v47  ;;  %vm16365_vm3 = vmmov %vm16362_vm0  ;;  %v7725_v56 = vsel %vm16368_vm15, %v7689_v26, 0.0  ;;  %v7692_v14 = vadd.f32 %v10010_v23, %v7366_v30  ;;  %v7597_v37 = vpop.f32.mrf.mxu1  ;;  %vm16373_vm9 = vcmp.lt.s32.totalorder %v16372_v59, 16 }
 0x6b4   : > { %v7772_v33 = vsel %vm16365_vm3, %v7723_v22, 0.0  ;;  %vm16366_vm1 = vmmov %vm16362_vm0  ;;  %v7839_v48 = vmul.f32 %v7725_v56, %v7725_v56  ;;  %v7727_v34 = vsel %vm16373_vm9, %v7691_v47, 0.0  ;;  %v7690_v22 = vadd.f32 %v7597_v37, %v7364_v17 }
 0x6b5   : > { %v7884_v29 = vsel %vm16366_vm1, %v7836_v45, 0.0  ;;  %v7773_v57 = vadd.f32 %v7772_v33, %v7771_v2  ;;  %vm16369_vm7 = vmmov %vm16362_vm0  ;;  %v7888_v52 = vsel %vm16362_vm0, %v7838_v61, 0.0  ;;  %vm16377_vm14 = vcmp.lt.s32.totalorder %v16376_v20, 16  ;;  %v10013_v4 = vpop.f32.mrf.mxu1 }
 0x6b6   : > { %v7885_v63 = vadd.f32 %v7884_v29, %v7883_v31  ;;  %7953 = vst.msk [vmem:[#allocation3 + $0x80] sm:$0xff] %vm16369_vm7, %v7689_v26  ;;  %vm16370_vm11 = vmmov %vm16362_vm0  ;;  %v7728_v46 = vsel %vm16377_vm14, %v7692_v14, 0.0  ;;  %v7367_v9 = vadd.f32 %v14910_v16, %v14808_v12  ;;  %vm16379_vm3 = vcmp.lt.s32.totalorder %v16378_v60, 16  ;;  %v16386_v29 = vld [vmem:[#allocation53_spill] sm:$0xff] }
 0x6b7   : > { %v7886_v10 = vsel %vm16370_vm11, %v7837_v25, 0.0  ;;  %vm16371_vm6 = vmmov %vm16362_vm0  ;;  %v7726_v3 = vsel %vm16379_vm3, %v7690_v22, 0.0  ;;  %v7695_v18 = vadd.f32 %v10013_v4, %v7369_v36  ;;  %v7841_v24 = vmul.f32 %v7727_v34, %v7727_v34  ;;  %v7610_v25 = vpop.f32.mrf.mxu1  ;;  %v16395_v36 = vld [vmem:[#allocation56_spill] sm:$0xff] }
 0x6b8   : > { %v7774_v35 = vsel %vm16371_vm6, %v7724_v19, 0.0  ;;  %v7887_v39 = vadd.f32 %v7886_v10, %v7885_v63  ;;  %vm16374_vm8 = vmmov %vm16362_vm0  ;;  %v7840_v47 = vmul.f32 %v7726_v3, %v7726_v3  ;;  %v7693_v12 = vadd.f32 %v7610_v25, %v7367_v9 }
 0x6b9   : > { %v7775_v38 = vadd.f32 %v7774_v35, %v7773_v57  ;;  %7956 = vst.msk [vmem:[#allocation3 + $0x98] sm:$0xff] %vm16374_vm8, %v7692_v14  ;;  %vm16375_vm13 = vmmov %vm16362_vm0  ;;  %v7370_v16 = vadd.f32 %v14927_v53, %v14812_v7  ;;  %v7842_v31 = vmul.f32 %v7728_v46, %v7728_v46  ;;  %v10014_v26 = vpop.f32.mrf.mxu1  ;;  %v7368_v30 = vadd.f32 %v14943_v27, %v14818_v50  ;;  %v16390_v27 = vld [vmem:[#allocation55_spill] sm:$0xff] }
 0x6ba   : > { %v7776_v11 = vsel %vm16375_vm13, %v7725_v56, 0.0  ;;  %v7889_v19 = vadd.f32 %v7888_v52, %v7887_v39  ;;  %vm16380_vm1 = vmmov %vm16362_vm0  ;;  %vm16387_vm8 = vcmp.lt.s32.totalorder %v16386_v29, 16  ;;  %7957 = vst.msk [vmem:[#allocation3 + $0xa0] sm:$0xff] %vm16362_vm0, %v7693_v12  ;;  %v7373_v49 = vadd.f32 %v14959_v28, %v14822_v42  ;;  %v15055_v56 = vpop.f32.mrf.mxu0 }
 0x6bb   : > { %v7777_v51 = vadd.f32 %v7776_v11, %v7775_v38  ;;  %7954 = vst.msk [vmem:[#allocation3 + $0x88] sm:$0xff] %vm16380_vm1, %v7690_v22  ;;  %vm16381_vm15 = vmmov %vm16362_vm0  ;;  %v7729_v23 = vsel %vm16387_vm8, %v7693_v12, 0.0  ;;  %v7696_v17 = vadd.f32 %v10014_v26, %v7370_v16  ;;  %v7613_v63 = vpop.f32.mrf.mxu1  ;;  %vm16391_vm3 = vcmp.lt.s32.totalorder %v16390_v27, 16  ;;  %v16397_v38 = vld [vmem:[#allocation54_spill] sm:$0xff]  ;;  %v16410_v26 = vld [vmem:[#allocation8_spill] sm:$0xff] }
 0x6bc   : > { %v7890_v5 = vsel %vm16381_vm15, %v7839_v48, 0.0  ;;  %vm16382_vm7 = vmmov %vm16362_vm0  ;;  %v7843_v53 = vmul.f32 %v7729_v23, %v7729_v23  ;;  %v7731_v14 = vsel %vm16391_vm3, %v7695_v18, 0.0  ;;  %v7694_v35 = vadd.f32 %v7613_v63, %v7368_v30  ;;  %v16417_v27 = vld [vmem:[#allocation58_spill] sm:$0xff] }
 0x6bd   : > { %v7778_v40 = vsel %vm16382_vm7, %v7726_v3, 0.0  ;;  %v7891_v21 = vadd.f32 %v7890_v5, %v7889_v19  ;;  %vm16383_vm11 = vmmov %vm16362_vm0  ;;  %v10017_v59 = vpop.f32.mrf.mxu1  ;;  %v7371_v42 = vadd.f32 %v14975_v0, %v14828_v54  ;;  %v7845_v11 = vmul.f32 %v7731_v14, %v7731_v14  ;;  %v16402_v0 = vld [vmem:[#allocation4_spill] sm:$0xff] }
 0x6be   : > { %v7779_v45 = vadd.f32 %v7778_v40, %v7777_v51  ;;  %7959 = vst.msk [vmem:[#allocation3 + $0xb0] sm:$0xff] %vm16383_vm11, %v7695_v18  ;;  %vm16384_vm6 = vmmov %vm16362_vm0  ;;  %vm16396_vm11 = vcmp.lt.s32.totalorder %v16395_v36, 16  ;;  %v7699_v52 = vadd.f32 %v10017_v59, %v7373_v49  ;;  %v7319_v51 = vpop.f32.mrf.mxu0  ;;  %v7374_v3 = vadd.f32 %v14991_v55, %v16402_v0 }
 0x6bf   : > { %v7780_v44 = vsel %vm16384_vm6, %v7727_v34, 0.0  ;;  %vm16385_vm9 = vmmov %vm16362_vm0  ;;  %v7732_v39 = vsel %vm16396_vm11, %v7696_v17, 0.0  ;;  %vm16398_vm6 = vcmp.lt.s32.totalorder %v16397_v38, 16  ;;  %v7626_v9 = vpop.f32.mrf.mxu1  ;;  %v7377_v30 = vadd.f32 %v15023_v15, %v16410_v26 }
 0x6c0   : > { %v7892_v2 = vsel %vm16385_vm9, %v7840_v47, 0.0  ;;  %v7781_v33 = vadd.f32 %v7780_v44, %v7779_v45  ;;  %vm16388_vm13 = vmmov %vm16362_vm0  ;;  %v7730_v22 = vsel %vm16398_vm6, %v7694_v35, 0.0  ;;  %v7697_v54 = vadd.f32 %v7626_v9, %v7371_v42  ;;  %v16405_v45 = vld [vmem:[#allocation57_spill] sm:$0xff]  ;;  %v16426_v9 = vld [vmem:[#allocation10_spill] sm:$0xff] }
 0x6c1   : > { %v7893_v61 = vadd.f32 %v7892_v2, %v7891_v21  ;;  %v7894_v57 = vsel %vm16388_vm13, %v7841_v24, 0.0  ;;  %vm16389_vm14 = vmmov %vm16362_vm0  ;;  %v7844_v4 = vmul.f32 %v7730_v22, %v7730_v22  ;;  %v7846_v24 = vmul.f32 %v7732_v39, %v7732_v39  ;;  %v10018_v40 = vpop.f32.mrf.mxu1 }
 0x6c2   : > { %v7782_v7 = vsel %vm16389_vm14, %v7728_v46, 0.0  ;;  %vm16392_vm1 = vmmov %vm16362_vm0  ;;  %v7786_v46 = vsel %vm16362_vm0, %v7730_v22, 0.0  ;;  %v7372_v47 = vadd.f32 %v15007_v13, %v14838_v41  ;;  %v7700_v16 = vadd.f32 %v10018_v40, %v7374_v3  ;;  %v16411_v41 = vld [vmem:[#allocation17_spill] sm:$0xff] }
 0x6c3   : > { %v7895_v50 = vadd.f32 %v7894_v57, %v7893_v61  ;;  %v7783_v10 = vadd.f32 %v7782_v7, %v7781_v33  ;;  %7960 = vst.msk [vmem:[#allocation3 + $0xb8] sm:$0xff] %vm16392_vm1, %v7696_v17  ;;  %vm16393_vm15 = vmmov %vm16362_vm0  ;;  %vm16406_vm1 = vcmp.lt.s32.totalorder %v16405_v45, 16  ;;  %v7629_v2 = vpop.f32.mrf.mxu1  ;;  %v9987_v33 = vpop.f32.mrf.mxu0  ;;  %vm16412_vm6 = vcmp.lt.s32.totalorder %v16411_v41, 16  ;;  %v16415_v7 = vld [vmem:[#allocation18_spill] sm:$0xff]  ;;  %v16430_v40 = vld [vmem:[#allocation13_spill] sm:$0xff] }
 0x6c4   : > { %v7896_v48 = vsel %vm16393_vm15, %v7842_v31, 0.0  ;;  %vm16394_vm7 = vmmov %vm16362_vm0  ;;  %v7733_v12 = vsel %vm16406_vm1, %v7697_v54, 0.0  ;;  %v7735_v13 = vsel %vm16412_vm6, %v7699_v52, 0.0  ;;  %v7375_v15 = vadd.f32 %v15039_v8, %v14848_v6  ;;  %v16423_v8 = vld [vmem:[#allocation9_spill] sm:$0xff] }
 0x6c5   : > { %v7784_v37 = vsel %vm16394_vm7, %v7729_v23, 0.0  ;;  %v7897_v34 = vadd.f32 %v7896_v48, %v7895_v50  ;;  %vm16399_vm9 = vmmov %vm16362_vm0  ;;  %v7847_v31 = vmul.f32 %v7733_v12, %v7733_v12  ;;  %v7698_v23 = vadd.f32 %v7629_v2, %v7372_v47  ;;  %v10021_v63 = vpop.f32.mrf.mxu1  ;;  %v7332_v59 = vpop.f32.mrf.mxu0 }
 0x6c6   : > { %v7785_v28 = vadd.f32 %v7784_v37, %v7783_v10  ;;  %7958 = vst.msk [vmem:[#allocation3 + $0xa8] sm:$0xff] %vm16399_vm9, %v7694_v35  ;;  %vm16400_vm8 = vmmov %vm16362_vm0  ;;  %v7792_v57 = vsel %vm16362_vm0, %v7733_v12, 0.0  ;;  %v7703_v10 = vadd.f32 %v10021_v63, %v7377_v30  ;;  %v7849_v35 = vmul.f32 %v7735_v13, %v7735_v13 }
 0x6c7   : > { %v7898_v20 = vsel %vm16400_vm8, %v7843_v53, 0.0  ;;  %vm16401_vm13 = vmmov %vm16362_vm0 }
 0x6c8   : > { %v7899_v19 = vadd.f32 %v7898_v20, %v7897_v34  ;;  %v7787_v60 = vadd.f32 %v7786_v46, %v7785_v28  ;;  %7963 = vst.msk [vmem:[#allocation3 + $0xd0] sm:$0xff] %vm16401_vm13, %v7699_v52  ;;  %vm16403_vm14 = vmmov %vm16362_vm0  ;;  %vm16416_vm13 = vcmp.lt.s32.totalorder %v16415_v7, 16  ;;  %v7378_v34 = vadd.f32 %v15055_v56, %v16423_v8 }
 0x6c9   : > { %v7788_v18 = vsel %vm16403_vm14, %v7731_v14, 0.0  ;;  %vm16404_vm3 = vmmov %vm16362_vm0  ;;  %v7736_v53 = vsel %vm16416_vm13, %v7700_v16, 0.0  ;;  %vm16418_vm14 = vcmp.lt.s32.totalorder %v16417_v27, 16  ;;  %v7376_v20 = vadd.f32 %v7319_v51, %v14858_v32 }
 0x6ca   : > { %v7900_v5 = vsel %vm16404_vm3, %v7844_v4, 0.0  ;;  %v7789_v25 = vadd.f32 %v7788_v18, %v7787_v60  ;;  %vm16407_vm15 = vmmov %vm16362_vm0  ;;  %v7734_v14 = vsel %vm16418_vm14, %v7698_v23, 0.0  ;;  %v7850_v22 = vmul.f32 %v7736_v53, %v7736_v53 }
 0x6cb   : > { %v7901_v21 = vadd.f32 %v7900_v5, %v7899_v19  ;;  %7961 = vst.msk [vmem:[#allocation3 + $0xc0] sm:$0xff] %vm16407_vm15, %v7697_v54  ;;  %vm16408_vm7 = vmmov %vm16362_vm0  ;;  %v7848_v36 = vmul.f32 %v7734_v14, %v7734_v14  ;;  %v7910_v54 = vsel %vm16362_vm0, %v7849_v35, 0.0  ;;  %v7381_v18 = vadd.f32 %v9987_v33, %v14862_v58 }
 0x6cc   : > { %v7902_v44 = vsel %vm16408_vm7, %v7845_v11, 0.0  ;;  %vm16409_vm11 = vmmov %vm16362_vm0  ;;  %vm16431_vm14 = vcmp.lt.s32.totalorder %v16430_v40, 16 }
 0x6cd   : > { %v7790_v55 = vsel %vm16409_vm11, %v7732_v39, 0.0  ;;  %v7903_v61 = vadd.f32 %v7902_v44, %v7901_v21  ;;  %vm16413_vm9 = vmmov %vm16362_vm0  ;;  %v7642_v39 = vpop.f32.mrf.mxu1  ;;  %v7739_v32 = vsel %vm16431_vm14, %v7703_v10, 0.0  ;;  %v7379_v44 = vadd.f32 %v7332_v59, %v14868_v43 }
 0x6ce   : > { %v7791_v29 = vadd.f32 %v7790_v55, %v7789_v25  ;;  %7964 = vst.msk [vmem:[#allocation3 + $0xd8] sm:$0xff] %vm16413_vm9, %v7700_v16  ;;  %vm16414_vm8 = vmmov %vm16362_vm0  ;;  %v7701_v6 = vadd.f32 %v7642_v39, %v7375_v15  ;;  %vm16427_vm9 = vcmp.lt.s32.totalorder %v16426_v9, 16  ;;  %v7853_v30 = vmul.f32 %v7739_v32, %v7739_v32 }
 0x6cf   : > { %v7904_v17 = vsel %vm16414_vm8, %v7846_v24, 0.0  ;;  %vm16419_vm3 = vmmov %vm16362_vm0  ;;  %v10022_v11 = vpop.f32.mrf.mxu1  ;;  %v9988_v24 = vpop.f32.mrf.mxu0 }
 0x6d0   : > { %v7793_v49 = vadd.f32 %v7792_v57, %v7791_v29  ;;  %v7905_v50 = vadd.f32 %v7904_v17, %v7903_v61  ;;  %7962 = vst.msk [vmem:[#allocation3 + $0xc8] sm:$0xff] %vm16419_vm3, %v7698_v23  ;;  %vm16420_vm1 = vmmov %vm16362_vm0  ;;  %v7737_v19 = vsel %vm16427_vm9, %v7701_v6, 0.0  ;;  %v7704_v60 = vadd.f32 %v10022_v11, %v7378_v34  ;;  %v15209_v11 = vld [vmem:[#allocation3 + $0xa2] sm:$0xff] }
 0x6d1   : > { %v7906_v48 = vsel %vm16420_vm1, %v7847_v31, 0.0  ;;  %vm16421_vm15 = vmmov %vm16362_vm0  ;;  %v7851_v0 = vmul.f32 %v7737_v19, %v7737_v19  ;;  %v7645_v3 = vpop.f32.mrf.mxu1  ;;  %v16436_v31 = vld [vmem:[#allocation20_spill] sm:$0xff]  ;;  %v7335_v29 = vpop.f32.mrf.mxu0  ;;  %v7382_v57 = vadd.f32 %v9988_v24, %v14872_v1 }
 0x6d2   : > { %v7794_v37 = vsel %vm16421_vm15, %v7734_v14, 0.0  ;;  %v7907_v42 = vadd.f32 %v7906_v48, %v7905_v50  ;;  %vm16422_vm7 = vmmov %vm16362_vm0  ;;  %v7702_v47 = vadd.f32 %v7645_v3, %v7376_v20  ;;  %v7740_v12 = vsel %vm3869_vm2, %v7704_v60, 0.0  ;;  %v15173_v14 = vld [vmem:[#allocation3 + $0x48] sm:$0xff] }
 0x6d3   : > { %v7795_v28 = vadd.f32 %v7794_v37, %v7793_v49  ;;  %7967 = vst.msk [vmem:[#allocation3 + $0xf0] sm:$0xff] %vm16422_vm7, %v7703_v10  ;;  %vm16424_vm11 = vmmov %vm16362_vm0  ;;  %v10025_v16 = vpop.f32.mrf.mxu1  ;;  %vm16437_vm7 = vcmp.lt.s32.totalorder %v16436_v31, 16  ;;  %v7380_v49 = vadd.f32 %v7335_v29, %v14878_v62 }
 0x6d4   : > { %v7796_v38 = vsel %vm16424_vm11, %v7735_v13, 0.0  ;;  %vm16425_vm6 = vmmov %vm16362_vm0  ;;  %v7738_v2 = vsel %vm16437_vm7, %v7702_v47, 0.0  ;;  %v7707_v26 = vadd.f32 %v10025_v16, %v7381_v18 }
 0x6d5   : > { %v7908_v52 = vsel %vm16425_vm6, %v7848_v36, 0.0  ;;  %v7797_v46 = vadd.f32 %v7796_v38, %v7795_v28  ;;  %vm16428_vm8 = vmmov %vm16362_vm0  ;;  %v7852_v41 = vmul.f32 %v7738_v2, %v7738_v2  ;;  %v7658_v13 = vpop.f32.mrf.mxu1 }
 0x6d6   : > { %v7909_v4 = vadd.f32 %v7908_v52, %v7907_v42  ;;  %7965 = vst.msk [vmem:[#allocation3 + $0xe0] sm:$0xff] %vm16428_vm8, %v7701_v6  ;;  %vm16429_vm13 = vmmov %vm16362_vm0  ;;  %v7705_v43 = vadd.f32 %v7658_v13, %v7379_v44  ;;  %v7743_v42 = vsel %vm3872_vm10, %v7707_v26, 0.0 }
 0x6d7   : > { %v7798_v56 = vsel %vm16429_vm13, %v7736_v53, 0.0  ;;  %vm16432_vm3 = vmmov %vm16362_vm0  ;;  %v7854_v53 = vmul.f32 %v7740_v12, %v7740_v12  ;;  %v7916_v63 = vsel %vm16362_vm0, %v7852_v41, 0.0  ;;  %v10026_v15 = vpop.f32.mrf.mxu1 }
 0x6d8   : > { %v7911_v5 = vadd.f32 %v7910_v54, %v7909_v4  ;;  %v7799_v51 = vadd.f32 %v7798_v56, %v7797_v46  ;;  %7968 = vst.msk [vmem:[#allocation3 + $0xf8] sm:$0xff] %vm16432_vm3, %v7704_v60  ;;  %vm16433_vm1 = vmmov %vm16362_vm0  ;;  %v7741_v10 = vsel %vm3870_vm12, %v7705_v43, 0.0  ;;  %v7708_v35 = vadd.f32 %v10026_v15, %v7382_v57  ;;  %v15157_v57 = vld [vmem:[#allocation3 + $0x12] sm:$0xff]  ;;  %v15165_v15 = vld [vmem:[#allocation3 + $0x24] sm:$0xff] }
 0x6d9   : > { %v7912_v25 = vsel %vm16433_vm1, %v7850_v22, 0.0  ;;  %vm16434_vm15 = vmmov %vm16362_vm0  ;;  %v7855_v37 = vmul.f32 %v7741_v10, %v7741_v10  ;;  %v7661_v36 = vpop.f32.mrf.mxu1  ;;  %v7857_v46 = vmul.f32 %v7743_v42, %v7743_v42  ;;  %v15205_v22 = vld [vmem:[#allocation3 + $0x86] sm:$0xff] }
 0x6da   : > { %v7800_v21 = vsel %vm16434_vm15, %v7737_v19, 0.0  ;;  %v7913_v55 = vadd.f32 %v7912_v25, %v7911_v5  ;;  %vm16438_vm11 = vmmov %vm16362_vm0  ;;  %v7706_v62 = vadd.f32 %v7661_v36, %v7380_v49  ;;  %v7744_v52 = vsel %vm3873_vm4, %v7708_v35, 0.0  ;;  %v15167_v49 = vld [vmem:[#allocation3 + $0x2c] sm:$0xff] }
 0x6db   : > { %v7801_v58 = vadd.f32 %v7800_v21, %v7799_v51  ;;  %7966 = vst.msk [vmem:[#allocation3 + $0xe8] sm:$0xff] %vm16438_vm11, %v7702_v47  ;;  %vm16439_vm6 = vmmov %vm16362_vm0 }
 0x6dc   : > { %v7914_v33 = vsel %vm16439_vm6, %v7851_v0, 0.0  ;;  %vm16440_vm9 = vmmov %vm16362_vm0  ;;  %v7742_v20 = vsel %vm3871_vm5, %v7706_v62, 0.0  ;;  %v7858_v0 = vmul.f32 %v7744_v52, %v7744_v52 }
 0x6dd   : > { %v7802_v61 = vsel %vm16440_vm9, %v7738_v2, 0.0  ;;  %v7915_v23 = vadd.f32 %v7914_v33, %v7913_v55  ;;  %vm16441_vm2 = vmmov %vm16362_vm0  ;;  %v7856_v19 = vmul.f32 %v7742_v20, %v7742_v20 }
 0x6de   : > { %v7803_v17 = vadd.f32 %v7802_v61, %v7801_v58  ;;  %7971 = vst.msk [vmem:[#allocation3 + $0x110] sm:$0xff] %vm16441_vm2, %v7707_v26  ;;  %vm16442_vm8 = vmmov %vm16362_vm0 }
 0x6df   : > { %v7804_v7 = vsel %vm16442_vm8, %v7739_v32, 0.0  ;;  %v7917_v27 = vadd.f32 %v7916_v63, %v7915_v23  ;;  %vm16444_vm13 = vmmov %vm16362_vm0  ;;  %v15163_v63 = vld [vmem:[#allocation3 + $0x36] sm:$0xff] }
 0x6e0   : > { %v7805_v50 = vadd.f32 %v7804_v7, %v7803_v17  ;;  %7969 = vst.msk [vmem:[#allocation3 + $0x100] sm:$0xff] %vm16444_vm13, %v7705_v43  ;;  %vm16445_vm14 = vmmov %vm16362_vm0  ;;  %v15155_v43 = vld [vmem:[#allocation3] sm:$0xff]  ;;  %v15159_v7 = vld [vmem:[#allocation3 + $0x8] sm:$0xff] }
 0x6e1   : > { %v7918_v48 = vsel %vm16445_vm14, %v7853_v30, 0.0  ;;  %vm16446_vm3 = vmmov %vm16362_vm0 }
 0x6e2   : > { %v7806_v1 = vsel %vm16446_vm3, %v7740_v12, 0.0  ;;  %v7919_v39 = vadd.f32 %v7918_v48, %v7917_v27  ;;  %vm16448_vm1 = vmmov %vm16362_vm0  ;;  %v15171_v27 = vld [vmem:[#allocation3 + $0x3e] sm:$0xff] }
 0x6e3   : > { %v7807_v28 = vadd.f32 %v7806_v1, %v7805_v50  ;;  %7972 = vst.msk [vmem:[#allocation3 + $0x118] sm:$0xff] %vm16448_vm1, %v7708_v35  ;;  %vm16449_vm15 = vmmov %vm16362_vm0  ;;  %v15169_v50 = vld [vmem:[#allocation3 + $0x50] sm:$0xff]  ;;  %v15179_v48 = vld [vmem:[#allocation3 + $0x62] sm:$0xff] }
 0x6e4   : > { %v7920_v6 = vsel %vm16449_vm15, %v7854_v53, 0.0  ;;  %vm16450_vm12 = vmmov %vm16362_vm0  ;;  %v15161_v53 = vld [vmem:[#allocation3 + $0x1a] sm:$0xff]  ;;  %v15181_v1 = vld [vmem:[#allocation3 + $0x6c] sm:$0xff] }
 0x6e5   : > { %v7808_v8 = vsel %vm16450_vm12, %v7741_v10, 0.0  ;;  %v7921_v38 = vadd.f32 %v7920_v6, %v7919_v39  ;;  %vm16453_vm7 = vmmov %vm16362_vm0  ;;  %v15175_v10 = vld [vmem:[#allocation3 + $0x5a] sm:$0xff] }
 0x6e6   : > { %v7809_v34 = vadd.f32 %v7808_v8, %v7807_v28  ;;  %7970 = vst.msk [vmem:[#allocation3 + $0x108] sm:$0xff] %vm16453_vm7, %v7706_v62  ;;  %vm16454_vm10 = vmmov %vm16362_vm0  ;;  %v15177_v35 = vld [vmem:[#allocation3 + $0x74] sm:$0xff]  ;;  %v15193_v28 = vld [vmem:[#allocation3 + $0x7e] sm:$0xff] }
 0x6e7   : > { %v7922_v4 = vsel %vm16454_vm10, %v7855_v37, 0.0  ;;  %vm16455_vm11 = vmmov %vm16362_vm0  ;;  %v15195_v62 = vld [vmem:[#allocation3 + $0x98] sm:$0xff] }
 0x6e8   : > { %v7810_v9 = vsel %vm16455_vm11, %v7742_v20, 0.0  ;;  %v7923_v60 = vadd.f32 %v7922_v4, %v7921_v38  ;;  %vm16456_vm6 = vmmov %vm16362_vm0 }
 0x6e9   : > { %v7811_v54 = vadd.f32 %v7810_v9, %v7809_v34  ;;  %v7812_v56 = vsel %vm16456_vm6, %v7743_v42, 0.0  ;;  %vm16457_vm9 = vmmov %vm16362_vm0  ;;  %v15191_v42 = vld [vmem:[#allocation3 + $0x90] sm:$0xff] }
 0x6ea   : > { %v7924_v3 = vsel %vm16457_vm9, %v7856_v19, 0.0  ;;  %vm16458_vm4 = vmmov %vm16362_vm0  ;;  %v15219_v19 = vld [vmem:[#allocation3 + $0xaa] sm:$0xff] }
 0x6eb   : > { %v7813_v18 = vadd.f32 %v7812_v56, %v7811_v54  ;;  %v7925_v24 = vadd.f32 %v7924_v3, %v7923_v60  ;;  %v7926_v5 = vsel %vm16458_vm4, %v7857_v46, 0.0  ;;  %vm16459_vm5 = vmmov %vm16362_vm0  ;;  %v15221_v60 = vld [vmem:[#allocation3 + $0xbc] sm:$0xff] }
 0x6ec   : > { %v7814_v40 = vsel %vm16459_vm5, %v7744_v52, 0.0  ;;  %vm16460_vm2 = vmmov %vm16362_vm0  ;;  %v15207_v52 = vld [vmem:[#allocation3 + $0xb4] sm:$0xff] }
 0x6ed   : > { %v7815_v32 = vadd.f32 %v7814_v40, %v7813_v18  ;;  %v7927_v51 = vadd.f32 %v7926_v5, %v7925_v24  ;;  %v7928_v47 = vsel %vm16460_vm2, %v7858_v0, 0.0  ;;  %v15223_v54 = vld [vmem:[#allocation3 + $0xd8] sm:$0xff]  ;;  %v15233_v24 = vld [vmem:[#allocation3 + $0xc6] sm:$0xff]  ;;  %v15235_v5 = vld [vmem:[#allocation3 + $0xce] sm:$0xff] }
 0x6ee   : > { %v15237_v40 = vld [vmem:[#allocation3 + $0xe0] sm:$0xff]  ;;  %vm16461_vm8 = vmmov %vm16362_vm0 }
 0x6ef   : > { %v7816_v25 = vrot.slane %v7815_v32, 4  ;;  %v7929_v21 = vadd.f32 %v7928_v47, %v7927_v51  ;;  %vm16462_vm13 = vmmov %vm16362_vm0 }
 0x6f0   : > { %vm16463_vm14 = vmmov %vm16362_vm0 }
 0x6f1   : > { %v7817_v45 = vadd.f32 %v7816_v25, %v7815_v32  ;;  %v7930_v12 = vrot.slane %v7929_v21, 4  ;;  %vm16464_vm3 = vmmov %vm16362_vm0 }
 0x6f2   : > { %vm16465_vm1 = vmmov %vm16362_vm0 }
 0x6f3   : > { %v7818_v16 = vrot.slane %v7817_v45, 2  ;;  %v7931_v44 = vadd.f32 %v7930_v12, %v7929_v21  ;;  %v15247_v21 = vld [vmem:[#allocation3 + $0xf2] sm:$0xff]  ;;  %v15251_v12 = vld [vmem:[#allocation3 + $0xfc] sm:$0xff]  ;;  %vm16466_vm15 = vmmov %vm16362_vm0 }
 0x6f4   : > { %vm16467_vm12 = vmmov %vm16362_vm0 }
 0x6f5   : > { %v7819_v58 = vadd.f32 %v7818_v16, %v7817_v45  ;;  %v7932_v55 = vrot.slane %v7931_v44, 2  ;;  %v15249_v45 = vld [vmem:[#allocation3 + $0xea] sm:$0xff]  ;;  %vm16468_vm7 = vmmov %vm16362_vm0 }
 0x6f6   : > { %v7982_v16 = vld [vmem:[%s10186_s21 + $0x13] sm:$0xff]  ;;  %vm16469_vm10 = vmmov %vm16362_vm0 }
 0x6f7   : > { %v7820_v31 = vrot.slane %v7819_v58, 1  ;;  %v7933_v2 = vadd.f32 %v7932_v55, %v7931_v44  ;;  %v7983_v44 = vld [vmem:[%s10186_s21 + $0x1b] sm:$0xff]  ;;  %vm16470_vm11 = vmmov %vm16362_vm0 }
 0x6f8   : > { %v8033_v55 = vld [vmem:[%s10186_s21 + $0x5b] sm:$0xff]  ;;  %vm16471_vm6 = vmmov %vm16362_vm0 }
 0x6f9   : > { %v7821_v26 = vadd.f32 %v7820_v31, %v7819_v58  ;;  %v7934_v30 = vrot.slane %v7933_v2, 1  ;;  %v8034_v58 = vld [vmem:[%s10186_s21 + $0x63] sm:$0xff]  ;;  %vm16474_vm9 = vmmov %vm16362_vm0 }
 0x6fa   : > { %vm16475_vm4 = vmmov %vm16362_vm0 }
 0x6fb   : > { %v7935_v33 = vadd.f32 %v7934_v30, %v7933_v2  ;;  %v15151_v61 = vmul.f32 0.00390625, %v7821_v26  ;;  %v15263_v26 = vld [vmem:[#allocation3 + $0x116] sm:$0xff]  ;;  %v8020_v30 = vld [vmem:[%s10186_s21 + $0x49] sm:$0xff]  ;;  %v8021_v2 = vld [vmem:[%s10186_s21 + $0x51] sm:$0xff] }
 0x6fc   : > { %vm16476_vm5 = vmmov %vm16362_vm0 }
 0x6fd   : > { %v7974_v41 = vmul.f32 0.00390625, %v7935_v33  ;;  %v7975_v13 = vmul.f32 %v15151_v61, %v15151_v61  ;;  %v7984_v37 = vsub.f32 %v15155_v43, %v15151_v61  ;;  %v7985_v36 = vsub.f32 %v15159_v7, %v15151_v61  ;;  %v7994_v43 = vld [vmem:[%s10186_s21 + $0x25] sm:$0xff]  ;;  %v8007_v7 = vld [vmem:[%s10186_s21 + $0x37] sm:$0xff]  ;;  %vm16477_vm2 = vmmov %vm16362_vm0 }
 0x6fe   : > { %v7996_v39 = vsub.f32 %v15157_v57, %v15151_v61  ;;  %v7997_v59 = vsub.f32 %v15161_v53, %v15151_v61  ;;  %v8009_v6 = vsub.f32 %v15165_v15, %v15151_v61  ;;  %v8010_v8 = vsub.f32 %v15167_v49, %v15151_v61  ;;  %v7995_v57 = vld [vmem:[%s10186_s21 + $0x2d] sm:$0xff]  ;;  %v8008_v53 = vld [vmem:[%s10186_s21 + $0x3f] sm:$0xff] }
 0x6ff   : > { %v7976_v29 = vsub.f32 %v7974_v41, %v7975_v13  ;;  %v8022_v34 = vsub.f32 %v15163_v63, %v15151_v61  ;;  %v8023_v38 = vsub.f32 %v15171_v27, %v15151_v61  ;;  %v8035_v20 = vsub.f32 %v15173_v14, %v15151_v61  ;;  %v8072_v14 = vld [vmem:[%s10186_s21 + $0x91] sm:$0xff] }
 0x700   : > { %v8036_v46 = vsub.f32 %v15169_v50, %v15151_v61  ;;  %v8048_v4 = vsub.f32 %v15175_v10, %v15151_v61  ;;  %v8049_v9 = vsub.f32 %v15179_v48, %v15151_v61  ;;  %v8061_v56 = vsub.f32 %v15181_v1, %v15151_v61 }
 0x701   : > { %v7977_v23 = vmax.f32 %v7976_v29, 0.0  ;;  %v8062_v0 = vsub.f32 %v15177_v35, %v15151_v61  ;;  %v8074_v3 = vsub.f32 %v15193_v28, %v15151_v61  ;;  %v8075_v18 = vsub.f32 %v15205_v22, %v15151_v61  ;;  %v15274_v29 = vld [vmem:[#allocation3 + $0x104] sm:$0xff]  ;;  %v8098_v22 = vld [vmem:[%s10186_s21 + $0xb5] sm:$0xff] }
 0x702   : > { %v8087_v32 = vsub.f32 %v15191_v42, %v15151_v61  ;;  %v8088_v51 = vsub.f32 %v15195_v62, %v15151_v61  ;;  %v8124_v42 = vld [vmem:[%s10186_s21 + $0xd9] sm:$0xff]  ;;  %v16478_v62 = vsub.f32 %v15207_v52, %v15151_v61 }
 0x703   : > { %v7978_v17 = vadd.f32 1e-05, %v7977_v23  ;;  %v15276_v23 = vld [vmem:[#allocation3 + $0x10e] sm:$0xff] }
 0x705   : > { %10123 = vrsqrt.f32 %v7978_v17 }
 0x712   : > { %v15278_v17 = vpop.eup %10123 }
 0x713   : > { %v7986_v27 = vmul.f32 %v15278_v17, %v7984_v37  ;;  %v7987_v13 = vmul.f32 %v15278_v17, %v7985_v36  ;;  %v7998_v41 = vmul.f32 %v15278_v17, %v7996_v39  ;;  %v7999_v33 = vmul.f32 %v15278_v17, %v7997_v59 }
 0x714   : > { %v8011_v37 = vmul.f32 %v15278_v17, %v8009_v6  ;;  %v8012_v36 = vmul.f32 %v15278_v17, %v8010_v8  ;;  %v8024_v39 = vmul.f32 %v15278_v17, %v8022_v34  ;;  %v8025_v59 = vmul.f32 %v15278_v17, %v8023_v38  ;;  %v8046_v34 = vld [vmem:[%s10186_s21 + $0x6d] sm:$0xff]  ;;  %v8047_v38 = vld [vmem:[%s10186_s21 + $0x75] sm:$0xff] }
 0x715   : > { %v7988_v49 = vadd.f32 %v7986_v27, %v7982_v16  ;;  %v7989_v15 = vadd.f32 %v7987_v13, %v7983_v44  ;;  %v8000_v63 = vadd.f32 %v7998_v41, %v7994_v43  ;;  %v8001_v31 = vadd.f32 %v7999_v33, %v7995_v57  ;;  %v8059_v16 = vld [vmem:[%s10186_s21 + $0x7f] sm:$0xff]  ;;  %v8060_v33 = vld [vmem:[%s10186_s21 + $0x87] sm:$0xff] }
 0x716   : > { %v8013_v25 = vadd.f32 %v8011_v37, %v8007_v7  ;;  %v8014_v6 = vadd.f32 %v8012_v36, %v8008_v53  ;;  %v8026_v8 = vadd.f32 %v8024_v39, %v8020_v30  ;;  %v8027_v47 = vadd.f32 %v8025_v59, %v8021_v2  ;;  %v8112_v53 = vld [vmem:[%s10186_s21 + $0xcf] sm:$0xff] }
 0x717   : > { %7990 = vst.msk [vmem:[%s15301_s7] sm:$0xff] %vm16461_vm8, %v7988_v49  ;;  %v8037_v44 = vmul.f32 %v15278_v17, %v8035_v20  ;;  %v8038_v2 = vmul.f32 %v15278_v17, %v8036_v46  ;;  %v8050_v30 = vmul.f32 %v15278_v17, %v8048_v4  ;;  %v8073_v20 = vld [vmem:[%s10186_s21 + $0x99] sm:$0xff]  ;;  %v8063_v50 = vmul.f32 %v15278_v17, %v8061_v56  ;;  %v8085_v56 = vld [vmem:[%s10186_s21 + $0xa3] sm:$0xff]  ;;  %v8137_v39 = vld [vmem:[%s10186_s21 + $0xeb] sm:$0xff] }
 0x718   : > { %7991 = vst.msk [vmem:[%s15301_s7 + $0x8] sm:$0xff] %vm16362_vm0, %v7989_v15  ;;  %v8064_v10 = vmul.f32 %v15278_v17, %v8062_v0  ;;  %v8076_v48 = vmul.f32 %v15278_v17, %v8074_v3  ;;  %v8077_v1 = vmul.f32 %v15278_v17, %v8075_v18  ;;  %v8086_v0 = vld [vmem:[%s10186_s21 + $0xab] sm:$0xff]  ;;  %v8099_v18 = vld [vmem:[%s10186_s21 + $0xbd] sm:$0xff]  ;;  %v8090_v41 = vmul.f32 %v15278_v17, %v8088_v51  ;;  %v8138_v59 = vld [vmem:[%s10186_s21 + $0xf3] sm:$0xff] }
 0x719   : > { %8599 = vst.msk [vmem:[%s15301_s7 + $0x10] sm:$0xff] %vm16462_vm13, %v8000_v63  ;;  %v8039_v46 = vadd.f32 %v8037_v44, %v8033_v55  ;;  %v8040_v4 = vadd.f32 %v8038_v2, %v8034_v58  ;;  %v8052_v35 = vadd.f32 %v8050_v30, %v8046_v34  ;;  %v8111_v55 = vld [vmem:[%s10186_s21 + $0xc7] sm:$0xff]  ;;  %v8089_v58 = vmul.f32 %v15278_v17, %v8087_v32  ;;  %vm16482_vm8 = vmmov %vm16362_vm0 }
 0x71a   : > { %8600 = vst.msk [vmem:[%s15301_s7 + $0x18] sm:$0xff] %vm16463_vm14, %v8001_v31  ;;  %v8051_v31 = vmul.f32 %v15278_v17, %v8049_v9  ;;  %v8066_v28 = vadd.f32 %v8064_v10, %v8060_v33  ;;  %v8078_v3 = vadd.f32 %v8076_v48, %v8072_v14  ;;  %v16472_v13 = vsub.f32 %v15209_v11, %v15151_v61  ;;  %v8125_v32 = vld [vmem:[%s10186_s21 + $0xe1] sm:$0xff]  ;;  %vm16483_vm13 = vmmov %vm16362_vm0  ;;  %v8164_v10 = vld [vmem:[%s10186_s21 + $0x117] sm:$0xff] }
 0x71b   : > { %8601 = vst.msk [vmem:[%s15301_s7 + $0x20] sm:$0xff] %vm16464_vm3, %v8013_v25  ;;  %v8079_v25 = vadd.f32 %v8077_v1, %v8073_v20  ;;  %v16473_v57 = vsub.f32 %v15219_v19, %v15151_v61  ;;  %v8115_v11 = vmul.f32 %v15278_v17, %v16478_v62  ;;  %v16479_v19 = vsub.f32 %v15221_v60, %v15151_v61  ;;  %vm16484_vm14 = vmmov %vm16362_vm0  ;;  %v8176_v48 = vld [vmem:[%s10186_s21 + $0x121] sm:$0xff] }
 0x71c   : > { %8602 = vst.msk [vmem:[%s15301_s7 + $0x28] sm:$0xff] %vm16465_vm1, %v8014_v6  ;;  %v8053_v9 = vadd.f32 %v8051_v31, %v8047_v38  ;;  %v8102_v43 = vmul.f32 %v15278_v17, %v16472_v13  ;;  %v16480_v63 = vsub.f32 %v15233_v24, %v15151_v61  ;;  %v16481_v49 = vsub.f32 %v15235_v5, %v15151_v61  ;;  %v8150_v5 = vld [vmem:[%s10186_s21 + $0xfd] sm:$0xff]  ;;  %v8151_v38 = vld [vmem:[%s10186_s21 + $0x105] sm:$0xff]  ;;  %vm16489_vm3 = vmmov %vm16362_vm0 }
 0x71d   : > { %8603 = vst.msk [vmem:[%s15301_s7 + $0x30] sm:$0xff] %vm16466_vm15, %v8026_v8  ;;  %v8103_v7 = vmul.f32 %v15278_v17, %v16473_v57  ;;  %v8116_v51 = vmul.f32 %v15278_v17, %v16479_v19  ;;  %v8091_v27 = vadd.f32 %v8089_v58, %v8085_v56  ;;  %v8092_v37 = vadd.f32 %v8090_v41, %v8086_v0  ;;  %vm16490_vm1 = vmmov %vm16362_vm0 }
 0x71e   : > { %8604 = vst.msk [vmem:[%s15301_s7 + $0x38] sm:$0xff] %vm16467_vm12, %v8027_v47  ;;  %v8065_v47 = vadd.f32 %v8063_v50, %v8059_v16  ;;  %v8128_v15 = vmul.f32 %v15278_v17, %v16480_v63  ;;  %v8129_v52 = vmul.f32 %v15278_v17, %v16481_v49  ;;  %v8104_v60 = vadd.f32 %v8102_v43, %v8098_v22  ;;  %v8163_v16 = vld [vmem:[%s10186_s21 + $0x10f] sm:$0xff]  ;;  %vm16491_vm15 = vmmov %vm16362_vm0 }
 0x71f   : > { %8605 = vst.msk [vmem:[%s15301_s7 + $0x40] sm:$0xff] %vm16468_vm7, %v8039_v46  ;;  %v8105_v36 = vadd.f32 %v8103_v7, %v8099_v18  ;;  %v8117_v6 = vadd.f32 %v8115_v11, %v8111_v55  ;;  %v8118_v24 = vadd.f32 %v8116_v51, %v8112_v53  ;;  %v16485_v44 = vsub.f32 %v15223_v54, %v15151_v61  ;;  %v8177_v54 = vld [vmem:[%s10186_s21 + $0x129] sm:$0xff]  ;;  %vm16492_vm12 = vmmov %vm16362_vm0 }
 0x720   : > { %8606 = vst.msk [vmem:[%s15301_s7 + $0x48] sm:$0xff] %vm16469_vm10, %v8040_v4  ;;  %v8130_v8 = vadd.f32 %v8128_v15, %v8124_v42  ;;  %v8131_v34 = vadd.f32 %v8129_v52, %v8125_v32  ;;  %v16486_v30 = vsub.f32 %v15237_v40, %v15151_v61  ;;  %v16487_v33 = vsub.f32 %v15249_v45, %v15151_v61  ;;  %vm16497_vm7 = vmmov %vm16362_vm0 }
 0x721   : > { %8607 = vst.msk [vmem:[%s15301_s7 + $0x50] sm:$0xff] %vm16470_vm11, %v8052_v35  ;;  %v8141_v2 = vmul.f32 %v15278_v17, %v16485_v44  ;;  %v16488_v20 = vsub.f32 %v15247_v21, %v15151_v61  ;;  %v16493_v40 = vsub.f32 %v15251_v12, %v15151_v61  ;;  %v16494_v45 = vsub.f32 %v15274_v29, %v15151_v61  ;;  %vm16498_vm10 = vmmov %vm16362_vm0 }
 0x722   : > { %8608 = vst.msk [vmem:[%s15301_s7 + $0x58] sm:$0xff] %vm16471_vm6, %v8053_v9  ;;  %v8142_v31 = vmul.f32 %v15278_v17, %v16486_v30  ;;  %v8154_v14 = vmul.f32 %v15278_v17, %v16487_v33  ;;  %v16495_v46 = vsub.f32 %v15276_v23, %v15151_v61  ;;  %v16496_v35 = vsub.f32 %v15263_v26, %v15151_v61  ;;  %vm16499_vm11 = vmmov %vm16362_vm0 }
 0x723   : > { %8609 = vst.msk [vmem:[%s15301_s7 + $0x60] sm:$0xff] %vm16474_vm9, %v8065_v47  ;;  %v8155_v50 = vmul.f32 %v15278_v17, %v16488_v20  ;;  %v8167_v21 = vmul.f32 %v15278_v17, %v16493_v40  ;;  %v8168_v1 = vmul.f32 %v15278_v17, %v16494_v45  ;;  %v8143_v9 = vadd.f32 %v8141_v2, %v8137_v39  ;;  %vm16500_vm6 = vmmov %vm16362_vm0 }
 0x724   : > { %8610 = vst.msk [vmem:[%s15301_s7 + $0x68] sm:$0xff] %vm16475_vm4, %v8066_v28  ;;  %v8180_v4 = vmul.f32 %v15278_v17, %v16495_v46  ;;  %v8181_v12 = vmul.f32 %v15278_v17, %v16496_v35  ;;  %v8144_v56 = vadd.f32 %v8142_v31, %v8138_v59  ;;  %v8156_v0 = vadd.f32 %v8154_v14, %v8150_v5  ;;  %vm16501_vm9 = vmmov %vm16362_vm0 }
 0x725   : > { %8611 = vst.msk [vmem:[%s15301_s7 + $0x70] sm:$0xff] %vm16476_vm5, %v8078_v3  ;;  %v8157_v29 = vadd.f32 %v8155_v50, %v8151_v38  ;;  %v8169_v47 = vadd.f32 %v8167_v21, %v8163_v16  ;;  %v8170_v28 = vadd.f32 %v8168_v1, %v8164_v10  ;;  %vm16502_vm4 = vmmov %vm16362_vm0 }
 0x726   : > { %8612 = vst.msk [vmem:[%s15301_s7 + $0x78] sm:$0xff] %vm16477_vm2, %v8079_v25  ;;  %v8182_v3 = vadd.f32 %v8180_v4, %v8176_v48  ;;  %v8183_v25 = vadd.f32 %v8181_v12, %v8177_v54  ;;  %vm16503_vm5 = vmmov %vm16362_vm0 }
 0x727   : > { %8613 = vst.msk [vmem:[%s15301_s7 + $0x80] sm:$0xff] %vm16482_vm8, %v8091_v27  ;;  %vm16504_vm2 = vmmov %vm16362_vm0 }
 0x728   : > { %8614 = vst.msk [vmem:[%s15301_s7 + $0x88] sm:$0xff] %vm16362_vm0, %v8092_v37 }
 0x729   : > { %8615 = vst.msk [vmem:[%s15301_s7 + $0x90] sm:$0xff] %vm16483_vm13, %v8104_v60 }
 0x72a   : > { %8616 = vst.msk [vmem:[%s15301_s7 + $0x98] sm:$0xff] %vm16484_vm14, %v8105_v36 }
 0x72b   : > { %8617 = vst.msk [vmem:[%s15301_s7 + $0xa0] sm:$0xff] %vm16489_vm3, %v8117_v6 }
 0x72c   : > { %8618 = vst.msk [vmem:[%s15301_s7 + $0xa8] sm:$0xff] %vm16490_vm1, %v8118_v24 }
 0x72d   : > { %8619 = vst.msk [vmem:[%s15301_s7 + $0xb0] sm:$0xff] %vm16491_vm15, %v8130_v8 }
 0x72e   : > { %8620 = vst.msk [vmem:[%s15301_s7 + $0xb8] sm:$0xff] %vm16492_vm12, %v8131_v34 }
 0x72f   : > { %8621 = vst.msk [vmem:[%s15301_s7 + $0xc0] sm:$0xff] %vm16497_vm7, %v8143_v9 }
 0x730   : > { %8622 = vst.msk [vmem:[%s15301_s7 + $0xc8] sm:$0xff] %vm16498_vm10, %v8144_v56 }
 0x731   : > { %8623 = vst.msk [vmem:[%s15301_s7 + $0xd0] sm:$0xff] %vm16499_vm11, %v8156_v0 }
 0x732   : > { %8624 = vst.msk [vmem:[%s15301_s7 + $0xd8] sm:$0xff] %vm16500_vm6, %v8157_v29 }
 0x733   : > { %8625 = vst.msk [vmem:[%s15301_s7 + $0xe0] sm:$0xff] %vm16501_vm9, %v8169_v47 }
 0x734   : > { %8626 = vst.msk [vmem:[%s15301_s7 + $0xe8] sm:$0xff] %vm16502_vm4, %v8170_v28 }
 0x735   : > { %8627 = vst.msk [vmem:[%s15301_s7 + $0xf0] sm:$0xff] %vm16503_vm5, %v8182_v3 }
 0x736   : > { %8628 = vst.msk [vmem:[%s15301_s7 + $0xf8] sm:$0xff] %vm16504_vm2, %v8183_v25 }
 0x737 PF: > { %s13_s12 = sadd.s32 1, %s10132_s12  }
 0x738   : > { %p10_p4 = scmp.ge.s32.totalorder %s13_s12, 4  }
 0x73a   :  { %12 = sbr.rel (!%p10_p4) target bundleno = 1 (0x1), region = 93 }

</bundles_post_ra>
